<compile_context>
chip_gen: v6e
topology: v6e:2x2x1
jax: 0.10.0
libtpu: 0.0.40
codegen_flags: <defaults>
</compile_context>

<pallas_src>
import functools

import numpy as np

import jax
import jax.numpy as jnp
from jax.experimental import pallas as pl
from jax.experimental.pallas import tpu as pltpu


# ---------------------------------------------------------------------------
# Static "plan": tap sequences, masks and conv1 gather indices (host, numpy)
# ---------------------------------------------------------------------------
@functools.lru_cache(maxsize=None)
def _build_plan(batch):
    """Build the concatenated tap sequences for the fused kernel.

    Returns (idx, mask1, mask2, n1, n2, n3):
      idx   : (16, n1) int32  gather indices into the flattened padded input
      mask1 : (1, n1)  f32    0 where a conv1-output column is conv2's padding
      mask2 : (1, n2)  f32    0 where a conv2-output column is conv3's padding
    """
    # conv3 output entries, q-major / batch-minor, padded to a multiple of 128.
    n3 = ((49 * batch + 127) // 128) * 128
    s3 = []
    for q in range(49):
        i3, j3 = q // 7, q % 7
        for b in range(batch):
            s3.append((True, b, i3, j3))
    while len(s3) < n3:
        s3.append((False, 0, 0, 0))                       # dummy (never read)

    # conv2 output sequence = concat of conv3's 9 tap sequences.
    s2 = []
    for kh in range(3):
        for kw in range(3):
            for (valid, b, i3, j3) in s3:
                if valid:
                    i2, j2 = 2 * i3 + kh - 1, 2 * j3 + kw - 1
                    if 0 <= i2 < 14 and 0 <= j2 < 14:
                        s2.append((True, b, i2, j2))
                        continue
                s2.append((False, 0, 0, 0))               # conv3 zero padding
    n2 = len(s2)                                          # 9 * n3

    # conv1 output sequence = concat of conv2's 9 tap sequences.
    s1 = []
    for kh in range(3):
        for kw in range(3):
            for (valid, b, i2, j2) in s2:
                if valid:
                    i1, j1 = 2 * i2 + kh - 1, 2 * j2 + kw - 1
                    if 0 <= i1 < 28 and 0 <= j1 < 28:
                        s1.append((True, b, i1, j1))
                        continue
                s1.append((False, 0, 0, 0))               # conv2 zero padding
    n1 = len(s1)                                          # 9 * n2

    mask2 = np.array([1.0 if v else 0.0 for (v, _, _, _) in s2],
                     np.float32).reshape(1, n2)
    mask1 = np.array([1.0 if v else 0.0 for (v, _, _, _) in s1],
                     np.float32).reshape(1, n1)

    # conv1 im2col gather indices into the padded input flattened to (B*30*30,)
    idx = np.zeros((16, n1), np.int32)                    # K padded 9 -> 16
    for e, (valid, b, i1, j1) in enumerate(s1):
        if valid:
            for kh in range(3):
                for kw in range(3):
                    idx[kh * 3 + kw, e] = b * 900 + (i1 + kh) * 30 + (j1 + kw)
    return idx, mask1, mask2, n1, n2, n3


# ---------------------------------------------------------------------------
# The fused Pallas kernel
# ---------------------------------------------------------------------------
def _actor_kernel(p_ref, m1_ref, m2_ref,
                  w1t_ref, b1_ref, w2k_ref, b2_ref, w3k_ref, b3_ref,
                  bf1_ref, wf2_ref, bf2_ref, wf1_hbm,
                  out_ref,
                  a1_ref, a2_ref, y3t_ref, xf_ref, wf1_vmem, dma_sem,
                  *, n2, n3, batch, action_bound):
    f32 = jnp.float32

    # --- overlap the 1.6 MB fc1-weight DMA with the whole conv stack --------
    wf1_copy = pltpu.make_async_copy(wf1_hbm, wf1_vmem, dma_sem.at[0])
    wf1_copy.start()

    # Zero the (tiny) padded tail of the fc1 activation row once.
    kf = xf_ref.shape[1]
    if kf > 49 * 64:
        xf_ref[:, 49 * 64:] = jnp.zeros((batch, kf - 49 * 64), f32)

    # ---- conv1: per-tap (32,16) @ (16, n2) dots, stored tap-stacked ---------
    for t in range(9):
        c = jnp.dot(w1t_ref[...], p_ref[:, t * n2:(t + 1) * n2],
                    preferred_element_type=f32)
        c = jnp.maximum(c + b1_ref[...], 0.0) * m1_ref[:, t * n2:(t + 1) * n2]
        a1_ref[t * 32:(t + 1) * 32, :] = c                # a1: (288, n2)

    # ---- conv2: ONE full-depth MXU matmul, K = 9*32 = 288 -------------------
    c2 = jnp.dot(w2k_ref[...], a1_ref[...], preferred_element_type=f32)
    c2 = jnp.maximum(c2 + b2_ref[...], 0.0) * m2_ref[...]          # (64, n2)
    for t in range(9):                                    # tap-stack for conv3
        a2_ref[t * 64:(t + 1) * 64, :] = c2[:, t * n3:(t + 1) * n3]

    # ---- conv3: ONE full-depth MXU matmul, K = 9*64 = 576 -------------------
    y3 = jnp.dot(w3k_ref[...], a2_ref[...], preferred_element_type=f32)
    y3 = jnp.maximum(y3 + b3_ref[...], 0.0)               # (64, n3)
    y3t_ref[...] = y3.T                                   # (n3, 64), row = q*B+b

    # ---- assemble fc1 activations: xf[b, q*64 + c] = y3[c, q*B + b] ---------
    for q in range(49):
        xf_ref[:, q * 64:(q + 1) * 64] = y3t_ref[q * batch:(q + 1) * batch, :]

    # ---- fc1: single (B, 3200) @ (3200, 128) dot (flatten folded into wf1) --
    wf1_copy.wait()
    h = jnp.dot(xf_ref[...], wf1_vmem[...], preferred_element_type=f32)
    h = jnp.maximum(h + bf1_ref[...], 0.0)                # (B, 128)
    # TODO(synk): nn.Dropout(0.1) -- eval-mode identity; training-mode random mask not implemented.

    # ---- fc2 + sigmoid + action_bound (output padded to 128 lanes) ----------
    o = jnp.dot(h, wf2_ref[...], preferred_element_type=f32) + bf2_ref[...]
    out_ref[...] = jax.nn.sigmoid(o) * action_bound


# ---------------------------------------------------------------------------
# Wrapper
# ---------------------------------------------------------------------------
def actor_forward(kparams, state, *, action_bound, action_dim):
    batch = state.shape[0]
    idx, mask1, mask2, n1, n2, n3 = _build_plan(batch)

    # Input-side glue only: pad the 28x28 input and gather conv1's im2col
    # patch matrix (16, n1) in the exact column order the kernel expects.
    # TODO(synk): fold this im2col gather into the kernel if it shows up in
    # end-to-end profiles (review suggestion).
    xpad = jnp.pad(state.astype(jnp.float32).reshape(batch, 28, 28),
                   ((0, 0), (1, 1), (1, 1)))
    patches = jnp.take(xpad.reshape(-1), jnp.asarray(idx), axis=0)

    args = (patches,
            jnp.asarray(mask1), jnp.asarray(mask2),
            kparams["w1t"], kparams["b1"],
            kparams["w2k"], kparams["b2"],
            kparams["w3k"], kparams["b3"],
            kparams["bf1"], kparams["wf2"], kparams["bf2"],
            kparams["wf1"])                                # last: DMA'd manually

    kf = kparams["wf1"].shape[0]                           # 3200
    flops = 2 * (32 * 16 * n1 + 64 * 288 * n2 + 64 * 576 * n3
                 + batch * kf * 128 + batch * 128 * 128)
    bytes_accessed = 4 * (16 * n1 + n1 + n2 + 32 * 16 + 32 + 64 * 288 + 64
                          + 64 * 576 + 64 + kf * 128 + 128 + 128 * 128 + 128
                          + batch * 128)

    in_specs = ([pl.BlockSpec(a.shape, lambda: (0, 0)) for a in args[:-1]]
                + [pl.BlockSpec(memory_space=pl.ANY)])

    kernel = functools.partial(_actor_kernel, n2=n2, n3=n3, batch=batch,
                               action_bound=float(action_bound))

    out = pl.pallas_call(
        kernel,
        out_shape=jax.ShapeDtypeStruct((batch, 128), jnp.float32),
        in_specs=in_specs,
        out_specs=pl.BlockSpec((batch, 128), lambda: (0, 0)),
        scratch_shapes=[
            pltpu.VMEM((288, n2), jnp.float32),   # conv1 acts, tap-stacked
            pltpu.VMEM((576, n3), jnp.float32),   # conv2 acts, tap-stacked
            pltpu.VMEM((n3, 64), jnp.float32),    # conv3 acts, transposed
            pltpu.VMEM((batch, kf), jnp.float32),  # fc1 activation rows
            pltpu.VMEM((kf, 128), jnp.float32),   # fc1 weight (manual DMA dst)
            pltpu.SemaphoreType.DMA((1,)),
        ],
        compiler_params=pltpu.CompilerParams(vmem_limit_bytes=16 * 1024 * 1024),
        cost_estimate=pl.CostEstimate(flops=int(flops),
                                      transcendentals=int(batch * 128),
                                      bytes_accessed=int(bytes_accessed)),
    )(*args)
    return out[:, :action_dim]


# ---------------------------------------------------------------------------
# Parameter init (PyTorch-default-style) and one-time kernel-layout prep
# ---------------------------------------------------------------------------
def _uniform(key, shape, fan_in):
    bound = 1.0 / float(fan_in) ** 0.5
    return jax.random.uniform(key, shape, jnp.float32, -bound, bound)


def init_params(key, action_dim):
    """Raw params: convs in HWIO, linears as (in, out); wf1 rows in NCHW order."""
    ks = jax.random.split(key, 10)
    return {
        "w1": _uniform(ks[0], (3, 3, 1, 32), 1 * 9),
        "b1": _uniform(ks[1], (32,), 1 * 9),
        "w2": _uniform(ks[2], (3, 3, 32, 64), 32 * 9),
        "b2": _uniform(ks[3], (64,), 32 * 9),
        "w3": _uniform(ks[4], (3, 3, 64, 64), 64 * 9),
        "b3": _uniform(ks[5], (64,), 64 * 9),
        "wf1": _uniform(ks[6], (64 * 7 * 7, 128), 64 * 7 * 7),   # NCHW row order
        "bf1": _uniform(ks[7], (128,), 64 * 7 * 7),
        "wf2": _uniform(ks[8], (128, action_dim), 128),
        "bf2": _uniform(ks[9], (action_dim,), 128),
    }


def prepare_params(raw):
    """One-time reshapes/transposes/paddings into the kernel's layouts."""
    action_dim = raw["wf2"].shape[1]
    # conv1: (32, 16) = W^T with K padded 9 -> 16 (zero columns).
    w1t = jnp.zeros((32, 16), jnp.float32).at[:, :9].set(raw["w1"].reshape(9, 32).T)
    # conv2/conv3 weights merged over taps along K:
    #   w2k[o, t*32 + i] = W2[tap t, in i, out o];  w3k analogously.
    w2k = jnp.transpose(raw["w2"].reshape(9, 32, 64), (2, 0, 1)).reshape(64, 288)
    w3k = jnp.transpose(raw["w3"].reshape(9, 64, 64), (2, 0, 1)).reshape(64, 576)
    # fc1: fold the NCHW flatten into a row permutation (kernel feature order is
    # q*64 + c), then zero-pad K 3136 -> 3200 (lane-dense contraction).
    perm = np.array([(g % 64) * 49 + (g // 64) for g in range(3136)], np.int32)
    wf1 = jnp.zeros((3200, 128), jnp.float32).at[:3136, :].set(raw["wf1"][perm])
    # fc2 padded to 128 output lanes (lane-dense final store).
    wf2 = jnp.zeros((128, 128), jnp.float32).at[:, :action_dim].set(raw["wf2"])
    bf2 = jnp.zeros((1, 128), jnp.float32).at[0, :action_dim].set(raw["bf2"])
    return {
        "w1t": w1t, "b1": raw["b1"].reshape(32, 1),
        "w2k": w2k, "b2": raw["b2"].reshape(64, 1),
        "w3k": w3k, "b3": raw["b3"].reshape(64, 1),
        "wf1": wf1, "bf1": raw["bf1"].reshape(1, 128),
        "wf2": wf2, "bf2": bf2,
    }


# ---------------------------------------------------------------------------
# Pure-JAX reference (golden) of the PyTorch forward (eval mode)
# ---------------------------------------------------------------------------
def actor_reference(raw, state, action_bound):
    batch = state.shape[0]
    hi = jax.lax.Precision.HIGHEST
    dn = ("NHWC", "HWIO", "NHWC")
    x = state.reshape(batch, 28, 28, 1)
    x = jax.nn.relu(jax.lax.conv_general_dilated(
        x, raw["w1"], (1, 1), ((1, 1), (1, 1)), dimension_numbers=dn,
        precision=hi) + raw["b1"])
    x = jax.nn.relu(jax.lax.conv_general_dilated(
        x, raw["w2"], (2, 2), ((1, 1), (1, 1)), dimension_numbers=dn,
        precision=hi) + raw["b2"])
    x = jax.nn.relu(jax.lax.conv_general_dilated(
        x, raw["w3"], (2, 2), ((1, 1), (1, 1)), dimension_numbers=dn,
        precision=hi) + raw["b3"])
    x = jnp.transpose(x, (0, 3, 1, 2)).reshape(batch, 64 * 7 * 7)   # NCHW flatten
    x = jax.nn.relu(jnp.dot(x, raw["wf1"], precision=hi) + raw["bf1"])
    x = jax.nn.sigmoid(jnp.dot(x, raw["wf2"], precision=hi) + raw["bf2"])
    return x * action_bound


if __name__ == "__main__":
    state_dim = 28 * 28          # the forward reshapes to (-1, 1, 28, 28)
    action_dim = 8
    action_bound = 2.0
    batch = 2

    key = jax.random.PRNGKey(0)
    k_params, k_state = jax.random.split(key)
    raw = init_params(k_params, action_dim)
    kparams = prepare_params(raw)
    state = jax.random.normal(k_state, (batch, state_dim), jnp.float32)

    fwd = jax.jit(functools.partial(actor_forward,
                                    action_bound=action_bound,
                                    action_dim=action_dim))
    out = jax.block_until_ready(fwd(kparams, state))

    assert out.shape == (batch, action_dim), out.shape
    assert bool(jnp.all(jnp.isfinite(out)))
    assert bool(jnp.all(out >= 0.0)) and bool(jnp.all(out <= action_bound))

    ref = actor_reference(raw, state, action_bound)
    err = float(jnp.max(jnp.abs(out - ref)))
    assert err < 3e-3, f"max abs error vs reference: {err}"

    print("KERNEL_OK")
</pallas_src>

<mosaic_0001>
module attributes {stable_mosaic.version = 11 : i64} {
  func.func @_actor_kernel(%arg0: memref<16x10368xf32, #tpu.memory_space<vmem>>, %arg1: memref<1x10368xf32, #tpu.memory_space<vmem>>, %arg2: memref<1x1152xf32, #tpu.memory_space<vmem>>, %arg3: memref<32x16xf32, #tpu.memory_space<vmem>>, %arg4: memref<32x1xf32, #tpu.memory_space<vmem>>, %arg5: memref<64x288xf32, #tpu.memory_space<vmem>>, %arg6: memref<64x1xf32, #tpu.memory_space<vmem>>, %arg7: memref<64x576xf32, #tpu.memory_space<vmem>>, %arg8: memref<64x1xf32, #tpu.memory_space<vmem>>, %arg9: memref<1x128xf32, #tpu.memory_space<vmem>>, %arg10: memref<128x128xf32, #tpu.memory_space<vmem>>, %arg11: memref<1x128xf32, #tpu.memory_space<vmem>>, %arg12: memref<3200x128xf32, #tpu.memory_space<any>>, %arg13: memref<2x128xf32, #tpu.memory_space<vmem>>, %arg14: memref<288x1152xf32, #tpu.memory_space<vmem>>, %arg15: memref<576x128xf32, #tpu.memory_space<vmem>>, %arg16: memref<128x64xf32, #tpu.memory_space<vmem>>, %arg17: memref<2x3200xf32, #tpu.memory_space<vmem>>, %arg18: memref<3200x128xf32, #tpu.memory_space<vmem>>, %arg19: memref<1x!tpu.dma_semaphore, #tpu.memory_space<semaphore_mem>>) attributes {dimension_semantics = [], scalar_prefetch = 0 : i64, scratch_operands = 6 : i64, tpu.core_type = #tpu.core_type<tc>} {
    %c0_i32 = arith.constant 0 : i32
    %0 = tpu.memref_slice %arg19[%c0_i32] : memref<1x!tpu.dma_semaphore, #tpu.memory_space<semaphore_mem>> -> memref<1x!tpu.dma_semaphore, #tpu.memory_space<semaphore_mem>>
    %1 = tpu.memref_squeeze %0 : memref<1x!tpu.dma_semaphore, #tpu.memory_space<semaphore_mem>> -> memref<!tpu.dma_semaphore, #tpu.memory_space<semaphore_mem>>
    tpu.enqueue_dma source(%arg12 : memref<3200x128xf32, #tpu.memory_space<any>>) target(%arg18 : memref<3200x128xf32, #tpu.memory_space<vmem>>) target_semaphore(%1 : memref<!tpu.dma_semaphore, #tpu.memory_space<semaphore_mem>>)
    %cst = arith.constant 0.000000e+00 : f32
    %2 = vector.broadcast %cst : f32 to vector<2x64xf32>
    %c0 = arith.constant 0 : index
    %c3136 = arith.constant 3136 : index
    %3 = vector.load %arg17[%c0, %c3136] : memref<2x3200xf32, #tpu.memory_space<vmem>>, vector<2x64xf32>
    tpu.vector_store %arg17[%c0, %c3136], %2 {strides = array<i32>} : memref<2x3200xf32, #tpu.memory_space<vmem>>, vector<2x64xf32>,
    %c0_0 = arith.constant 0 : index
    %c0_1 = arith.constant 0 : index
    %4 = vector.load %arg3[%c0_0, %c0_1] : memref<32x16xf32, #tpu.memory_space<vmem>>, vector<32x16xf32>
    %c0_2 = arith.constant 0 : index
    %c0_3 = arith.constant 0 : index
    %5 = vector.load %arg0[%c0_2, %c0_3] : memref<16x10368xf32, #tpu.memory_space<vmem>>, vector<16x1152xf32>
    %cst_4 = arith.constant dense<0.000000e+00> : vector<32x1152xf32>
    %6 = tpu.matmul %4, %5, %cst_4 {dimension_numbers = #tpu.dot_dimension_numbers<[1], [0], [0], [1], [0, 0, 1, 1], [], []>} : vector<32x16xf32>, vector<16x1152xf32>, vector<32x1152xf32> -> vector<32x1152xf32>
    %c0_5 = arith.constant 0 : index
    %c0_6 = arith.constant 0 : index
    %7 = vector.load %arg4[%c0_5, %c0_6] : memref<32x1xf32, #tpu.memory_space<vmem>>, vector<32x1xf32>
    %8 = vector.broadcast %7 : vector<32x1xf32> to vector<32x1152xf32>
    %9 = arith.addf %6, %8 : vector<32x1152xf32>
    %cst_7 = arith.constant 0.000000e+00 : f32
    %10 = vector.broadcast %cst_7 : f32 to vector<32x1152xf32>
    %11 = arith.maximumf %9, %10 : vector<32x1152xf32>
    %c0_8 = arith.constant 0 : index
    %c0_9 = arith.constant 0 : index
    %12 = vector.load %arg1[%c0_8, %c0_9] : memref<1x10368xf32, #tpu.memory_space<vmem>>, vector<1x1152xf32>
    %13 = vector.broadcast %12 : vector<1x1152xf32> to vector<32x1152xf32>
    %14 = arith.mulf %11, %13 : vector<32x1152xf32>
    %c0_10 = arith.constant 0 : index
    %c0_11 = arith.constant 0 : index
    %15 = vector.load %arg14[%c0_10, %c0_11] : memref<288x1152xf32, #tpu.memory_space<vmem>>, vector<32x1152xf32>
    tpu.vector_store %arg14[%c0_10, %c0_11], %14 {strides = array<i32>} : memref<288x1152xf32, #tpu.memory_space<vmem>>, vector<32x1152xf32>,
    %c0_12 = arith.constant 0 : index
    %c0_13 = arith.constant 0 : index
    %16 = vector.load %arg3[%c0_12, %c0_13] : memref<32x16xf32, #tpu.memory_space<vmem>>, vector<32x16xf32>
    %c0_14 = arith.constant 0 : index
    %c1152 = arith.constant 1152 : index
    %17 = vector.load %arg0[%c0_14, %c1152] : memref<16x10368xf32, #tpu.memory_space<vmem>>, vector<16x1152xf32>
    %cst_15 = arith.constant dense<0.000000e+00> : vector<32x1152xf32>
    %18 = tpu.matmul %16, %17, %cst_15 {dimension_numbers = #tpu.dot_dimension_numbers<[1], [0], [0], [1], [0, 0, 1, 1], [], []>} : vector<32x16xf32>, vector<16x1152xf32>, vector<32x1152xf32> -> vector<32x1152xf32>
    %c0_16 = arith.constant 0 : index
    %c0_17 = arith.constant 0 : index
    %19 = vector.load %arg4[%c0_16, %c0_17] : memref<32x1xf32, #tpu.memory_space<vmem>>, vector<32x1xf32>
    %20 = vector.broadcast %19 : vector<32x1xf32> to vector<32x1152xf32>
    %21 = arith.addf %18, %20 : vector<32x1152xf32>
    %cst_18 = arith.constant 0.000000e+00 : f32
    %22 = vector.broadcast %cst_18 : f32 to vector<32x1152xf32>
    %23 = arith.maximumf %21, %22 : vector<32x1152xf32>
    %c0_19 = arith.constant 0 : index
    %c1152_20 = arith.constant 1152 : index
    %24 = vector.load %arg1[%c0_19, %c1152_20] : memref<1x10368xf32, #tpu.memory_space<vmem>>, vector<1x1152xf32>
    %25 = vector.broadcast %24 : vector<1x1152xf32> to vector<32x1152xf32>
    %26 = arith.mulf %23, %25 : vector<32x1152xf32>
    %c32 = arith.constant 32 : index
    %c0_21 = arith.constant 0 : index
    %27 = vector.load %arg14[%c32, %c0_21] : memref<288x1152xf32, #tpu.memory_space<vmem>>, vector<32x1152xf32>
    tpu.vector_store %arg14[%c32, %c0_21], %26 {strides = array<i32>} : memref<288x1152xf32, #tpu.memory_space<vmem>>, vector<32x1152xf32>,
    %c0_22 = arith.constant 0 : index
    %c0_23 = arith.constant 0 : index
    %28 = vector.load %arg3[%c0_22, %c0_23] : memref<32x16xf32, #tpu.memory_space<vmem>>, vector<32x16xf32>
    %c0_24 = arith.constant 0 : index
    %c2304 = arith.constant 2304 : index
    %29 = vector.load %arg0[%c0_24, %c2304] : memref<16x10368xf32, #tpu.memory_space<vmem>>, vector<16x1152xf32>
    %cst_25 = arith.constant dense<0.000000e+00> : vector<32x1152xf32>
    %30 = tpu.matmul %28, %29, %cst_25 {dimension_numbers = #tpu.dot_dimension_numbers<[1], [0], [0], [1], [0, 0, 1, 1], [], []>} : vector<32x16xf32>, vector<16x1152xf32>, vector<32x1152xf32> -> vector<32x1152xf32>
    %c0_26 = arith.constant 0 : index
    %c0_27 = arith.constant 0 : index
    %31 = vector.load %arg4[%c0_26, %c0_27] : memref<32x1xf32, #tpu.memory_space<vmem>>, vector<32x1xf32>
    %32 = vector.broadcast %31 : vector<32x1xf32> to vector<32x1152xf32>
    %33 = arith.addf %30, %32 : vector<32x1152xf32>
    %cst_28 = arith.constant 0.000000e+00 : f32
    %34 = vector.broadcast %cst_28 : f32 to vector<32x1152xf32>
    %35 = arith.maximumf %33, %34 : vector<32x1152xf32>
    %c0_29 = arith.constant 0 : index
    %c2304_30 = arith.constant 2304 : index
    %36 = vector.load %arg1[%c0_29, %c2304_30] : memref<1x10368xf32, #tpu.memory_space<vmem>>, vector<1x1152xf32>
    %37 = vector.broadcast %36 : vector<1x1152xf32> to vector<32x1152xf32>
    %38 = arith.mulf %35, %37 : vector<32x1152xf32>
    %c64 = arith.constant 64 : index
    %c0_31 = arith.constant 0 : index
    %39 = vector.load %arg14[%c64, %c0_31] : memref<288x1152xf32, #tpu.memory_space<vmem>>, vector<32x1152xf32>
    tpu.vector_store %arg14[%c64, %c0_31], %38 {strides = array<i32>} : memref<288x1152xf32, #tpu.memory_space<vmem>>, vector<32x1152xf32>,
    %c0_32 = arith.constant 0 : index
    %c0_33 = arith.constant 0 : index
    %40 = vector.load %arg3[%c0_32, %c0_33] : memref<32x16xf32, #tpu.memory_space<vmem>>, vector<32x16xf32>
    %c0_34 = arith.constant 0 : index
    %c3456 = arith.constant 3456 : index
    %41 = vector.load %arg0[%c0_34, %c3456] : memref<16x10368xf32, #tpu.memory_space<vmem>>, vector<16x1152xf32>
    %cst_35 = arith.constant dense<0.000000e+00> : vector<32x1152xf32>
    %42 = tpu.matmul %40, %41, %cst_35 {dimension_numbers = #tpu.dot_dimension_numbers<[1], [0], [0], [1], [0, 0, 1, 1], [], []>} : vector<32x16xf32>, vector<16x1152xf32>, vector<32x1152xf32> -> vector<32x1152xf32>
    %c0_36 = arith.constant 0 : index
    %c0_37 = arith.constant 0 : index
    %43 = vector.load %arg4[%c0_36, %c0_37] : memref<32x1xf32, #tpu.memory_space<vmem>>, vector<32x1xf32>
    %44 = vector.broadcast %43 : vector<32x1xf32> to vector<32x1152xf32>
    %45 = arith.addf %42, %44 : vector<32x1152xf32>
    %cst_38 = arith.constant 0.000000e+00 : f32
    %46 = vector.broadcast %cst_38 : f32 to vector<32x1152xf32>
    %47 = arith.maximumf %45, %46 : vector<32x1152xf32>
    %c0_39 = arith.constant 0 : index
    %c3456_40 = arith.constant 3456 : index
    %48 = vector.load %arg1[%c0_39, %c3456_40] : memref<1x10368xf32, #tpu.memory_space<vmem>>, vector<1x1152xf32>
    %49 = vector.broadcast %48 : vector<1x1152xf32> to vector<32x1152xf32>
    %50 = arith.mulf %47, %49 : vector<32x1152xf32>
    %c96 = arith.constant 96 : index
    %c0_41 = arith.constant 0 : index
    %51 = vector.load %arg14[%c96, %c0_41] : memref<288x1152xf32, #tpu.memory_space<vmem>>, vector<32x1152xf32>
    tpu.vector_store %arg14[%c96, %c0_41], %50 {strides = array<i32>} : memref<288x1152xf32, #tpu.memory_space<vmem>>, vector<32x1152xf32>,
    %c0_42 = arith.constant 0 : index
    %c0_43 = arith.constant 0 : index
    %52 = vector.load %arg3[%c0_42, %c0_43] : memref<32x16xf32, #tpu.memory_space<vmem>>, vector<32x16xf32>
    %c0_44 = arith.constant 0 : index
    %c4608 = arith.constant 4608 : index
    %53 = vector.load %arg0[%c0_44, %c4608] : memref<16x10368xf32, #tpu.memory_space<vmem>>, vector<16x1152xf32>
    %cst_45 = arith.constant dense<0.000000e+00> : vector<32x1152xf32>
    %54 = tpu.matmul %52, %53, %cst_45 {dimension_numbers = #tpu.dot_dimension_numbers<[1], [0], [0], [1], [0, 0, 1, 1], [], []>} : vector<32x16xf32>, vector<16x1152xf32>, vector<32x1152xf32> -> vector<32x1152xf32>
    %c0_46 = arith.constant 0 : index
    %c0_47 = arith.constant 0 : index
    %55 = vector.load %arg4[%c0_46, %c0_47] : memref<32x1xf32, #tpu.memory_space<vmem>>, vector<32x1xf32>
    %56 = vector.broadcast %55 : vector<32x1xf32> to vector<32x1152xf32>
    %57 = arith.addf %54, %56 : vector<32x1152xf32>
    %cst_48 = arith.constant 0.000000e+00 : f32
    %58 = vector.broadcast %cst_48 : f32 to vector<32x1152xf32>
    %59 = arith.maximumf %57, %58 : vector<32x1152xf32>
    %c0_49 = arith.constant 0 : index
    %c4608_50 = arith.constant 4608 : index
    %60 = vector.load %arg1[%c0_49, %c4608_50] : memref<1x10368xf32, #tpu.memory_space<vmem>>, vector<1x1152xf32>
    %61 = vector.broadcast %60 : vector<1x1152xf32> to vector<32x1152xf32>
    %62 = arith.mulf %59, %61 : vector<32x1152xf32>
    %c128 = arith.constant 128 : index
    %c0_51 = arith.constant 0 : index
    %63 = vector.load %arg14[%c128, %c0_51] : memref<288x1152xf32, #tpu.memory_space<vmem>>, vector<32x1152xf32>
    tpu.vector_store %arg14[%c128, %c0_51], %62 {strides = array<i32>} : memref<288x1152xf32, #tpu.memory_space<vmem>>, vector<32x1152xf32>,
    %c0_52 = arith.constant 0 : index
    %c0_53 = arith.constant 0 : index
    %64 = vector.load %arg3[%c0_52, %c0_53] : memref<32x16xf32, #tpu.memory_space<vmem>>, vector<32x16xf32>
    %c0_54 = arith.constant 0 : index
    %c5760 = arith.constant 5760 : index
    %65 = vector.load %arg0[%c0_54, %c5760] : memref<16x10368xf32, #tpu.memory_space<vmem>>, vector<16x1152xf32>
    %cst_55 = arith.constant dense<0.000000e+00> : vector<32x1152xf32>
    %66 = tpu.matmul %64, %65, %cst_55 {dimension_numbers = #tpu.dot_dimension_numbers<[1], [0], [0], [1], [0, 0, 1, 1], [], []>} : vector<32x16xf32>, vector<16x1152xf32>, vector<32x1152xf32> -> vector<32x1152xf32>
    %c0_56 = arith.constant 0 : index
    %c0_57 = arith.constant 0 : index
    %67 = vector.load %arg4[%c0_56, %c0_57] : memref<32x1xf32, #tpu.memory_space<vmem>>, vector<32x1xf32>
    %68 = vector.broadcast %67 : vector<32x1xf32> to vector<32x1152xf32>
    %69 = arith.addf %66, %68 : vector<32x1152xf32>
    %cst_58 = arith.constant 0.000000e+00 : f32
    %70 = vector.broadcast %cst_58 : f32 to vector<32x1152xf32>
    %71 = arith.maximumf %69, %70 : vector<32x1152xf32>
    %c0_59 = arith.constant 0 : index
    %c5760_60 = arith.constant 5760 : index
    %72 = vector.load %arg1[%c0_59, %c5760_60] : memref<1x10368xf32, #tpu.memory_space<vmem>>, vector<1x1152xf32>
    %73 = vector.broadcast %72 : vector<1x1152xf32> to vector<32x1152xf32>
    %74 = arith.mulf %71, %73 : vector<32x1152xf32>
    %c160 = arith.constant 160 : index
    %c0_61 = arith.constant 0 : index
    %75 = vector.load %arg14[%c160, %c0_61] : memref<288x1152xf32, #tpu.memory_space<vmem>>, vector<32x1152xf32>
    tpu.vector_store %arg14[%c160, %c0_61], %74 {strides = array<i32>} : memref<288x1152xf32, #tpu.memory_space<vmem>>, vector<32x1152xf32>,
    %c0_62 = arith.constant 0 : index
    %c0_63 = arith.constant 0 : index
    %76 = vector.load %arg3[%c0_62, %c0_63] : memref<32x16xf32, #tpu.memory_space<vmem>>, vector<32x16xf32>
    %c0_64 = arith.constant 0 : index
    %c6912 = arith.constant 6912 : index
    %77 = vector.load %arg0[%c0_64, %c6912] : memref<16x10368xf32, #tpu.memory_space<vmem>>, vector<16x1152xf32>
    %cst_65 = arith.constant dense<0.000000e+00> : vector<32x1152xf32>
    %78 = tpu.matmul %76, %77, %cst_65 {dimension_numbers = #tpu.dot_dimension_numbers<[1], [0], [0], [1], [0, 0, 1, 1], [], []>} : vector<32x16xf32>, vector<16x1152xf32>, vector<32x1152xf32> -> vector<32x1152xf32>
    %c0_66 = arith.constant 0 : index
    %c0_67 = arith.constant 0 : index
    %79 = vector.load %arg4[%c0_66, %c0_67] : memref<32x1xf32, #tpu.memory_space<vmem>>, vector<32x1xf32>
    %80 = vector.broadcast %79 : vector<32x1xf32> to vector<32x1152xf32>
    %81 = arith.addf %78, %80 : vector<32x1152xf32>
    %cst_68 = arith.constant 0.000000e+00 : f32
    %82 = vector.broadcast %cst_68 : f32 to vector<32x1152xf32>
    %83 = arith.maximumf %81, %82 : vector<32x1152xf32>
    %c0_69 = arith.constant 0 : index
    %c6912_70 = arith.constant 6912 : index
    %84 = vector.load %arg1[%c0_69, %c6912_70] : memref<1x10368xf32, #tpu.memory_space<vmem>>, vector<1x1152xf32>
    %85 = vector.broadcast %84 : vector<1x1152xf32> to vector<32x1152xf32>
    %86 = arith.mulf %83, %85 : vector<32x1152xf32>
    %c192 = arith.constant 192 : index
    %c0_71 = arith.constant 0 : index
    %87 = vector.load %arg14[%c192, %c0_71] : memref<288x1152xf32, #tpu.memory_space<vmem>>, vector<32x1152xf32>
    tpu.vector_store %arg14[%c192, %c0_71], %86 {strides = array<i32>} : memref<288x1152xf32, #tpu.memory_space<vmem>>, vector<32x1152xf32>,
    %c0_72 = arith.constant 0 : index
    %c0_73 = arith.constant 0 : index
    %88 = vector.load %arg3[%c0_72, %c0_73] : memref<32x16xf32, #tpu.memory_space<vmem>>, vector<32x16xf32>
    %c0_74 = arith.constant 0 : index
    %c8064 = arith.constant 8064 : index
    %89 = vector.load %arg0[%c0_74, %c8064] : memref<16x10368xf32, #tpu.memory_space<vmem>>, vector<16x1152xf32>
    %cst_75 = arith.constant dense<0.000000e+00> : vector<32x1152xf32>
    %90 = tpu.matmul %88, %89, %cst_75 {dimension_numbers = #tpu.dot_dimension_numbers<[1], [0], [0], [1], [0, 0, 1, 1], [], []>} : vector<32x16xf32>, vector<16x1152xf32>, vector<32x1152xf32> -> vector<32x1152xf32>
    %c0_76 = arith.constant 0 : index
    %c0_77 = arith.constant 0 : index
    %91 = vector.load %arg4[%c0_76, %c0_77] : memref<32x1xf32, #tpu.memory_space<vmem>>, vector<32x1xf32>
    %92 = vector.broadcast %91 : vector<32x1xf32> to vector<32x1152xf32>
    %93 = arith.addf %90, %92 : vector<32x1152xf32>
    %cst_78 = arith.constant 0.000000e+00 : f32
    %94 = vector.broadcast %cst_78 : f32 to vector<32x1152xf32>
    %95 = arith.maximumf %93, %94 : vector<32x1152xf32>
    %c0_79 = arith.constant 0 : index
    %c8064_80 = arith.constant 8064 : index
    %96 = vector.load %arg1[%c0_79, %c8064_80] : memref<1x10368xf32, #tpu.memory_space<vmem>>, vector<1x1152xf32>
    %97 = vector.broadcast %96 : vector<1x1152xf32> to vector<32x1152xf32>
    %98 = arith.mulf %95, %97 : vector<32x1152xf32>
    %c224 = arith.constant 224 : index
    %c0_81 = arith.constant 0 : index
    %99 = vector.load %arg14[%c224, %c0_81] : memref<288x1152xf32, #tpu.memory_space<vmem>>, vector<32x1152xf32>
    tpu.vector_store %arg14[%c224, %c0_81], %98 {strides = array<i32>} : memref<288x1152xf32, #tpu.memory_space<vmem>>, vector<32x1152xf32>,
    %c0_82 = arith.constant 0 : index
    %c0_83 = arith.constant 0 : index
    %100 = vector.load %arg3[%c0_82, %c0_83] : memref<32x16xf32, #tpu.memory_space<vmem>>, vector<32x16xf32>
    %c0_84 = arith.constant 0 : index
    %c9216 = arith.constant 9216 : index
    %101 = vector.load %arg0[%c0_84, %c9216] : memref<16x10368xf32, #tpu.memory_space<vmem>>, vector<16x1152xf32>
    %cst_85 = arith.constant dense<0.000000e+00> : vector<32x1152xf32>
    %102 = tpu.matmul %100, %101, %cst_85 {dimension_numbers = #tpu.dot_dimension_numbers<[1], [0], [0], [1], [0, 0, 1, 1], [], []>} : vector<32x16xf32>, vector<16x1152xf32>, vector<32x1152xf32> -> vector<32x1152xf32>
    %c0_86 = arith.constant 0 : index
    %c0_87 = arith.constant 0 : index
    %103 = vector.load %arg4[%c0_86, %c0_87] : memref<32x1xf32, #tpu.memory_space<vmem>>, vector<32x1xf32>
    %104 = vector.broadcast %103 : vector<32x1xf32> to vector<32x1152xf32>
    %105 = arith.addf %102, %104 : vector<32x1152xf32>
    %cst_88 = arith.constant 0.000000e+00 : f32
    %106 = vector.broadcast %cst_88 : f32 to vector<32x1152xf32>
    %107 = arith.maximumf %105, %106 : vector<32x1152xf32>
    %c0_89 = arith.constant 0 : index
    %c9216_90 = arith.constant 9216 : index
    %108 = vector.load %arg1[%c0_89, %c9216_90] : memref<1x10368xf32, #tpu.memory_space<vmem>>, vector<1x1152xf32>
    %109 = vector.broadcast %108 : vector<1x1152xf32> to vector<32x1152xf32>
    %110 = arith.mulf %107, %109 : vector<32x1152xf32>
    %c256 = arith.constant 256 : index
    %c0_91 = arith.constant 0 : index
    %111 = vector.load %arg14[%c256, %c0_91] : memref<288x1152xf32, #tpu.memory_space<vmem>>, vector<32x1152xf32>
    tpu.vector_store %arg14[%c256, %c0_91], %110 {strides = array<i32>} : memref<288x1152xf32, #tpu.memory_space<vmem>>, vector<32x1152xf32>,
    %c0_92 = arith.constant 0 : index
    %c0_93 = arith.constant 0 : index
    %112 = vector.load %arg5[%c0_92, %c0_93] : memref<64x288xf32, #tpu.memory_space<vmem>>, vector<64x288xf32>
    %c0_94 = arith.constant 0 : index
    %c0_95 = arith.constant 0 : index
    %113 = vector.load %arg14[%c0_94, %c0_95] : memref<288x1152xf32, #tpu.memory_space<vmem>>, vector<288x1152xf32>
    %cst_96 = arith.constant dense<0.000000e+00> : vector<64x1152xf32>
    %114 = tpu.matmul %112, %113, %cst_96 {dimension_numbers = #tpu.dot_dimension_numbers<[1], [0], [0], [1], [0, 0, 1, 1], [], []>} : vector<64x288xf32>, vector<288x1152xf32>, vector<64x1152xf32> -> vector<64x1152xf32>
    %c0_97 = arith.constant 0 : index
    %c0_98 = arith.constant 0 : index
    %115 = vector.load %arg6[%c0_97, %c0_98] : memref<64x1xf32, #tpu.memory_space<vmem>>, vector<64x1xf32>
    %116 = vector.broadcast %115 : vector<64x1xf32> to vector<64x1152xf32>
    %117 = arith.addf %114, %116 : vector<64x1152xf32>
    %cst_99 = arith.constant 0.000000e+00 : f32
    %118 = vector.broadcast %cst_99 : f32 to vector<64x1152xf32>
    %119 = arith.maximumf %117, %118 : vector<64x1152xf32>
    %c0_100 = arith.constant 0 : index
    %c0_101 = arith.constant 0 : index
    %120 = vector.load %arg2[%c0_100, %c0_101] : memref<1x1152xf32, #tpu.memory_space<vmem>>, vector<1x1152xf32>
    %121 = vector.broadcast %120 : vector<1x1152xf32> to vector<64x1152xf32>
    %122 = arith.mulf %119, %121 : vector<64x1152xf32>
    %123 = vector.extract_strided_slice %122 {offsets = [0, 0], sizes = [64, 128], strides = [1, 1]} : vector<64x1152xf32> to vector<64x128xf32>
    %c0_102 = arith.constant 0 : index
    %c0_103 = arith.constant 0 : index
    %124 = vector.load %arg15[%c0_102, %c0_103] : memref<576x128xf32, #tpu.memory_space<vmem>>, vector<64x128xf32>
    tpu.vector_store %arg15[%c0_102, %c0_103], %123 {strides = array<i32>} : memref<576x128xf32, #tpu.memory_space<vmem>>, vector<64x128xf32>,
    %125 = vector.extract_strided_slice %122 {offsets = [0, 128], sizes = [64, 128], strides = [1, 1]} : vector<64x1152xf32> to vector<64x128xf32>
    %c64_104 = arith.constant 64 : index
    %c0_105 = arith.constant 0 : index
    %126 = vector.load %arg15[%c64_104, %c0_105] : memref<576x128xf32, #tpu.memory_space<vmem>>, vector<64x128xf32>
    tpu.vector_store %arg15[%c64_104, %c0_105], %125 {strides = array<i32>} : memref<576x128xf32, #tpu.memory_space<vmem>>, vector<64x128xf32>,
    %127 = vector.extract_strided_slice %122 {offsets = [0, 256], sizes = [64, 128], strides = [1, 1]} : vector<64x1152xf32> to vector<64x128xf32>
    %c128_106 = arith.constant 128 : index
    %c0_107 = arith.constant 0 : index
    %128 = vector.load %arg15[%c128_106, %c0_107] : memref<576x128xf32, #tpu.memory_space<vmem>>, vector<64x128xf32>
    tpu.vector_store %arg15[%c128_106, %c0_107], %127 {strides = array<i32>} : memref<576x128xf32, #tpu.memory_space<vmem>>, vector<64x128xf32>,
    %129 = vector.extract_strided_slice %122 {offsets = [0, 384], sizes = [64, 128], strides = [1, 1]} : vector<64x1152xf32> to vector<64x128xf32>
    %c192_108 = arith.constant 192 : index
    %c0_109 = arith.constant 0 : index
    %130 = vector.load %arg15[%c192_108, %c0_109] : memref<576x128xf32, #tpu.memory_space<vmem>>, vector<64x128xf32>
    tpu.vector_store %arg15[%c192_108, %c0_109], %129 {strides = array<i32>} : memref<576x128xf32, #tpu.memory_space<vmem>>, vector<64x128xf32>,
    %131 = vector.extract_strided_slice %122 {offsets = [0, 512], sizes = [64, 128], strides = [1, 1]} : vector<64x1152xf32> to vector<64x128xf32>
    %c256_110 = arith.constant 256 : index
    %c0_111 = arith.constant 0 : index
    %132 = vector.load %arg15[%c256_110, %c0_111] : memref<576x128xf32, #tpu.memory_space<vmem>>, vector<64x128xf32>
    tpu.vector_store %arg15[%c256_110, %c0_111], %131 {strides = array<i32>} : memref<576x128xf32, #tpu.memory_space<vmem>>, vector<64x128xf32>,
    %133 = vector.extract_strided_slice %122 {offsets = [0, 640], sizes = [64, 128], strides = [1, 1]} : vector<64x1152xf32> to vector<64x128xf32>
    %c320 = arith.constant 320 : index
    %c0_112 = arith.constant 0 : index
    %134 = vector.load %arg15[%c320, %c0_112] : memref<576x128xf32, #tpu.memory_space<vmem>>, vector<64x128xf32>
    tpu.vector_store %arg15[%c320, %c0_112], %133 {strides = array<i32>} : memref<576x128xf32, #tpu.memory_space<vmem>>, vector<64x128xf32>,
    %135 = vector.extract_strided_slice %122 {offsets = [0, 768], sizes = [64, 128], strides = [1, 1]} : vector<64x1152xf32> to vector<64x128xf32>
    %c384 = arith.constant 384 : index
    %c0_113 = arith.constant 0 : index
    %136 = vector.load %arg15[%c384, %c0_113] : memref<576x128xf32, #tpu.memory_space<vmem>>, vector<64x128xf32>
    tpu.vector_store %arg15[%c384, %c0_113], %135 {strides = array<i32>} : memref<576x128xf32, #tpu.memory_space<vmem>>, vector<64x128xf32>,
    %137 = vector.extract_strided_slice %122 {offsets = [0, 896], sizes = [64, 128], strides = [1, 1]} : vector<64x1152xf32> to vector<64x128xf32>
    %c448 = arith.constant 448 : index
    %c0_114 = arith.constant 0 : index
    %138 = vector.load %arg15[%c448, %c0_114] : memref<576x128xf32, #tpu.memory_space<vmem>>, vector<64x128xf32>
    tpu.vector_store %arg15[%c448, %c0_114], %137 {strides = array<i32>} : memref<576x128xf32, #tpu.memory_space<vmem>>, vector<64x128xf32>,
    %139 = vector.extract_strided_slice %122 {offsets = [0, 1024], sizes = [64, 128], strides = [1, 1]} : vector<64x1152xf32> to vector<64x128xf32>
    %c512 = arith.constant 512 : index
    %c0_115 = arith.constant 0 : index
    %140 = vector.load %arg15[%c512, %c0_115] : memref<576x128xf32, #tpu.memory_space<vmem>>, vector<64x128xf32>
    tpu.vector_store %arg15[%c512, %c0_115], %139 {strides = array<i32>} : memref<576x128xf32, #tpu.memory_space<vmem>>, vector<64x128xf32>,
    %c0_116 = arith.constant 0 : index
    %c0_117 = arith.constant 0 : index
    %141 = vector.load %arg7[%c0_116, %c0_117] : memref<64x576xf32, #tpu.memory_space<vmem>>, vector<64x576xf32>
    %c0_118 = arith.constant 0 : index
    %c0_119 = arith.constant 0 : index
    %142 = vector.load %arg15[%c0_118, %c0_119] : memref<576x128xf32, #tpu.memory_space<vmem>>, vector<576x128xf32>
    %cst_120 = arith.constant dense<0.000000e+00> : vector<64x128xf32>
    %143 = tpu.matmul %141, %142, %cst_120 {dimension_numbers = #tpu.dot_dimension_numbers<[1], [0], [0], [1], [0, 0, 1, 1], [], []>} : vector<64x576xf32>, vector<576x128xf32>, vector<64x128xf32> -> vector<64x128xf32>
    %c0_121 = arith.constant 0 : index
    %c0_122 = arith.constant 0 : index
    %144 = vector.load %arg8[%c0_121, %c0_122] : memref<64x1xf32, #tpu.memory_space<vmem>>, vector<64x1xf32>
    %145 = vector.broadcast %144 : vector<64x1xf32> to vector<64x128xf32>
    %146 = arith.addf %143, %145 : vector<64x128xf32>
    %cst_123 = arith.constant 0.000000e+00 : f32
    %147 = vector.broadcast %cst_123 : f32 to vector<64x128xf32>
    %148 = arith.maximumf %146, %147 : vector<64x128xf32>
    %149 = tpu.transpose %148, [1, 0] : vector<64x128xf32> -> vector<128x64xf32>
    %c0_124 = arith.constant 0 : index
    %c0_125 = arith.constant 0 : index
    %150 = vector.load %arg16[%c0_124, %c0_125] : memref<128x64xf32, #tpu.memory_space<vmem>>, vector<128x64xf32>
    tpu.vector_store %arg16[%c0_124, %c0_125], %149 {strides = array<i32>} : memref<128x64xf32, #tpu.memory_space<vmem>>, vector<128x64xf32>,
    %c0_126 = arith.constant 0 : index
    %c0_127 = arith.constant 0 : index
    %151 = vector.load %arg16[%c0_126, %c0_127] : memref<128x64xf32, #tpu.memory_space<vmem>>, vector<2x64xf32>
    %c0_128 = arith.constant 0 : index
    %c0_129 = arith.constant 0 : index
    %152 = vector.load %arg17[%c0_128, %c0_129] : memref<2x3200xf32, #tpu.memory_space<vmem>>, vector<2x64xf32>
    tpu.vector_store %arg17[%c0_128, %c0_129], %151 {strides = array<i32>} : memref<2x3200xf32, #tpu.memory_space<vmem>>, vector<2x64xf32>,
    %c2 = arith.constant 2 : index
    %c0_130 = arith.constant 0 : index
    %153 = vector.load %arg16[%c2, %c0_130] : memref<128x64xf32, #tpu.memory_space<vmem>>, vector<2x64xf32>
    %c0_131 = arith.constant 0 : index
    %c64_132 = arith.constant 64 : index
    %154 = vector.load %arg17[%c0_131, %c64_132] : memref<2x3200xf32, #tpu.memory_space<vmem>>, vector<2x64xf32>
    tpu.vector_store %arg17[%c0_131, %c64_132], %153 {strides = array<i32>} : memref<2x3200xf32, #tpu.memory_space<vmem>>, vector<2x64xf32>,
    %c4 = arith.constant 4 : index
    %c0_133 = arith.constant 0 : index
    %155 = vector.load %arg16[%c4, %c0_133] : memref<128x64xf32, #tpu.memory_space<vmem>>, vector<2x64xf32>
    %c0_134 = arith.constant 0 : index
    %c128_135 = arith.constant 128 : index
    %156 = vector.load %arg17[%c0_134, %c128_135] : memref<2x3200xf32, #tpu.memory_space<vmem>>, vector<2x64xf32>
    tpu.vector_store %arg17[%c0_134, %c128_135], %155 {strides = array<i32>} : memref<2x3200xf32, #tpu.memory_space<vmem>>, vector<2x64xf32>,
    %c6 = arith.constant 6 : index
    %c0_136 = arith.constant 0 : index
    %157 = vector.load %arg16[%c6, %c0_136] : memref<128x64xf32, #tpu.memory_space<vmem>>, vector<2x64xf32>
    %c0_137 = arith.constant 0 : index
    %c192_138 = arith.constant 192 : index
    %158 = vector.load %arg17[%c0_137, %c192_138] : memref<2x3200xf32, #tpu.memory_space<vmem>>, vector<2x64xf32>
    tpu.vector_store %arg17[%c0_137, %c192_138], %157 {strides = array<i32>} : memref<2x3200xf32, #tpu.memory_space<vmem>>, vector<2x64xf32>,
    %c8 = arith.constant 8 : index
    %c0_139 = arith.constant 0 : index
    %159 = vector.load %arg16[%c8, %c0_139] : memref<128x64xf32, #tpu.memory_space<vmem>>, vector<2x64xf32>
    %c0_140 = arith.constant 0 : index
    %c256_141 = arith.constant 256 : index
    %160 = vector.load %arg17[%c0_140, %c256_141] : memref<2x3200xf32, #tpu.memory_space<vmem>>, vector<2x64xf32>
    tpu.vector_store %arg17[%c0_140, %c256_141], %159 {strides = array<i32>} : memref<2x3200xf32, #tpu.memory_space<vmem>>, vector<2x64xf32>,
    %c10 = arith.constant 10 : index
    %c0_142 = arith.constant 0 : index
    %161 = vector.load %arg16[%c10, %c0_142] : memref<128x64xf32, #tpu.memory_space<vmem>>, vector<2x64xf32>
    %c0_143 = arith.constant 0 : index
    %c320_144 = arith.constant 320 : index
    %162 = vector.load %arg17[%c0_143, %c320_144] : memref<2x3200xf32, #tpu.memory_space<vmem>>, vector<2x64xf32>
    tpu.vector_store %arg17[%c0_143, %c320_144], %161 {strides = array<i32>} : memref<2x3200xf32, #tpu.memory_space<vmem>>, vector<2x64xf32>,
    %c12 = arith.constant 12 : index
    %c0_145 = arith.constant 0 : index
    %163 = vector.load %arg16[%c12, %c0_145] : memref<128x64xf32, #tpu.memory_space<vmem>>, vector<2x64xf32>
    %c0_146 = arith.constant 0 : index
    %c384_147 = arith.constant 384 : index
    %164 = vector.load %arg17[%c0_146, %c384_147] : memref<2x3200xf32, #tpu.memory_space<vmem>>, vector<2x64xf32>
    tpu.vector_store %arg17[%c0_146, %c384_147], %163 {strides = array<i32>} : memref<2x3200xf32, #tpu.memory_space<vmem>>, vector<2x64xf32>,
    %c14 = arith.constant 14 : index
    %c0_148 = arith.constant 0 : index
    %165 = vector.load %arg16[%c14, %c0_148] : memref<128x64xf32, #tpu.memory_space<vmem>>, vector<2x64xf32>
    %c0_149 = arith.constant 0 : index
    %c448_150 = arith.constant 448 : index
    %166 = vector.load %arg17[%c0_149, %c448_150] : memref<2x3200xf32, #tpu.memory_space<vmem>>, vector<2x64xf32>
    tpu.vector_store %arg17[%c0_149, %c448_150], %165 {strides = array<i32>} : memref<2x3200xf32, #tpu.memory_space<vmem>>, vector<2x64xf32>,
    %c16 = arith.constant 16 : index
    %c0_151 = arith.constant 0 : index
    %167 = vector.load %arg16[%c16, %c0_151] : memref<128x64xf32, #tpu.memory_space<vmem>>, vector<2x64xf32>
    %c0_152 = arith.constant 0 : index
    %c512_153 = arith.constant 512 : index
    %168 = vector.load %arg17[%c0_152, %c512_153] : memref<2x3200xf32, #tpu.memory_space<vmem>>, vector<2x64xf32>
    tpu.vector_store %arg17[%c0_152, %c512_153], %167 {strides = array<i32>} : memref<2x3200xf32, #tpu.memory_space<vmem>>, vector<2x64xf32>,
    %c18 = arith.constant 18 : index
    %c0_154 = arith.constant 0 : index
    %169 = vector.load %arg16[%c18, %c0_154] : memref<128x64xf32, #tpu.memory_space<vmem>>, vector<2x64xf32>
    %c0_155 = arith.constant 0 : index
    %c576 = arith.constant 576 : index
    %170 = vector.load %arg17[%c0_155, %c576] : memref<2x3200xf32, #tpu.memory_space<vmem>>, vector<2x64xf32>
    tpu.vector_store %arg17[%c0_155, %c576], %169 {strides = array<i32>} : memref<2x3200xf32, #tpu.memory_space<vmem>>, vector<2x64xf32>,
    %c20 = arith.constant 20 : index
    %c0_156 = arith.constant 0 : index
    %171 = vector.load %arg16[%c20, %c0_156] : memref<128x64xf32, #tpu.memory_space<vmem>>, vector<2x64xf32>
    %c0_157 = arith.constant 0 : index
    %c640 = arith.constant 640 : index
    %172 = vector.load %arg17[%c0_157, %c640] : memref<2x3200xf32, #tpu.memory_space<vmem>>, vector<2x64xf32>
    tpu.vector_store %arg17[%c0_157, %c640], %171 {strides = array<i32>} : memref<2x3200xf32, #tpu.memory_space<vmem>>, vector<2x64xf32>,
    %c22 = arith.constant 22 : index
    %c0_158 = arith.constant 0 : index
    %173 = vector.load %arg16[%c22, %c0_158] : memref<128x64xf32, #tpu.memory_space<vmem>>, vector<2x64xf32>
    %c0_159 = arith.constant 0 : index
    %c704 = arith.constant 704 : index
    %174 = vector.load %arg17[%c0_159, %c704] : memref<2x3200xf32, #tpu.memory_space<vmem>>, vector<2x64xf32>
    tpu.vector_store %arg17[%c0_159, %c704], %173 {strides = array<i32>} : memref<2x3200xf32, #tpu.memory_space<vmem>>, vector<2x64xf32>,
    %c24 = arith.constant 24 : index
    %c0_160 = arith.constant 0 : index
    %175 = vector.load %arg16[%c24, %c0_160] : memref<128x64xf32, #tpu.memory_space<vmem>>, vector<2x64xf32>
    %c0_161 = arith.constant 0 : index
    %c768 = arith.constant 768 : index
    %176 = vector.load %arg17[%c0_161, %c768] : memref<2x3200xf32, #tpu.memory_space<vmem>>, vector<2x64xf32>
    tpu.vector_store %arg17[%c0_161, %c768], %175 {strides = array<i32>} : memref<2x3200xf32, #tpu.memory_space<vmem>>, vector<2x64xf32>,
    %c26 = arith.constant 26 : index
    %c0_162 = arith.constant 0 : index
    %177 = vector.load %arg16[%c26, %c0_162] : memref<128x64xf32, #tpu.memory_space<vmem>>, vector<2x64xf32>
    %c0_163 = arith.constant 0 : index
    %c832 = arith.constant 832 : index
    %178 = vector.load %arg17[%c0_163, %c832] : memref<2x3200xf32, #tpu.memory_space<vmem>>, vector<2x64xf32>
    tpu.vector_store %arg17[%c0_163, %c832], %177 {strides = array<i32>} : memref<2x3200xf32, #tpu.memory_space<vmem>>, vector<2x64xf32>,
    %c28 = arith.constant 28 : index
    %c0_164 = arith.constant 0 : index
    %179 = vector.load %arg16[%c28, %c0_164] : memref<128x64xf32, #tpu.memory_space<vmem>>, vector<2x64xf32>
    %c0_165 = arith.constant 0 : index
    %c896 = arith.constant 896 : index
    %180 = vector.load %arg17[%c0_165, %c896] : memref<2x3200xf32, #tpu.memory_space<vmem>>, vector<2x64xf32>
    tpu.vector_store %arg17[%c0_165, %c896], %179 {strides = array<i32>} : memref<2x3200xf32, #tpu.memory_space<vmem>>, vector<2x64xf32>,
    %c30 = arith.constant 30 : index
    %c0_166 = arith.constant 0 : index
    %181 = vector.load %arg16[%c30, %c0_166] : memref<128x64xf32, #tpu.memory_space<vmem>>, vector<2x64xf32>
    %c0_167 = arith.constant 0 : index
    %c960 = arith.constant 960 : index
    %182 = vector.load %arg17[%c0_167, %c960] : memref<2x3200xf32, #tpu.memory_space<vmem>>, vector<2x64xf32>
    tpu.vector_store %arg17[%c0_167, %c960], %181 {strides = array<i32>} : memref<2x3200xf32, #tpu.memory_space<vmem>>, vector<2x64xf32>,
    %c32_168 = arith.constant 32 : index
    %c0_169 = arith.constant 0 : index
    %183 = vector.load %arg16[%c32_168, %c0_169] : memref<128x64xf32, #tpu.memory_space<vmem>>, vector<2x64xf32>
    %c0_170 = arith.constant 0 : index
    %c1024 = arith.constant 1024 : index
    %184 = vector.load %arg17[%c0_170, %c1024] : memref<2x3200xf32, #tpu.memory_space<vmem>>, vector<2x64xf32>
    tpu.vector_store %arg17[%c0_170, %c1024], %183 {strides = array<i32>} : memref<2x3200xf32, #tpu.memory_space<vmem>>, vector<2x64xf32>,
    %c34 = arith.constant 34 : index
    %c0_171 = arith.constant 0 : index
    %185 = vector.load %arg16[%c34, %c0_171] : memref<128x64xf32, #tpu.memory_space<vmem>>, vector<2x64xf32>
    %c0_172 = arith.constant 0 : index
    %c1088 = arith.constant 1088 : index
    %186 = vector.load %arg17[%c0_172, %c1088] : memref<2x3200xf32, #tpu.memory_space<vmem>>, vector<2x64xf32>
    tpu.vector_store %arg17[%c0_172, %c1088], %185 {strides = array<i32>} : memref<2x3200xf32, #tpu.memory_space<vmem>>, vector<2x64xf32>,
    %c36 = arith.constant 36 : index
    %c0_173 = arith.constant 0 : index
    %187 = vector.load %arg16[%c36, %c0_173] : memref<128x64xf32, #tpu.memory_space<vmem>>, vector<2x64xf32>
    %c0_174 = arith.constant 0 : index
    %c1152_175 = arith.constant 1152 : index
    %188 = vector.load %arg17[%c0_174, %c1152_175] : memref<2x3200xf32, #tpu.memory_space<vmem>>, vector<2x64xf32>
    tpu.vector_store %arg17[%c0_174, %c1152_175], %187 {strides = array<i32>} : memref<2x3200xf32, #tpu.memory_space<vmem>>, vector<2x64xf32>,
    %c38 = arith.constant 38 : index
    %c0_176 = arith.constant 0 : index
    %189 = vector.load %arg16[%c38, %c0_176] : memref<128x64xf32, #tpu.memory_space<vmem>>, vector<2x64xf32>
    %c0_177 = arith.constant 0 : index
    %c1216 = arith.constant 1216 : index
    %190 = vector.load %arg17[%c0_177, %c1216] : memref<2x3200xf32, #tpu.memory_space<vmem>>, vector<2x64xf32>
    tpu.vector_store %arg17[%c0_177, %c1216], %189 {strides = array<i32>} : memref<2x3200xf32, #tpu.memory_space<vmem>>, vector<2x64xf32>,
    %c40 = arith.constant 40 : index
    %c0_178 = arith.constant 0 : index
    %191 = vector.load %arg16[%c40, %c0_178] : memref<128x64xf32, #tpu.memory_space<vmem>>, vector<2x64xf32>
    %c0_179 = arith.constant 0 : index
    %c1280 = arith.constant 1280 : index
    %192 = vector.load %arg17[%c0_179, %c1280] : memref<2x3200xf32, #tpu.memory_space<vmem>>, vector<2x64xf32>
    tpu.vector_store %arg17[%c0_179, %c1280], %191 {strides = array<i32>} : memref<2x3200xf32, #tpu.memory_space<vmem>>, vector<2x64xf32>,
    %c42 = arith.constant 42 : index
    %c0_180 = arith.constant 0 : index
    %193 = vector.load %arg16[%c42, %c0_180] : memref<128x64xf32, #tpu.memory_space<vmem>>, vector<2x64xf32>
    %c0_181 = arith.constant 0 : index
    %c1344 = arith.constant 1344 : index
    %194 = vector.load %arg17[%c0_181, %c1344] : memref<2x3200xf32, #tpu.memory_space<vmem>>, vector<2x64xf32>
    tpu.vector_store %arg17[%c0_181, %c1344], %193 {strides = array<i32>} : memref<2x3200xf32, #tpu.memory_space<vmem>>, vector<2x64xf32>,
    %c44 = arith.constant 44 : index
    %c0_182 = arith.constant 0 : index
    %195 = vector.load %arg16[%c44, %c0_182] : memref<128x64xf32, #tpu.memory_space<vmem>>, vector<2x64xf32>
    %c0_183 = arith.constant 0 : index
    %c1408 = arith.constant 1408 : index
    %196 = vector.load %arg17[%c0_183, %c1408] : memref<2x3200xf32, #tpu.memory_space<vmem>>, vector<2x64xf32>
    tpu.vector_store %arg17[%c0_183, %c1408], %195 {strides = array<i32>} : memref<2x3200xf32, #tpu.memory_space<vmem>>, vector<2x64xf32>,
    %c46 = arith.constant 46 : index
    %c0_184 = arith.constant 0 : index
    %197 = vector.load %arg16[%c46, %c0_184] : memref<128x64xf32, #tpu.memory_space<vmem>>, vector<2x64xf32>
    %c0_185 = arith.constant 0 : index
    %c1472 = arith.constant 1472 : index
    %198 = vector.load %arg17[%c0_185, %c1472] : memref<2x3200xf32, #tpu.memory_space<vmem>>, vector<2x64xf32>
    tpu.vector_store %arg17[%c0_185, %c1472], %197 {strides = array<i32>} : memref<2x3200xf32, #tpu.memory_space<vmem>>, vector<2x64xf32>,
    %c48 = arith.constant 48 : index
    %c0_186 = arith.constant 0 : index
    %199 = vector.load %arg16[%c48, %c0_186] : memref<128x64xf32, #tpu.memory_space<vmem>>, vector<2x64xf32>
    %c0_187 = arith.constant 0 : index
    %c1536 = arith.constant 1536 : index
    %200 = vector.load %arg17[%c0_187, %c1536] : memref<2x3200xf32, #tpu.memory_space<vmem>>, vector<2x64xf32>
    tpu.vector_store %arg17[%c0_187, %c1536], %199 {strides = array<i32>} : memref<2x3200xf32, #tpu.memory_space<vmem>>, vector<2x64xf32>,
    %c50 = arith.constant 50 : index
    %c0_188 = arith.constant 0 : index
    %201 = vector.load %arg16[%c50, %c0_188] : memref<128x64xf32, #tpu.memory_space<vmem>>, vector<2x64xf32>
    %c0_189 = arith.constant 0 : index
    %c1600 = arith.constant 1600 : index
    %202 = vector.load %arg17[%c0_189, %c1600] : memref<2x3200xf32, #tpu.memory_space<vmem>>, vector<2x64xf32>
    tpu.vector_store %arg17[%c0_189, %c1600], %201 {strides = array<i32>} : memref<2x3200xf32, #tpu.memory_space<vmem>>, vector<2x64xf32>,
    %c52 = arith.constant 52 : index
    %c0_190 = arith.constant 0 : index
    %203 = vector.load %arg16[%c52, %c0_190] : memref<128x64xf32, #tpu.memory_space<vmem>>, vector<2x64xf32>
    %c0_191 = arith.constant 0 : index
    %c1664 = arith.constant 1664 : index
    %204 = vector.load %arg17[%c0_191, %c1664] : memref<2x3200xf32, #tpu.memory_space<vmem>>, vector<2x64xf32>
    tpu.vector_store %arg17[%c0_191, %c1664], %203 {strides = array<i32>} : memref<2x3200xf32, #tpu.memory_space<vmem>>, vector<2x64xf32>,
    %c54 = arith.constant 54 : index
    %c0_192 = arith.constant 0 : index
    %205 = vector.load %arg16[%c54, %c0_192] : memref<128x64xf32, #tpu.memory_space<vmem>>, vector<2x64xf32>
    %c0_193 = arith.constant 0 : index
    %c1728 = arith.constant 1728 : index
    %206 = vector.load %arg17[%c0_193, %c1728] : memref<2x3200xf32, #tpu.memory_space<vmem>>, vector<2x64xf32>
    tpu.vector_store %arg17[%c0_193, %c1728], %205 {strides = array<i32>} : memref<2x3200xf32, #tpu.memory_space<vmem>>, vector<2x64xf32>,
    %c56 = arith.constant 56 : index
    %c0_194 = arith.constant 0 : index
    %207 = vector.load %arg16[%c56, %c0_194] : memref<128x64xf32, #tpu.memory_space<vmem>>, vector<2x64xf32>
    %c0_195 = arith.constant 0 : index
    %c1792 = arith.constant 1792 : index
    %208 = vector.load %arg17[%c0_195, %c1792] : memref<2x3200xf32, #tpu.memory_space<vmem>>, vector<2x64xf32>
    tpu.vector_store %arg17[%c0_195, %c1792], %207 {strides = array<i32>} : memref<2x3200xf32, #tpu.memory_space<vmem>>, vector<2x64xf32>,
    %c58 = arith.constant 58 : index
    %c0_196 = arith.constant 0 : index
    %209 = vector.load %arg16[%c58, %c0_196] : memref<128x64xf32, #tpu.memory_space<vmem>>, vector<2x64xf32>
    %c0_197 = arith.constant 0 : index
    %c1856 = arith.constant 1856 : index
    %210 = vector.load %arg17[%c0_197, %c1856] : memref<2x3200xf32, #tpu.memory_space<vmem>>, vector<2x64xf32>
    tpu.vector_store %arg17[%c0_197, %c1856], %209 {strides = array<i32>} : memref<2x3200xf32, #tpu.memory_space<vmem>>, vector<2x64xf32>,
    %c60 = arith.constant 60 : index
    %c0_198 = arith.constant 0 : index
    %211 = vector.load %arg16[%c60, %c0_198] : memref<128x64xf32, #tpu.memory_space<vmem>>, vector<2x64xf32>
    %c0_199 = arith.constant 0 : index
    %c1920 = arith.constant 1920 : index
    %212 = vector.load %arg17[%c0_199, %c1920] : memref<2x3200xf32, #tpu.memory_space<vmem>>, vector<2x64xf32>
    tpu.vector_store %arg17[%c0_199, %c1920], %211 {strides = array<i32>} : memref<2x3200xf32, #tpu.memory_space<vmem>>, vector<2x64xf32>,
    %c62 = arith.constant 62 : index
    %c0_200 = arith.constant 0 : index
    %213 = vector.load %arg16[%c62, %c0_200] : memref<128x64xf32, #tpu.memory_space<vmem>>, vector<2x64xf32>
    %c0_201 = arith.constant 0 : index
    %c1984 = arith.constant 1984 : index
    %214 = vector.load %arg17[%c0_201, %c1984] : memref<2x3200xf32, #tpu.memory_space<vmem>>, vector<2x64xf32>
    tpu.vector_store %arg17[%c0_201, %c1984], %213 {strides = array<i32>} : memref<2x3200xf32, #tpu.memory_space<vmem>>, vector<2x64xf32>,
    %c64_202 = arith.constant 64 : index
    %c0_203 = arith.constant 0 : index
    %215 = vector.load %arg16[%c64_202, %c0_203] : memref<128x64xf32, #tpu.memory_space<vmem>>, vector<2x64xf32>
    %c0_204 = arith.constant 0 : index
    %c2048 = arith.constant 2048 : index
    %216 = vector.load %arg17[%c0_204, %c2048] : memref<2x3200xf32, #tpu.memory_space<vmem>>, vector<2x64xf32>
    tpu.vector_store %arg17[%c0_204, %c2048], %215 {strides = array<i32>} : memref<2x3200xf32, #tpu.memory_space<vmem>>, vector<2x64xf32>,
    %c66 = arith.constant 66 : index
    %c0_205 = arith.constant 0 : index
    %217 = vector.load %arg16[%c66, %c0_205] : memref<128x64xf32, #tpu.memory_space<vmem>>, vector<2x64xf32>
    %c0_206 = arith.constant 0 : index
    %c2112 = arith.constant 2112 : index
    %218 = vector.load %arg17[%c0_206, %c2112] : memref<2x3200xf32, #tpu.memory_space<vmem>>, vector<2x64xf32>
    tpu.vector_store %arg17[%c0_206, %c2112], %217 {strides = array<i32>} : memref<2x3200xf32, #tpu.memory_space<vmem>>, vector<2x64xf32>,
    %c68 = arith.constant 68 : index
    %c0_207 = arith.constant 0 : index
    %219 = vector.load %arg16[%c68, %c0_207] : memref<128x64xf32, #tpu.memory_space<vmem>>, vector<2x64xf32>
    %c0_208 = arith.constant 0 : index
    %c2176 = arith.constant 2176 : index
    %220 = vector.load %arg17[%c0_208, %c2176] : memref<2x3200xf32, #tpu.memory_space<vmem>>, vector<2x64xf32>
    tpu.vector_store %arg17[%c0_208, %c2176], %219 {strides = array<i32>} : memref<2x3200xf32, #tpu.memory_space<vmem>>, vector<2x64xf32>,
    %c70 = arith.constant 70 : index
    %c0_209 = arith.constant 0 : index
    %221 = vector.load %arg16[%c70, %c0_209] : memref<128x64xf32, #tpu.memory_space<vmem>>, vector<2x64xf32>
    %c0_210 = arith.constant 0 : index
    %c2240 = arith.constant 2240 : index
    %222 = vector.load %arg17[%c0_210, %c2240] : memref<2x3200xf32, #tpu.memory_space<vmem>>, vector<2x64xf32>
    tpu.vector_store %arg17[%c0_210, %c2240], %221 {strides = array<i32>} : memref<2x3200xf32, #tpu.memory_space<vmem>>, vector<2x64xf32>,
    %c72 = arith.constant 72 : index
    %c0_211 = arith.constant 0 : index
    %223 = vector.load %arg16[%c72, %c0_211] : memref<128x64xf32, #tpu.memory_space<vmem>>, vector<2x64xf32>
    %c0_212 = arith.constant 0 : index
    %c2304_213 = arith.constant 2304 : index
    %224 = vector.load %arg17[%c0_212, %c2304_213] : memref<2x3200xf32, #tpu.memory_space<vmem>>, vector<2x64xf32>
    tpu.vector_store %arg17[%c0_212, %c2304_213], %223 {strides = array<i32>} : memref<2x3200xf32, #tpu.memory_space<vmem>>, vector<2x64xf32>,
    %c74 = arith.constant 74 : index
    %c0_214 = arith.constant 0 : index
    %225 = vector.load %arg16[%c74, %c0_214] : memref<128x64xf32, #tpu.memory_space<vmem>>, vector<2x64xf32>
    %c0_215 = arith.constant 0 : index
    %c2368 = arith.constant 2368 : index
    %226 = vector.load %arg17[%c0_215, %c2368] : memref<2x3200xf32, #tpu.memory_space<vmem>>, vector<2x64xf32>
    tpu.vector_store %arg17[%c0_215, %c2368], %225 {strides = array<i32>} : memref<2x3200xf32, #tpu.memory_space<vmem>>, vector<2x64xf32>,
    %c76 = arith.constant 76 : index
    %c0_216 = arith.constant 0 : index
    %227 = vector.load %arg16[%c76, %c0_216] : memref<128x64xf32, #tpu.memory_space<vmem>>, vector<2x64xf32>
    %c0_217 = arith.constant 0 : index
    %c2432 = arith.constant 2432 : index
    %228 = vector.load %arg17[%c0_217, %c2432] : memref<2x3200xf32, #tpu.memory_space<vmem>>, vector<2x64xf32>
    tpu.vector_store %arg17[%c0_217, %c2432], %227 {strides = array<i32>} : memref<2x3200xf32, #tpu.memory_space<vmem>>, vector<2x64xf32>,
    %c78 = arith.constant 78 : index
    %c0_218 = arith.constant 0 : index
    %229 = vector.load %arg16[%c78, %c0_218] : memref<128x64xf32, #tpu.memory_space<vmem>>, vector<2x64xf32>
    %c0_219 = arith.constant 0 : index
    %c2496 = arith.constant 2496 : index
    %230 = vector.load %arg17[%c0_219, %c2496] : memref<2x3200xf32, #tpu.memory_space<vmem>>, vector<2x64xf32>
    tpu.vector_store %arg17[%c0_219, %c2496], %229 {strides = array<i32>} : memref<2x3200xf32, #tpu.memory_space<vmem>>, vector<2x64xf32>,
    %c80 = arith.constant 80 : index
    %c0_220 = arith.constant 0 : index
    %231 = vector.load %arg16[%c80, %c0_220] : memref<128x64xf32, #tpu.memory_space<vmem>>, vector<2x64xf32>
    %c0_221 = arith.constant 0 : index
    %c2560 = arith.constant 2560 : index
    %232 = vector.load %arg17[%c0_221, %c2560] : memref<2x3200xf32, #tpu.memory_space<vmem>>, vector<2x64xf32>
    tpu.vector_store %arg17[%c0_221, %c2560], %231 {strides = array<i32>} : memref<2x3200xf32, #tpu.memory_space<vmem>>, vector<2x64xf32>,
    %c82 = arith.constant 82 : index
    %c0_222 = arith.constant 0 : index
    %233 = vector.load %arg16[%c82, %c0_222] : memref<128x64xf32, #tpu.memory_space<vmem>>, vector<2x64xf32>
    %c0_223 = arith.constant 0 : index
    %c2624 = arith.constant 2624 : index
    %234 = vector.load %arg17[%c0_223, %c2624] : memref<2x3200xf32, #tpu.memory_space<vmem>>, vector<2x64xf32>
    tpu.vector_store %arg17[%c0_223, %c2624], %233 {strides = array<i32>} : memref<2x3200xf32, #tpu.memory_space<vmem>>, vector<2x64xf32>,
    %c84 = arith.constant 84 : index
    %c0_224 = arith.constant 0 : index
    %235 = vector.load %arg16[%c84, %c0_224] : memref<128x64xf32, #tpu.memory_space<vmem>>, vector<2x64xf32>
    %c0_225 = arith.constant 0 : index
    %c2688 = arith.constant 2688 : index
    %236 = vector.load %arg17[%c0_225, %c2688] : memref<2x3200xf32, #tpu.memory_space<vmem>>, vector<2x64xf32>
    tpu.vector_store %arg17[%c0_225, %c2688], %235 {strides = array<i32>} : memref<2x3200xf32, #tpu.memory_space<vmem>>, vector<2x64xf32>,
    %c86 = arith.constant 86 : index
    %c0_226 = arith.constant 0 : index
    %237 = vector.load %arg16[%c86, %c0_226] : memref<128x64xf32, #tpu.memory_space<vmem>>, vector<2x64xf32>
    %c0_227 = arith.constant 0 : index
    %c2752 = arith.constant 2752 : index
    %238 = vector.load %arg17[%c0_227, %c2752] : memref<2x3200xf32, #tpu.memory_space<vmem>>, vector<2x64xf32>
    tpu.vector_store %arg17[%c0_227, %c2752], %237 {strides = array<i32>} : memref<2x3200xf32, #tpu.memory_space<vmem>>, vector<2x64xf32>,
    %c88 = arith.constant 88 : index
    %c0_228 = arith.constant 0 : index
    %239 = vector.load %arg16[%c88, %c0_228] : memref<128x64xf32, #tpu.memory_space<vmem>>, vector<2x64xf32>
    %c0_229 = arith.constant 0 : index
    %c2816 = arith.constant 2816 : index
    %240 = vector.load %arg17[%c0_229, %c2816] : memref<2x3200xf32, #tpu.memory_space<vmem>>, vector<2x64xf32>
    tpu.vector_store %arg17[%c0_229, %c2816], %239 {strides = array<i32>} : memref<2x3200xf32, #tpu.memory_space<vmem>>, vector<2x64xf32>,
    %c90 = arith.constant 90 : index
    %c0_230 = arith.constant 0 : index
    %241 = vector.load %arg16[%c90, %c0_230] : memref<128x64xf32, #tpu.memory_space<vmem>>, vector<2x64xf32>
    %c0_231 = arith.constant 0 : index
    %c2880 = arith.constant 2880 : index
    %242 = vector.load %arg17[%c0_231, %c2880] : memref<2x3200xf32, #tpu.memory_space<vmem>>, vector<2x64xf32>
    tpu.vector_store %arg17[%c0_231, %c2880], %241 {strides = array<i32>} : memref<2x3200xf32, #tpu.memory_space<vmem>>, vector<2x64xf32>,
    %c92 = arith.constant 92 : index
    %c0_232 = arith.constant 0 : index
    %243 = vector.load %arg16[%c92, %c0_232] : memref<128x64xf32, #tpu.memory_space<vmem>>, vector<2x64xf32>
    %c0_233 = arith.constant 0 : index
    %c2944 = arith.constant 2944 : index
    %244 = vector.load %arg17[%c0_233, %c2944] : memref<2x3200xf32, #tpu.memory_space<vmem>>, vector<2x64xf32>
    tpu.vector_store %arg17[%c0_233, %c2944], %243 {strides = array<i32>} : memref<2x3200xf32, #tpu.memory_space<vmem>>, vector<2x64xf32>,
    %c94 = arith.constant 94 : index
    %c0_234 = arith.constant 0 : index
    %245 = vector.load %arg16[%c94, %c0_234] : memref<128x64xf32, #tpu.memory_space<vmem>>, vector<2x64xf32>
    %c0_235 = arith.constant 0 : index
    %c3008 = arith.constant 3008 : index
    %246 = vector.load %arg17[%c0_235, %c3008] : memref<2x3200xf32, #tpu.memory_space<vmem>>, vector<2x64xf32>
    tpu.vector_store %arg17[%c0_235, %c3008], %245 {strides = array<i32>} : memref<2x3200xf32, #tpu.memory_space<vmem>>, vector<2x64xf32>,
    %c96_236 = arith.constant 96 : index
    %c0_237 = arith.constant 0 : index
    %247 = vector.load %arg16[%c96_236, %c0_237] : memref<128x64xf32, #tpu.memory_space<vmem>>, vector<2x64xf32>
    %c0_238 = arith.constant 0 : index
    %c3072 = arith.constant 3072 : index
    %248 = vector.load %arg17[%c0_238, %c3072] : memref<2x3200xf32, #tpu.memory_space<vmem>>, vector<2x64xf32>
    tpu.vector_store %arg17[%c0_238, %c3072], %247 {strides = array<i32>} : memref<2x3200xf32, #tpu.memory_space<vmem>>, vector<2x64xf32>,
    %c0_i32_239 = arith.constant 0 : i32
    %249 = tpu.memref_slice %arg19[%c0_i32_239] : memref<1x!tpu.dma_semaphore, #tpu.memory_space<semaphore_mem>> -> memref<1x!tpu.dma_semaphore, #tpu.memory_space<semaphore_mem>>
    %250 = tpu.memref_squeeze %249 : memref<1x!tpu.dma_semaphore, #tpu.memory_space<semaphore_mem>> -> memref<!tpu.dma_semaphore, #tpu.memory_space<semaphore_mem>>
    tpu.wait_dma2 semaphore(%250 : memref<!tpu.dma_semaphore, #tpu.memory_space<semaphore_mem>>) src(%arg12 : memref<3200x128xf32, #tpu.memory_space<any>>) dst(%arg18 : memref<3200x128xf32, #tpu.memory_space<vmem>>)
    %c0_240 = arith.constant 0 : index
    %c0_241 = arith.constant 0 : index
    %251 = vector.load %arg17[%c0_240, %c0_241] : memref<2x3200xf32, #tpu.memory_space<vmem>>, vector<2x3200xf32>
    %c0_242 = arith.constant 0 : index
    %c0_243 = arith.constant 0 : index
    %252 = vector.load %arg18[%c0_242, %c0_243] : memref<3200x128xf32, #tpu.memory_space<vmem>>, vector<3200x128xf32>
    %cst_244 = arith.constant dense<0.000000e+00> : vector<2x128xf32>
    %253 = tpu.matmul %251, %252, %cst_244 {dimension_numbers = #tpu.dot_dimension_numbers<[1], [0], [0], [1], [0, 0, 1, 1], [], []>} : vector<2x3200xf32>, vector<3200x128xf32>, vector<2x128xf32> -> vector<2x128xf32>
    %c0_245 = arith.constant 0 : index
    %c0_246 = arith.constant 0 : index
    %254 = vector.load %arg9[%c0_245, %c0_246] : memref<1x128xf32, #tpu.memory_space<vmem>>, vector<1x128xf32>
    %255 = vector.broadcast %254 : vector<1x128xf32> to vector<2x128xf32>
    %256 = arith.addf %253, %255 : vector<2x128xf32>
    %cst_247 = arith.constant 0.000000e+00 : f32
    %257 = vector.broadcast %cst_247 : f32 to vector<2x128xf32>
    %258 = arith.maximumf %256, %257 : vector<2x128xf32>
    %c0_248 = arith.constant 0 : index
    %c0_249 = arith.constant 0 : index
    %259 = vector.load %arg10[%c0_248, %c0_249] : memref<128x128xf32, #tpu.memory_space<vmem>>, vector<128x128xf32>
    %cst_250 = arith.constant dense<0.000000e+00> : vector<2x128xf32>
    %260 = tpu.matmul %258, %259, %cst_250 {dimension_numbers = #tpu.dot_dimension_numbers<[1], [0], [0], [1], [0, 0, 1, 1], [], []>} : vector<2x128xf32>, vector<128x128xf32>, vector<2x128xf32> -> vector<2x128xf32>
    %c0_251 = arith.constant 0 : index
    %c0_252 = arith.constant 0 : index
    %261 = vector.load %arg11[%c0_251, %c0_252] : memref<1x128xf32, #tpu.memory_space<vmem>>, vector<1x128xf32>
    %262 = vector.broadcast %261 : vector<1x128xf32> to vector<2x128xf32>
    %263 = arith.addf %260, %262 : vector<2x128xf32>
    %264 = arith.negf %263 : vector<2x128xf32>
    %265 = math.exp %264 : vector<2x128xf32>
    %cst_253 = arith.constant 1.000000e+00 : f32
    %266 = vector.broadcast %cst_253 : f32 to vector<2x128xf32>
    %267 = arith.addf %266, %265 : vector<2x128xf32>
    %268 = arith.divf %266, %267 : vector<2x128xf32>
    %cst_254 = arith.constant 2.000000e+00 : f32
    %269 = vector.broadcast %cst_254 : f32 to vector<2x128xf32>
    %270 = arith.mulf %268, %269 : vector<2x128xf32>
    %c0_255 = arith.constant 0 : index
    %c0_256 = arith.constant 0 : index
    %271 = vector.load %arg13[%c0_255, %c0_256] : memref<2x128xf32, #tpu.memory_space<vmem>>, vector<2x128xf32>
    tpu.vector_store %arg13[%c0_255, %c0_256], %270 {strides = array<i32>} : memref<2x128xf32, #tpu.memory_space<vmem>>, vector<2x128xf32>,
    return
  }
}

</mosaic_0001>

<bundles_post_ra>
// kernel: actor_forward.1
= control target key start
LH: loop header
LB: loop body
LE: loop exit
PB: predicated region body
PF: predicated region fallthrough
CT: control target
= control target key end

     0   :  { %18 = vsyncpa [#allocation9], 0  ;;  %s19405_s0 = inlined_call_operand.vmem [shape: f32[16,10368], index: 0, kind: input, shape index: {}]   ;;  %s19406_s1 = inlined_call_operand.vmem [shape: f32[1,10368], index: 1, kind: input, shape index: {}]   ;;  %s19407_s2 = inlined_call_operand.vmem [shape: f32[1,1152], index: 2, kind: input, shape index: {}]   ;;  %s19408_s3 = inlined_call_operand.vmem [shape: f32[32,16], index: 3, kind: input, shape index: {}]   ;;  %s19409_s4 = inlined_call_operand.vmem [shape: f32[32,1], index: 4, kind: input, shape index: {}]   ;;  %s19410_s5 = inlined_call_operand.vmem [shape: f32[64,288], index: 5, kind: input, shape index: {}]   ;;  %s19411_s6 = inlined_call_operand.vmem [shape: f32[64,1], index: 6, kind: input, shape index: {}]   ;;  %s19412_s7 = inlined_call_operand.vmem [shape: f32[64,576], index: 7, kind: input, shape index: {}]   ;;  %s19413_s8 = inlined_call_operand.vmem [shape: f32[64,1], index: 8, kind: input, shape index: {}]   ;;  %s19414_s9 = inlined_call_operand.vmem [shape: f32[1,128], index: 9, kind: input, shape index: {}]   ;;  %s19415_s10 = inlined_call_operand.vmem [shape: f32[128,128], index: 10, kind: input, shape index: {}]   ;;  %s19416_s11 = inlined_call_operand.vmem [shape: f32[1,128], index: 11, kind: input, shape index: {}]   ;;  %s19417_s12 = inlined_call_operand.vmem [shape: f32[3200,128], index: 12, kind: input, shape index: {}]   ;;  %s19418_s13 = inlined_call_operand.hbm [shape: f32[2,128], index: 13, kind: output, shape index: {}]  }
   0x1   :  { %v12448_v0 = vld [vmem:[%s19417_s12] sm:$0xff]  ;;  %v12453_v1 = vld [vmem:[%s19417_s12 + $0x8] sm:$0xff]  ;;  %v12458_v2 = vld [vmem:[%s19417_s12 + $0x10] sm:$0xff] }
   0x2   :  { %19599 = vst [vmem:[#allocation13_spill] sm:$0xff] %v12448_v0  ;;  %19600 = vst [vmem:[#allocation14_spill] sm:$0xff] %v12453_v1  ;;  %v12463_v3 = vld [vmem:[%s19417_s12 + $0x18] sm:$0xff]  ;;  %v12468_v4 = vld [vmem:[%s19417_s12 + $0x20] sm:$0xff] }
   0x3   :  { %19601 = vst [vmem:[#allocation15_spill] sm:$0xff] %v12458_v2  ;;  %19602 = vst [vmem:[#allocation16_spill] sm:$0xff] %v12463_v3  ;;  %v12473_v5 = vld [vmem:[%s19417_s12 + $0x28] sm:$0xff]  ;;  %v12478_v6 = vld [vmem:[%s19417_s12 + $0x30] sm:$0xff] }
   0x4   :  { %19603 = vst [vmem:[#allocation17_spill] sm:$0xff] %v12468_v4  ;;  %19604 = vst [vmem:[#allocation18_spill] sm:$0xff] %v12473_v5  ;;  %v12483_v7 = vld [vmem:[%s19417_s12 + $0x38] sm:$0xff]  ;;  %v12488_v8 = vld [vmem:[%s19417_s12 + $0x40] sm:$0xff] }
   0x5   :  { %19605 = vst [vmem:[#allocation19_spill] sm:$0xff] %v12478_v6  ;;  %19606 = vst [vmem:[#allocation20_spill] sm:$0xff] %v12483_v7  ;;  %v12493_v9 = vld [vmem:[%s19417_s12 + $0x48] sm:$0xff]  ;;  %v12498_v10 = vld [vmem:[%s19417_s12 + $0x50] sm:$0xff] }
   0x6   :  { %19607 = vst [vmem:[#allocation21_spill] sm:$0xff] %v12488_v8  ;;  %19608 = vst [vmem:[#allocation22_spill] sm:$0xff] %v12493_v9  ;;  %v12503_v11 = vld [vmem:[%s19417_s12 + $0x58] sm:$0xff]  ;;  %v12508_v12 = vld [vmem:[%s19417_s12 + $0x60] sm:$0xff] }
   0x7   :  { %19609 = vst [vmem:[#allocation23_spill] sm:$0xff] %v12498_v10  ;;  %19610 = vst [vmem:[#allocation24_spill] sm:$0xff] %v12503_v11  ;;  %v12513_v13 = vld [vmem:[%s19417_s12 + $0x68] sm:$0xff]  ;;  %v12518_v14 = vld [vmem:[%s19417_s12 + $0x70] sm:$0xff] }
   0x8   :  { %19611 = vst [vmem:[#allocation25_spill] sm:$0xff] %v12508_v12  ;;  %19612 = vst [vmem:[#allocation26_spill] sm:$0xff] %v12513_v13  ;;  %v12523_v15 = vld [vmem:[%s19417_s12 + $0x78] sm:$0xff]  ;;  %v12528_v16 = vld [vmem:[%s19417_s12 + $0x80] sm:$0xff] }
   0x9   :  { %19613 = vst [vmem:[#allocation27_spill] sm:$0xff] %v12518_v14  ;;  %19614 = vst [vmem:[#allocation28_spill] sm:$0xff] %v12523_v15  ;;  %v12533_v17 = vld [vmem:[%s19417_s12 + $0x88] sm:$0xff]  ;;  %v12538_v18 = vld [vmem:[%s19417_s12 + $0x90] sm:$0xff] }
   0xa   :  { %19615 = vst [vmem:[#allocation29_spill] sm:$0xff] %v12528_v16  ;;  %19616 = vst [vmem:[#allocation30_spill] sm:$0xff] %v12533_v17  ;;  %v12543_v19 = vld [vmem:[%s19417_s12 + $0x98] sm:$0xff]  ;;  %v12548_v20 = vld [vmem:[%s19417_s12 + $0xa0] sm:$0xff] }
   0xb   :  { %19617 = vst [vmem:[#allocation31_spill] sm:$0xff] %v12538_v18  ;;  %19618 = vst [vmem:[#allocation32_spill] sm:$0xff] %v12543_v19  ;;  %v12553_v21 = vld [vmem:[%s19417_s12 + $0xa8] sm:$0xff]  ;;  %v12558_v22 = vld [vmem:[%s19417_s12 + $0xb0] sm:$0xff] }
   0xc   :  { %19619 = vst [vmem:[#allocation33_spill] sm:$0xff] %v12548_v20  ;;  %19620 = vst [vmem:[#allocation34_spill] sm:$0xff] %v12553_v21  ;;  %v12563_v23 = vld [vmem:[%s19417_s12 + $0xb8] sm:$0xff]  ;;  %v12568_v24 = vld [vmem:[%s19417_s12 + $0xc0] sm:$0xff] }
   0xd   :  { %19621 = vst [vmem:[#allocation35_spill] sm:$0xff] %v12558_v22  ;;  %19622 = vst [vmem:[#allocation36_spill] sm:$0xff] %v12563_v23  ;;  %v12573_v25 = vld [vmem:[%s19417_s12 + $0xc8] sm:$0xff]  ;;  %v12578_v26 = vld [vmem:[%s19417_s12 + $0xd0] sm:$0xff] }
   0xe   :  { %19623 = vst [vmem:[#allocation37_spill] sm:$0xff] %v12568_v24  ;;  %19624 = vst [vmem:[#allocation38_spill] sm:$0xff] %v12573_v25  ;;  %v12583_v27 = vld [vmem:[%s19417_s12 + $0xd8] sm:$0xff]  ;;  %v12588_v28 = vld [vmem:[%s19417_s12 + $0xe0] sm:$0xff] }
   0xf   :  { %19625 = vst [vmem:[#allocation39_spill] sm:$0xff] %v12578_v26  ;;  %19626 = vst [vmem:[#allocation40_spill] sm:$0xff] %v12583_v27  ;;  %v12593_v29 = vld [vmem:[%s19417_s12 + $0xe8] sm:$0xff]  ;;  %v12598_v30 = vld [vmem:[%s19417_s12 + $0xf0] sm:$0xff] }
  0x10   :  { %19627 = vst [vmem:[#allocation41_spill] sm:$0xff] %v12588_v28  ;;  %19628 = vst [vmem:[#allocation42_spill] sm:$0xff] %v12593_v29  ;;  %v12603_v31 = vld [vmem:[%s19417_s12 + $0xf8] sm:$0xff]  ;;  %v12608_v32 = vld [vmem:[%s19417_s12 + $0x100] sm:$0xff] }
  0x11   :  { %19629 = vst [vmem:[#allocation43_spill] sm:$0xff] %v12598_v30  ;;  %19630 = vst [vmem:[#allocation44_spill] sm:$0xff] %v12603_v31  ;;  %v12613_v33 = vld [vmem:[%s19417_s12 + $0x108] sm:$0xff]  ;;  %v12618_v34 = vld [vmem:[%s19417_s12 + $0x110] sm:$0xff] }
  0x12   :  { %19631 = vst [vmem:[#allocation45_spill] sm:$0xff] %v12608_v32  ;;  %19632 = vst [vmem:[#allocation46_spill] sm:$0xff] %v12613_v33  ;;  %v12623_v35 = vld [vmem:[%s19417_s12 + $0x118] sm:$0xff]  ;;  %v12628_v36 = vld [vmem:[%s19417_s12 + $0x120] sm:$0xff] }
  0x13   :  { %19633 = vst [vmem:[#allocation47_spill] sm:$0xff] %v12618_v34  ;;  %19634 = vst [vmem:[#allocation48_spill] sm:$0xff] %v12623_v35  ;;  %v12633_v37 = vld [vmem:[%s19417_s12 + $0x128] sm:$0xff]  ;;  %v12638_v38 = vld [vmem:[%s19417_s12 + $0x130] sm:$0xff] }
  0x14   :  { %19635 = vst [vmem:[#allocation49_spill] sm:$0xff] %v12628_v36  ;;  %19636 = vst [vmem:[#allocation50_spill] sm:$0xff] %v12633_v37  ;;  %v12643_v39 = vld [vmem:[%s19417_s12 + $0x138] sm:$0xff]  ;;  %v12648_v40 = vld [vmem:[%s19417_s12 + $0x140] sm:$0xff] }
  0x15   :  { %19637 = vst [vmem:[#allocation51_spill] sm:$0xff] %v12638_v38  ;;  %19638 = vst [vmem:[#allocation52_spill] sm:$0xff] %v12643_v39  ;;  %v12653_v41 = vld [vmem:[%s19417_s12 + $0x148] sm:$0xff]  ;;  %v12658_v42 = vld [vmem:[%s19417_s12 + $0x150] sm:$0xff] }
  0x16   :  { %19639 = vst [vmem:[#allocation53_spill] sm:$0xff] %v12648_v40  ;;  %19640 = vst [vmem:[#allocation54_spill] sm:$0xff] %v12653_v41  ;;  %v12663_v43 = vld [vmem:[%s19417_s12 + $0x158] sm:$0xff]  ;;  %v12668_v44 = vld [vmem:[%s19417_s12 + $0x160] sm:$0xff] }
  0x17   :  { %19641 = vst [vmem:[#allocation55_spill] sm:$0xff] %v12658_v42  ;;  %19642 = vst [vmem:[#allocation56_spill] sm:$0xff] %v12663_v43  ;;  %v12673_v45 = vld [vmem:[%s19417_s12 + $0x168] sm:$0xff]  ;;  %v12678_v46 = vld [vmem:[%s19417_s12 + $0x170] sm:$0xff] }
  0x18   :  { %19643 = vst [vmem:[#allocation57_spill] sm:$0xff] %v12668_v44  ;;  %19644 = vst [vmem:[#allocation58_spill] sm:$0xff] %v12673_v45  ;;  %v12683_v47 = vld [vmem:[%s19417_s12 + $0x178] sm:$0xff]  ;;  %v12688_v48 = vld [vmem:[%s19417_s12 + $0x180] sm:$0xff] }
  0x19   :  { %19645 = vst [vmem:[#allocation59_spill] sm:$0xff] %v12678_v46  ;;  %19646 = vst [vmem:[#allocation60_spill] sm:$0xff] %v12683_v47  ;;  %v12693_v49 = vld [vmem:[%s19417_s12 + $0x188] sm:$0xff]  ;;  %v12698_v50 = vld [vmem:[%s19417_s12 + $0x190] sm:$0xff] }
  0x1a   :  { %19647 = vst [vmem:[#allocation61_spill] sm:$0xff] %v12688_v48  ;;  %19648 = vst [vmem:[#allocation62_spill] sm:$0xff] %v12693_v49  ;;  %v12703_v51 = vld [vmem:[%s19417_s12 + $0x198] sm:$0xff]  ;;  %v12708_v52 = vld [vmem:[%s19417_s12 + $0x1a0] sm:$0xff] }
  0x1b   :  { %19649 = vst [vmem:[#allocation63_spill] sm:$0xff] %v12698_v50  ;;  %19650 = vst [vmem:[#allocation64_spill] sm:$0xff] %v12703_v51  ;;  %v12713_v53 = vld [vmem:[%s19417_s12 + $0x1a8] sm:$0xff]  ;;  %v12718_v54 = vld [vmem:[%s19417_s12 + $0x1b0] sm:$0xff] }
  0x1c   :  { %19651 = vst [vmem:[#allocation65_spill] sm:$0xff] %v12708_v52  ;;  %19652 = vst [vmem:[#allocation66_spill] sm:$0xff] %v12713_v53  ;;  %v12723_v55 = vld [vmem:[%s19417_s12 + $0x1b8] sm:$0xff]  ;;  %v12728_v56 = vld [vmem:[%s19417_s12 + $0x1c0] sm:$0xff] }
  0x1d   :  { %19653 = vst [vmem:[#allocation67_spill] sm:$0xff] %v12718_v54  ;;  %19654 = vst [vmem:[#allocation68_spill] sm:$0xff] %v12723_v55  ;;  %v12733_v57 = vld [vmem:[%s19417_s12 + $0x1c8] sm:$0xff]  ;;  %v12738_v58 = vld [vmem:[%s19417_s12 + $0x1d0] sm:$0xff] }
  0x1e   :  { %19655 = vst [vmem:[#allocation69_spill] sm:$0xff] %v12728_v56  ;;  %19656 = vst [vmem:[#allocation70_spill] sm:$0xff] %v12733_v57  ;;  %v12743_v59 = vld [vmem:[%s19417_s12 + $0x1d8] sm:$0xff]  ;;  %v12748_v60 = vld [vmem:[%s19417_s12 + $0x1e0] sm:$0xff] }
  0x1f   :  { %19657 = vst [vmem:[#allocation71_spill] sm:$0xff] %v12738_v58  ;;  %19658 = vst [vmem:[#allocation72_spill] sm:$0xff] %v12743_v59  ;;  %v12753_v61 = vld [vmem:[%s19417_s12 + $0x1e8] sm:$0xff]  ;;  %v12758_v62 = vld [vmem:[%s19417_s12 + $0x1f0] sm:$0xff] }
  0x20   :  { %19659 = vst [vmem:[#allocation73_spill] sm:$0xff] %v12748_v60  ;;  %19660 = vst [vmem:[#allocation74_spill] sm:$0xff] %v12753_v61  ;;  %v12763_v63 = vld [vmem:[%s19417_s12 + $0x1f8] sm:$0xff]  ;;  %v12768_v32 = vld [vmem:[%s19417_s12 + $0x200] sm:$0xff] }
  0x21   :  { %19661 = vst [vmem:[#allocation75_spill] sm:$0xff] %v12758_v62  ;;  %19662 = vst [vmem:[#allocation76_spill] sm:$0xff] %v12763_v63  ;;  %v12773_v48 = vld [vmem:[%s19417_s12 + $0x208] sm:$0xff]  ;;  %v12778_v0 = vld [vmem:[%s19417_s12 + $0x210] sm:$0xff] }
  0x22   :  { %19663 = vst [vmem:[#allocation77_spill] sm:$0xff] %v12768_v32  ;;  %19664 = vst [vmem:[#allocation78_spill] sm:$0xff] %v12773_v48  ;;  %v12783_v33 = vld [vmem:[%s19417_s12 + $0x218] sm:$0xff]  ;;  %v12788_v16 = vld [vmem:[%s19417_s12 + $0x220] sm:$0xff] }
  0x23   :  { %19665 = vst [vmem:[#allocation79_spill] sm:$0xff] %v12778_v0  ;;  %19666 = vst [vmem:[#allocation80_spill] sm:$0xff] %v12783_v33  ;;  %v12793_v32 = vld [vmem:[%s19417_s12 + $0x228] sm:$0xff]  ;;  %v12798_v48 = vld [vmem:[%s19417_s12 + $0x230] sm:$0xff] }
  0x24   :  { %19667 = vst [vmem:[#allocation81_spill] sm:$0xff] %v12788_v16  ;;  %19668 = vst [vmem:[#allocation82_spill] sm:$0xff] %v12793_v32  ;;  %v12803_v0 = vld [vmem:[%s19417_s12 + $0x238] sm:$0xff]  ;;  %v12808_v33 = vld [vmem:[%s19417_s12 + $0x240] sm:$0xff] }
  0x25   :  { %19669 = vst [vmem:[#allocation83_spill] sm:$0xff] %v12798_v48  ;;  %19670 = vst [vmem:[#allocation84_spill] sm:$0xff] %v12803_v0  ;;  %v12813_v16 = vld [vmem:[%s19417_s12 + $0x248] sm:$0xff]  ;;  %v12818_v32 = vld [vmem:[%s19417_s12 + $0x250] sm:$0xff] }
  0x26   :  { %19671 = vst [vmem:[#allocation85_spill] sm:$0xff] %v12808_v33  ;;  %19672 = vst [vmem:[#allocation86_spill] sm:$0xff] %v12813_v16  ;;  %v12823_v48 = vld [vmem:[%s19417_s12 + $0x258] sm:$0xff]  ;;  %v12828_v0 = vld [vmem:[%s19417_s12 + $0x260] sm:$0xff] }
  0x27   :  { %19673 = vst [vmem:[#allocation87_spill] sm:$0xff] %v12818_v32  ;;  %19674 = vst [vmem:[#allocation88_spill] sm:$0xff] %v12823_v48  ;;  %v12833_v33 = vld [vmem:[%s19417_s12 + $0x268] sm:$0xff]  ;;  %v12838_v16 = vld [vmem:[%s19417_s12 + $0x270] sm:$0xff] }
  0x28   :  { %19675 = vst [vmem:[#allocation89_spill] sm:$0xff] %v12828_v0  ;;  %19676 = vst [vmem:[#allocation90_spill] sm:$0xff] %v12833_v33  ;;  %v12843_v32 = vld [vmem:[%s19417_s12 + $0x278] sm:$0xff]  ;;  %v12848_v48 = vld [vmem:[%s19417_s12 + $0x280] sm:$0xff] }
  0x29   :  { %19677 = vst [vmem:[#allocation91_spill] sm:$0xff] %v12838_v16  ;;  %19678 = vst [vmem:[#allocation92_spill] sm:$0xff] %v12843_v32  ;;  %v12853_v0 = vld [vmem:[%s19417_s12 + $0x288] sm:$0xff]  ;;  %v12858_v33 = vld [vmem:[%s19417_s12 + $0x290] sm:$0xff] }
  0x2a   :  { %19679 = vst [vmem:[#allocation93_spill] sm:$0xff] %v12848_v48  ;;  %19680 = vst [vmem:[#allocation94_spill] sm:$0xff] %v12853_v0  ;;  %v12863_v16 = vld [vmem:[%s19417_s12 + $0x298] sm:$0xff]  ;;  %v12868_v32 = vld [vmem:[%s19417_s12 + $0x2a0] sm:$0xff] }
  0x2b   :  { %19681 = vst [vmem:[#allocation95_spill] sm:$0xff] %v12858_v33  ;;  %19682 = vst [vmem:[#allocation96_spill] sm:$0xff] %v12863_v16  ;;  %v12873_v48 = vld [vmem:[%s19417_s12 + $0x2a8] sm:$0xff]  ;;  %v12878_v0 = vld [vmem:[%s19417_s12 + $0x2b0] sm:$0xff] }
  0x2c   :  { %19683 = vst [vmem:[#allocation97_spill] sm:$0xff] %v12868_v32  ;;  %19684 = vst [vmem:[#allocation98_spill] sm:$0xff] %v12873_v48  ;;  %v12883_v33 = vld [vmem:[%s19417_s12 + $0x2b8] sm:$0xff]  ;;  %v12888_v16 = vld [vmem:[%s19417_s12 + $0x2c0] sm:$0xff] }
  0x2d   :  { %19685 = vst [vmem:[#allocation99_spill] sm:$0xff] %v12878_v0  ;;  %19686 = vst [vmem:[#allocation100_spill] sm:$0xff] %v12883_v33  ;;  %v12893_v32 = vld [vmem:[%s19417_s12 + $0x2c8] sm:$0xff]  ;;  %v12898_v48 = vld [vmem:[%s19417_s12 + $0x2d0] sm:$0xff] }
  0x2e   :  { %19687 = vst [vmem:[#allocation101_spill] sm:$0xff] %v12888_v16  ;;  %19688 = vst [vmem:[#allocation102_spill] sm:$0xff] %v12893_v32  ;;  %v12903_v0 = vld [vmem:[%s19417_s12 + $0x2d8] sm:$0xff]  ;;  %v12908_v33 = vld [vmem:[%s19417_s12 + $0x2e0] sm:$0xff] }
  0x2f   :  { %19689 = vst [vmem:[#allocation103_spill] sm:$0xff] %v12898_v48  ;;  %19690 = vst [vmem:[#allocation104_spill] sm:$0xff] %v12903_v0  ;;  %v12913_v16 = vld [vmem:[%s19417_s12 + $0x2e8] sm:$0xff]  ;;  %v12918_v32 = vld [vmem:[%s19417_s12 + $0x2f0] sm:$0xff] }
  0x30   :  { %19691 = vst [vmem:[#allocation105_spill] sm:$0xff] %v12908_v33  ;;  %19692 = vst [vmem:[#allocation106_spill] sm:$0xff] %v12913_v16  ;;  %v12923_v48 = vld [vmem:[%s19417_s12 + $0x2f8] sm:$0xff]  ;;  %v12928_v0 = vld [vmem:[%s19417_s12 + $0x300] sm:$0xff] }
  0x31   :  { %19693 = vst [vmem:[#allocation107_spill] sm:$0xff] %v12918_v32  ;;  %19694 = vst [vmem:[#allocation108_spill] sm:$0xff] %v12923_v48  ;;  %v12933_v33 = vld [vmem:[%s19417_s12 + $0x308] sm:$0xff]  ;;  %v12938_v16 = vld [vmem:[%s19417_s12 + $0x310] sm:$0xff] }
  0x32   :  { %19695 = vst [vmem:[#allocation109_spill] sm:$0xff] %v12928_v0  ;;  %19696 = vst [vmem:[#allocation110_spill] sm:$0xff] %v12933_v33  ;;  %v12943_v32 = vld [vmem:[%s19417_s12 + $0x318] sm:$0xff]  ;;  %v12948_v48 = vld [vmem:[%s19417_s12 + $0x320] sm:$0xff] }
  0x33   :  { %19697 = vst [vmem:[#allocation111_spill] sm:$0xff] %v12938_v16  ;;  %19698 = vst [vmem:[#allocation112_spill] sm:$0xff] %v12943_v32  ;;  %v12953_v0 = vld [vmem:[%s19417_s12 + $0x328] sm:$0xff]  ;;  %v12958_v33 = vld [vmem:[%s19417_s12 + $0x330] sm:$0xff] }
  0x34   :  { %19699 = vst [vmem:[#allocation113_spill] sm:$0xff] %v12948_v48  ;;  %19700 = vst [vmem:[#allocation114_spill] sm:$0xff] %v12953_v0  ;;  %v12963_v16 = vld [vmem:[%s19417_s12 + $0x338] sm:$0xff]  ;;  %v12968_v32 = vld [vmem:[%s19417_s12 + $0x340] sm:$0xff] }
  0x35   :  { %19701 = vst [vmem:[#allocation115_spill] sm:$0xff] %v12958_v33  ;;  %19702 = vst [vmem:[#allocation116_spill] sm:$0xff] %v12963_v16  ;;  %v12973_v48 = vld [vmem:[%s19417_s12 + $0x348] sm:$0xff]  ;;  %v12978_v0 = vld [vmem:[%s19417_s12 + $0x350] sm:$0xff] }
  0x36   :  { %19703 = vst [vmem:[#allocation117_spill] sm:$0xff] %v12968_v32  ;;  %19704 = vst [vmem:[#allocation118_spill] sm:$0xff] %v12973_v48  ;;  %v12983_v33 = vld [vmem:[%s19417_s12 + $0x358] sm:$0xff]  ;;  %v12988_v16 = vld [vmem:[%s19417_s12 + $0x360] sm:$0xff] }
  0x37   :  { %19705 = vst [vmem:[#allocation119_spill] sm:$0xff] %v12978_v0  ;;  %19706 = vst [vmem:[#allocation120_spill] sm:$0xff] %v12983_v33  ;;  %v12993_v32 = vld [vmem:[%s19417_s12 + $0x368] sm:$0xff]  ;;  %v12998_v48 = vld [vmem:[%s19417_s12 + $0x370] sm:$0xff] }
  0x38   :  { %19707 = vst [vmem:[#allocation121_spill] sm:$0xff] %v12988_v16  ;;  %19708 = vst [vmem:[#allocation122_spill] sm:$0xff] %v12993_v32  ;;  %v13003_v0 = vld [vmem:[%s19417_s12 + $0x378] sm:$0xff]  ;;  %v13008_v33 = vld [vmem:[%s19417_s12 + $0x380] sm:$0xff] }
  0x39   :  { %19709 = vst [vmem:[#allocation123_spill] sm:$0xff] %v12998_v48  ;;  %19710 = vst [vmem:[#allocation124_spill] sm:$0xff] %v13003_v0  ;;  %v13013_v16 = vld [vmem:[%s19417_s12 + $0x388] sm:$0xff]  ;;  %v13018_v32 = vld [vmem:[%s19417_s12 + $0x390] sm:$0xff] }
  0x3a   :  { %19711 = vst [vmem:[#allocation125_spill] sm:$0xff] %v13008_v33  ;;  %19712 = vst [vmem:[#allocation126_spill] sm:$0xff] %v13013_v16  ;;  %v13023_v48 = vld [vmem:[%s19417_s12 + $0x398] sm:$0xff]  ;;  %v13028_v0 = vld [vmem:[%s19417_s12 + $0x3a0] sm:$0xff] }
  0x3b   :  { %19713 = vst [vmem:[#allocation127_spill] sm:$0xff] %v13018_v32  ;;  %19714 = vst [vmem:[#allocation128_spill] sm:$0xff] %v13023_v48  ;;  %v13033_v33 = vld [vmem:[%s19417_s12 + $0x3a8] sm:$0xff]  ;;  %v13038_v16 = vld [vmem:[%s19417_s12 + $0x3b0] sm:$0xff] }
  0x3c   :  { %19715 = vst [vmem:[#allocation129_spill] sm:$0xff] %v13028_v0  ;;  %19716 = vst [vmem:[#allocation130_spill] sm:$0xff] %v13033_v33  ;;  %v13043_v32 = vld [vmem:[%s19417_s12 + $0x3b8] sm:$0xff]  ;;  %v13048_v48 = vld [vmem:[%s19417_s12 + $0x3c0] sm:$0xff] }
  0x3d   :  { %19717 = vst [vmem:[#allocation131_spill] sm:$0xff] %v13038_v16  ;;  %19718 = vst [vmem:[#allocation132_spill] sm:$0xff] %v13043_v32  ;;  %v13053_v0 = vld [vmem:[%s19417_s12 + $0x3c8] sm:$0xff]  ;;  %v13058_v33 = vld [vmem:[%s19417_s12 + $0x3d0] sm:$0xff] }
  0x3e   :  { %19719 = vst [vmem:[#allocation133_spill] sm:$0xff] %v13048_v48  ;;  %19720 = vst [vmem:[#allocation134_spill] sm:$0xff] %v13053_v0  ;;  %v13063_v16 = vld [vmem:[%s19417_s12 + $0x3d8] sm:$0xff]  ;;  %v13068_v32 = vld [vmem:[%s19417_s12 + $0x3e0] sm:$0xff] }
  0x3f   :  { %19721 = vst [vmem:[#allocation135_spill] sm:$0xff] %v13058_v33  ;;  %19722 = vst [vmem:[#allocation136_spill] sm:$0xff] %v13063_v16  ;;  %v13073_v48 = vld [vmem:[%s19417_s12 + $0x3e8] sm:$0xff]  ;;  %v13078_v0 = vld [vmem:[%s19417_s12 + $0x3f0] sm:$0xff] }
  0x40   :  { %19723 = vst [vmem:[#allocation137_spill] sm:$0xff] %v13068_v32  ;;  %19724 = vst [vmem:[#allocation138_spill] sm:$0xff] %v13073_v48  ;;  %v13083_v33 = vld [vmem:[%s19417_s12 + $0x3f8] sm:$0xff]  ;;  %v13088_v16 = vld [vmem:[%s19417_s12 + $0x400] sm:$0xff] }
  0x41   :  { %19725 = vst [vmem:[#allocation139_spill] sm:$0xff] %v13078_v0  ;;  %19726 = vst [vmem:[#allocation140_spill] sm:$0xff] %v13083_v33  ;;  %v13093_v32 = vld [vmem:[%s19417_s12 + $0x408] sm:$0xff]  ;;  %v13098_v48 = vld [vmem:[%s19417_s12 + $0x410] sm:$0xff] }
  0x42   :  { %19727 = vst [vmem:[#allocation141_spill] sm:$0xff] %v13088_v16  ;;  %19728 = vst [vmem:[#allocation142_spill] sm:$0xff] %v13093_v32  ;;  %v13103_v0 = vld [vmem:[%s19417_s12 + $0x418] sm:$0xff]  ;;  %v13108_v33 = vld [vmem:[%s19417_s12 + $0x420] sm:$0xff] }
  0x43   :  { %19729 = vst [vmem:[#allocation143_spill] sm:$0xff] %v13098_v48  ;;  %19730 = vst [vmem:[#allocation144_spill] sm:$0xff] %v13103_v0  ;;  %v13113_v16 = vld [vmem:[%s19417_s12 + $0x428] sm:$0xff]  ;;  %v13118_v32 = vld [vmem:[%s19417_s12 + $0x430] sm:$0xff] }
  0x44   :  { %19731 = vst [vmem:[#allocation145_spill] sm:$0xff] %v13108_v33  ;;  %19732 = vst [vmem:[#allocation146_spill] sm:$0xff] %v13113_v16  ;;  %v13123_v48 = vld [vmem:[%s19417_s12 + $0x438] sm:$0xff]  ;;  %v13128_v0 = vld [vmem:[%s19417_s12 + $0x440] sm:$0xff] }
  0x45   :  { %19733 = vst [vmem:[#allocation147_spill] sm:$0xff] %v13118_v32  ;;  %19734 = vst [vmem:[#allocation148_spill] sm:$0xff] %v13123_v48  ;;  %v13133_v33 = vld [vmem:[%s19417_s12 + $0x448] sm:$0xff]  ;;  %v13138_v16 = vld [vmem:[%s19417_s12 + $0x450] sm:$0xff] }
  0x46   :  { %19735 = vst [vmem:[#allocation149_spill] sm:$0xff] %v13128_v0  ;;  %19736 = vst [vmem:[#allocation150_spill] sm:$0xff] %v13133_v33  ;;  %v13143_v32 = vld [vmem:[%s19417_s12 + $0x458] sm:$0xff]  ;;  %v13148_v48 = vld [vmem:[%s19417_s12 + $0x460] sm:$0xff] }
  0x47   :  { %19737 = vst [vmem:[#allocation151_spill] sm:$0xff] %v13138_v16  ;;  %19738 = vst [vmem:[#allocation152_spill] sm:$0xff] %v13143_v32  ;;  %v13153_v0 = vld [vmem:[%s19417_s12 + $0x468] sm:$0xff]  ;;  %v13158_v33 = vld [vmem:[%s19417_s12 + $0x470] sm:$0xff] }
  0x48   :  { %19739 = vst [vmem:[#allocation153_spill] sm:$0xff] %v13148_v48  ;;  %19740 = vst [vmem:[#allocation154_spill] sm:$0xff] %v13153_v0  ;;  %v13163_v16 = vld [vmem:[%s19417_s12 + $0x478] sm:$0xff]  ;;  %v13168_v32 = vld [vmem:[%s19417_s12 + $0x480] sm:$0xff] }
  0x49   :  { %19741 = vst [vmem:[#allocation155_spill] sm:$0xff] %v13158_v33  ;;  %19742 = vst [vmem:[#allocation156_spill] sm:$0xff] %v13163_v16  ;;  %v13173_v48 = vld [vmem:[%s19417_s12 + $0x488] sm:$0xff]  ;;  %v13178_v0 = vld [vmem:[%s19417_s12 + $0x490] sm:$0xff] }
  0x4a   :  { %19743 = vst [vmem:[#allocation157_spill] sm:$0xff] %v13168_v32  ;;  %19744 = vst [vmem:[#allocation158_spill] sm:$0xff] %v13173_v48  ;;  %v13183_v33 = vld [vmem:[%s19417_s12 + $0x498] sm:$0xff]  ;;  %v13188_v16 = vld [vmem:[%s19417_s12 + $0x4a0] sm:$0xff] }
  0x4b   :  { %19745 = vst [vmem:[#allocation159_spill] sm:$0xff] %v13178_v0  ;;  %19746 = vst [vmem:[#allocation160_spill] sm:$0xff] %v13183_v33  ;;  %v13193_v32 = vld [vmem:[%s19417_s12 + $0x4a8] sm:$0xff]  ;;  %v13198_v48 = vld [vmem:[%s19417_s12 + $0x4b0] sm:$0xff] }
  0x4c   :  { %19747 = vst [vmem:[#allocation161_spill] sm:$0xff] %v13188_v16  ;;  %19748 = vst [vmem:[#allocation162_spill] sm:$0xff] %v13193_v32  ;;  %v13203_v0 = vld [vmem:[%s19417_s12 + $0x4b8] sm:$0xff]  ;;  %v13208_v33 = vld [vmem:[%s19417_s12 + $0x4c0] sm:$0xff] }
  0x4d   :  { %19749 = vst [vmem:[#allocation163_spill] sm:$0xff] %v13198_v48  ;;  %19750 = vst [vmem:[#allocation164_spill] sm:$0xff] %v13203_v0  ;;  %v13213_v16 = vld [vmem:[%s19417_s12 + $0x4c8] sm:$0xff]  ;;  %v13218_v32 = vld [vmem:[%s19417_s12 + $0x4d0] sm:$0xff] }
  0x4e   :  { %19751 = vst [vmem:[#allocation165_spill] sm:$0xff] %v13208_v33  ;;  %19752 = vst [vmem:[#allocation166_spill] sm:$0xff] %v13213_v16  ;;  %v13223_v48 = vld [vmem:[%s19417_s12 + $0x4d8] sm:$0xff]  ;;  %v13228_v0 = vld [vmem:[%s19417_s12 + $0x4e0] sm:$0xff] }
  0x4f   :  { %19753 = vst [vmem:[#allocation167_spill] sm:$0xff] %v13218_v32  ;;  %19754 = vst [vmem:[#allocation168_spill] sm:$0xff] %v13223_v48  ;;  %v13233_v33 = vld [vmem:[%s19417_s12 + $0x4e8] sm:$0xff]  ;;  %v13238_v16 = vld [vmem:[%s19417_s12 + $0x4f0] sm:$0xff] }
  0x50   :  { %19755 = vst [vmem:[#allocation169_spill] sm:$0xff] %v13228_v0  ;;  %19756 = vst [vmem:[#allocation170_spill] sm:$0xff] %v13233_v33  ;;  %v13243_v32 = vld [vmem:[%s19417_s12 + $0x4f8] sm:$0xff]  ;;  %v13248_v48 = vld [vmem:[%s19417_s12 + $0x500] sm:$0xff] }
  0x51   :  { %19757 = vst [vmem:[#allocation171_spill] sm:$0xff] %v13238_v16  ;;  %19758 = vst [vmem:[#allocation172_spill] sm:$0xff] %v13243_v32  ;;  %v13253_v0 = vld [vmem:[%s19417_s12 + $0x508] sm:$0xff]  ;;  %v13258_v33 = vld [vmem:[%s19417_s12 + $0x510] sm:$0xff] }
  0x52   :  { %19759 = vst [vmem:[#allocation173_spill] sm:$0xff] %v13248_v48  ;;  %19760 = vst [vmem:[#allocation174_spill] sm:$0xff] %v13253_v0  ;;  %v13263_v16 = vld [vmem:[%s19417_s12 + $0x518] sm:$0xff]  ;;  %v13268_v32 = vld [vmem:[%s19417_s12 + $0x520] sm:$0xff] }
  0x53   :  { %19761 = vst [vmem:[#allocation175_spill] sm:$0xff] %v13258_v33  ;;  %19762 = vst [vmem:[#allocation176_spill] sm:$0xff] %v13263_v16  ;;  %v13273_v48 = vld [vmem:[%s19417_s12 + $0x528] sm:$0xff]  ;;  %v13278_v0 = vld [vmem:[%s19417_s12 + $0x530] sm:$0xff] }
  0x54   :  { %19763 = vst [vmem:[#allocation177_spill] sm:$0xff] %v13268_v32  ;;  %19764 = vst [vmem:[#allocation178_spill] sm:$0xff] %v13273_v48  ;;  %v13283_v33 = vld [vmem:[%s19417_s12 + $0x538] sm:$0xff]  ;;  %v13288_v16 = vld [vmem:[%s19417_s12 + $0x540] sm:$0xff] }
  0x55   :  { %19765 = vst [vmem:[#allocation179_spill] sm:$0xff] %v13278_v0  ;;  %19766 = vst [vmem:[#allocation180_spill] sm:$0xff] %v13283_v33  ;;  %v13293_v32 = vld [vmem:[%s19417_s12 + $0x548] sm:$0xff]  ;;  %v13298_v48 = vld [vmem:[%s19417_s12 + $0x550] sm:$0xff] }
  0x56   :  { %19767 = vst [vmem:[#allocation181_spill] sm:$0xff] %v13288_v16  ;;  %19768 = vst [vmem:[#allocation182_spill] sm:$0xff] %v13293_v32  ;;  %v13303_v0 = vld [vmem:[%s19417_s12 + $0x558] sm:$0xff]  ;;  %v13308_v33 = vld [vmem:[%s19417_s12 + $0x560] sm:$0xff] }
  0x57   :  { %19769 = vst [vmem:[#allocation183_spill] sm:$0xff] %v13298_v48  ;;  %19770 = vst [vmem:[#allocation184_spill] sm:$0xff] %v13303_v0  ;;  %v13313_v16 = vld [vmem:[%s19417_s12 + $0x568] sm:$0xff]  ;;  %v13318_v32 = vld [vmem:[%s19417_s12 + $0x570] sm:$0xff] }
  0x58   :  { %19771 = vst [vmem:[#allocation185_spill] sm:$0xff] %v13308_v33  ;;  %19772 = vst [vmem:[#allocation186_spill] sm:$0xff] %v13313_v16  ;;  %v13323_v48 = vld [vmem:[%s19417_s12 + $0x578] sm:$0xff]  ;;  %v13328_v0 = vld [vmem:[%s19417_s12 + $0x580] sm:$0xff] }
  0x59   :  { %19773 = vst [vmem:[#allocation187_spill] sm:$0xff] %v13318_v32  ;;  %19774 = vst [vmem:[#allocation188_spill] sm:$0xff] %v13323_v48  ;;  %v13333_v33 = vld [vmem:[%s19417_s12 + $0x588] sm:$0xff]  ;;  %v13338_v16 = vld [vmem:[%s19417_s12 + $0x590] sm:$0xff] }
  0x5a   :  { %19775 = vst [vmem:[#allocation189_spill] sm:$0xff] %v13328_v0  ;;  %19776 = vst [vmem:[#allocation190_spill] sm:$0xff] %v13333_v33  ;;  %v13343_v32 = vld [vmem:[%s19417_s12 + $0x598] sm:$0xff]  ;;  %v13348_v48 = vld [vmem:[%s19417_s12 + $0x5a0] sm:$0xff] }
  0x5b   :  { %19777 = vst [vmem:[#allocation191_spill] sm:$0xff] %v13338_v16  ;;  %19778 = vst [vmem:[#allocation192_spill] sm:$0xff] %v13343_v32  ;;  %v13353_v0 = vld [vmem:[%s19417_s12 + $0x5a8] sm:$0xff]  ;;  %v13358_v33 = vld [vmem:[%s19417_s12 + $0x5b0] sm:$0xff] }
  0x5c   :  { %19779 = vst [vmem:[#allocation193_spill] sm:$0xff] %v13348_v48  ;;  %19780 = vst [vmem:[#allocation194_spill] sm:$0xff] %v13353_v0  ;;  %v13363_v16 = vld [vmem:[%s19417_s12 + $0x5b8] sm:$0xff]  ;;  %v13368_v32 = vld [vmem:[%s19417_s12 + $0x5c0] sm:$0xff] }
  0x5d   :  { %19781 = vst [vmem:[#allocation195_spill] sm:$0xff] %v13358_v33  ;;  %19782 = vst [vmem:[#allocation196_spill] sm:$0xff] %v13363_v16  ;;  %v13373_v48 = vld [vmem:[%s19417_s12 + $0x5c8] sm:$0xff]  ;;  %v13378_v0 = vld [vmem:[%s19417_s12 + $0x5d0] sm:$0xff] }
  0x5e   :  { %19783 = vst [vmem:[#allocation197_spill] sm:$0xff] %v13368_v32  ;;  %19784 = vst [vmem:[#allocation198_spill] sm:$0xff] %v13373_v48  ;;  %v13383_v33 = vld [vmem:[%s19417_s12 + $0x5d8] sm:$0xff]  ;;  %v13388_v16 = vld [vmem:[%s19417_s12 + $0x5e0] sm:$0xff] }
  0x5f   :  { %19785 = vst [vmem:[#allocation199_spill] sm:$0xff] %v13378_v0  ;;  %19786 = vst [vmem:[#allocation200_spill] sm:$0xff] %v13383_v33  ;;  %v13393_v32 = vld [vmem:[%s19417_s12 + $0x5e8] sm:$0xff]  ;;  %v13398_v48 = vld [vmem:[%s19417_s12 + $0x5f0] sm:$0xff] }
  0x60   :  { %19787 = vst [vmem:[#allocation201_spill] sm:$0xff] %v13388_v16  ;;  %19788 = vst [vmem:[#allocation202_spill] sm:$0xff] %v13393_v32  ;;  %v13403_v0 = vld [vmem:[%s19417_s12 + $0x5f8] sm:$0xff]  ;;  %v13408_v33 = vld [vmem:[%s19417_s12 + $0x600] sm:$0xff] }
  0x61   :  { %19789 = vst [vmem:[#allocation203_spill] sm:$0xff] %v13398_v48  ;;  %19790 = vst [vmem:[#allocation204_spill] sm:$0xff] %v13403_v0  ;;  %v13413_v16 = vld [vmem:[%s19417_s12 + $0x608] sm:$0xff]  ;;  %v13418_v32 = vld [vmem:[%s19417_s12 + $0x610] sm:$0xff] }
  0x62   :  { %19791 = vst [vmem:[#allocation205_spill] sm:$0xff] %v13408_v33  ;;  %19792 = vst [vmem:[#allocation206_spill] sm:$0xff] %v13413_v16  ;;  %v13423_v48 = vld [vmem:[%s19417_s12 + $0x618] sm:$0xff]  ;;  %v13428_v0 = vld [vmem:[%s19417_s12 + $0x620] sm:$0xff] }
  0x63   :  { %19793 = vst [vmem:[#allocation207_spill] sm:$0xff] %v13418_v32  ;;  %19794 = vst [vmem:[#allocation208_spill] sm:$0xff] %v13423_v48  ;;  %v13433_v33 = vld [vmem:[%s19417_s12 + $0x628] sm:$0xff]  ;;  %v13438_v16 = vld [vmem:[%s19417_s12 + $0x630] sm:$0xff] }
  0x64   :  { %19795 = vst [vmem:[#allocation209_spill] sm:$0xff] %v13428_v0  ;;  %19796 = vst [vmem:[#allocation210_spill] sm:$0xff] %v13433_v33  ;;  %v13443_v32 = vld [vmem:[%s19417_s12 + $0x638] sm:$0xff]  ;;  %v13448_v48 = vld [vmem:[%s19417_s12 + $0x640] sm:$0xff] }
  0x65   :  { %19797 = vst [vmem:[#allocation211_spill] sm:$0xff] %v13438_v16  ;;  %19798 = vst [vmem:[#allocation212_spill] sm:$0xff] %v13443_v32  ;;  %v13453_v0 = vld [vmem:[%s19417_s12 + $0x648] sm:$0xff]  ;;  %v13458_v33 = vld [vmem:[%s19417_s12 + $0x650] sm:$0xff] }
  0x66   :  { %19799 = vst [vmem:[#allocation213_spill] sm:$0xff] %v13448_v48  ;;  %19800 = vst [vmem:[#allocation214_spill] sm:$0xff] %v13453_v0  ;;  %v13463_v16 = vld [vmem:[%s19417_s12 + $0x658] sm:$0xff]  ;;  %v13468_v32 = vld [vmem:[%s19417_s12 + $0x660] sm:$0xff] }
  0x67   :  { %19801 = vst [vmem:[#allocation215_spill] sm:$0xff] %v13458_v33  ;;  %19802 = vst [vmem:[#allocation216_spill] sm:$0xff] %v13463_v16  ;;  %v13473_v48 = vld [vmem:[%s19417_s12 + $0x668] sm:$0xff]  ;;  %v13478_v0 = vld [vmem:[%s19417_s12 + $0x670] sm:$0xff] }
  0x68   :  { %19803 = vst [vmem:[#allocation217_spill] sm:$0xff] %v13468_v32  ;;  %19804 = vst [vmem:[#allocation218_spill] sm:$0xff] %v13473_v48  ;;  %v13483_v33 = vld [vmem:[%s19417_s12 + $0x678] sm:$0xff]  ;;  %v13488_v16 = vld [vmem:[%s19417_s12 + $0x680] sm:$0xff] }
  0x69   :  { %19805 = vst [vmem:[#allocation219_spill] sm:$0xff] %v13478_v0  ;;  %19806 = vst [vmem:[#allocation220_spill] sm:$0xff] %v13483_v33  ;;  %v13493_v32 = vld [vmem:[%s19417_s12 + $0x688] sm:$0xff]  ;;  %v13498_v48 = vld [vmem:[%s19417_s12 + $0x690] sm:$0xff] }
  0x6a   :  { %19807 = vst [vmem:[#allocation221_spill] sm:$0xff] %v13488_v16  ;;  %19808 = vst [vmem:[#allocation222_spill] sm:$0xff] %v13493_v32  ;;  %v13503_v0 = vld [vmem:[%s19417_s12 + $0x698] sm:$0xff]  ;;  %v13508_v33 = vld [vmem:[%s19417_s12 + $0x6a0] sm:$0xff] }
  0x6b   :  { %19809 = vst [vmem:[#allocation223_spill] sm:$0xff] %v13498_v48  ;;  %19810 = vst [vmem:[#allocation224_spill] sm:$0xff] %v13503_v0  ;;  %v13513_v16 = vld [vmem:[%s19417_s12 + $0x6a8] sm:$0xff]  ;;  %v13518_v32 = vld [vmem:[%s19417_s12 + $0x6b0] sm:$0xff] }
  0x6c   :  { %19811 = vst [vmem:[#allocation225_spill] sm:$0xff] %v13508_v33  ;;  %19812 = vst [vmem:[#allocation226_spill] sm:$0xff] %v13513_v16  ;;  %v13523_v48 = vld [vmem:[%s19417_s12 + $0x6b8] sm:$0xff]  ;;  %v13528_v0 = vld [vmem:[%s19417_s12 + $0x6c0] sm:$0xff] }
  0x6d   :  { %19813 = vst [vmem:[#allocation227_spill] sm:$0xff] %v13518_v32  ;;  %19814 = vst [vmem:[#allocation228_spill] sm:$0xff] %v13523_v48  ;;  %v13533_v33 = vld [vmem:[%s19417_s12 + $0x6c8] sm:$0xff]  ;;  %v13538_v16 = vld [vmem:[%s19417_s12 + $0x6d0] sm:$0xff] }
  0x6e   :  { %19815 = vst [vmem:[#allocation229_spill] sm:$0xff] %v13528_v0  ;;  %19816 = vst [vmem:[#allocation230_spill] sm:$0xff] %v13533_v33  ;;  %v13543_v32 = vld [vmem:[%s19417_s12 + $0x6d8] sm:$0xff]  ;;  %v13548_v48 = vld [vmem:[%s19417_s12 + $0x6e0] sm:$0xff] }
  0x6f   :  { %19817 = vst [vmem:[#allocation231_spill] sm:$0xff] %v13538_v16  ;;  %19818 = vst [vmem:[#allocation232_spill] sm:$0xff] %v13543_v32  ;;  %v13553_v0 = vld [vmem:[%s19417_s12 + $0x6e8] sm:$0xff]  ;;  %v13558_v33 = vld [vmem:[%s19417_s12 + $0x6f0] sm:$0xff] }
  0x70   :  { %19819 = vst [vmem:[#allocation233_spill] sm:$0xff] %v13548_v48  ;;  %19820 = vst [vmem:[#allocation234_spill] sm:$0xff] %v13553_v0  ;;  %v13563_v16 = vld [vmem:[%s19417_s12 + $0x6f8] sm:$0xff]  ;;  %v13568_v32 = vld [vmem:[%s19417_s12 + $0x700] sm:$0xff] }
  0x71   :  { %19821 = vst [vmem:[#allocation235_spill] sm:$0xff] %v13558_v33  ;;  %19822 = vst [vmem:[#allocation236_spill] sm:$0xff] %v13563_v16  ;;  %v13573_v48 = vld [vmem:[%s19417_s12 + $0x708] sm:$0xff]  ;;  %v13578_v0 = vld [vmem:[%s19417_s12 + $0x710] sm:$0xff] }
  0x72   :  { %19823 = vst [vmem:[#allocation237_spill] sm:$0xff] %v13568_v32  ;;  %19824 = vst [vmem:[#allocation238_spill] sm:$0xff] %v13573_v48  ;;  %v13583_v33 = vld [vmem:[%s19417_s12 + $0x718] sm:$0xff]  ;;  %v13588_v16 = vld [vmem:[%s19417_s12 + $0x720] sm:$0xff] }
  0x73   :  { %19825 = vst [vmem:[#allocation239_spill] sm:$0xff] %v13578_v0  ;;  %19826 = vst [vmem:[#allocation240_spill] sm:$0xff] %v13583_v33  ;;  %v13593_v32 = vld [vmem:[%s19417_s12 + $0x728] sm:$0xff]  ;;  %v13598_v48 = vld [vmem:[%s19417_s12 + $0x730] sm:$0xff] }
  0x74   :  { %19827 = vst [vmem:[#allocation241_spill] sm:$0xff] %v13588_v16  ;;  %19828 = vst [vmem:[#allocation242_spill] sm:$0xff] %v13593_v32  ;;  %v13603_v0 = vld [vmem:[%s19417_s12 + $0x738] sm:$0xff]  ;;  %v13608_v33 = vld [vmem:[%s19417_s12 + $0x740] sm:$0xff] }
  0x75   :  { %19829 = vst [vmem:[#allocation243_spill] sm:$0xff] %v13598_v48  ;;  %19830 = vst [vmem:[#allocation244_spill] sm:$0xff] %v13603_v0  ;;  %v13613_v16 = vld [vmem:[%s19417_s12 + $0x748] sm:$0xff]  ;;  %v13618_v32 = vld [vmem:[%s19417_s12 + $0x750] sm:$0xff] }
  0x76   :  { %19831 = vst [vmem:[#allocation245_spill] sm:$0xff] %v13608_v33  ;;  %19832 = vst [vmem:[#allocation246_spill] sm:$0xff] %v13613_v16  ;;  %v13623_v48 = vld [vmem:[%s19417_s12 + $0x758] sm:$0xff]  ;;  %v13628_v0 = vld [vmem:[%s19417_s12 + $0x760] sm:$0xff] }
  0x77   :  { %19833 = vst [vmem:[#allocation247_spill] sm:$0xff] %v13618_v32  ;;  %19834 = vst [vmem:[#allocation248_spill] sm:$0xff] %v13623_v48  ;;  %v13633_v33 = vld [vmem:[%s19417_s12 + $0x768] sm:$0xff]  ;;  %v13638_v16 = vld [vmem:[%s19417_s12 + $0x770] sm:$0xff] }
  0x78   :  { %19835 = vst [vmem:[#allocation249_spill] sm:$0xff] %v13628_v0  ;;  %19836 = vst [vmem:[#allocation250_spill] sm:$0xff] %v13633_v33  ;;  %v13643_v32 = vld [vmem:[%s19417_s12 + $0x778] sm:$0xff]  ;;  %v13648_v48 = vld [vmem:[%s19417_s12 + $0x780] sm:$0xff] }
  0x79   :  { %19837 = vst [vmem:[#allocation251_spill] sm:$0xff] %v13638_v16  ;;  %19838 = vst [vmem:[#allocation252_spill] sm:$0xff] %v13643_v32  ;;  %v13653_v0 = vld [vmem:[%s19417_s12 + $0x788] sm:$0xff]  ;;  %v13658_v33 = vld [vmem:[%s19417_s12 + $0x790] sm:$0xff] }
  0x7a   :  { %19839 = vst [vmem:[#allocation253_spill] sm:$0xff] %v13648_v48  ;;  %19840 = vst [vmem:[#allocation254_spill] sm:$0xff] %v13653_v0  ;;  %v13663_v16 = vld [vmem:[%s19417_s12 + $0x798] sm:$0xff]  ;;  %v13668_v32 = vld [vmem:[%s19417_s12 + $0x7a0] sm:$0xff] }
  0x7b   :  { %19841 = vst [vmem:[#allocation255_spill] sm:$0xff] %v13658_v33  ;;  %19842 = vst [vmem:[#allocation256_spill] sm:$0xff] %v13663_v16  ;;  %v13673_v48 = vld [vmem:[%s19417_s12 + $0x7a8] sm:$0xff]  ;;  %v13678_v0 = vld [vmem:[%s19417_s12 + $0x7b0] sm:$0xff] }
  0x7c   :  { %19843 = vst [vmem:[#allocation257_spill] sm:$0xff] %v13668_v32  ;;  %19844 = vst [vmem:[#allocation258_spill] sm:$0xff] %v13673_v48  ;;  %v13683_v33 = vld [vmem:[%s19417_s12 + $0x7b8] sm:$0xff]  ;;  %v13688_v16 = vld [vmem:[%s19417_s12 + $0x7c0] sm:$0xff] }
  0x7d   :  { %19845 = vst [vmem:[#allocation259_spill] sm:$0xff] %v13678_v0  ;;  %19846 = vst [vmem:[#allocation260_spill] sm:$0xff] %v13683_v33  ;;  %v13693_v32 = vld [vmem:[%s19417_s12 + $0x7c8] sm:$0xff]  ;;  %v13698_v48 = vld [vmem:[%s19417_s12 + $0x7d0] sm:$0xff] }
  0x7e   :  { %19847 = vst [vmem:[#allocation261_spill] sm:$0xff] %v13688_v16  ;;  %19848 = vst [vmem:[#allocation262_spill] sm:$0xff] %v13693_v32  ;;  %v13703_v0 = vld [vmem:[%s19417_s12 + $0x7d8] sm:$0xff]  ;;  %v13708_v33 = vld [vmem:[%s19417_s12 + $0x7e0] sm:$0xff] }
  0x7f   :  { %19849 = vst [vmem:[#allocation263_spill] sm:$0xff] %v13698_v48  ;;  %19850 = vst [vmem:[#allocation264_spill] sm:$0xff] %v13703_v0  ;;  %v13713_v16 = vld [vmem:[%s19417_s12 + $0x7e8] sm:$0xff]  ;;  %v13718_v32 = vld [vmem:[%s19417_s12 + $0x7f0] sm:$0xff] }
  0x80   :  { %19851 = vst [vmem:[#allocation265_spill] sm:$0xff] %v13708_v33  ;;  %19852 = vst [vmem:[#allocation266_spill] sm:$0xff] %v13713_v16  ;;  %v13723_v48 = vld [vmem:[%s19417_s12 + $0x7f8] sm:$0xff]  ;;  %v13728_v0 = vld [vmem:[%s19417_s12 + $0x800] sm:$0xff] }
  0x81   :  { %19853 = vst [vmem:[#allocation267_spill] sm:$0xff] %v13718_v32  ;;  %19854 = vst [vmem:[#allocation268_spill] sm:$0xff] %v13723_v48  ;;  %v13733_v33 = vld [vmem:[%s19417_s12 + $0x808] sm:$0xff]  ;;  %v13738_v16 = vld [vmem:[%s19417_s12 + $0x810] sm:$0xff] }
  0x82   :  { %19855 = vst [vmem:[#allocation269_spill] sm:$0xff] %v13728_v0  ;;  %19856 = vst [vmem:[#allocation270_spill] sm:$0xff] %v13733_v33  ;;  %v13743_v32 = vld [vmem:[%s19417_s12 + $0x818] sm:$0xff]  ;;  %v13748_v48 = vld [vmem:[%s19417_s12 + $0x820] sm:$0xff] }
  0x83   :  { %19857 = vst [vmem:[#allocation271_spill] sm:$0xff] %v13738_v16  ;;  %19858 = vst [vmem:[#allocation272_spill] sm:$0xff] %v13743_v32  ;;  %v13753_v0 = vld [vmem:[%s19417_s12 + $0x828] sm:$0xff]  ;;  %v13758_v33 = vld [vmem:[%s19417_s12 + $0x830] sm:$0xff] }
  0x84   :  { %19859 = vst [vmem:[#allocation273_spill] sm:$0xff] %v13748_v48  ;;  %19860 = vst [vmem:[#allocation274_spill] sm:$0xff] %v13753_v0  ;;  %v13763_v16 = vld [vmem:[%s19417_s12 + $0x838] sm:$0xff]  ;;  %v13768_v32 = vld [vmem:[%s19417_s12 + $0x840] sm:$0xff] }
  0x85   :  { %19861 = vst [vmem:[#allocation275_spill] sm:$0xff] %v13758_v33  ;;  %19862 = vst [vmem:[#allocation276_spill] sm:$0xff] %v13763_v16  ;;  %v13773_v48 = vld [vmem:[%s19417_s12 + $0x848] sm:$0xff]  ;;  %v13778_v0 = vld [vmem:[%s19417_s12 + $0x850] sm:$0xff] }
  0x86   :  { %19863 = vst [vmem:[#allocation277_spill] sm:$0xff] %v13768_v32  ;;  %19864 = vst [vmem:[#allocation278_spill] sm:$0xff] %v13773_v48  ;;  %v13783_v33 = vld [vmem:[%s19417_s12 + $0x858] sm:$0xff]  ;;  %v13788_v16 = vld [vmem:[%s19417_s12 + $0x860] sm:$0xff] }
  0x87   :  { %19865 = vst [vmem:[#allocation279_spill] sm:$0xff] %v13778_v0  ;;  %19866 = vst [vmem:[#allocation280_spill] sm:$0xff] %v13783_v33  ;;  %v13793_v32 = vld [vmem:[%s19417_s12 + $0x868] sm:$0xff]  ;;  %v13798_v48 = vld [vmem:[%s19417_s12 + $0x870] sm:$0xff] }
  0x88   :  { %19867 = vst [vmem:[#allocation281_spill] sm:$0xff] %v13788_v16  ;;  %19868 = vst [vmem:[#allocation282_spill] sm:$0xff] %v13793_v32  ;;  %v13803_v0 = vld [vmem:[%s19417_s12 + $0x878] sm:$0xff]  ;;  %v13808_v33 = vld [vmem:[%s19417_s12 + $0x880] sm:$0xff] }
  0x89   :  { %19869 = vst [vmem:[#allocation283_spill] sm:$0xff] %v13798_v48  ;;  %19870 = vst [vmem:[#allocation284_spill] sm:$0xff] %v13803_v0  ;;  %v13813_v16 = vld [vmem:[%s19417_s12 + $0x888] sm:$0xff]  ;;  %v13818_v32 = vld [vmem:[%s19417_s12 + $0x890] sm:$0xff] }
  0x8a   :  { %19871 = vst [vmem:[#allocation285_spill] sm:$0xff] %v13808_v33  ;;  %19872 = vst [vmem:[#allocation286_spill] sm:$0xff] %v13813_v16  ;;  %v13823_v48 = vld [vmem:[%s19417_s12 + $0x898] sm:$0xff]  ;;  %v13828_v0 = vld [vmem:[%s19417_s12 + $0x8a0] sm:$0xff] }
  0x8b   :  { %19873 = vst [vmem:[#allocation287_spill] sm:$0xff] %v13818_v32  ;;  %19874 = vst [vmem:[#allocation288_spill] sm:$0xff] %v13823_v48  ;;  %v13833_v33 = vld [vmem:[%s19417_s12 + $0x8a8] sm:$0xff]  ;;  %v13838_v16 = vld [vmem:[%s19417_s12 + $0x8b0] sm:$0xff] }
  0x8c   :  { %19875 = vst [vmem:[#allocation289_spill] sm:$0xff] %v13828_v0  ;;  %19876 = vst [vmem:[#allocation290_spill] sm:$0xff] %v13833_v33  ;;  %v13843_v32 = vld [vmem:[%s19417_s12 + $0x8b8] sm:$0xff]  ;;  %v13848_v48 = vld [vmem:[%s19417_s12 + $0x8c0] sm:$0xff] }
  0x8d   :  { %19877 = vst [vmem:[#allocation291_spill] sm:$0xff] %v13838_v16  ;;  %19878 = vst [vmem:[#allocation292_spill] sm:$0xff] %v13843_v32  ;;  %v13853_v0 = vld [vmem:[%s19417_s12 + $0x8c8] sm:$0xff]  ;;  %v13858_v33 = vld [vmem:[%s19417_s12 + $0x8d0] sm:$0xff] }
  0x8e   :  { %19879 = vst [vmem:[#allocation293_spill] sm:$0xff] %v13848_v48  ;;  %19880 = vst [vmem:[#allocation294_spill] sm:$0xff] %v13853_v0  ;;  %v13863_v16 = vld [vmem:[%s19417_s12 + $0x8d8] sm:$0xff]  ;;  %v13868_v32 = vld [vmem:[%s19417_s12 + $0x8e0] sm:$0xff] }
  0x8f   :  { %19881 = vst [vmem:[#allocation295_spill] sm:$0xff] %v13858_v33  ;;  %19882 = vst [vmem:[#allocation296_spill] sm:$0xff] %v13863_v16  ;;  %v13873_v48 = vld [vmem:[%s19417_s12 + $0x8e8] sm:$0xff]  ;;  %v13878_v0 = vld [vmem:[%s19417_s12 + $0x8f0] sm:$0xff] }
  0x90   :  { %19883 = vst [vmem:[#allocation297_spill] sm:$0xff] %v13868_v32  ;;  %19884 = vst [vmem:[#allocation298_spill] sm:$0xff] %v13873_v48  ;;  %v13883_v33 = vld [vmem:[%s19417_s12 + $0x8f8] sm:$0xff]  ;;  %v13888_v16 = vld [vmem:[%s19417_s12 + $0x900] sm:$0xff] }
  0x91   :  { %19885 = vst [vmem:[#allocation299_spill] sm:$0xff] %v13878_v0  ;;  %19886 = vst [vmem:[#allocation300_spill] sm:$0xff] %v13883_v33  ;;  %v13893_v32 = vld [vmem:[%s19417_s12 + $0x908] sm:$0xff]  ;;  %v13898_v48 = vld [vmem:[%s19417_s12 + $0x910] sm:$0xff] }
  0x92   :  { %19887 = vst [vmem:[#allocation301_spill] sm:$0xff] %v13888_v16  ;;  %19888 = vst [vmem:[#allocation302_spill] sm:$0xff] %v13893_v32  ;;  %v13903_v0 = vld [vmem:[%s19417_s12 + $0x918] sm:$0xff]  ;;  %v13908_v33 = vld [vmem:[%s19417_s12 + $0x920] sm:$0xff] }
  0x93   :  { %19889 = vst [vmem:[#allocation303_spill] sm:$0xff] %v13898_v48  ;;  %19890 = vst [vmem:[#allocation304_spill] sm:$0xff] %v13903_v0  ;;  %v13913_v16 = vld [vmem:[%s19417_s12 + $0x928] sm:$0xff]  ;;  %v13918_v32 = vld [vmem:[%s19417_s12 + $0x930] sm:$0xff] }
  0x94   :  { %19891 = vst [vmem:[#allocation305_spill] sm:$0xff] %v13908_v33  ;;  %19892 = vst [vmem:[#allocation306_spill] sm:$0xff] %v13913_v16  ;;  %v13923_v48 = vld [vmem:[%s19417_s12 + $0x938] sm:$0xff]  ;;  %v13928_v0 = vld [vmem:[%s19417_s12 + $0x940] sm:$0xff] }
  0x95   :  { %19893 = vst [vmem:[#allocation307_spill] sm:$0xff] %v13918_v32  ;;  %19894 = vst [vmem:[#allocation308_spill] sm:$0xff] %v13923_v48  ;;  %v13933_v33 = vld [vmem:[%s19417_s12 + $0x948] sm:$0xff]  ;;  %v13938_v16 = vld [vmem:[%s19417_s12 + $0x950] sm:$0xff] }
  0x96   :  { %19895 = vst [vmem:[#allocation309_spill] sm:$0xff] %v13928_v0  ;;  %19896 = vst [vmem:[#allocation310_spill] sm:$0xff] %v13933_v33  ;;  %v13943_v32 = vld [vmem:[%s19417_s12 + $0x958] sm:$0xff]  ;;  %v13948_v48 = vld [vmem:[%s19417_s12 + $0x960] sm:$0xff] }
  0x97   :  { %19897 = vst [vmem:[#allocation311_spill] sm:$0xff] %v13938_v16  ;;  %19898 = vst [vmem:[#allocation312_spill] sm:$0xff] %v13943_v32  ;;  %v13953_v0 = vld [vmem:[%s19417_s12 + $0x968] sm:$0xff]  ;;  %v13958_v33 = vld [vmem:[%s19417_s12 + $0x970] sm:$0xff] }
  0x98   :  { %19899 = vst [vmem:[#allocation313_spill] sm:$0xff] %v13948_v48  ;;  %19900 = vst [vmem:[#allocation314_spill] sm:$0xff] %v13953_v0  ;;  %v13963_v16 = vld [vmem:[%s19417_s12 + $0x978] sm:$0xff]  ;;  %v13968_v32 = vld [vmem:[%s19417_s12 + $0x980] sm:$0xff] }
  0x99   :  { %19901 = vst [vmem:[#allocation315_spill] sm:$0xff] %v13958_v33  ;;  %19902 = vst [vmem:[#allocation316_spill] sm:$0xff] %v13963_v16  ;;  %v13973_v48 = vld [vmem:[%s19417_s12 + $0x988] sm:$0xff]  ;;  %v13978_v0 = vld [vmem:[%s19417_s12 + $0x990] sm:$0xff] }
  0x9a   :  { %19903 = vst [vmem:[#allocation317_spill] sm:$0xff] %v13968_v32  ;;  %19904 = vst [vmem:[#allocation318_spill] sm:$0xff] %v13973_v48  ;;  %v13983_v33 = vld [vmem:[%s19417_s12 + $0x998] sm:$0xff]  ;;  %v13988_v16 = vld [vmem:[%s19417_s12 + $0x9a0] sm:$0xff] }
  0x9b   :  { %19905 = vst [vmem:[#allocation319_spill] sm:$0xff] %v13978_v0  ;;  %19906 = vst [vmem:[#allocation320_spill] sm:$0xff] %v13983_v33  ;;  %v13993_v32 = vld [vmem:[%s19417_s12 + $0x9a8] sm:$0xff]  ;;  %v13998_v48 = vld [vmem:[%s19417_s12 + $0x9b0] sm:$0xff] }
  0x9c   :  { %19907 = vst [vmem:[#allocation321_spill] sm:$0xff] %v13988_v16  ;;  %19908 = vst [vmem:[#allocation322_spill] sm:$0xff] %v13993_v32  ;;  %v14003_v0 = vld [vmem:[%s19417_s12 + $0x9b8] sm:$0xff]  ;;  %v14008_v33 = vld [vmem:[%s19417_s12 + $0x9c0] sm:$0xff] }
  0x9d   :  { %19909 = vst [vmem:[#allocation323_spill] sm:$0xff] %v13998_v48  ;;  %19910 = vst [vmem:[#allocation324_spill] sm:$0xff] %v14003_v0  ;;  %v14013_v16 = vld [vmem:[%s19417_s12 + $0x9c8] sm:$0xff]  ;;  %v14018_v32 = vld [vmem:[%s19417_s12 + $0x9d0] sm:$0xff] }
  0x9e   :  { %19911 = vst [vmem:[#allocation325_spill] sm:$0xff] %v14008_v33  ;;  %19912 = vst [vmem:[#allocation326_spill] sm:$0xff] %v14013_v16  ;;  %v14023_v48 = vld [vmem:[%s19417_s12 + $0x9d8] sm:$0xff]  ;;  %v14028_v0 = vld [vmem:[%s19417_s12 + $0x9e0] sm:$0xff] }
  0x9f   :  { %19913 = vst [vmem:[#allocation327_spill] sm:$0xff] %v14018_v32  ;;  %19914 = vst [vmem:[#allocation328_spill] sm:$0xff] %v14023_v48  ;;  %v14033_v33 = vld [vmem:[%s19417_s12 + $0x9e8] sm:$0xff]  ;;  %v14038_v16 = vld [vmem:[%s19417_s12 + $0x9f0] sm:$0xff] }
  0xa0   :  { %19915 = vst [vmem:[#allocation329_spill] sm:$0xff] %v14028_v0  ;;  %19916 = vst [vmem:[#allocation330_spill] sm:$0xff] %v14033_v33  ;;  %v14043_v32 = vld [vmem:[%s19417_s12 + $0x9f8] sm:$0xff]  ;;  %v14048_v48 = vld [vmem:[%s19417_s12 + $0xa00] sm:$0xff] }
  0xa1   :  { %19917 = vst [vmem:[#allocation331_spill] sm:$0xff] %v14038_v16  ;;  %19918 = vst [vmem:[#allocation332_spill] sm:$0xff] %v14043_v32  ;;  %v14053_v0 = vld [vmem:[%s19417_s12 + $0xa08] sm:$0xff]  ;;  %v14058_v33 = vld [vmem:[%s19417_s12 + $0xa10] sm:$0xff] }
  0xa2   :  { %19919 = vst [vmem:[#allocation333_spill] sm:$0xff] %v14048_v48  ;;  %19920 = vst [vmem:[#allocation334_spill] sm:$0xff] %v14053_v0  ;;  %v14063_v16 = vld [vmem:[%s19417_s12 + $0xa18] sm:$0xff]  ;;  %v14068_v32 = vld [vmem:[%s19417_s12 + $0xa20] sm:$0xff] }
  0xa3   :  { %19921 = vst [vmem:[#allocation335_spill] sm:$0xff] %v14058_v33  ;;  %19922 = vst [vmem:[#allocation336_spill] sm:$0xff] %v14063_v16  ;;  %v14073_v48 = vld [vmem:[%s19417_s12 + $0xa28] sm:$0xff]  ;;  %v14078_v0 = vld [vmem:[%s19417_s12 + $0xa30] sm:$0xff] }
  0xa4   :  { %19923 = vst [vmem:[#allocation337_spill] sm:$0xff] %v14068_v32  ;;  %19924 = vst [vmem:[#allocation338_spill] sm:$0xff] %v14073_v48  ;;  %v14083_v33 = vld [vmem:[%s19417_s12 + $0xa38] sm:$0xff]  ;;  %v14088_v16 = vld [vmem:[%s19417_s12 + $0xa40] sm:$0xff] }
  0xa5   :  { %19925 = vst [vmem:[#allocation339_spill] sm:$0xff] %v14078_v0  ;;  %19926 = vst [vmem:[#allocation340_spill] sm:$0xff] %v14083_v33  ;;  %v14093_v32 = vld [vmem:[%s19417_s12 + $0xa48] sm:$0xff]  ;;  %v14098_v48 = vld [vmem:[%s19417_s12 + $0xa50] sm:$0xff] }
  0xa6   :  { %19927 = vst [vmem:[#allocation341_spill] sm:$0xff] %v14088_v16  ;;  %19928 = vst [vmem:[#allocation342_spill] sm:$0xff] %v14093_v32  ;;  %v14103_v0 = vld [vmem:[%s19417_s12 + $0xa58] sm:$0xff]  ;;  %v14108_v33 = vld [vmem:[%s19417_s12 + $0xa60] sm:$0xff] }
  0xa7   :  { %19929 = vst [vmem:[#allocation343_spill] sm:$0xff] %v14098_v48  ;;  %19930 = vst [vmem:[#allocation344_spill] sm:$0xff] %v14103_v0  ;;  %v14113_v16 = vld [vmem:[%s19417_s12 + $0xa68] sm:$0xff]  ;;  %v14118_v32 = vld [vmem:[%s19417_s12 + $0xa70] sm:$0xff] }
  0xa8   :  { %19931 = vst [vmem:[#allocation345_spill] sm:$0xff] %v14108_v33  ;;  %19932 = vst [vmem:[#allocation346_spill] sm:$0xff] %v14113_v16  ;;  %v14123_v48 = vld [vmem:[%s19417_s12 + $0xa78] sm:$0xff]  ;;  %v14128_v0 = vld [vmem:[%s19417_s12 + $0xa80] sm:$0xff] }
  0xa9   :  { %19933 = vst [vmem:[#allocation347_spill] sm:$0xff] %v14118_v32  ;;  %19934 = vst [vmem:[#allocation348_spill] sm:$0xff] %v14123_v48  ;;  %v14133_v33 = vld [vmem:[%s19417_s12 + $0xa88] sm:$0xff]  ;;  %v14138_v16 = vld [vmem:[%s19417_s12 + $0xa90] sm:$0xff] }
  0xaa   :  { %19935 = vst [vmem:[#allocation349_spill] sm:$0xff] %v14128_v0  ;;  %19936 = vst [vmem:[#allocation350_spill] sm:$0xff] %v14133_v33  ;;  %v14143_v32 = vld [vmem:[%s19417_s12 + $0xa98] sm:$0xff]  ;;  %v14148_v48 = vld [vmem:[%s19417_s12 + $0xaa0] sm:$0xff] }
  0xab   :  { %19937 = vst [vmem:[#allocation351_spill] sm:$0xff] %v14138_v16  ;;  %19938 = vst [vmem:[#allocation352_spill] sm:$0xff] %v14143_v32  ;;  %v14153_v0 = vld [vmem:[%s19417_s12 + $0xaa8] sm:$0xff]  ;;  %v14158_v33 = vld [vmem:[%s19417_s12 + $0xab0] sm:$0xff] }
  0xac   :  { %19939 = vst [vmem:[#allocation353_spill] sm:$0xff] %v14148_v48  ;;  %19940 = vst [vmem:[#allocation354_spill] sm:$0xff] %v14153_v0  ;;  %v14163_v16 = vld [vmem:[%s19417_s12 + $0xab8] sm:$0xff]  ;;  %v14168_v32 = vld [vmem:[%s19417_s12 + $0xac0] sm:$0xff] }
  0xad   :  { %19941 = vst [vmem:[#allocation355_spill] sm:$0xff] %v14158_v33  ;;  %19942 = vst [vmem:[#allocation356_spill] sm:$0xff] %v14163_v16  ;;  %v14173_v48 = vld [vmem:[%s19417_s12 + $0xac8] sm:$0xff]  ;;  %v14178_v0 = vld [vmem:[%s19417_s12 + $0xad0] sm:$0xff] }
  0xae   :  { %19943 = vst [vmem:[#allocation357_spill] sm:$0xff] %v14168_v32  ;;  %19944 = vst [vmem:[#allocation358_spill] sm:$0xff] %v14173_v48  ;;  %v14183_v33 = vld [vmem:[%s19417_s12 + $0xad8] sm:$0xff]  ;;  %v14188_v16 = vld [vmem:[%s19417_s12 + $0xae0] sm:$0xff] }
  0xaf   :  { %19945 = vst [vmem:[#allocation359_spill] sm:$0xff] %v14178_v0  ;;  %19946 = vst [vmem:[#allocation360_spill] sm:$0xff] %v14183_v33  ;;  %v14193_v32 = vld [vmem:[%s19417_s12 + $0xae8] sm:$0xff]  ;;  %v14198_v48 = vld [vmem:[%s19417_s12 + $0xaf0] sm:$0xff] }
  0xb0   :  { %19947 = vst [vmem:[#allocation361_spill] sm:$0xff] %v14188_v16  ;;  %19948 = vst [vmem:[#allocation362_spill] sm:$0xff] %v14193_v32  ;;  %v14203_v0 = vld [vmem:[%s19417_s12 + $0xaf8] sm:$0xff]  ;;  %v14208_v33 = vld [vmem:[%s19417_s12 + $0xb00] sm:$0xff] }
  0xb1   :  { %19949 = vst [vmem:[#allocation363_spill] sm:$0xff] %v14198_v48  ;;  %19950 = vst [vmem:[#allocation364_spill] sm:$0xff] %v14203_v0  ;;  %v14213_v16 = vld [vmem:[%s19417_s12 + $0xb08] sm:$0xff]  ;;  %v14218_v32 = vld [vmem:[%s19417_s12 + $0xb10] sm:$0xff] }
  0xb2   :  { %19951 = vst [vmem:[#allocation365_spill] sm:$0xff] %v14208_v33  ;;  %19952 = vst [vmem:[#allocation366_spill] sm:$0xff] %v14213_v16  ;;  %v14223_v48 = vld [vmem:[%s19417_s12 + $0xb18] sm:$0xff]  ;;  %v14228_v0 = vld [vmem:[%s19417_s12 + $0xb20] sm:$0xff] }
  0xb3   :  { %19953 = vst [vmem:[#allocation367_spill] sm:$0xff] %v14218_v32  ;;  %19954 = vst [vmem:[#allocation368_spill] sm:$0xff] %v14223_v48  ;;  %v14233_v33 = vld [vmem:[%s19417_s12 + $0xb28] sm:$0xff]  ;;  %v14238_v16 = vld [vmem:[%s19417_s12 + $0xb30] sm:$0xff] }
  0xb4   :  { %19955 = vst [vmem:[#allocation369_spill] sm:$0xff] %v14228_v0  ;;  %19956 = vst [vmem:[#allocation370_spill] sm:$0xff] %v14233_v33  ;;  %v14243_v32 = vld [vmem:[%s19417_s12 + $0xb38] sm:$0xff]  ;;  %v14248_v48 = vld [vmem:[%s19417_s12 + $0xb40] sm:$0xff] }
  0xb5   :  { %19957 = vst [vmem:[#allocation371_spill] sm:$0xff] %v14238_v16  ;;  %19958 = vst [vmem:[#allocation372_spill] sm:$0xff] %v14243_v32  ;;  %v14253_v0 = vld [vmem:[%s19417_s12 + $0xb48] sm:$0xff]  ;;  %v14258_v33 = vld [vmem:[%s19417_s12 + $0xb50] sm:$0xff] }
  0xb6   :  { %19959 = vst [vmem:[#allocation373_spill] sm:$0xff] %v14248_v48  ;;  %19960 = vst [vmem:[#allocation374_spill] sm:$0xff] %v14253_v0  ;;  %v14263_v16 = vld [vmem:[%s19417_s12 + $0xb58] sm:$0xff]  ;;  %v14268_v32 = vld [vmem:[%s19417_s12 + $0xb60] sm:$0xff] }
  0xb7   :  { %19961 = vst [vmem:[#allocation375_spill] sm:$0xff] %v14258_v33  ;;  %19962 = vst [vmem:[#allocation376_spill] sm:$0xff] %v14263_v16  ;;  %v14273_v48 = vld [vmem:[%s19417_s12 + $0xb68] sm:$0xff]  ;;  %v14278_v0 = vld [vmem:[%s19417_s12 + $0xb70] sm:$0xff] }
  0xb8   :  { %19963 = vst [vmem:[#allocation377_spill] sm:$0xff] %v14268_v32  ;;  %19964 = vst [vmem:[#allocation378_spill] sm:$0xff] %v14273_v48  ;;  %v14283_v33 = vld [vmem:[%s19417_s12 + $0xb78] sm:$0xff]  ;;  %v14288_v16 = vld [vmem:[%s19417_s12 + $0xb80] sm:$0xff] }
  0xb9   :  { %19965 = vst [vmem:[#allocation379_spill] sm:$0xff] %v14278_v0  ;;  %19966 = vst [vmem:[#allocation380_spill] sm:$0xff] %v14283_v33  ;;  %v14293_v32 = vld [vmem:[%s19417_s12 + $0xb88] sm:$0xff]  ;;  %v14298_v48 = vld [vmem:[%s19417_s12 + $0xb90] sm:$0xff] }
  0xba   :  { %19967 = vst [vmem:[#allocation381_spill] sm:$0xff] %v14288_v16  ;;  %19968 = vst [vmem:[#allocation382_spill] sm:$0xff] %v14293_v32  ;;  %v14303_v0 = vld [vmem:[%s19417_s12 + $0xb98] sm:$0xff]  ;;  %v14308_v33 = vld [vmem:[%s19417_s12 + $0xba0] sm:$0xff] }
  0xbb   :  { %19969 = vst [vmem:[#allocation383_spill] sm:$0xff] %v14298_v48  ;;  %19970 = vst [vmem:[#allocation384_spill] sm:$0xff] %v14303_v0  ;;  %v14313_v16 = vld [vmem:[%s19417_s12 + $0xba8] sm:$0xff]  ;;  %v14318_v32 = vld [vmem:[%s19417_s12 + $0xbb0] sm:$0xff] }
  0xbc   :  { %19971 = vst [vmem:[#allocation385_spill] sm:$0xff] %v14308_v33  ;;  %19972 = vst [vmem:[#allocation386_spill] sm:$0xff] %v14313_v16  ;;  %v14323_v48 = vld [vmem:[%s19417_s12 + $0xbb8] sm:$0xff]  ;;  %v14328_v0 = vld [vmem:[%s19417_s12 + $0xbc0] sm:$0xff] }
  0xbd   :  { %19973 = vst [vmem:[#allocation387_spill] sm:$0xff] %v14318_v32  ;;  %19974 = vst [vmem:[#allocation388_spill] sm:$0xff] %v14323_v48  ;;  %v14333_v33 = vld [vmem:[%s19417_s12 + $0xbc8] sm:$0xff]  ;;  %v14338_v16 = vld [vmem:[%s19417_s12 + $0xbd0] sm:$0xff] }
  0xbe   :  { %19975 = vst [vmem:[#allocation389_spill] sm:$0xff] %v14328_v0  ;;  %19976 = vst [vmem:[#allocation390_spill] sm:$0xff] %v14333_v33  ;;  %v14343_v32 = vld [vmem:[%s19417_s12 + $0xbd8] sm:$0xff]  ;;  %v14348_v48 = vld [vmem:[%s19417_s12 + $0xbe0] sm:$0xff] }
  0xbf   :  { %19977 = vst [vmem:[#allocation391_spill] sm:$0xff] %v14338_v16  ;;  %19978 = vst [vmem:[#allocation392_spill] sm:$0xff] %v14343_v32  ;;  %v14353_v0 = vld [vmem:[%s19417_s12 + $0xbe8] sm:$0xff]  ;;  %v14358_v33 = vld [vmem:[%s19417_s12 + $0xbf0] sm:$0xff] }
  0xc0   :  { %19979 = vst [vmem:[#allocation393_spill] sm:$0xff] %v14348_v48  ;;  %19980 = vst [vmem:[#allocation394_spill] sm:$0xff] %v14353_v0  ;;  %v14363_v16 = vld [vmem:[%s19417_s12 + $0xbf8] sm:$0xff]  ;;  %v14368_v32 = vld [vmem:[%s19417_s12 + $0xc00] sm:$0xff] }
  0xc1   :  { %19981 = vst [vmem:[#allocation395_spill] sm:$0xff] %v14358_v33  ;;  %19982 = vst [vmem:[#allocation396_spill] sm:$0xff] %v14363_v16  ;;  %v14373_v48 = vld [vmem:[%s19417_s12 + $0xc08] sm:$0xff]  ;;  %v14378_v0 = vld [vmem:[%s19417_s12 + $0xc10] sm:$0xff] }
  0xc2   :  { %19983 = vst [vmem:[#allocation397_spill] sm:$0xff] %v14368_v32  ;;  %19984 = vst [vmem:[#allocation398_spill] sm:$0xff] %v14373_v48  ;;  %v14383_v33 = vld [vmem:[%s19417_s12 + $0xc18] sm:$0xff]  ;;  %v14388_v16 = vld [vmem:[%s19417_s12 + $0xc20] sm:$0xff] }
  0xc3   :  { %19985 = vst [vmem:[#allocation399_spill] sm:$0xff] %v14378_v0  ;;  %19986 = vst [vmem:[#allocation400_spill] sm:$0xff] %v14383_v33  ;;  %v14393_v32 = vld [vmem:[%s19417_s12 + $0xc28] sm:$0xff]  ;;  %v14398_v48 = vld [vmem:[%s19417_s12 + $0xc30] sm:$0xff] }
  0xc4   :  { %19987 = vst [vmem:[#allocation401_spill] sm:$0xff] %v14388_v16  ;;  %19988 = vst [vmem:[#allocation402_spill] sm:$0xff] %v14393_v32  ;;  %v14403_v0 = vld [vmem:[%s19417_s12 + $0xc38] sm:$0xff]  ;;  %v14408_v33 = vld [vmem:[%s19417_s12 + $0xc40] sm:$0xff] }
  0xc5   :  { %19989 = vst [vmem:[#allocation403_spill] sm:$0xff] %v14398_v48  ;;  %19990 = vst [vmem:[#allocation404_spill] sm:$0xff] %v14403_v0  ;;  %v14413_v16 = vld [vmem:[%s19417_s12 + $0xc48] sm:$0xff]  ;;  %v14418_v32 = vld [vmem:[%s19417_s12 + $0xc50] sm:$0xff] }
  0xc6   :  { %19991 = vst [vmem:[#allocation405_spill] sm:$0xff] %v14408_v33  ;;  %19992 = vst [vmem:[#allocation406_spill] sm:$0xff] %v14413_v16  ;;  %v14423_v48 = vld [vmem:[%s19417_s12 + $0xc58] sm:$0xff]  ;;  %v14428_v0 = vld [vmem:[%s19417_s12 + $0xc60] sm:$0xff] }
  0xc7   :  { %19993 = vst [vmem:[#allocation407_spill] sm:$0xff] %v14418_v32  ;;  %19994 = vst [vmem:[#allocation408_spill] sm:$0xff] %v14423_v48  ;;  %v14433_v33 = vld [vmem:[%s19417_s12 + $0xc68] sm:$0xff]  ;;  %v14438_v16 = vld [vmem:[%s19417_s12 + $0xc70] sm:$0xff] }
  0xc8   :  { %19995 = vst [vmem:[#allocation409_spill] sm:$0xff] %v14428_v0  ;;  %19996 = vst [vmem:[#allocation410_spill] sm:$0xff] %v14433_v33  ;;  %v14443_v32 = vld [vmem:[%s19417_s12 + $0xc78] sm:$0xff] }
  0xc9   :  { %19997 = vst [vmem:[#allocation411_spill] sm:$0xff] %v14438_v16  ;;  %19998 = vst [vmem:[#allocation412_spill] sm:$0xff] %v14443_v32 }
  0xca   :  { %883 = vsyncadd [#allocation7], 51200  ;;  %v900_v48 = vld [vmem:[%s19405_s0 + $0x290] sm:$0xff]  ;;  %v899_v0 = vld [vmem:[%s19405_s0 + $0x288] sm:$0xff]  ;;  %vm932_vm0 = vcmask 130048   ;;  %vm7187_vm1 = vcmask 261120  }
  0xcb   :  { %973 = vmatprep.subr.mxu0 %v900_v48  ;;  %12287 = vmatprep.subr.mxu1 %v900_v48  ;;  %v891_v33 = vld [vmem:[%s19405_s0 + $0x8] sm:$0xff]  ;;  %v890_v16 = vld [vmem:[%s19405_s0] sm:$0xff]  ;;  %v904_v1 = vld [vmem:[%s19405_s0 + $0x2b0] sm:$0xff]  ;;  %vm8751_vm2 = vcmask 523264   ;;  %vm884_vm3 = vcmask 1041920   ;;  %vm9148_vm4 = vcmask 517120  }
  0xcc   :  { %974 = vmatpush1.msra.mxu0 %v899_v0  ;;  %12289 = vmatpush1.msra.mxu1 %v899_v0  ;;  %v14460_v32 = vld [vmem:[%s19408_s3] sm:$0xff]  ;;  %v14465_v48 = vld [vmem:[%s19408_s3 + $0x8] sm:$0xff]  ;;  %v19419_v0 = vmov 0.0   ;;  %v14492_v34 = vld [vmem:[%s19408_s3 + $0x10] sm:$0xff] }
  0xcd   :  { %975 = vmatprep.subr.mxu0 %v891_v33  ;;  %12288 = vmatprep.subr.mxu1 %v891_v33  ;;  %v903_v33 = vld [vmem:[%s19405_s0 + $0x2a8] sm:$0xff]  ;;  %v902_v49 = vld [vmem:[%s19405_s0 + $0x2a0] sm:$0xff]  ;;  %v893_v2 = vld [vmem:[%s19405_s0 + $0x18] sm:$0xff] }
  0xce   :  { %976 = vmatpush1.msra.mxu0 %v890_v16  ;;  %12290 = vmatpush1.msra.mxu1 %v890_v16  ;;  %v895_v16 = vld [vmem:[%s19405_s0 + $0x28] sm:$0xff]  ;;  %v894_v17 = vld [vmem:[%s19405_s0 + $0x20] sm:$0xff]  ;;  %v14594_v18 = vld [vmem:[%s19409_s4 + $0x10] sm:$0xff] }
  0xcf   :  { %1009 = vmatprep.mubr.f32.mxu0 %v19419_v0  ;;  %1015 = vmatprep.mubr.f32.mxu1 %v19419_v0  ;;  %v906_v50 = vld [vmem:[%s19405_s0 + $0x2c0] sm:$0xff]  ;;  %v1547_v3 = vld [vmem:[%s19405_s0 + $0x48] sm:$0xff]  ;;  %v1553_v51 = vld [vmem:[%s19405_s0 + $0x78] sm:$0xff] }
  0xd0   :  { %11108 = vmatmul.mubr.msk.f32.vlgmr.msra.gmra.mxu0 %vm932_vm0, %v14460_v32  ;;  %11109 = vmatmul.mubr.msk.f32.vlgmr.msra.gmra.mxu1 %vm932_vm0, %v14465_v48  ;;  %v1554_v35 = vld [vmem:[%s19405_s0 + $0x80] sm:$0xff]  ;;  %v2873_v19 = vld [vmem:[%s19405_s0 + $0x388] sm:$0xff]  ;;  %v4177_v36 = vld [vmem:[%s19405_s0 + $0x198] sm:$0xff] }
  0xd1   :  { %1151 = vmatprep.subr.mxu0 %v904_v1  ;;  %1021 = vmatprep.mubr.f32.mxu1 %v19419_v0  ;;  %v901_v1 = vld [vmem:[%s19405_s0 + $0x298] sm:$0xff]  ;;  %v4175_v52 = vld [vmem:[%s19405_s0 + $0x188] sm:$0xff]  ;;  %v7145_v53 = vld [vmem:[%s19411_s6 + $0x30] sm:$0xff] }
  0xd2   :  { %1152 = vmatpush1.msra.mxu0 %v903_v33  ;;  %1187 = vmatprep.mubr.f32.mxu0 %v19419_v0  ;;  %v907_v33 = vld [vmem:[%s19405_s0 + $0x2c8] sm:$0xff]  ;;  %v4185_v4 = vld [vmem:[%s19405_s0 + $0x418] sm:$0xff]  ;;  %v12301_v43 = vld [vmem:[%s19408_s3 + $0x10] sm:$0xff] }
  0xd3   :  { %1153 = vmatprep.subr.mxu0 %v895_v16  ;;  %1062 = vmatprep.subr.mxu1 %v902_v49  ;;  %v892_v49 = vld [vmem:[%s19405_s0 + $0x10] sm:$0xff]  ;;  %v898_v16 = vld [vmem:[%s19405_s0 + $0x40] sm:$0xff]  ;;  %v7142_v5 = vld [vmem:[%s19411_s6 + $0x18] sm:$0xff] }
  0xd4   :  { %1154 = vmatpush1.msra.mxu0 %v894_v17  ;;  %11110 = vmatmul.mubr.msk.f32.gmra.mxu1 %vm932_vm0, %v14492_v34  ;;  %v14512_v17 = vld [vmem:[%s19408_s3 + $0x18] sm:$0xff]  ;;  %v7140_v6 = vld [vmem:[%s19411_s6 + $0x8] sm:$0xff]  ;;  %v8705_v27 = vld [vmem:[%s19413_s8 + $0x10] sm:$0xff] }
  0xd5   :  { %11116 = vmatmul.mubr.msk.f32.vlgmr.msra.gmra.mxu0 %vm932_vm0, %v14460_v32  ;;  %1027 = vmatprep.mubr.f32.mxu1 %v19419_v0  ;;  %v4840_v55 = vld [vmem:[%s19405_s0 + $0x458] sm:$0xff]  ;;  %v12300_v9 = vld [vmem:[%s19408_s3 + $0x8] sm:$0xff]  ;;  %v4843_v29 = vld [vmem:[%s19405_s0 + $0x470] sm:$0xff] }
  0xd6   :  { %1193 = vmatprep.mubr.f32.mxu0 %v19419_v0  ;;  %1063 = vmatpush1.msra.mxu1 %v901_v1  ;;  %v905_v1 = vld [vmem:[%s19405_s0 + $0x2b8] sm:$0xff]  ;;  %v4834_v14 = vld [vmem:[%s19405_s0 + $0x1e8] sm:$0xff]  ;;  %v4833_v47 = vld [vmem:[%s19405_s0 + $0x1e0] sm:$0xff] }
  0xd7   :  { %1064 = vmatprep.subr.mxu1 %v893_v2  ;;  %12079 = vmatprep.subr.mxu0 %v907_v33  ;;  %v1559_v2 = vld [vmem:[%s19405_s0 + $0x2e8] sm:$0xff]  ;;  %v4832_v23 = vld [vmem:[%s19405_s0 + $0x1d8] sm:$0xff] }
  0xd8   :  { %11111 = vmatmul.mubr.msk.f32.gmra.mxu1 %vm932_vm0, %v14512_v17  ;;  %12080 = vmatpush3.msra.mxu0 %v907_v33  ;;  %v896_v33 = vld [vmem:[%s19405_s0 + $0x30] sm:$0xff]  ;;  %v15342_v11 = vld [vmem:[%s19408_s3 + $0x18] sm:$0xff]  ;;  %v5493_v63 = vld [vmem:[%s19405_s0 + $0x488] sm:$0xff] }
  0xd9   :  { %11117 = vmatmul.mubr.msk.f32.gmra.mxu0 %vm932_vm0, %v14465_v48  ;;  %1065 = vmatpush1.msra.mxu1 %v892_v49  ;;  %v12370_v49 = vmov 0   ;;  %v12302_v12 = vld [vmem:[%s19408_s3 + $0x18] sm:$0xff] }
  0xda   :  { %1098 = vmatprep.mubr.f32.mxu1 %v19419_v0  ;;  %1199 = vmatprep.mubr.f32.mxu0 %v19419_v0 }
  0xdb   :  { %12081 = vmatprep.subr.mxu0 %v898_v16  ;;  %1240 = vmatprep.subr.mxu1 %v906_v50  ;;  %v897_v50 = vld [vmem:[%s19405_s0 + $0x38] sm:$0xff] }
  0xdc   :  { %11112 = vmatmul.mubr.msk.f32.vlgmr.msra.gmra.mxu1 %vm932_vm0, %v14460_v32  ;;  %12082 = vmatpush3.msra.mxu0 %v898_v16  ;;  %v14553_v16 = vld [vmem:[%s19409_s4 + $0x8] sm:$0xff] }
  0xdd   :  { %11118 = vmatmul.mubr.msk.f32.gmra.mxu0 %vm932_vm0, %v14492_v34  ;;  %1104 = vmatprep.mubr.f32.mxu1 %v19419_v0 }
  0xde   :  { %1205 = vmatprep.mubr.f32.mxu0 %v19419_v0  ;;  %1718 = vmatprep.subr.mxu0 %v1559_v2  ;;  %v1557_v2 = vld [vmem:[%s19405_s0 + $0x2d8] sm:$0xff] }
  0xdf   :  { %1241 = vmatpush1.msra.mxu1 %v905_v1  ;;  %12298 = vset.pattern.permute.xlu1 %v12370_v49  ;;  %v1558_v1 = vld [vmem:[%s19405_s0 + $0x2e0] sm:$0xff] }
  0xe0   :  { %11113 = vmatmul.mubr.msk.f32.gmra.mxu1 %vm932_vm0, %v14465_v48  ;;  %1242 = vmatprep.subr.mxu1 %v897_v50  ;;  %v1550_v50 = vld [vmem:[%s19405_s0 + $0x60] sm:$0xff] }
  0xe1   :  { %11119 = vmatmul.mubr.msk.f32.gmra.mxu0 %vm932_vm0, %v14512_v17  ;;  %1110 = vmatprep.mubr.f32.mxu1 %v19419_v0  ;;  %v14575_v0 = vld [vmem:[%s19409_s4] sm:$0xff] }
  0xe2   :  { %12083 = vmatprep.mubr.msk.f32.mxu0 %vm932_vm0, %v14460_v32  ;;  %1243 = vmatpush1.msra.mxu1 %v896_v33  ;;  %v19999_v33 = vmov 0.0  }
  0xe3   :  { %2888 = vperm.xlu1 %12298, %v14553_v16   ;;  %1629 = vmatprep.subr.mxu1 %v1557_v2  ;;  %v1549_v2 = vld [vmem:[%s19405_s0 + $0x58] sm:$0xff] }
  0xe4   :  { %11114 = vmatmul.mubr.msk.f32.gmra.mxu1 %vm932_vm0, %v14492_v34  ;;  %12297 = vset.pattern.permute.xlu0 %v12370_v49  ;;  %v1563_v49 = vld [vmem:[%s19405_s0 + $0x308] sm:$0xff] }
  0xe5   :  { %12084 = vmatmul.mubr.msk.f32.vlgmr.msra.gmra.mxu0 %vm932_vm0, %v14465_v48  ;;  %1116 = vmatprep.mubr.f32.mxu1 %v19999_v33 }
  0xe6   :  { %12086 = vmatprep.mubr.msk.f32.mxu0 %vm932_vm0, %v14492_v34  ;;  %1719 = vmatpush1.msra.mxu0 %v1558_v1  ;;  %v14603_v1 = vld [vmem:[%s19409_s4 + $0x18] sm:$0xff] }
  0xe7   :  { %1720 = vmatprep.subr.mxu0 %v1550_v50  ;;  %2883 = vperm.xlu1 %12298, %v14575_v0   ;;  %v1556_v50 = vld [vmem:[%s19405_s0 + $0x2d0] sm:$0xff] }
  0xe8   :  { %11115 = vmatmul.mubr.msk.f32.gmra.mxu1 %vm932_vm0, %v14512_v17  ;;  %1721 = vmatpush1.msra.mxu0 %v1549_v2  ;;  %v1562_v2 = vld [vmem:[%s19405_s0 + $0x300] sm:$0xff] }
  0xe9   :  { %12087 = vmatmul.mubr.msk.f32.gmra.mxu0 %vm932_vm0, %v14512_v17  ;;  %1276 = vmatprep.mubr.f32.mxu1 %v19999_v33 }
  0xea   :  { %1754 = vmatprep.mubr.f32.mxu0 %v19999_v33  ;;  %1896 = vmatprep.subr.mxu0 %v1563_v49  ;;  %v1548_v49 = vld [vmem:[%s19405_s0 + $0x50] sm:$0xff] }
  0xeb   :  { %2237 = vperm.xlu1 %12298, %v14594_v18   ;;  %2898 = vperm.xlu0 %12297, %v14603_v1  }
  0xec   :  { %11120 = vmatmul.mubr.msk.f32.vlgmr.msra.gmra.mxu1 %vm932_vm0, %v14460_v32 }
  0xed   :  { %11133 = vmatmul.mubr.msk.f32.vlgmr.msra.gmra.mxu0 %vm932_vm0, %v14460_v32  ;;  %1282 = vmatprep.mubr.f32.mxu1 %v19999_v33 }
  0xee   :  { %1760 = vmatprep.mubr.f32.mxu0 %v19999_v33  ;;  %1630 = vmatpush1.msra.mxu1 %v1556_v50  ;;  %v1561_v50 = vld [vmem:[%s19405_s0 + $0x2f8] sm:$0xff] }
  0xef   :  { %1897 = vmatpush1.msra.mxu0 %v1562_v2  ;;  %1631 = vmatprep.subr.mxu1 %v1548_v49  ;;  %v1552_v2 = vld [vmem:[%s19405_s0 + $0x70] sm:$0xff]  ;;  %v2204_v49 = vld [vmem:[%s19405_s0 + $0x98] sm:$0xff] }
  0xf0   :  { %11121 = vmatmul.mubr.msk.f32.gmra.mxu1 %vm932_vm0, %v14465_v48  ;;  %1898 = vmatprep.subr.mxu0 %v1554_v35  ;;  %v2213_v35 = vld [vmem:[%s19405_s0 + $0x320] sm:$0xff] }
  0xf1   :  { %11134 = vmatmul.mubr.msk.f32.gmra.mxu0 %vm932_vm0, %v14465_v48  ;;  %1288 = vmatprep.mubr.f32.mxu1 %v19999_v33 }
  0xf2   :  { %1766 = vmatprep.mubr.f32.mxu0 %v19999_v33  ;;  %1632 = vmatpush1.msra.mxu1 %v1547_v3  ;;  %v1560_v3 = vld [vmem:[%s19405_s0 + $0x2f0] sm:$0xff] }
  0xf3   :  { %1899 = vmatpush1.msra.mxu0 %v1553_v51  ;;  %2227 = vperm.xlu1 %12298, %v14575_v0   ;;  %v2212_v51 = vld [vmem:[%s19405_s0 + $0x318] sm:$0xff] }
  0xf4   :  { %11122 = vmatmul.mubr.msk.f32.gmra.mxu1 %vm932_vm0, %v14492_v34  ;;  %1807 = vmatprep.subr.mxu1 %v1561_v50  ;;  %v1551_v50 = vld [vmem:[%s19405_s0 + $0x68] sm:$0xff] }
  0xf5   :  { %11135 = vmatmul.mubr.msk.f32.gmra.mxu0 %vm932_vm0, %v14492_v34  ;;  %1294 = vmatprep.mubr.f32.mxu1 %v19999_v33 }
  0xf6   :  { %1772 = vmatprep.mubr.f32.mxu0 %v19999_v33  ;;  %2285 = vmatprep.subr.mxu0 %v2213_v35  ;;  %v2203_v35 = vld [vmem:[%s19405_s0 + $0x90] sm:$0xff] }
  0xf7   :  { %1581 = vperm.xlu1 %12298, %v14594_v18   ;;  %2893 = vperm.xlu0 %12297, %v14594_v18  }
  0xf8   :  { %11123 = vmatmul.mubr.msk.f32.gmra.mxu1 %vm932_vm0, %v14512_v17 }
  0xf9   :  { %11136 = vmatmul.mubr.msk.f32.gmra.mxu0 %vm932_vm0, %v14512_v17  ;;  %1665 = vmatprep.mubr.f32.mxu1 %v19999_v33 }
  0xfa   :  { %1932 = vmatprep.mubr.f32.mxu0 %v19999_v33 }
  0xfb   :  { %1571 = vperm.xlu1 %12298, %v14575_v0   ;;  %2242 = vperm.xlu0 %12297, %v14603_v1  }
  0xfc   :  { %11129 = vmatmul.mubr.msk.f32.vlgmr.msra.gmra.mxu1 %vm932_vm0, %v14460_v32 }
  0xfd   :  { %11141 = vmatmul.mubr.msk.f32.vlgmr.msra.gmra.mxu0 %vm932_vm0, %v14460_v32  ;;  %1671 = vmatprep.mubr.f32.mxu1 %v19999_v33 }
  0xfe   :  { %1938 = vmatprep.mubr.f32.mxu0 %v19999_v33  ;;  %1808 = vmatpush1.msra.mxu1 %v1560_v3  ;;  %v1564_v3 = vld [vmem:[%s19405_s0 + $0x310] sm:$0xff] }
  0xff   :  { %929 = vperm.xlu1 %12298, %v14603_v1   ;;  %2286 = vmatpush1.msra.mxu0 %v2212_v51  ;;  %v2217_v51 = vld [vmem:[%s19405_s0 + $0x340] sm:$0xff] }
 0x100   :  { %11130 = vmatmul.mubr.msk.f32.gmra.mxu1 %vm932_vm0, %v14465_v48  ;;  %1809 = vmatprep.subr.mxu1 %v1552_v2  ;;  %v2216_v2 = vld [vmem:[%s19405_s0 + $0x338] sm:$0xff] }
 0x101   :  { %11142 = vmatmul.mubr.msk.f32.gmra.mxu0 %vm932_vm0, %v14465_v48  ;;  %1677 = vmatprep.mubr.f32.mxu1 %v19999_v33 }
 0x102   :  { %1944 = vmatprep.mubr.f32.mxu0 %v19999_v33  ;;  %2287 = vmatprep.subr.mxu0 %v2204_v49  ;;  %v1555_v49 = vld [vmem:[%s19405_s0 + $0x88] sm:$0xff] }
 0x103   :  { %1810 = vmatpush1.msra.mxu1 %v1551_v50  ;;  %2288 = vmatpush1.msra.mxu0 %v2203_v35  ;;  %v2208_v50 = vld [vmem:[%s19405_s0 + $0xb8] sm:$0xff]  ;;  %v2207_v35 = vld [vmem:[%s19405_s0 + $0xb0] sm:$0xff] }
 0x104   :  { %11131 = vmatmul.mubr.msk.f32.gmra.mxu1 %vm932_vm0, %v14492_v34  ;;  %924 = vperm.xlu1 %12298, %v14594_v18  }
 0x105   :  { %11143 = vmatmul.mubr.msk.f32.gmra.mxu0 %vm932_vm0, %v14492_v34  ;;  %1683 = vmatprep.mubr.f32.mxu1 %v19999_v33 }
 0x106   :  { %1950 = vmatprep.mubr.f32.mxu0 %v19999_v33  ;;  %12089 = vmatprep.subr.mxu1 %v1564_v3 }
 0x107   :  { %2463 = vmatprep.subr.mxu0 %v2217_v51  ;;  %2232 = vperm.xlu0 %12297, %v14553_v16   ;;  %v2215_v51 = vld [vmem:[%s19405_s0 + $0x330] sm:$0xff] }
 0x108   :  { %11132 = vmatmul.mubr.msk.f32.gmra.mxu1 %vm932_vm0, %v14512_v17  ;;  %919 = vperm.xlu1 %12298, %v14553_v16  }
 0x109   :  { %11144 = vmatmul.mubr.msk.f32.gmra.mxu0 %vm932_vm0, %v14512_v17  ;;  %1843 = vmatprep.mubr.f32.mxu1 %v19999_v33 }
 0x10a   :  { %2321 = vmatprep.mubr.f32.mxu0 %v19999_v33 }
 0x10b   :  { %1586 = vperm.xlu0 %12297, %v14603_v1  }
 0x10c   :  { %11137 = vmatmul.mubr.msk.f32.vlgmr.msra.gmra.mxu1 %vm932_vm0, %v14460_v32  ;;  %914 = vperm.xlu1 %12298, %v14575_v0  }
 0x10d   :  { %11150 = vmatmul.mubr.msk.f32.vlgmr.msra.gmra.mxu0 %vm932_vm0, %v14460_v32  ;;  %1849 = vmatprep.mubr.f32.mxu1 %v19999_v33 }
 0x10e   :  { %2327 = vmatprep.mubr.f32.mxu0 %v19999_v33  ;;  %12090 = vmatpush3.msra.mxu1 %v1564_v3  ;;  %v2220_v3 = vld [vmem:[%s19405_s0 + $0x358] sm:$0xff] }
 0x10f   :  { %2464 = vmatpush1.msra.mxu0 %v2216_v2  ;;  %12091 = vmatprep.subr.mxu1 %v1555_v49  ;;  %v2214_v2 = vld [vmem:[%s19405_s0 + $0x328] sm:$0xff] }
 0x110   :  { %11138 = vmatmul.mubr.msk.f32.gmra.mxu1 %vm932_vm0, %v14465_v48  ;;  %2465 = vmatprep.subr.mxu0 %v2208_v50  ;;  %v2211_v50 = vld [vmem:[%s19405_s0 + $0xd0] sm:$0xff] }
 0x111   :  { %11151 = vmatmul.mubr.msk.f32.gmra.mxu0 %vm932_vm0, %v14465_v48  ;;  %1855 = vmatprep.mubr.f32.mxu1 %v19999_v33 }
 0x112   :  { %2333 = vmatprep.mubr.f32.mxu0 %v19999_v33  ;;  %12092 = vmatpush3.msra.mxu1 %v1555_v49  ;;  %v2206_v49 = vld [vmem:[%s19405_s0 + $0xa8] sm:$0xff] }
 0x113   :  { %2466 = vmatpush1.msra.mxu0 %v2207_v35  ;;  %2374 = vmatprep.subr.mxu1 %v2215_v51  ;;  %v2205_v35 = vld [vmem:[%s19405_s0 + $0xa0] sm:$0xff]  ;;  %v2219_v51 = vld [vmem:[%s19405_s0 + $0x350] sm:$0xff] }
 0x114   :  { %11139 = vmatmul.mubr.msk.f32.gmra.mxu1 %vm932_vm0, %v14492_v34  ;;  %12099 = vmatprep.subr.mxu0 %v2220_v3 }
 0x115   :  { %11152 = vmatmul.mubr.msk.f32.gmra.mxu0 %vm932_vm0, %v14492_v34  ;;  %1861 = vmatprep.mubr.f32.mxu1 %v19999_v33 }
 0x116   :  { %2339 = vmatprep.mubr.f32.mxu0 %v19999_v33  ;;  %1576 = vperm.xlu0 %12297, %v14553_v16  }
 0x117   :  { %5517 = vperm.xlu1 %12298, %v14594_v18  }
 0x118   :  { %11140 = vmatmul.mubr.msk.f32.gmra.mxu1 %vm932_vm0, %v14512_v17 }
 0x119   :  { %11153 = vmatmul.mubr.msk.f32.gmra.mxu0 %vm932_vm0, %v14512_v17  ;;  %12093 = vmatprep.mubr.msk.f32.mxu1 %vm932_vm0, %v14460_v32 }
 0x11a   :  { %2499 = vmatprep.mubr.f32.mxu0 %v19999_v33  ;;  %6178 = vperm.xlu0 %12297, %v14603_v1  }
 0x11b   :  { %5507 = vperm.xlu1 %12298, %v14575_v0  }
 0x11c   :  { %12094 = vmatmul.mubr.msk.f32.vlgmr.msra.gmra.mxu1 %vm932_vm0, %v14465_v48 }
 0x11d   :  { %11158 = vmatmul.mubr.msk.f32.vlgmr.msra.gmra.mxu0 %vm932_vm0, %v14460_v32  ;;  %12096 = vmatprep.mubr.msk.f32.mxu1 %vm932_vm0, %v14492_v34 }
 0x11e   :  { %2505 = vmatprep.mubr.f32.mxu0 %v19999_v33  ;;  %2375 = vmatpush1.msra.mxu1 %v2214_v2  ;;  %v2871_v2 = vld [vmem:[%s19405_s0 + $0x378] sm:$0xff] }
 0x11f   :  { %2376 = vmatprep.subr.mxu1 %v2206_v49  ;;  %12100 = vmatpush3.msra.mxu0 %v2220_v3  ;;  %v2218_v3 = vld [vmem:[%s19405_s0 + $0x348] sm:$0xff] }
 0x120   :  { %12097 = vmatmul.mubr.msk.f32.gmra.mxu1 %vm932_vm0, %v14512_v17  ;;  %12101 = vmatprep.subr.mxu0 %v2211_v50  ;;  %v2210_v49 = vld [vmem:[%s19405_s0 + $0xc8] sm:$0xff] }
 0x121   :  { %11159 = vmatmul.mubr.msk.f32.gmra.mxu0 %vm932_vm0, %v14465_v48  ;;  %2377 = vmatpush1.msra.mxu1 %v2205_v35  ;;  %v2869_v35 = vld [vmem:[%s19405_s0 + $0x368] sm:$0xff] }
 0x122   :  { %2410 = vmatprep.mubr.f32.mxu1 %v19999_v33  ;;  %2511 = vmatprep.mubr.f32.mxu0 %v19999_v33 }
 0x123   :  { %12102 = vmatpush3.msra.mxu0 %v2211_v50  ;;  %2552 = vmatprep.subr.mxu1 %v2219_v51  ;;  %v2209_v50 = vld [vmem:[%s19405_s0 + $0xc0] sm:$0xff]  ;;  %v2870_v51 = vld [vmem:[%s19405_s0 + $0x370] sm:$0xff] }
 0x124   :  { %11154 = vmatmul.mubr.msk.f32.vlgmr.msra.gmra.mxu1 %vm932_vm0, %v14460_v32  ;;  %3030 = vmatprep.subr.mxu0 %v2871_v2  ;;  %v2862_v2 = vld [vmem:[%s19405_s0 + $0xf0] sm:$0xff] }
 0x125   :  { %11160 = vmatmul.mubr.msk.f32.gmra.mxu0 %vm932_vm0, %v14492_v34  ;;  %2416 = vmatprep.mubr.f32.mxu1 %v19999_v33 }
 0x126   :  { %2517 = vmatprep.mubr.f32.mxu0 %v19999_v33  ;;  %2553 = vmatpush1.msra.mxu1 %v2218_v3  ;;  %v2861_v3 = vld [vmem:[%s19405_s0 + $0xe8] sm:$0xff] }
 0x127   :  { %2554 = vmatprep.subr.mxu1 %v2210_v49  ;;  %6173 = vperm.xlu0 %12297, %v14594_v18   ;;  %v2875_v49 = vld [vmem:[%s19405_s0 + $0x398] sm:$0xff] }
 0x128   :  { %11155 = vmatmul.mubr.msk.f32.gmra.mxu1 %vm932_vm0, %v14465_v48  ;;  %4861 = vperm.xlu1 %12298, %v14594_v18  }
 0x129   :  { %11161 = vmatmul.mubr.msk.f32.gmra.mxu0 %vm932_vm0, %v14512_v17  ;;  %2422 = vmatprep.mubr.f32.mxu1 %v19999_v33 }
 0x12a   :  { %12103 = vmatprep.mubr.msk.f32.mxu0 %vm932_vm0, %v14460_v32  ;;  %2555 = vmatpush1.msra.mxu1 %v2209_v50  ;;  %v2868_v50 = vld [vmem:[%s19405_s0 + $0x360] sm:$0xff] }
 0x12b   :  { %2941 = vmatprep.subr.mxu1 %v2869_v35  ;;  %6168 = vperm.xlu0 %12297, %v14553_v16   ;;  %v2874_v35 = vld [vmem:[%s19405_s0 + $0x390] sm:$0xff] }
 0x12c   :  { %11156 = vmatmul.mubr.msk.f32.gmra.mxu1 %vm932_vm0, %v14492_v34  ;;  %4851 = vperm.xlu1 %12298, %v14575_v0  }
 0x12d   :  { %12104 = vmatmul.mubr.msk.f32.vlgmr.msra.gmra.mxu0 %vm932_vm0, %v14465_v48  ;;  %2428 = vmatprep.mubr.f32.mxu1 %v19999_v33 }
 0x12e   :  { %12106 = vmatprep.mubr.msk.f32.mxu0 %vm932_vm0, %v14492_v34  ;;  %3031 = vmatpush1.msra.mxu0 %v2870_v51  ;;  %v2860_v51 = vld [vmem:[%s19405_s0 + $0xe0] sm:$0xff] }
 0x12f   :  { %3032 = vmatprep.subr.mxu0 %v2862_v2  ;;  %6163 = vperm.xlu0 %12297, %v14575_v0   ;;  %v2866_v2 = vld [vmem:[%s19405_s0 + $0x110] sm:$0xff] }
 0x130   :  { %11157 = vmatmul.mubr.msk.f32.gmra.mxu1 %vm932_vm0, %v14512_v17  ;;  %3033 = vmatpush1.msra.mxu0 %v2861_v3  ;;  %v2859_v3 = vld [vmem:[%s19405_s0 + $0xd8] sm:$0xff] }
 0x131   :  { %12107 = vmatmul.mubr.msk.f32.gmra.mxu0 %vm932_vm0, %v14512_v17  ;;  %2588 = vmatprep.mubr.f32.mxu1 %v19999_v33 }
 0x132   :  { %3066 = vmatprep.mubr.f32.mxu0 %v19999_v33  ;;  %3208 = vmatprep.subr.mxu0 %v2875_v49  ;;  %v2865_v49 = vld [vmem:[%s19405_s0 + $0x108] sm:$0xff] }
 0x133   :  { %5522 = vperm.xlu0 %12297, %v14603_v1   ;;  %4205 = vperm.xlu1 %12298, %v14594_v18  }
 0x134   :  { %11162 = vmatmul.mubr.msk.f32.vlgmr.msra.gmra.mxu1 %vm932_vm0, %v14460_v32 }
 0x135   :  { %11175 = vmatmul.mubr.msk.f32.vlgmr.msra.gmra.mxu0 %vm932_vm0, %v14460_v32  ;;  %2594 = vmatprep.mubr.f32.mxu1 %v19999_v33 }
 0x136   :  { %3072 = vmatprep.mubr.f32.mxu0 %v19999_v33  ;;  %2942 = vmatpush1.msra.mxu1 %v2868_v50  ;;  %v3525_v50 = vld [vmem:[%s19405_s0 + $0x3b0] sm:$0xff] }
 0x137   :  { %3209 = vmatpush1.msra.mxu0 %v2874_v35  ;;  %2943 = vmatprep.subr.mxu1 %v2860_v51  ;;  %v3524_v35 = vld [vmem:[%s19405_s0 + $0x3a8] sm:$0xff]  ;;  %v2864_v51 = vld [vmem:[%s19405_s0 + $0x100] sm:$0xff] }
 0x138   :  { %11163 = vmatmul.mubr.msk.f32.gmra.mxu1 %vm932_vm0, %v14465_v48  ;;  %3210 = vmatprep.subr.mxu0 %v2866_v2  ;;  %v2863_v2 = vld [vmem:[%s19405_s0 + $0xf8] sm:$0xff] }
 0x139   :  { %11176 = vmatmul.mubr.msk.f32.gmra.mxu0 %vm932_vm0, %v14465_v48  ;;  %2600 = vmatprep.mubr.f32.mxu1 %v19999_v33 }
 0x13a   :  { %3078 = vmatprep.mubr.f32.mxu0 %v19999_v33  ;;  %2944 = vmatpush1.msra.mxu1 %v2859_v3  ;;  %v3515_v3 = vld [vmem:[%s19405_s0 + $0x120] sm:$0xff] }
 0x13b   :  { %3211 = vmatpush1.msra.mxu0 %v2865_v49  ;;  %3119 = vmatprep.subr.mxu1 %v2873_v19  ;;  %v2872_v19 = vld [vmem:[%s19405_s0 + $0x380] sm:$0xff] }
 0x13c   :  { %11164 = vmatmul.mubr.msk.f32.gmra.mxu1 %vm932_vm0, %v14492_v34  ;;  %3597 = vmatprep.subr.mxu0 %v3525_v50  ;;  %v2876_v49 = vld [vmem:[%s19405_s0 + $0x3a0] sm:$0xff]  ;;  %v3529_v50 = vld [vmem:[%s19405_s0 + $0x3d0] sm:$0xff] }
 0x13d   :  { %11177 = vmatmul.mubr.msk.f32.gmra.mxu0 %vm932_vm0, %v14492_v34  ;;  %2606 = vmatprep.mubr.f32.mxu1 %v19999_v33 }
 0x13e   :  { %3084 = vmatprep.mubr.f32.mxu0 %v19999_v33  ;;  %5512 = vperm.xlu0 %12297, %v14553_v16  }
 0x13f   :  { %4195 = vperm.xlu1 %12298, %v14575_v0  }
 0x140   :  { %11165 = vmatmul.mubr.msk.f32.gmra.mxu1 %vm932_vm0, %v14512_v17 }
 0x141   :  { %11178 = vmatmul.mubr.msk.f32.gmra.mxu0 %vm932_vm0, %v14512_v17  ;;  %2977 = vmatprep.mubr.f32.mxu1 %v19999_v33 }
 0x142   :  { %3244 = vmatprep.mubr.f32.mxu0 %v19999_v33  ;;  %4866 = vperm.xlu0 %12297, %v14603_v1  }
 0x143   :  { %3549 = vperm.xlu1 %12298, %v14594_v18   ;;  %v3516_v18 = vld [vmem:[%s19405_s0 + $0x128] sm:$0xff] }
 0x144   :  { %11171 = vmatmul.mubr.msk.f32.vlgmr.msra.gmra.mxu1 %vm932_vm0, %v14460_v32 }
 0x145   :  { %11183 = vmatmul.mubr.msk.f32.vlgmr.msra.gmra.mxu0 %vm932_vm0, %v14460_v32  ;;  %2983 = vmatprep.mubr.f32.mxu1 %v19999_v33 }
 0x146   :  { %3250 = vmatprep.mubr.f32.mxu0 %v19999_v33  ;;  %3120 = vmatpush1.msra.mxu1 %v2872_v19  ;;  %v3528_v19 = vld [vmem:[%s19405_s0 + $0x3c8] sm:$0xff] }
 0x147   :  { %3598 = vmatpush1.msra.mxu0 %v3524_v35  ;;  %3121 = vmatprep.subr.mxu1 %v2864_v51  ;;  %v3520_v35 = vld [vmem:[%s19405_s0 + $0x148] sm:$0xff]  ;;  %v3519_v51 = vld [vmem:[%s19405_s0 + $0x140] sm:$0xff] }
 0x148   :  { %11172 = vmatmul.mubr.msk.f32.gmra.mxu1 %vm932_vm0, %v14465_v48  ;;  %3599 = vmatprep.subr.mxu0 %v3516_v18  ;;  %v3527_v18 = vld [vmem:[%s19405_s0 + $0x3c0] sm:$0xff] }
 0x149   :  { %11184 = vmatmul.mubr.msk.f32.gmra.mxu0 %vm932_vm0, %v14465_v48  ;;  %2989 = vmatprep.mubr.f32.mxu1 %v19999_v33 }
 0x14a   :  { %3256 = vmatprep.mubr.f32.mxu0 %v19999_v33  ;;  %3122 = vmatpush1.msra.mxu1 %v2863_v2  ;;  %v3532_v2 = vld [vmem:[%s19405_s0 + $0x3e8] sm:$0xff] }
 0x14b   :  { %3600 = vmatpush1.msra.mxu0 %v3515_v3  ;;  %12109 = vmatprep.subr.mxu1 %v2876_v49 }
 0x14c   :  { %11173 = vmatmul.mubr.msk.f32.gmra.mxu1 %vm932_vm0, %v14492_v34  ;;  %3775 = vmatprep.subr.mxu0 %v3529_v50 }
 0x14d   :  { %11185 = vmatmul.mubr.msk.f32.gmra.mxu0 %vm932_vm0, %v14492_v34  ;;  %2995 = vmatprep.mubr.f32.mxu1 %v19999_v33 }
 0x14e   :  { %3262 = vmatprep.mubr.f32.mxu0 %v19999_v33  ;;  %4856 = vperm.xlu0 %12297, %v14553_v16  }
 0x14f   :  { %3539 = vperm.xlu1 %12298, %v14575_v0   ;;  %v2867_v0 = vld [vmem:[%s19405_s0 + $0x118] sm:$0xff] }
 0x150   :  { %11174 = vmatmul.mubr.msk.f32.gmra.mxu1 %vm932_vm0, %v14512_v17 }
 0x151   :  { %11186 = vmatmul.mubr.msk.f32.gmra.mxu0 %vm932_vm0, %v14512_v17  ;;  %3155 = vmatprep.mubr.f32.mxu1 %v19999_v33 }
 0x152   :  { %3633 = vmatprep.mubr.f32.mxu0 %v19999_v33  ;;  %4210 = vperm.xlu0 %12297, %v14603_v1  }
 0x153   :  { %7179 = vperm.xlu1 %12298, %v7145_v53  }
 0x154   :  { %11179 = vmatmul.mubr.msk.f32.vlgmr.msra.gmra.mxu1 %vm932_vm0, %v14460_v32 }
 0x155   :  { %11192 = vmatmul.mubr.msk.f32.vlgmr.msra.gmra.mxu0 %vm932_vm0, %v14460_v32  ;;  %3161 = vmatprep.mubr.f32.mxu1 %v19999_v33 }
 0x156   :  { %3639 = vmatprep.mubr.f32.mxu0 %v19999_v33  ;;  %12110 = vmatpush3.msra.mxu1 %v2876_v49  ;;  %v3526_v49 = vld [vmem:[%s19405_s0 + $0x3b8] sm:$0xff] }
 0x157   :  { %3776 = vmatpush1.msra.mxu0 %v3528_v19  ;;  %12111 = vmatprep.subr.mxu1 %v2867_v0  ;;  %v3517_v19 = vld [vmem:[%s19405_s0 + $0x130] sm:$0xff] }
 0x158   :  { %11180 = vmatmul.mubr.msk.f32.gmra.mxu1 %vm932_vm0, %v14465_v48  ;;  %3777 = vmatprep.subr.mxu0 %v3520_v35  ;;  %v4183_v35 = vld [vmem:[%s19405_s0 + $0x408] sm:$0xff] }
 0x159   :  { %11193 = vmatmul.mubr.msk.f32.gmra.mxu0 %vm932_vm0, %v14465_v48  ;;  %3167 = vmatprep.mubr.f32.mxu1 %v19999_v33 }
 0x15a   :  { %3645 = vmatprep.mubr.f32.mxu0 %v19999_v33  ;;  %12112 = vmatpush3.msra.mxu1 %v2867_v0  ;;  %v3531_v0 = vld [vmem:[%s19405_s0 + $0x3e0] sm:$0xff] }
 0x15b   :  { %3778 = vmatpush1.msra.mxu0 %v3519_v51  ;;  %3686 = vmatprep.subr.mxu1 %v3527_v18  ;;  %v3530_v18 = vld [vmem:[%s19405_s0 + $0x3d8] sm:$0xff] }
 0x15c   :  { %11181 = vmatmul.mubr.msk.f32.gmra.mxu1 %vm932_vm0, %v14492_v34  ;;  %12119 = vmatprep.subr.mxu0 %v3532_v2 }
 0x15d   :  { %11194 = vmatmul.mubr.msk.f32.gmra.mxu0 %vm932_vm0, %v14492_v34  ;;  %3173 = vmatprep.mubr.f32.mxu1 %v19999_v33 }
 0x15e   :  { %3651 = vmatprep.mubr.f32.mxu0 %v19999_v33  ;;  %4200 = vperm.xlu0 %12297, %v14553_v16   ;;  %v14989_v3 = vpop.permute.xlu1 %2888  ;;  %v3518_v16 = vld [vmem:[%s19405_s0 + $0x138] sm:$0xff] }
 0x15f   :  { %20000 = vst [vmem:[#allocation413_spill] sm:$0xff] %v14989_v3 }
 0x160   :  { %11182 = vmatmul.mubr.msk.f32.gmra.mxu1 %vm932_vm0, %v14512_v17 }
 0x161   :  { %11195 = vmatmul.mubr.msk.f32.gmra.mxu0 %vm932_vm0, %v14512_v17  ;;  %12113 = vmatprep.mubr.msk.f32.mxu1 %vm932_vm0, %v14460_v32 }
 0x162   :  { %3811 = vmatprep.mubr.f32.mxu0 %v19999_v33  ;;  %3554 = vperm.xlu0 %12297, %v14603_v1   ;;  %v15011_v50 = vpop.permute.xlu1 %2883  ;;  %v3523_v1 = vld [vmem:[%s19405_s0 + $0x160] sm:$0xff] }
 0x163   :  { %20001 = vst [vmem:[#allocation414_spill] sm:$0xff] %v15011_v50 }
 0x164   :  { %12114 = vmatmul.mubr.msk.f32.vlgmr.msra.gmra.mxu1 %vm932_vm0, %v14465_v48 }
 0x165   :  { %11200 = vmatmul.mubr.msk.f32.vlgmr.msra.gmra.mxu0 %vm932_vm0, %v14460_v32  ;;  %12116 = vmatprep.mubr.msk.f32.mxu1 %vm932_vm0, %v14492_v34 }
 0x166   :  { %3817 = vmatprep.mubr.f32.mxu0 %v19999_v33  ;;  %3687 = vmatpush1.msra.mxu1 %v3526_v49  ;;  %v15032_v51 = vpop.permute.xlu1 %2237  ;;  %v3534_v49 = vld [vmem:[%s19409_s4 + $0x8] sm:$0xff] }
 0x167   :  { %3688 = vmatprep.subr.mxu1 %v3518_v16  ;;  %12120 = vmatpush3.msra.mxu0 %v3532_v2  ;;  %20002 = vst [vmem:[#allocation415_spill] sm:$0xff] %v15032_v51  ;;  %v3522_v2 = vld [vmem:[%s19405_s0 + $0x158] sm:$0xff]  ;;  %v3521_v16 = vld [vmem:[%s19405_s0 + $0x150] sm:$0xff] }
 0x168   :  { %12117 = vmatmul.mubr.msk.f32.gmra.mxu1 %vm932_vm0, %v14512_v17  ;;  %12121 = vmatprep.subr.mxu0 %v3523_v1 }
 0x169   :  { %11201 = vmatmul.mubr.msk.f32.gmra.mxu0 %vm932_vm0, %v14465_v48  ;;  %3689 = vmatpush1.msra.mxu1 %v3517_v19 }
 0x16a   :  { %3722 = vmatprep.mubr.f32.mxu1 %v19999_v33  ;;  %3823 = vmatprep.mubr.f32.mxu0 %v19999_v33 }
 0x16b   :  { %12122 = vmatpush3.msra.mxu0 %v3523_v1  ;;  %3864 = vmatprep.subr.mxu1 %v3531_v0  ;;  %v4181_v1 = vld [vmem:[%s19405_s0 + $0x3f8] sm:$0xff]  ;;  %v4182_v0 = vld [vmem:[%s19405_s0 + $0x400] sm:$0xff] }
 0x16c   :  { %11196 = vmatmul.mubr.msk.f32.vlgmr.msra.gmra.mxu1 %vm932_vm0, %v14460_v32  ;;  %4342 = vmatprep.subr.mxu0 %v4183_v35  ;;  %v4174_v35 = vld [vmem:[%s19405_s0 + $0x180] sm:$0xff] }
 0x16d   :  { %11202 = vmatmul.mubr.msk.f32.gmra.mxu0 %vm932_vm0, %v14492_v34  ;;  %3728 = vmatprep.mubr.f32.mxu1 %v19999_v33 }
 0x16e   :  { %3829 = vmatprep.mubr.f32.mxu0 %v19999_v33  ;;  %3865 = vmatpush1.msra.mxu1 %v3530_v18  ;;  %v15060_v19 = vpop.permute.xlu1 %2227  ;;  %v4173_v18 = vld [vmem:[%s19405_s0 + $0x178] sm:$0xff] }
 0x16f   :  { %3866 = vmatprep.subr.mxu1 %v3522_v2  ;;  %3544 = vperm.xlu0 %12297, %v3534_v49   ;;  %20003 = vst [vmem:[#allocation416_spill] sm:$0xff] %v15060_v19  ;;  %v4187_v49 = vld [vmem:[%s19405_s0 + $0x428] sm:$0xff] }
 0x170   :  { %11197 = vmatmul.mubr.msk.f32.gmra.mxu1 %vm932_vm0, %v14465_v48 }
 0x171   :  { %11203 = vmatmul.mubr.msk.f32.gmra.mxu0 %vm932_vm0, %v14512_v17  ;;  %3734 = vmatprep.mubr.f32.mxu1 %v19999_v33 }
 0x172   :  { %12123 = vmatprep.mubr.msk.f32.mxu0 %vm932_vm0, %v14460_v32  ;;  %3867 = vmatpush1.msra.mxu1 %v3521_v16  ;;  %v15080_v2 = vpop.permute.xlu1 %1581  ;;  %v4180_v16 = vld [vmem:[%s19405_s0 + $0x3f0] sm:$0xff] }
 0x173   :  { %4253 = vmatprep.subr.mxu1 %v4181_v1  ;;  %20004 = vst [vmem:[#allocation417_spill] sm:$0xff] %v15080_v2  ;;  %v4186_v1 = vld [vmem:[%s19405_s0 + $0x420] sm:$0xff] }
 0x174   :  { %11198 = vmatmul.mubr.msk.f32.gmra.mxu1 %vm932_vm0, %v14492_v34 }
 0x175   :  { %12124 = vmatmul.mubr.msk.f32.vlgmr.msra.gmra.mxu0 %vm932_vm0, %v14465_v48  ;;  %3740 = vmatprep.mubr.f32.mxu1 %v19999_v33 }
 0x176   :  { %12126 = vmatprep.mubr.msk.f32.mxu0 %vm932_vm0, %v14492_v34  ;;  %4343 = vmatpush1.msra.mxu0 %v4182_v0  ;;  %v4172_v0 = vld [vmem:[%s19405_s0 + $0x170] sm:$0xff] }
 0x177   :  { %4344 = vmatprep.subr.mxu0 %v4174_v35  ;;  %v15105_v35 = vpop.permute.xlu1 %1571 }
 0x178   :  { %11199 = vmatmul.mubr.msk.f32.gmra.mxu1 %vm932_vm0, %v14512_v17  ;;  %4345 = vmatpush1.msra.mxu0 %v4173_v18  ;;  %20005 = vst [vmem:[#allocation418_spill] sm:$0xff] %v15105_v35  ;;  %v4178_v18 = vld [vmem:[%s19405_s0 + $0x1a0] sm:$0xff] }
 0x179   :  { %12127 = vmatmul.mubr.msk.f32.gmra.mxu0 %vm932_vm0, %v14512_v17  ;;  %3900 = vmatprep.mubr.f32.mxu1 %v19999_v33 }
 0x17a   :  { %4378 = vmatprep.mubr.f32.mxu0 %v19999_v33  ;;  %4520 = vmatprep.subr.mxu0 %v4187_v49  ;;  %v4171_v49 = vld [vmem:[%s19405_s0 + $0x168] sm:$0xff] }
 0x17c   :  { %11204 = vmatmul.mubr.msk.f32.vlgmr.msra.gmra.mxu1 %vm932_vm0, %v14460_v32 }
 0x17d   :  { %11217 = vmatmul.mubr.msk.f32.vlgmr.msra.gmra.mxu0 %vm932_vm0, %v14460_v32  ;;  %3906 = vmatprep.mubr.f32.mxu1 %v19999_v33 }
 0x17e   :  { %4384 = vmatprep.mubr.f32.mxu0 %v19999_v33  ;;  %4254 = vmatpush1.msra.mxu1 %v4180_v16  ;;  %v4837_v16 = vld [vmem:[%s19405_s0 + $0x440] sm:$0xff] }
 0x17f   :  { %4521 = vmatpush1.msra.mxu0 %v4186_v1  ;;  %4255 = vmatprep.subr.mxu1 %v4172_v0  ;;  %v15129_v1 = vpop.permute.xlu1 %929  ;;  %v7146_v0 = vld [vmem:[%s19411_s6 + $0x38] sm:$0xff] }
 0x180   :  { %11205 = vmatmul.mubr.msk.f32.gmra.mxu1 %vm932_vm0, %v14465_v48  ;;  %4522 = vmatprep.subr.mxu0 %v4178_v18  ;;  %v4184_v18 = vld [vmem:[%s19405_s0 + $0x410] sm:$0xff] }
 0x181   :  { %11218 = vmatmul.mubr.msk.f32.gmra.mxu0 %vm932_vm0, %v14465_v48  ;;  %3912 = vmatprep.mubr.f32.mxu1 %v19999_v33 }
 0x182   :  { %4390 = vmatprep.mubr.f32.mxu0 %v19999_v33  ;;  %4256 = vmatpush1.msra.mxu1 %v4171_v49  ;;  %v4836_v49 = vld [vmem:[%s19405_s0 + $0x438] sm:$0xff] }
 0x183   :  { %4523 = vmatpush1.msra.mxu0 %v4177_v36  ;;  %4431 = vmatprep.subr.mxu1 %v4185_v4  ;;  %v7144_v4 = vld [vmem:[%s19411_s6 + $0x28] sm:$0xff]  ;;  %v15145_v36 = vpop.permute.xlu1 %924 }
 0x184   :  { %11206 = vmatmul.mubr.msk.f32.gmra.mxu1 %vm932_vm0, %v14492_v34  ;;  %4909 = vmatprep.subr.mxu0 %v4837_v16  ;;  %v4176_v16 = vld [vmem:[%s19405_s0 + $0x190] sm:$0xff] }
 0x185   :  { %11219 = vmatmul.mubr.msk.f32.gmra.mxu0 %vm932_vm0, %v14492_v34  ;;  %3918 = vmatprep.mubr.f32.mxu1 %v19999_v33 }
 0x186   :  { %4396 = vmatprep.mubr.f32.mxu0 %v19999_v33  ;;  %7184 = vperm.xlu0 %12297, %v7146_v0   ;;  %v4828_v0 = vld [vmem:[%s19405_s0 + $0x1b8] sm:$0xff] }
 0x188   :  { %11207 = vmatmul.mubr.msk.f32.gmra.mxu1 %vm932_vm0, %v14512_v17 }
 0x189   :  { %11220 = vmatmul.mubr.msk.f32.gmra.mxu0 %vm932_vm0, %v14512_v17  ;;  %4289 = vmatprep.mubr.f32.mxu1 %v19999_v33 }
 0x18a   :  { %4556 = vmatprep.mubr.f32.mxu0 %v19999_v33  ;;  %7174 = vperm.xlu0 %12297, %v7144_v4   ;;  %v15169_v4 = vpop.permute.xlu1 %919 }
 0x18c   :  { %11213 = vmatmul.mubr.msk.f32.vlgmr.msra.gmra.mxu1 %vm932_vm0, %v14460_v32 }
 0x18d   :  { %11225 = vmatmul.mubr.msk.f32.vlgmr.msra.gmra.mxu0 %vm932_vm0, %v14460_v32  ;;  %4295 = vmatprep.mubr.f32.mxu1 %v19999_v33 }
 0x18e   :  { %4562 = vmatprep.mubr.f32.mxu0 %v19999_v33  ;;  %4432 = vmatpush1.msra.mxu1 %v4184_v18  ;;  %v4827_v18 = vld [vmem:[%s19405_s0 + $0x1b0] sm:$0xff]  ;;  %v15207_v21 = vpop.permute.xlu1 %914 }
 0x18f   :  { %4910 = vmatpush1.msra.mxu0 %v4836_v49  ;;  %4433 = vmatprep.subr.mxu1 %v4176_v16  ;;  %v4188_v49 = vld [vmem:[%s19405_s0 + $0x430] sm:$0xff]  ;;  %v4841_v16 = vld [vmem:[%s19405_s0 + $0x460] sm:$0xff] }
 0x190   :  { %v15174_v20 = vpop.f32.mrf.mxu0  ;;  %v15176_v32 = vpop.f32.mrf.mxu1  ;;  %11214 = vmatmul.mubr.msk.f32.gmra.mxu1 %vm932_vm0, %v14465_v48  ;;  %4911 = vmatprep.subr.mxu0 %v4828_v0 }
 0x191   :  { %11226 = vmatmul.mubr.msk.f32.gmra.mxu0 %vm932_vm0, %v14465_v48  ;;  %4301 = vmatprep.mubr.f32.mxu1 %v19999_v33 }
 0x192   :  { %v15192_v37 = vpop.f32.mrf.mxu0  ;;  %v15194_v0 = vpop.f32.mrf.mxu1  ;;  %4568 = vmatprep.mubr.f32.mxu0 %v19999_v33  ;;  %4434 = vmatpush1.msra.mxu1 %v4175_v52 }
 0x193   :  { %4912 = vmatpush1.msra.mxu0 %v4827_v18  ;;  %12129 = vmatprep.subr.mxu1 %v4188_v49 }
 0x194   :  { %v15200_v48 = vpop.f32.mrf.mxu1  ;;  %11215 = vmatmul.mubr.msk.f32.gmra.mxu1 %vm932_vm0, %v14492_v34  ;;  %5087 = vmatprep.subr.mxu0 %v4841_v16 }
 0x195   :  { %v1189_v38 = vpop.f32.mrf.mxu0  ;;  %11227 = vmatmul.mubr.msk.f32.gmra.mxu0 %vm932_vm0, %v14492_v34  ;;  %4307 = vmatprep.mubr.f32.mxu1 %v19999_v33 }
 0x196   :  { %v15213_v52 = vadd.f32 %v1189_v38, %v15207_v21  ;;  %v15215_v18 = vpop.f32.mrf.mxu1  ;;  %4574 = vmatprep.mubr.f32.mxu0 %v19999_v33  ;;  %7164 = vperm.xlu0 %12297, %v7142_v5   ;;  %v7143_v38 = vld [vmem:[%s19411_s6 + $0x20] sm:$0xff] }
 0x197   :  { %v1191_v16 = vpop.f32.mrf.mxu0  ;;  %7169 = vperm.xlu1 %12298, %v7143_v38  }
 0x198   :  { %v15222_v54 = vadd.f32 %v1191_v16, %v15207_v21  ;;  %v15224_v34 = vpop.f32.mrf.mxu1  ;;  %11216 = vmatmul.mubr.msk.f32.gmra.mxu1 %vm932_vm0, %v14512_v17  ;;  %v15243_v16 = vld [vmem:[%s19408_s3] sm:$0xff] }
 0x199   :  { %v1195_v22 = vpop.f32.mrf.mxu0  ;;  %11228 = vmatmul.mubr.msk.f32.gmra.mxu0 %vm932_vm0, %v14512_v17  ;;  %4467 = vmatprep.mubr.f32.mxu1 %v19999_v33 }
 0x19a   :  { %20006 = vst [vmem:[#allocation419_spill] sm:$0xff] %v15222_v54  ;;  %v15235_v5 = vadd.f32 %v1195_v22, %v15169_v4  ;;  %v15237_v53 = vpop.f32.mrf.mxu1  ;;  %4945 = vmatprep.mubr.f32.mxu0 %v19999_v33  ;;  %7154 = vperm.xlu0 %12297, %v7140_v6   ;;  %v15251_v22 = vld [vmem:[%s19408_s3] sm:$0xff]  ;;  %v4179_v6 = vld [vmem:[%s19405_s0 + $0x1a8] sm:$0xff] }
 0x19b   :  { %v1197_v39 = vpop.f32.mrf.mxu0 }
 0x19c   :  { %20007 = vst [vmem:[#allocation420_spill] sm:$0xff] %v15235_v5  ;;  %v15246_v7 = vadd.f32 %v1197_v39, %v15169_v4  ;;  %v1100_v17 = vpop.f32.mrf.mxu1  ;;  %11221 = vmatmul.mubr.msk.f32.vlgmr.msra.gmra.mxu1 %vm932_vm0, %v15251_v22 }
 0x19d   :  { %v15262_v39 = vadd.f32 %v1100_v17, %v15207_v21  ;;  %v1201_v38 = vpop.f32.mrf.mxu0  ;;  %11234 = vmatmul.mubr.msk.f32.vlgmr.msra.gmra.mxu0 %vm932_vm0, %v15243_v16  ;;  %4473 = vmatprep.mubr.f32.mxu1 %v19999_v33  ;;  %v15277_v17 = vld [vmem:[%s19408_s3 + $0x8] sm:$0xff] }
 0x19e   :  { %20008 = vst [vmem:[#allocation421_spill] sm:$0xff] %v15246_v7  ;;  %v15271_v40 = vadd.f32 %v1201_v38, %v15145_v36  ;;  %v1102_v8 = vpop.f32.mrf.mxu1  ;;  %4951 = vmatprep.mubr.f32.mxu0 %v19999_v33  ;;  %12130 = vmatpush3.msra.mxu1 %v4188_v49  ;;  %v4831_v49 = vld [vmem:[%s19405_s0 + $0x1d0] sm:$0xff] }
 0x19f   :  { %20009 = vst [vmem:[#allocation422_spill] sm:$0xff] %v15262_v39  ;;  %v15280_v56 = vadd.f32 %v1102_v8, %v15207_v21  ;;  %v1203_v24 = vpop.f32.mrf.mxu0  ;;  %5088 = vmatpush1.msra.mxu0 %v4840_v55  ;;  %12131 = vmatprep.subr.mxu1 %v4179_v6  ;;  %v4839_v8 = vld [vmem:[%s19405_s0 + $0x450] sm:$0xff] }
 0x1a0   :  { %20010 = vst [vmem:[#allocation423_spill] sm:$0xff] %v15271_v40  ;;  %v15283_v41 = vadd.f32 %v1203_v24, %v15145_v36  ;;  %v1106_v38 = vpop.f32.mrf.mxu1  ;;  %11222 = vmatmul.mubr.msk.f32.gmra.mxu1 %vm932_vm0, %v12300_v9  ;;  %5089 = vmatprep.subr.mxu0 %v4832_v23  ;;  %v4844_v23 = vld [vmem:[%s19405_s0 + $0x478] sm:$0xff] }
 0x1a1   :  { %20011 = vst [vmem:[#allocation424_spill] sm:$0xff] %v15280_v56  ;;  %v15296_v55 = vadd.f32 %v1106_v38, %v15169_v4  ;;  %v1207_v24 = vpop.f32.mrf.mxu0  ;;  %11235 = vmatmul.mubr.msk.f32.gmra.mxu0 %vm932_vm0, %v15277_v17  ;;  %4479 = vmatprep.mubr.f32.mxu1 %v19999_v33  ;;  %v15311_v38 = vld [vmem:[%s19408_s3 + $0x10] sm:$0xff] }
 0x1a2   :  { %20012 = vst [vmem:[#allocation425_spill] sm:$0xff] %v15283_v41  ;;  %v15305_v57 = vadd.f32 %v1207_v24, %v15129_v1  ;;  %v1108_v25 = vpop.f32.mrf.mxu1  ;;  %4957 = vmatprep.mubr.f32.mxu0 %v19999_v33  ;;  %12132 = vmatpush3.msra.mxu1 %v4179_v6  ;;  %v8703_v24 = vld [vmem:[%s19413_s8] sm:$0xff] }
 0x1a3   :  { %20013 = vst [vmem:[#allocation426_spill] sm:$0xff] %v15296_v55  ;;  %v15314_v42 = vadd.f32 %v1108_v25, %v15169_v4  ;;  %v1209_v10 = vpop.f32.mrf.mxu0  ;;  %5090 = vmatpush1.msra.mxu0 %v4831_v49  ;;  %4998 = vmatprep.subr.mxu1 %v4839_v8  ;;  %v7141_v25 = vld [vmem:[%s19411_s6 + $0x10] sm:$0xff] }
 0x1a4   :  { %20014 = vst [vmem:[#allocation427_spill] sm:$0xff] %v15305_v57  ;;  %v15320_v58 = vadd.f32 %v1209_v10, %v15129_v1  ;;  %v1112_v26 = vpop.f32.mrf.mxu1  ;;  %11223 = vmatmul.mubr.msk.f32.gmra.mxu1 %vm932_vm0, %v12301_v43  ;;  %12139 = vmatprep.subr.mxu0 %v4844_v23 }
 0x1a5   :  { %20015 = vst [vmem:[#allocation428_spill] sm:$0xff] %v15314_v42  ;;  %v15330_v6 = vadd.f32 %v1112_v26, %v15145_v36  ;;  %v12085_v49 = vpop.f32.mrf.mxu0  ;;  %11236 = vmatmul.mubr.msk.f32.gmra.mxu0 %vm932_vm0, %v15311_v38  ;;  %4485 = vmatprep.mubr.f32.mxu1 %v19999_v33 }
 0x1a6   :  { %20016 = vst [vmem:[#allocation429_spill] sm:$0xff] %v15320_v58  ;;  %v15336_v10 = vadd.f32 %v12085_v49, %v15169_v4  ;;  %v1114_v8 = vpop.f32.mrf.mxu1  ;;  %4963 = vmatprep.mubr.f32.mxu0 %v19999_v33  ;;  %8713 = vperm.xlu0 %12297, %v8703_v24   ;;  %v7139_v24 = vld [vmem:[%s19411_s6] sm:$0xff] }
 0x1a7   :  { %20017 = vst [vmem:[#allocation430_spill] sm:$0xff] %v15330_v6  ;;  %v15345_v26 = vadd.f32 %v1114_v8, %v15145_v36  ;;  %v1367_v59 = vpop.f32.mrf.mxu0  ;;  %7159 = vperm.xlu1 %12298, %v7141_v25   ;;  %v5487_v6 = vld [vmem:[%s19405_s0 + $0x218] sm:$0xff] }
 0x1a8   :  { %20018 = vst [vmem:[#allocation431_spill] sm:$0xff] %v15336_v10  ;;  %v15351_v49 = vadd.f32 %v1367_v59, %v15207_v21  ;;  %v1118_v44 = vpop.f32.mrf.mxu1  ;;  %11224 = vmatmul.mubr.msk.f32.gmra.mxu1 %vm932_vm0, %v12302_v12 }
 0x1a9   :  { %20019 = vst [vmem:[#allocation432_spill] sm:$0xff] %v15345_v26  ;;  %v15361_v8 = vadd.f32 %v1118_v44, %v15129_v1  ;;  %v12088_v60 = vpop.f32.mrf.mxu0  ;;  %11237 = vmatmul.mubr.msk.f32.gmra.mxu0 %vm932_vm0, %v15342_v11  ;;  %12133 = vmatprep.mubr.msk.f32.mxu1 %vm932_vm0, %v15251_v22  ;;  %v4838_v44 = vld [vmem:[%s19405_s0 + $0x448] sm:$0xff] }
 0x1aa   :  { %20020 = vst [vmem:[#allocation433_spill] sm:$0xff] %v15351_v49  ;;  %v15368_v59 = vadd.f32 %v12088_v60, %v15129_v1  ;;  %v1120_v25 = vpop.f32.mrf.mxu1  ;;  %5123 = vmatprep.mubr.f32.mxu0 %v19999_v33  ;;  %8723 = vperm.xlu0 %12297, %v8705_v27   ;;  %v4830_v60 = vld [vmem:[%s19405_s0 + $0x1c8] sm:$0xff]  ;;  %v5494_v49 = vld [vmem:[%s19405_s0 + $0x490] sm:$0xff] }
 0x1ab   :  { %20021 = vst [vmem:[#allocation434_spill] sm:$0xff] %v15361_v8  ;;  %v15372_v28 = vadd.f32 %v1120_v25, %v15129_v1  ;;  %v1377_v45 = vpop.f32.mrf.mxu0  ;;  %7149 = vperm.xlu1 %12298, %v7139_v24  }
 0x1ac   :  { %20022 = vst [vmem:[#allocation435_spill] sm:$0xff] %v15368_v59  ;;  %v15378_v13 = vadd.f32 %v1377_v45, %v15145_v36  ;;  %v1278_v22 = vpop.f32.mrf.mxu1  ;;  %12134 = vmatmul.mubr.msk.f32.vlgmr.msra.gmra.mxu1 %vm932_vm0, %v12300_v9  ;;  %v4835_v45 = vld [vmem:[%s19405_s0 + $0x1f0] sm:$0xff]  ;;  %v4829_v9 = vld [vmem:[%s19405_s0 + $0x1c0] sm:$0xff] }
 0x1ad   :  { %20023 = vst [vmem:[#allocation436_spill] sm:$0xff] %v15372_v28  ;;  %v15385_v27 = vadd.f32 %v1278_v22, %v15207_v21  ;;  %v15387_v25 = vpop.f32.mrf.mxu0  ;;  %11242 = vmatmul.mubr.msk.f32.vlgmr.msra.gmra.mxu0 %vm932_vm0, %v15243_v16  ;;  %12136 = vmatprep.mubr.msk.f32.mxu1 %vm932_vm0, %v12301_v43 }
 0x1ae   :  { %20024 = vst [vmem:[#allocation437_spill] sm:$0xff] %v15378_v13  ;;  %20026 = vst [vmem:[#allocation439_spill] sm:$0xff] %v15387_v25  ;;  %v1280_v24 = vpop.f32.mrf.mxu1  ;;  %5129 = vmatprep.mubr.f32.mxu0 %v19999_v33  ;;  %4999 = vmatpush1.msra.mxu1 %v4838_v44 }
 0x1af   :  { %20025 = vst [vmem:[#allocation438_spill] sm:$0xff] %v15385_v27  ;;  %v15400_v22 = vadd.f32 %v1280_v24, %v15207_v21  ;;  %v15402_v61 = vpop.f32.mrf.mxu0  ;;  %5000 = vmatprep.subr.mxu1 %v4830_v60  ;;  %12140 = vmatpush3.msra.mxu0 %v4844_v23  ;;  %v5495_v23 = vld [vmem:[%s19405_s0 + $0x498] sm:$0xff] }
 0x1b0   :  { %20028 = vst [vmem:[#allocation441_spill] sm:$0xff] %v15402_v61  ;;  %v1284_v43 = vpop.f32.mrf.mxu1  ;;  %12137 = vmatmul.mubr.msk.f32.gmra.mxu1 %vm932_vm0, %v12302_v12  ;;  %12141 = vmatprep.subr.mxu0 %v4835_v45 }
 0x1b1   :  { %20027 = vst [vmem:[#allocation440_spill] sm:$0xff] %v15400_v22  ;;  %v15409_v44 = vadd.f32 %v1284_v43, %v15169_v4  ;;  %v15411_v46 = vpop.f32.mrf.mxu0  ;;  %11243 = vmatmul.mubr.msk.f32.gmra.mxu0 %vm932_vm0, %v15277_v17  ;;  %5001 = vmatpush1.msra.mxu1 %v4829_v9  ;;  %v4842_v9 = vld [vmem:[%s19405_s0 + $0x468] sm:$0xff] }
 0x1b2   :  { %20030 = vst [vmem:[#allocation443_spill] sm:$0xff] %v15411_v46  ;;  %v1286_v60 = vpop.f32.mrf.mxu1  ;;  %5034 = vmatprep.mubr.f32.mxu1 %v19999_v33  ;;  %5135 = vmatprep.mubr.f32.mxu0 %v19999_v33  ;;  %v6151_v46 = vld [vmem:[%s19405_s0 + $0x4e0] sm:$0xff] }
 0x1b3   :  { %20029 = vst [vmem:[#allocation442_spill] sm:$0xff] %v15409_v44  ;;  %v15421_v12 = vadd.f32 %v1286_v60, %v15169_v4  ;;  %v15423_v24 = vpop.f32.mrf.mxu0  ;;  %12142 = vmatpush3.msra.mxu0 %v4835_v45  ;;  %5176 = vmatprep.subr.mxu1 %v4843_v29  ;;  %v8707_v60 = vld [vmem:[%s19413_s8 + $0x20] sm:$0xff] }
 0x1b4   :  { %20032 = vst [vmem:[#allocation445_spill] sm:$0xff] %v15423_v24  ;;  %v1290_v43 = vpop.f32.mrf.mxu1  ;;  %11238 = vmatmul.mubr.msk.f32.vlgmr.msra.gmra.mxu1 %vm932_vm0, %v15243_v16  ;;  %5654 = vmatprep.subr.mxu0 %v5495_v23  ;;  %v8704_v23 = vld [vmem:[%s19413_s8 + $0x8] sm:$0xff] }
 0x1b5   :  { %20031 = vst [vmem:[#allocation444_spill] sm:$0xff] %v15421_v12  ;;  %v15437_v45 = vadd.f32 %v1290_v43, %v15145_v36  ;;  %v15439_v29 = vpop.f32.mrf.mxu0  ;;  %11244 = vmatmul.mubr.msk.f32.gmra.mxu0 %vm932_vm0, %v15311_v38  ;;  %5040 = vmatprep.mubr.f32.mxu1 %v19999_v33  ;;  %v5489_v12 = vld [vmem:[%s19405_s0 + $0x228] sm:$0xff] }
 0x1b6   :  { %20034 = vst [vmem:[#allocation447_spill] sm:$0xff] %v15439_v29  ;;  %v1292_v62 = vpop.f32.mrf.mxu1  ;;  %5141 = vmatprep.mubr.f32.mxu0 %v19999_v33  ;;  %5177 = vmatpush1.msra.mxu1 %v4842_v9 }
 0x1b7   :  { %20033 = vst [vmem:[#allocation446_spill] sm:$0xff] %v15437_v45  ;;  %v15449_v30 = vadd.f32 %v1292_v62, %v15145_v36  ;;  %v15451_v43 = vpop.f32.mrf.mxu0  ;;  %5178 = vmatprep.subr.mxu1 %v4834_v14  ;;  %8733 = vperm.xlu0 %12297, %v8707_v60   ;;  %v8709_v62 = vld [vmem:[%s19413_s8 + $0x30] sm:$0xff]  ;;  %v8706_v60 = vld [vmem:[%s19413_s8 + $0x18] sm:$0xff] }
 0x1b8   :  { %20036 = vst [vmem:[#allocation449_spill] sm:$0xff] %v15451_v43  ;;  %v1296_v15 = vpop.f32.mrf.mxu1  ;;  %11239 = vmatmul.mubr.msk.f32.gmra.mxu1 %vm932_vm0, %v15277_v17  ;;  %8718 = vperm.xlu1 %12298, %v8704_v23  }
 0x1b9   :  { %20035 = vst [vmem:[#allocation448_spill] sm:$0xff] %v15449_v30  ;;  %v15465_v14 = vadd.f32 %v1296_v15, %v15129_v1  ;;  %v15467_v9 = vpop.f32.mrf.mxu0  ;;  %11245 = vmatmul.mubr.msk.f32.gmra.mxu0 %vm932_vm0, %v15342_v11  ;;  %5046 = vmatprep.mubr.f32.mxu1 %v19999_v33 }
 0x1ba   :  { %20038 = vst [vmem:[#allocation451_spill] sm:$0xff] %v15467_v9  ;;  %v1298_v31 = vpop.f32.mrf.mxu1  ;;  %12143 = vmatprep.mubr.msk.f32.mxu0 %vm932_vm0, %v15243_v16  ;;  %5179 = vmatpush1.msra.mxu1 %v4833_v47  ;;  %v5486_v47 = vld [vmem:[%s19405_s0 + $0x210] sm:$0xff] }
 0x1bb   :  { %20037 = vst [vmem:[#allocation450_spill] sm:$0xff] %v15465_v14  ;;  %v15478_v23 = vadd.f32 %v1298_v31, %v15129_v1  ;;  %v15480_v15 = vpop.f32.mrf.mxu0  ;;  %5565 = vmatprep.subr.mxu1 %v5493_v63  ;;  %8743 = vperm.xlu0 %12297, %v8709_v62   ;;  %v5485_v63 = vld [vmem:[%s19405_s0 + $0x208] sm:$0xff] }
 0x1bc   :  { %20040 = vst [vmem:[#allocation453_spill] sm:$0xff] %v15480_v15  ;;  %v15485_v10 = vpop.f32.mrf.mxu1  ;;  %11240 = vmatmul.mubr.msk.f32.gmra.mxu1 %vm932_vm0, %v15311_v38  ;;  %8728 = vperm.xlu1 %12298, %v8706_v60   ;;  %v5499_v60 = vld [vmem:[%s19405_s0 + $0x4b8] sm:$0xff]  ;;  %v6141_v15 = vld [vmem:[%s19405_s0 + $0x250] sm:$0xff] }
 0x1bd   :  { %20039 = vst [vmem:[#allocation452_spill] sm:$0xff] %v15478_v23  ;;  %v15492_v31 = vpop.f32.mrf.mxu0  ;;  %12144 = vmatmul.mubr.msk.f32.vlgmr.msra.gmra.mxu0 %vm932_vm0, %v15277_v17  ;;  %5052 = vmatprep.mubr.f32.mxu1 %v19999_v33  ;;  %v8708_v23 = vld [vmem:[%s19413_s8 + $0x28] sm:$0xff] }
 0x1be   :  { %20041 = vst [vmem:[#allocation454_spill] sm:$0xff] %v15492_v31  ;;  %v15500_v62 = vpop.f32.mrf.mxu1  ;;  %12146 = vmatprep.mubr.msk.f32.mxu0 %vm932_vm0, %v15311_v38  ;;  %5655 = vmatpush1.msra.mxu0 %v5494_v49 }
 0x1bf   :  { %v15504_v13 = vpop.f32.mrf.mxu0  ;;  %5656 = vmatprep.subr.mxu0 %v5486_v47 }
 0x1c0   :  { %20042 = vst [vmem:[#allocation455_spill] sm:$0xff] %v15504_v13  ;;  %v15509_v59 = vpop.f32.mrf.mxu1  ;;  %11241 = vmatmul.mubr.msk.f32.gmra.mxu1 %vm932_vm0, %v15342_v11  ;;  %5657 = vmatpush1.msra.mxu0 %v5485_v63  ;;  %v5492_v63 = vld [vmem:[%s19405_s0 + $0x480] sm:$0xff] }
 0x1c1   :  { %v15516_v14 = vpop.f32.mrf.mxu0  ;;  %12147 = vmatmul.mubr.msk.f32.gmra.mxu0 %vm932_vm0, %v15342_v11  ;;  %5212 = vmatprep.mubr.f32.mxu1 %v19999_v33 }
 0x1c2   :  { %20043 = vst [vmem:[#allocation456_spill] sm:$0xff] %v15516_v14  ;;  %v15521_v49 = vpop.f32.mrf.mxu1  ;;  %5690 = vmatprep.mubr.f32.mxu0 %v19999_v33  ;;  %5832 = vmatprep.subr.mxu0 %v5499_v60  ;;  %v5498_v14 = vld [vmem:[%s19405_s0 + $0x4b0] sm:$0xff]  ;;  %v5484_v60 = vld [vmem:[%s19405_s0 + $0x200] sm:$0xff] }
 0x1c3   :  { %v15524_v47 = vpop.f32.mrf.mxu0  ;;  %8738 = vperm.xlu1 %12298, %v8708_v23   ;;  %v5490_v23 = vld [vmem:[%s19405_s0 + $0x230] sm:$0xff] }
 0x1c4   :  { %20044 = vst [vmem:[#allocation457_spill] sm:$0xff] %v15524_v47  ;;  %v15529_v13 = vpop.f32.mrf.mxu1  ;;  %11246 = vmatmul.mubr.msk.f32.vlgmr.msra.gmra.mxu1 %vm932_vm0, %v15243_v16 }
 0x1c5   :  { %v15539_v31 = vpop.f32.mrf.mxu0  ;;  %11259 = vmatmul.mubr.msk.f32.vlgmr.msra.gmra.mxu0 %vm932_vm0, %v15243_v16  ;;  %5218 = vmatprep.mubr.f32.mxu1 %v19999_v33 }
 0x1c6   :  { %20045 = vst [vmem:[#allocation458_spill] sm:$0xff] %v15539_v31  ;;  %v15547_v47 = vpop.f32.mrf.mxu1  ;;  %5696 = vmatprep.mubr.f32.mxu0 %v19999_v33  ;;  %5566 = vmatpush1.msra.mxu1 %v5492_v63  ;;  %v5483_v31 = vld [vmem:[%s19405_s0 + $0x1f8] sm:$0xff]  ;;  %v5497_v63 = vld [vmem:[%s19405_s0 + $0x4a8] sm:$0xff] }
 0x1c7   :  { %v15550_v30 = vpop.f32.mrf.mxu0  ;;  %5833 = vmatpush1.msra.mxu0 %v5498_v14  ;;  %5567 = vmatprep.subr.mxu1 %v5484_v60  ;;  %v6149_v60 = vld [vmem:[%s19405_s0 + $0x4d0] sm:$0xff] }
 0x1c8   :  { %20046 = vst [vmem:[#allocation459_spill] sm:$0xff] %v15550_v30  ;;  %v15555_v45 = vpop.f32.mrf.mxu1  ;;  %11247 = vmatmul.mubr.msk.f32.gmra.mxu1 %vm932_vm0, %v15277_v17  ;;  %5834 = vmatprep.subr.mxu0 %v5490_v23 }
 0x1c9   :  { %v15565_v14 = vpop.f32.mrf.mxu0  ;;  %11260 = vmatmul.mubr.msk.f32.gmra.mxu0 %vm932_vm0, %v15277_v17  ;;  %5224 = vmatprep.mubr.f32.mxu1 %v19999_v33 }
 0x1ca   :  { %20047 = vst [vmem:[#allocation460_spill] sm:$0xff] %v15565_v14  ;;  %v15573_v23 = vpop.f32.mrf.mxu1  ;;  %5702 = vmatprep.mubr.f32.mxu0 %v19999_v33  ;;  %5568 = vmatpush1.msra.mxu1 %v5483_v31  ;;  %v8710_v14 = vld [vmem:[%s19413_s8 + $0x38] sm:$0xff] }
 0x1cb   :  { %v15576_v30 = vpop.f32.mrf.mxu0  ;;  %5835 = vmatpush1.msra.mxu0 %v5489_v12  ;;  %5743 = vmatprep.subr.mxu1 %v5497_v63 }
 0x1cc   :  { %20048 = vst [vmem:[#allocation461_spill] sm:$0xff] %v15576_v30  ;;  %v15581_v44 = vpop.f32.mrf.mxu1  ;;  %11248 = vmatmul.mubr.msk.f32.gmra.mxu1 %vm932_vm0, %v15311_v38  ;;  %6221 = vmatprep.subr.mxu0 %v6149_v60  ;;  %v6148_v30 = vld [vmem:[%s19405_s0 + $0x4c8] sm:$0xff] }
 0x1cd   :  { %20049 = vst [vmem:[#allocation462_spill] sm:$0xff] %v15581_v44  ;;  %v15585_v22 = vpop.f32.mrf.mxu0  ;;  %11261 = vmatmul.mubr.msk.f32.gmra.mxu0 %vm932_vm0, %v15311_v38  ;;  %5230 = vmatprep.mubr.f32.mxu1 %v19999_v33 }
 0x1ce   :  { %v15590_v31 = vpop.f32.mrf.mxu1  ;;  %5708 = vmatprep.mubr.f32.mxu0 %v19999_v33  ;;  %8748 = vperm.xlu1 %12298, %v8710_v14   ;;  %v5496_v14 = vld [vmem:[%s19405_s0 + $0x4a0] sm:$0xff] }
 0x1cf   :  { %20050 = vst [vmem:[#allocation463_spill] sm:$0xff] %v15590_v31  ;;  %v15593_v12 = vpop.f32.mrf.mxu0 }
 0x1d0   :  { %v15595_v63 = vpop.f32.mrf.mxu1  ;;  %11249 = vmatmul.mubr.msk.f32.gmra.mxu1 %vm932_vm0, %v15342_v11 }
 0x1d1   :  { %20051 = vst [vmem:[#allocation464_spill] sm:$0xff] %v15595_v63  ;;  %v15599_v60 = vpop.f32.mrf.mxu0  ;;  %11262 = vmatmul.mubr.msk.f32.gmra.mxu0 %vm932_vm0, %v15342_v11  ;;  %5601 = vmatprep.mubr.f32.mxu1 %v19999_v33 }
 0x1d2   :  { %v15604_v44 = vpop.f32.mrf.mxu1  ;;  %5868 = vmatprep.mubr.f32.mxu0 %v19999_v33 }
 0x1d3   :  { %20052 = vst [vmem:[#allocation465_spill] sm:$0xff] %v15604_v44  ;;  %v15607_v31 = vpop.f32.mrf.mxu0  ;;  %v5488_v44 = vld [vmem:[%s19405_s0 + $0x220] sm:$0xff] }
 0x1d4   :  { %v15612_v63 = vpop.f32.mrf.mxu1  ;;  %11255 = vmatmul.mubr.msk.f32.vlgmr.msra.gmra.mxu1 %vm932_vm0, %v15243_v16 }
 0x1d5   :  { %20053 = vst [vmem:[#allocation466_spill] sm:$0xff] %v15612_v63  ;;  %v15622_v27 = vpop.f32.mrf.mxu0  ;;  %11267 = vmatmul.mubr.msk.f32.vlgmr.msra.gmra.mxu0 %vm932_vm0, %v15243_v16  ;;  %5607 = vmatprep.mubr.f32.mxu1 %v19999_v33  ;;  %v6140_v63 = vld [vmem:[%s19405_s0 + $0x248] sm:$0xff] }
 0x1d6   :  { %v15630_v26 = vpop.f32.mrf.mxu1  ;;  %5874 = vmatprep.mubr.f32.mxu0 %v19999_v33  ;;  %5744 = vmatpush1.msra.mxu1 %v5496_v14  ;;  %v5500_v14 = vld [vmem:[%s19405_s0 + $0x4c0] sm:$0xff] }
 0x1d7   :  { %20054 = vst [vmem:[#allocation467_spill] sm:$0xff] %v15630_v26  ;;  %v15633_v8 = vpop.f32.mrf.mxu0  ;;  %6222 = vmatpush1.msra.mxu0 %v6148_v30  ;;  %5745 = vmatprep.subr.mxu1 %v5488_v44  ;;  %v6139_v26 = vld [vmem:[%s19405_s0 + $0x240] sm:$0xff]  ;;  %v6153_v44 = vld [vmem:[%s19405_s0 + $0x4f0] sm:$0xff] }
 0x1d8   :  { %v15638_v58 = vpop.f32.mrf.mxu1  ;;  %11256 = vmatmul.mubr.msk.f32.gmra.mxu1 %vm932_vm0, %v15277_v17  ;;  %6223 = vmatprep.subr.mxu0 %v6140_v63 }
 0x1d9   :  { %20055 = vst [vmem:[#allocation468_spill] sm:$0xff] %v15638_v58  ;;  %v15648_v30 = vpop.f32.mrf.mxu0  ;;  %11268 = vmatmul.mubr.msk.f32.gmra.mxu0 %vm932_vm0, %v15277_v17  ;;  %5613 = vmatprep.mubr.f32.mxu1 %v19999_v33 }
 0x1da   :  { %v15656_v63 = vpop.f32.mrf.mxu1  ;;  %5880 = vmatprep.mubr.f32.mxu0 %v19999_v33  ;;  %5746 = vmatpush1.msra.mxu1 %v5487_v6 }
 0x1db   :  { %20056 = vst [vmem:[#allocation469_spill] sm:$0xff] %v15656_v63  ;;  %v15659_v58 = vpop.f32.mrf.mxu0  ;;  %6224 = vmatpush1.msra.mxu0 %v6139_v26  ;;  %12149 = vmatprep.subr.mxu1 %v5500_v14 }
 0x1dc   :  { %v15661_v28 = vpop.f32.mrf.mxu1  ;;  %11257 = vmatmul.mubr.msk.f32.gmra.mxu1 %vm932_vm0, %v15311_v38  ;;  %6399 = vmatprep.subr.mxu0 %v6153_v44 }
 0x1dd   :  { %20057 = vst [vmem:[#allocation470_spill] sm:$0xff] %v15661_v28  ;;  %v15665_v42 = vpop.f32.mrf.mxu0  ;;  %11269 = vmatmul.mubr.msk.f32.gmra.mxu0 %vm932_vm0, %v15311_v38  ;;  %5619 = vmatprep.mubr.f32.mxu1 %v19999_v33 }
 0x1de   :  { %20058 = vst [vmem:[#allocation471_spill] sm:$0xff] %v15665_v42  ;;  %v15670_v63 = vpop.f32.mrf.mxu1  ;;  %5886 = vmatprep.mubr.f32.mxu0 %v19999_v33 }
 0x1df   :  { %20059 = vst [vmem:[#allocation472_spill] sm:$0xff] %v15670_v63  ;;  %v15673_v6 = vpop.f32.mrf.mxu0 }
 0x1e0   :  { %20060 = vst [vmem:[#allocation473_spill] sm:$0xff] %v15673_v6  ;;  %v15675_v26 = vpop.f32.mrf.mxu1  ;;  %11258 = vmatmul.mubr.msk.f32.gmra.mxu1 %vm932_vm0, %v15342_v11  ;;  %v5491_v6 = vld [vmem:[%s19405_s0 + $0x238] sm:$0xff] }
 0x1e1   :  { %20061 = vst [vmem:[#allocation474_spill] sm:$0xff] %v15675_v26  ;;  %v15679_v28 = vpop.f32.mrf.mxu0  ;;  %11270 = vmatmul.mubr.msk.f32.gmra.mxu0 %vm932_vm0, %v15342_v11  ;;  %5779 = vmatprep.mubr.f32.mxu1 %v19999_v33  ;;  %v6152_v26 = vld [vmem:[%s19405_s0 + $0x4e8] sm:$0xff] }
 0x1e2   :  { %20062 = vst [vmem:[#allocation475_spill] sm:$0xff] %v15679_v28  ;;  %v15684_v44 = vpop.f32.mrf.mxu1  ;;  %6257 = vmatprep.mubr.f32.mxu0 %v19999_v33 }
 0x1e3   :  { %20063 = vst [vmem:[#allocation476_spill] sm:$0xff] %v15684_v44  ;;  %v15687_v63 = vpop.f32.mrf.mxu0  ;;  %v6144_v44 = vld [vmem:[%s19405_s0 + $0x268] sm:$0xff] }
 0x1e4   :  { %20064 = vst [vmem:[#allocation477_spill] sm:$0xff] %v15687_v63  ;;  %v15689_v42 = vpop.f32.mrf.mxu1  ;;  %11263 = vmatmul.mubr.msk.f32.vlgmr.msra.gmra.mxu1 %vm932_vm0, %v15243_v16 }
 0x1e5   :  { %20065 = vst [vmem:[#allocation478_spill] sm:$0xff] %v15689_v42  ;;  %v15699_v28 = vpop.f32.mrf.mxu0  ;;  %11276 = vmatmul.mubr.msk.f32.vlgmr.msra.gmra.mxu0 %vm932_vm0, %v15243_v16  ;;  %5785 = vmatprep.mubr.f32.mxu1 %v19999_v33 }
 0x1e6   :  { %20066 = vst [vmem:[#allocation479_spill] sm:$0xff] %v15699_v28  ;;  %v15707_v63 = vpop.f32.mrf.mxu1  ;;  %6263 = vmatprep.mubr.f32.mxu0 %v19999_v33  ;;  %12150 = vmatpush3.msra.mxu1 %v5500_v14  ;;  %v6143_v28 = vld [vmem:[%s19405_s0 + $0x260] sm:$0xff]  ;;  %v6156_v14 = vld [vmem:[%s19405_s0 + $0x508] sm:$0xff] }
 0x1e7   :  { %20067 = vst [vmem:[#allocation480_spill] sm:$0xff] %v15707_v63  ;;  %v15710_v25 = vpop.f32.mrf.mxu0  ;;  %6400 = vmatpush1.msra.mxu0 %v6152_v26  ;;  %12151 = vmatprep.subr.mxu1 %v5491_v6 }
 0x1e8   :  { %20068 = vst [vmem:[#allocation481_spill] sm:$0xff] %v15710_v25  ;;  %v15712_v57 = vpop.f32.mrf.mxu1  ;;  %11264 = vmatmul.mubr.msk.f32.gmra.mxu1 %vm932_vm0, %v15277_v17  ;;  %6401 = vmatprep.subr.mxu0 %v6144_v44 }
 0x1e9   :  { %20069 = vst [vmem:[#allocation482_spill] sm:$0xff] %v15712_v57  ;;  %v15722_v29 = vpop.f32.mrf.mxu0  ;;  %11277 = vmatmul.mubr.msk.f32.gmra.mxu0 %vm932_vm0, %v15277_v17  ;;  %5791 = vmatprep.mubr.f32.mxu1 %v19999_v33 }
 0x1ea   :  { %20070 = vst [vmem:[#allocation483_spill] sm:$0xff] %v15722_v29  ;;  %v15730_v26 = vpop.f32.mrf.mxu1  ;;  %6269 = vmatprep.mubr.f32.mxu0 %v19999_v33  ;;  %12152 = vmatpush3.msra.mxu1 %v5491_v6 }
 0x1eb   :  { %20071 = vst [vmem:[#allocation484_spill] sm:$0xff] %v15730_v26  ;;  %v15733_v44 = vpop.f32.mrf.mxu0  ;;  %6402 = vmatpush1.msra.mxu0 %v6143_v28  ;;  %6310 = vmatprep.subr.mxu1 %v6151_v46 }
 0x1ec   :  { %20072 = vst [vmem:[#allocation485_spill] sm:$0xff] %v15733_v44  ;;  %v15735_v25 = vpop.f32.mrf.mxu1  ;;  %11265 = vmatmul.mubr.msk.f32.gmra.mxu1 %vm932_vm0, %v15311_v38  ;;  %12159 = vmatprep.subr.mxu0 %v6156_v14 }
 0x1ed   :  { %20073 = vst [vmem:[#allocation486_spill] sm:$0xff] %v15735_v25  ;;  %v15739_v29 = vpop.f32.mrf.mxu0  ;;  %11278 = vmatmul.mubr.msk.f32.gmra.mxu0 %vm932_vm0, %v15311_v38  ;;  %5797 = vmatprep.mubr.f32.mxu1 %v19999_v33 }
 0x1ee   :  { %20074 = vst [vmem:[#allocation487_spill] sm:$0xff] %v15739_v29  ;;  %v15744_v43 = vpop.f32.mrf.mxu1  ;;  %6275 = vmatprep.mubr.f32.mxu0 %v19999_v33 }
 0x1ef   :  { %20075 = vst [vmem:[#allocation488_spill] sm:$0xff] %v15744_v43  ;;  %v15747_v6 = vpop.f32.mrf.mxu0 }
 0x1f0   :  { %20076 = vst [vmem:[#allocation489_spill] sm:$0xff] %v15747_v6  ;;  %v15749_v28 = vpop.f32.mrf.mxu1  ;;  %11266 = vmatmul.mubr.msk.f32.gmra.mxu1 %vm932_vm0, %v15342_v11  ;;  %v6150_v6 = vld [vmem:[%s19405_s0 + $0x4d8] sm:$0xff] }
 0x1f1   :  { %20077 = vst [vmem:[#allocation490_spill] sm:$0xff] %v15749_v28  ;;  %v15753_v46 = vpop.f32.mrf.mxu0  ;;  %11279 = vmatmul.mubr.msk.f32.gmra.mxu0 %vm932_vm0, %v15342_v11  ;;  %12153 = vmatprep.mubr.msk.f32.mxu1 %vm932_vm0, %v15243_v16 }
 0x1f2   :  { %20078 = vst [vmem:[#allocation491_spill] sm:$0xff] %v15753_v46  ;;  %v15759_v29 = vpop.f32.mrf.mxu1  ;;  %6435 = vmatprep.mubr.f32.mxu0 %v19999_v33  ;;  %v6142_v46 = vld [vmem:[%s19405_s0 + $0x258] sm:$0xff] }
 0x1f3   :  { %20079 = vst [vmem:[#allocation492_spill] sm:$0xff] %v15759_v29  ;;  %v15762_v44 = vpop.f32.mrf.mxu0 }
 0x1f4   :  { %20080 = vst [vmem:[#allocation493_spill] sm:$0xff] %v15762_v44  ;;  %v15767_v24 = vpop.f32.mrf.mxu1  ;;  %12154 = vmatmul.mubr.msk.f32.vlgmr.msra.gmra.mxu1 %vm932_vm0, %v15277_v17  ;;  %v6147_v44 = vld [vmem:[%s19405_s0 + $0x280] sm:$0xff] }
 0x1f5   :  { %20081 = vst [vmem:[#allocation494_spill] sm:$0xff] %v15767_v24  ;;  %v15774_v61 = vpop.f32.mrf.mxu0  ;;  %11284 = vmatmul.mubr.msk.f32.vlgmr.msra.gmra.mxu0 %vm932_vm0, %v15243_v16  ;;  %12156 = vmatprep.mubr.msk.f32.mxu1 %vm932_vm0, %v15311_v38 }
 0x1f6   :  { %20082 = vst [vmem:[#allocation495_spill] sm:$0xff] %v15774_v61  ;;  %v15783_v24 = vpop.f32.mrf.mxu1  ;;  %6441 = vmatprep.mubr.f32.mxu0 %v19999_v33  ;;  %6311 = vmatpush1.msra.mxu1 %v6150_v6 }
 0x1f7   :  { %20083 = vst [vmem:[#allocation496_spill] sm:$0xff] %v15783_v24  ;;  %v15789_v9 = vpop.f32.mrf.mxu0  ;;  %6312 = vmatprep.subr.mxu1 %v6142_v46  ;;  %12160 = vmatpush3.msra.mxu0 %v6156_v14  ;;  %v6155_v24 = vld [vmem:[%s19405_s0 + $0x500] sm:$0xff]  ;;  %v15806_v14 = vpop.permute.xlu1 %5517 }
 0x1f8   :  { %20084 = vst [vmem:[#allocation497_spill] sm:$0xff] %v15789_v9  ;;  %v15791_v42 = vpop.f32.mrf.mxu1  ;;  %12157 = vmatmul.mubr.msk.f32.gmra.mxu1 %vm932_vm0, %v15342_v11  ;;  %12161 = vmatprep.subr.mxu0 %v6147_v44  ;;  %20088 = vst [vmem:[#allocation501_spill] sm:$0xff] %v15806_v14 }
 0x1f9   :  { %20085 = vst [vmem:[#allocation498_spill] sm:$0xff] %v15791_v42  ;;  %v15798_v63 = vpop.f32.mrf.mxu0  ;;  %11285 = vmatmul.mubr.msk.f32.gmra.mxu0 %vm932_vm0, %v15277_v17  ;;  %6313 = vmatpush1.msra.mxu1 %v6141_v15  ;;  %v6154_v42 = vld [vmem:[%s19405_s0 + $0x4f8] sm:$0xff] }
 0x1fa   :  { %20086 = vst [vmem:[#allocation499_spill] sm:$0xff] %v15798_v63  ;;  %v15802_v6 = vpop.f32.mrf.mxu1  ;;  %6346 = vmatprep.mubr.f32.mxu1 %v19999_v33  ;;  %6447 = vmatprep.mubr.f32.mxu0 %v19999_v33  ;;  %v6146_v15 = vld [vmem:[%s19405_s0 + $0x278] sm:$0xff]  ;;  %v1426_v63 = vlaneseq }
 0x1fb   :  { %20087 = vst [vmem:[#allocation500_spill] sm:$0xff] %v15802_v6  ;;  %v15808_v46 = vpop.f32.mrf.mxu0  ;;  %12162 = vmatpush3.msra.mxu0 %v6147_v44  ;;  %6488 = vmatprep.subr.mxu1 %v6155_v24  ;;  %v15837_v29 = vpop.permute.xlu1 %5507 }
 0x1fc   :  { %20089 = vst [vmem:[#allocation502_spill] sm:$0xff] %v15808_v46  ;;  %v15813_v57 = vpop.f32.mrf.mxu1  ;;  %11280 = vmatmul.mubr.msk.f32.vlgmr.msra.gmra.mxu1 %vm932_vm0, %v15243_v16  ;;  %20095 = vst [vmem:[#allocation508_spill] sm:$0xff] %v15837_v29 }
 0x1fd   :  { %20090 = vst [vmem:[#allocation503_spill] sm:$0xff] %v15813_v57  ;;  %v15820_v6 = vpop.f32.mrf.mxu0  ;;  %11286 = vmatmul.mubr.msk.f32.gmra.mxu0 %vm932_vm0, %v15311_v38  ;;  %6352 = vmatprep.mubr.f32.mxu1 %v19999_v33  ;;  %v6145_v57 = vld [vmem:[%s19405_s0 + $0x270] sm:$0xff] }
 0x1fe   :  { %20091 = vst [vmem:[#allocation504_spill] sm:$0xff] %v15820_v6  ;;  %v15825_v24 = vpop.f32.mrf.mxu1  ;;  %6453 = vmatprep.mubr.f32.mxu0 %v19999_v33  ;;  %6489 = vmatpush1.msra.mxu1 %v6154_v42 }
 0x1ff   :  { %20092 = vst [vmem:[#allocation505_spill] sm:$0xff] %v15825_v24  ;;  %v15828_v44 = vpop.f32.mrf.mxu0  ;;  %6490 = vmatprep.subr.mxu1 %v6146_v15  ;;  %v15850_v24 = vpop.permute.xlu0 %2898 }
 0x200   :  { %20093 = vst [vmem:[#allocation506_spill] sm:$0xff] %v15828_v44  ;;  %v15833_v26 = vpop.f32.mrf.mxu1  ;;  %11281 = vmatmul.mubr.msk.f32.gmra.mxu1 %vm932_vm0, %v15277_v17  ;;  %20099 = vst [vmem:[#allocation512_spill] sm:$0xff] %v15850_v24 }
 0x201   :  { %20094 = vst [vmem:[#allocation507_spill] sm:$0xff] %v15833_v26  ;;  %v15839_v14 = vpop.f32.mrf.mxu0  ;;  %11287 = vmatmul.mubr.msk.f32.gmra.mxu0 %vm932_vm0, %v15342_v11  ;;  %6358 = vmatprep.mubr.f32.mxu1 %v19999_v33 }
 0x202   :  { %20096 = vst [vmem:[#allocation509_spill] sm:$0xff] %v15839_v14  ;;  %v15844_v42 = vpop.f32.mrf.mxu1  ;;  %12163 = vmatprep.mubr.msk.f32.mxu0 %vm932_vm0, %v15243_v16  ;;  %6491 = vmatpush1.msra.mxu1 %v6145_v57  ;;  %v15861_v57 = vpop.permute.xlu1 %4861 }
 0x203   :  { %20097 = vst [vmem:[#allocation510_spill] sm:$0xff] %v15844_v42  ;;  %v15848_v15 = vpop.f32.mrf.mxu0  ;;  %20101 = vst [vmem:[#allocation514_spill] sm:$0xff] %v15861_v57 }
 0x204   :  { %20098 = vst [vmem:[#allocation511_spill] sm:$0xff] %v15848_v15  ;;  %v2979_v26 = vpop.f32.mrf.mxu1  ;;  %11282 = vmatmul.mubr.msk.f32.gmra.mxu1 %vm932_vm0, %v15311_v38 }
 0x205   :  { %v15854_v46 = vpop.f32.mrf.mxu0  ;;  %12164 = vmatmul.mubr.msk.f32.vlgmr.msra.gmra.mxu0 %vm932_vm0, %v15277_v17  ;;  %6364 = vmatprep.mubr.f32.mxu1 %v19999_v33  ;;  %v2980_v7 = vadd.f32 %v2979_v26, %v15011_v50 }
 0x206   :  { %20100 = vst [vmem:[#allocation513_spill] sm:$0xff] %v15854_v46  ;;  %v2981_v42 = vpop.f32.mrf.mxu1  ;;  %12166 = vmatprep.mubr.msk.f32.mxu0 %vm932_vm0, %v15311_v38  ;;  %v15872_v46 = vpop.permute.xlu0 %2893 }
 0x207   :  { %v15863_v15 = vpop.f32.mrf.mxu0  ;;  %20104 = vst [vmem:[#allocation517_spill] sm:$0xff] %v15872_v46  ;;  %v15881_v25 = vpop.permute.xlu1 %4851  ;;  %v2982_v56 = vadd.f32 %v2981_v42, %v15011_v50 }
 0x208   :  { %20102 = vst [vmem:[#allocation515_spill] sm:$0xff] %v15863_v15  ;;  %v2985_v9 = vpop.f32.mrf.mxu1  ;;  %11283 = vmatmul.mubr.msk.f32.gmra.mxu1 %vm932_vm0, %v15342_v11  ;;  %v15877_v15 = vshrl.u32 %v1426_v63, 7  ;;  %20107 = vst [vmem:[#allocation520_spill] sm:$0xff] %v15881_v25 }
 0x209   :  { %v15867_v61 = vpop.f32.mrf.mxu0  ;;  %12167 = vmatmul.mubr.msk.f32.gmra.mxu0 %vm932_vm0, %v15342_v11  ;;  %6524 = vmatprep.mubr.f32.mxu1 %v19999_v33 }
 0x20a   :  { %20103 = vst [vmem:[#allocation516_spill] sm:$0xff] %v15867_v61  ;;  %v2987_v28 = vpop.f32.mrf.mxu1  ;;  %7389 = vmatprep.mubr.f32.mxu0 %v19999_v33  ;;  %20106 = vst [vmem:[#allocation519_spill] sm:$0xff] %v15877_v15  ;;  %v15890_v29 = vsub.s32 0, %v15877_v15  ;;  %v15892_v63 = vpop.permute.xlu0 %2242 }
 0x20b   :  { %v15875_v57 = vpop.f32.mrf.mxu0  ;;  %20111 = vst [vmem:[#allocation524_spill] sm:$0xff] %v15892_v63  ;;  %v15916_v40 = vpop.permute.xlu1 %4205  ;;  %v2344_v26 = vadd.f32 %v15659_v58, %v15892_v63 }
 0x20c   :  { %20105 = vst [vmem:[#allocation518_spill] sm:$0xff] %v15875_v57  ;;  %v2991_v43 = vpop.f32.mrf.mxu1  ;;  %11288 = vmatmul.mubr.msk.f32.vlgmr.msra.gmra.mxu1 %vm932_vm0, %v15243_v16  ;;  %20110 = vst [vmem:[#allocation523_spill] sm:$0xff] %v15890_v29  ;;  %v15898_v16 = vsub.s32 1, %v15877_v15 }
 0x20d   :  { %v15883_v61 = vpop.f32.mrf.mxu0  ;;  %6530 = vmatprep.mubr.f32.mxu1 %v19999_v33  ;;  %v2992_v57 = vadd.f32 %v2991_v43, %v15872_v46  ;;  %20115 = vst [vmem:[#allocation528_spill] sm:$0xff] %v15916_v40 }
 0x20e   :  { %20108 = vst [vmem:[#allocation521_spill] sm:$0xff] %v15883_v61  ;;  %v2993_v14 = vpop.f32.mrf.mxu1  ;;  %20112 = vst [vmem:[#allocation525_spill] sm:$0xff] %v15898_v16  ;;  %v2988_v61 = vadd.f32 %v2987_v28, %v14989_v3 }
 0x20f   :  { %v2994_v44 = vadd.f32 %v2993_v14, %v15872_v46  ;;  %v15887_v6 = vpop.f32.mrf.mxu0  ;;  %v15903_v14 = vld [vmem:[%s19406_s1 + $0x1b] sm:$0xff]  ;;  %v3372_v5 = vmax.f32 %v2992_v57, 0.0  ;;  %v3355_v57 = vmax.f32 %v2982_v56, 0.0 }
 0x210   :  { %20109 = vst [vmem:[#allocation522_spill] sm:$0xff] %v15887_v6  ;;  %v2997_v55 = vpop.f32.mrf.mxu1  ;;  %11289 = vmatmul.mubr.msk.f32.gmra.mxu1 %vm932_vm0, %v15277_v17  ;;  %20113 = vst [vmem:[#allocation526_spill] sm:$0xff] %v15903_v14  ;;  %v3397_v43 = vrot.slane %v15903_v14, %v15890_v29  ;;  %v2986_v17 = vadd.f32 %v2985_v9, %v14989_v3  ;;  %v3401_v41 = vrot.slane %v15903_v14, %v15898_v16 }
 0x211   :  { %v2998_v6 = vadd.f32 %v2997_v55, %v15850_v24  ;;  %v15907_v25 = vpop.f32.mrf.mxu0  ;;  %6536 = vmatprep.mubr.f32.mxu1 %v19999_v33  ;;  %v3373_v28 = vmax.f32 %v2994_v44, 0.0  ;;  %v3364_v9 = vmax.f32 %v2988_v61, 0.0  ;;  %v15929_v44 = vpop.permute.xlu0 %2232  ;;  %v2342_v61 = vadd.f32 %v15648_v30, %v15892_v63 }
 0x212   :  { %20114 = vst [vmem:[#allocation527_spill] sm:$0xff] %v15907_v25  ;;  %v2999_v46 = vpop.f32.mrf.mxu1  ;;  %20118 = vst [vmem:[#allocation531_spill] sm:$0xff] %v15929_v44  ;;  %v3457_v40 = vmul.f32 %v3397_v43, %v3372_v5  ;;  %v2332_v5 = vadd.f32 %v15607_v31, %v15929_v44 }
 0x213   :  { %v3381_v39 = vmax.f32 %v2998_v6, 0.0  ;;  %v3000_v55 = vadd.f32 %v2999_v46, %v15850_v24  ;;  %v15919_v25 = vpop.f32.mrf.mxu0  ;;  %v3363_v6 = vmax.f32 %v2986_v17, 0.0  ;;  %v15945_v17 = vpop.permute.xlu1 %4195  ;;  %v3449_v58 = vmul.f32 %v3401_v41, %v3364_v9 }
 0x214   :  { %20116 = vst [vmem:[#allocation529_spill] sm:$0xff] %v15919_v25  ;;  %v15922_v54 = vpop.f32.mrf.mxu1  ;;  %11290 = vmatmul.mubr.msk.f32.gmra.mxu1 %vm932_vm0, %v15311_v38  ;;  %v3458_v38 = vmul.f32 %v3401_v41, %v3373_v28  ;;  %20122 = vst [vmem:[#allocation535_spill] sm:$0xff] %v15945_v17 }
 0x215   :  { %20117 = vst [vmem:[#allocation530_spill] sm:$0xff] %v15922_v54  ;;  %v3382_v3 = vmax.f32 %v3000_v55, 0.0  ;;  %v15926_v14 = vpop.f32.mrf.mxu0  ;;  %6542 = vmatprep.mubr.f32.mxu1 %v19999_v33  ;;  %v3466_v46 = vmul.f32 %v3397_v43, %v3381_v39  ;;  %v3354_v55 = vmax.f32 %v2980_v7, 0.0  ;;  %v2338_v39 = vadd.f32 %v15633_v8, %v15032_v51  ;;  %v15962_v9 = vpop.permute.xlu0 %1586 }
 0x216   :  { %v15931_v42 = vpop.f32.mrf.mxu1  ;;  %v3448_v30 = vmul.f32 %v3397_v43, %v3363_v6  ;;  %v2726_v8 = vmax.f32 %v2344_v26, 0.0  ;;  %20126 = vst [vmem:[#allocation539_spill] sm:$0xff] %v15962_v9  ;;  %v2725_v6 = vmax.f32 %v2342_v61, 0.0  ;;  %v2324_v26 = vadd.f32 %v15585_v22, %v15060_v19 }
 0x217   :  { %20119 = vst [vmem:[#allocation532_spill] sm:$0xff] %v15931_v42  ;;  %v15935_v54 = vpop.f32.mrf.mxu0  ;;  %v3467_v25 = vmul.f32 %v3401_v41, %v3382_v3  ;;  %v2336_v3 = vadd.f32 %v15622_v27, %v15032_v51  ;;  %v2330_v27 = vadd.f32 %v15599_v60, %v15929_v44  ;;  %v1686_v22 = vadd.f32 %v15555_v45, %v15962_v9  ;;  %v20255_v44 = vld [vmem:[#allocation420_spill] sm:$0xff] }
 0x218   :  { %20120 = vst [vmem:[#allocation533_spill] sm:$0xff] %v15935_v54  ;;  %v15939_v33 = vpop.f32.mrf.mxu1  ;;  %11291 = vmatmul.mubr.msk.f32.gmra.mxu1 %vm932_vm0, %v15342_v11  ;;  %v15956_v11 = vld [vmem:[%s19406_s1 + $0x12] sm:$0xff] }
 0x219   :  { %20121 = vst [vmem:[#allocation534_spill] sm:$0xff] %v15939_v33  ;;  %v15947_v56 = vpop.f32.mrf.mxu0  ;;  %7212 = vmatprep.subr.mxu1 %v3467_v25  ;;  %v3440_v25 = vmul.f32 %v3401_v41, %v3355_v57  ;;  %v2326_v33 = vadd.f32 %v15593_v12, %v15060_v19  ;;  %v2745_v41 = vrot.slane %v15956_v11, %v15898_v16  ;;  %v2708_v12 = vmax.f32 %v2332_v5, 0.0 }
 0x21a   :  { %20123 = vst [vmem:[#allocation536_spill] sm:$0xff] %v15947_v56  ;;  %v15951_v7 = vpop.f32.mrf.mxu1  ;;  %7213 = vmatpush1.msra.mxu1 %v3466_v46  ;;  %v3439_v46 = vmul.f32 %v3397_v43, %v3354_v55  ;;  %v2741_v60 = vrot.slane %v15956_v11, %v15890_v29  ;;  %v2716_v43 = vmax.f32 %v2336_v3, 0.0  ;;  %v1682_v3 = vadd.f32 %v15547_v47, %v15080_v2 }
 0x21b   :  { %20124 = vst [vmem:[#allocation537_spill] sm:$0xff] %v15951_v7  ;;  %v15960_v28 = vpop.f32.mrf.mxu0  ;;  %7214 = vmatprep.subr.mxu1 %v3458_v38  ;;  %v2717_v7 = vmax.f32 %v2338_v39, 0.0  ;;  %v15982_v38 = vpop.permute.xlu1 %3549  ;;  %v2811_v55 = vmul.f32 %v2745_v41, %v2726_v8  ;;  %v2707_v39 = vmax.f32 %v2330_v27, 0.0  ;;  %v1680_v8 = vadd.f32 %v15529_v13, %v15080_v2 }
 0x21c   :  { %20125 = vst [vmem:[#allocation538_spill] sm:$0xff] %v15960_v28  ;;  %v15966_v42 = vpop.f32.mrf.mxu1  ;;  %7215 = vmatpush1.msra.mxu1 %v3457_v40  ;;  %v1688_v40 = vadd.f32 %v15573_v23, %v15962_v9  ;;  %20129 = vst [vmem:[#allocation542_spill] sm:$0xff] %v15982_v38  ;;  %v2801_v45 = vmul.f32 %v2741_v60, %v2716_v43  ;;  %v2069_v43 = vmax.f32 %v1686_v22, 0.0  ;;  %v20254_v9 = vld [vmem:[#allocation419_spill] sm:$0xff] }
 0x21d   :  { %20127 = vst [vmem:[#allocation540_spill] sm:$0xff] %v15966_v42  ;;  %v15970_v31 = vpop.f32.mrf.mxu0  ;;  %7216 = vmatprep.subr.mxu1 %v3449_v58  ;;  %v2810_v58 = vmul.f32 %v2741_v60, %v2725_v6  ;;  %v2802_v5 = vmul.f32 %v2745_v41, %v2717_v7  ;;  %v16003_v6 = vld [vmem:[%s19406_s1 + $0x9] sm:$0xff]  ;;  %v2060_v22 = vmax.f32 %v1680_v8, 0.0  ;;  %v1391_v19 = vmax.f32 %v20254_v9, 0.0 }
 0x21e   :  { %v15978_v57 = vpop.f32.mrf.mxu1  ;;  %7217 = vmatpush1.msra.mxu1 %v3448_v30  ;;  %v2699_v30 = vmax.f32 %v2326_v33, 0.0  ;;  %v2070_v47 = vmax.f32 %v1688_v40, 0.0  ;;  %v2085_v13 = vrot.slane %v16003_v6, %v15890_v29  ;;  %v20262_v9 = vld [vmem:[#allocation423_spill] sm:$0xff] }
 0x21f   :  { %20128 = vst [vmem:[#allocation541_spill] sm:$0xff] %v15978_v57  ;;  %v15984_v61 = vpop.f32.mrf.mxu0  ;;  %7218 = vmatprep.subr.mxu1 %v3440_v25  ;;  %v15994_v57 = vpop.permute.xlu0 %1576  ;;  %v2698_v25 = vmax.f32 %v2324_v26, 0.0  ;;  %v1408_v28 = vmax.f32 %v20262_v9, 0.0 }
 0x220   :  { %v15988_v42 = vpop.f32.mrf.mxu1  ;;  %7219 = vmatpush1.msra.mxu1 %v3439_v46  ;;  %20131 = vst [vmem:[#allocation544_spill] sm:$0xff] %v15994_v57  ;;  %v1676_v33 = vadd.f32 %v15521_v49, %v15994_v57  ;;  %v2793_v46 = vmul.f32 %v2745_v41, %v2708_v12  ;;  %v1674_v26 = vadd.f32 %v15509_v59, %v15994_v57  ;;  %v2061_v49 = vmax.f32 %v1682_v3, 0.0  ;;  %v16017_v40 = vpop.permute.xlu1 %3539 }
 0x221   :  { %20130 = vst [vmem:[#allocation543_spill] sm:$0xff] %v15988_v42  ;;  %v15992_v23 = vpop.f32.mrf.mxu0  ;;  %7220 = vmatprep.subr.mxu1 %v2811_v55  ;;  %v2792_v55 = vmul.f32 %v2741_v60, %v2707_v39  ;;  %v1670_v42 = vadd.f32 %v15500_v62, %v15105_v35  ;;  %v2784_v12 = vmul.f32 %v2745_v41, %v2699_v30 }
 0x222   :  { %v15998_v27 = vpop.f32.mrf.mxu1  ;;  %7221 = vmatpush1.msra.mxu1 %v2810_v58  ;;  %v1668_v59 = vadd.f32 %v15485_v10, %v15105_v35  ;;  %v2783_v39 = vmul.f32 %v2741_v60, %v2698_v25  ;;  %v1032_v62 = vadd.f32 %v15237_v53, %v15129_v1  ;;  %v2052_v3 = vmax.f32 %v1676_v33, 0.0 }
 0x223   :  { %20132 = vst [vmem:[#allocation545_spill] sm:$0xff] %v15998_v27  ;;  %v16007_v7 = vpop.f32.mrf.mxu0  ;;  %7222 = vmatprep.subr.mxu1 %v2802_v5  ;;  %v2089_v5 = vrot.slane %v16003_v6, %v15898_v16  ;;  %v1030_v30 = vadd.f32 %v15224_v34, %v15129_v1  ;;  %v2051_v10 = vmax.f32 %v1674_v26, 0.0  ;;  %v2154_v8 = vmul.f32 %v2085_v13, %v2069_v43  ;;  %v16047_v1 = vld [vmem:[%s19406_s1] sm:$0xff] }
 0x224   :  { %v16013_v58 = vpop.f32.mrf.mxu1  ;;  %7223 = vmatpush1.msra.mxu1 %v2801_v45  ;;  %v1026_v25 = vadd.f32 %v15215_v18, %v15145_v36  ;;  %v1024_v33 = vadd.f32 %v15200_v48, %v15145_v36  ;;  %v1020_v18 = vadd.f32 %v15194_v0, %v15169_v4  ;;  %v1414_v34 = vmax.f32 %v1032_v62, 0.0 }
 0x225   :  { %20133 = vst [vmem:[#allocation546_spill] sm:$0xff] %v16013_v58  ;;  %v3813_v27 = vpop.f32.mrf.mxu0  ;;  %7224 = vmatprep.subr.mxu1 %v2793_v46  ;;  %v2155_v41 = vmul.f32 %v2089_v5, %v2070_v47  ;;  %v2146_v53 = vmul.f32 %v2089_v5, %v2061_v49  ;;  %v2042_v47 = vmax.f32 %v1668_v59, 0.0  ;;  %v2137_v26 = vmul.f32 %v2089_v5, %v2052_v3 }
 0x226   :  { %v16024_v58 = vadd.f32 %v3813_v27, %v16017_v40  ;;  %v16026_v45 = vpop.f32.mrf.mxu1  ;;  %7225 = vmatpush1.msra.mxu1 %v2792_v55  ;;  %v2043_v27 = vmax.f32 %v1670_v42, 0.0  ;;  %v1018_v36 = vadd.f32 %v15176_v32, %v15169_v4  ;;  %v1413_v48 = vmax.f32 %v1030_v30, 0.0 }
 0x227   :  { %20135 = vst [vmem:[#allocation548_spill] sm:$0xff] %v16026_v45  ;;  %v16030_v46 = vpop.f32.mrf.mxu0  ;;  %7226 = vmatprep.subr.mxu1 %v2784_v12  ;;  %v2145_v12 = vmul.f32 %v2085_v13, %v2060_v22  ;;  %v2136_v43 = vmul.f32 %v2085_v13, %v2051_v10  ;;  %v1014_v59 = vadd.f32 %v15192_v37, %v15207_v21  ;;  %v1405_v22 = vmax.f32 %v1026_v25, 0.0 }
 0x228   :  { %20134 = vst [vmem:[#allocation547_spill] sm:$0xff] %v16024_v58  ;;  %20136 = vst [vmem:[#allocation549_spill] sm:$0xff] %v16030_v46  ;;  %v16034_v60 = vpop.f32.mrf.mxu1  ;;  %7227 = vmatpush1.msra.mxu1 %v2783_v39  ;;  %v2128_v0 = vmul.f32 %v2089_v5, %v2043_v27  ;;  %v1433_v62 = vrot.slane %v16047_v1, %v15898_v16  ;;  %v1012_v3 = vadd.f32 %v15174_v20, %v15207_v21 }
 0x229   :  { %20137 = vst [vmem:[#allocation550_spill] sm:$0xff] %v16034_v60  ;;  %v16038_v55 = vpop.f32.mrf.mxu0  ;;  %7228 = vmatprep.subr.mxu1 %v2155_v41  ;;  %v1429_v4 = vrot.slane %v16047_v1, %v15890_v29  ;;  %v1404_v32 = vmax.f32 %v1024_v33, 0.0  ;;  %v2127_v41 = vmul.f32 %v2085_v13, %v2042_v47  ;;  %v1396_v37 = vmax.f32 %v1020_v18, 0.0 }
 0x22a   :  { %20138 = vst [vmem:[#allocation551_spill] sm:$0xff] %v16038_v55  ;;  %v16042_v45 = vpop.f32.mrf.mxu1  ;;  %7229 = vmatpush1.msra.mxu1 %v2154_v8  ;;  %v1499_v8 = vmul.f32 %v1433_v62, %v1414_v34  ;;  %v1395_v5 = vmax.f32 %v1018_v36, 0.0  ;;  %v1490_v21 = vmul.f32 %v1433_v62, %v1405_v22  ;;  %v1386_v33 = vmax.f32 %v1012_v3, 0.0 }
 0x22b   :  { %20139 = vst [vmem:[#allocation552_spill] sm:$0xff] %v16042_v45  ;;  %v16051_v42 = vpop.f32.mrf.mxu0  ;;  %7230 = vmatprep.subr.mxu1 %v2146_v53  ;;  %v1498_v25 = vmul.f32 %v1429_v4, %v1413_v48  ;;  %v1387_v53 = vmax.f32 %v1014_v59, 0.0  ;;  %v1489_v13 = vmul.f32 %v1429_v4, %v1404_v32  ;;  %v1481_v18 = vmul.f32 %v1433_v62, %v1396_v37 }
 0x22c   :  { %20140 = vst [vmem:[#allocation553_spill] sm:$0xff] %v16051_v42  ;;  %v16055_v49 = vpop.f32.mrf.mxu1  ;;  %7231 = vmatpush1.msra.mxu1 %v2145_v12  ;;  %v1480_v34 = vmul.f32 %v1429_v4, %v1395_v5 }
 0x22d   :  { %20141 = vst [vmem:[#allocation554_spill] sm:$0xff] %v16055_v49  ;;  %v16059_v39 = vpop.f32.mrf.mxu0  ;;  %7232 = vmatprep.subr.mxu1 %v2137_v26  ;;  %v1472_v48 = vmul.f32 %v1433_v62, %v1387_v53 }
 0x22e   :  { %20142 = vst [vmem:[#allocation555_spill] sm:$0xff] %v16059_v39  ;;  %v16067_v30 = vpop.f32.mrf.mxu1  ;;  %7233 = vmatpush1.msra.mxu1 %v2136_v43  ;;  %v1471_v43 = vmul.f32 %v1429_v4, %v1386_v33 }
 0x22f   :  { %20143 = vst [vmem:[#allocation556_spill] sm:$0xff] %v16067_v30  ;;  %v16069_v10 = vpop.f32.mrf.mxu0  ;;  %7234 = vmatprep.subr.mxu1 %v2128_v0 }
 0x230   :  { %20144 = vst [vmem:[#allocation557_spill] sm:$0xff] %v16069_v10  ;;  %v16071_v27 = vpop.f32.mrf.mxu1  ;;  %7235 = vmatpush1.msra.mxu1 %v2127_v41 }
 0x231   :  { %20145 = vst [vmem:[#allocation558_spill] sm:$0xff] %v16071_v27  ;;  %v16073_v20 = vpop.f32.mrf.mxu0  ;;  %7236 = vmatprep.subr.mxu1 %v1499_v8 }
 0x232   :  { %20146 = vst [vmem:[#allocation559_spill] sm:$0xff] %v16073_v20  ;;  %v16075_v47 = vpop.f32.mrf.mxu1  ;;  %7237 = vmatpush1.msra.mxu1 %v1498_v25 }
 0x233   :  { %20147 = vst [vmem:[#allocation560_spill] sm:$0xff] %v16075_v47  ;;  %v16077_v12 = vpop.f32.mrf.mxu0  ;;  %7238 = vmatprep.subr.mxu1 %v1490_v21 }
 0x234   :  { %20148 = vst [vmem:[#allocation561_spill] sm:$0xff] %v16077_v12  ;;  %v16079_v26 = vpop.f32.mrf.mxu1  ;;  %7239 = vmatpush1.msra.mxu1 %v1489_v13 }
 0x235   :  { %20149 = vst [vmem:[#allocation562_spill] sm:$0xff] %v16079_v26  ;;  %v16081_v36 = vpop.f32.mrf.mxu0  ;;  %7240 = vmatprep.subr.mxu1 %v1481_v18 }
 0x236   :  { %20150 = vst [vmem:[#allocation563_spill] sm:$0xff] %v16081_v36  ;;  %v16083_v59 = vpop.f32.mrf.mxu1  ;;  %7241 = vmatpush1.msra.mxu1 %v1480_v34 }
 0x237   :  { %20151 = vst [vmem:[#allocation564_spill] sm:$0xff] %v16083_v59  ;;  %v16085_v22 = vpop.f32.mrf.mxu0  ;;  %7242 = vmatprep.subr.mxu1 %v1472_v48 }
 0x238   :  { %20152 = vst [vmem:[#allocation565_spill] sm:$0xff] %v16085_v22  ;;  %v16087_v0 = vpop.f32.mrf.mxu1  ;;  %7243 = vmatpush1.msra.mxu1 %v1471_v43 }
 0x239   :  { %20153 = vst [vmem:[#allocation566_spill] sm:$0xff] %v16087_v0  ;;  %v16089_v3 = vpop.f32.mrf.mxu0 }
 0x23a   :  { %20154 = vst [vmem:[#allocation567_spill] sm:$0xff] %v16089_v3  ;;  %v16091_v32 = vpop.f32.mrf.mxu1 }
 0x23b   :  { %20155 = vst [vmem:[#allocation568_spill] sm:$0xff] %v16091_v32  ;;  %v16093_v41 = vpop.f32.mrf.mxu0 }
 0x23c   :  { %20156 = vst [vmem:[#allocation569_spill] sm:$0xff] %v16093_v41  ;;  %v3902_v37 = vpop.f32.mrf.mxu1 }
 0x23d   :  { %v16096_v8 = vadd.f32 %v3902_v37, %v16017_v40  ;;  %v16098_v62 = vpop.f32.mrf.mxu0  ;;  %v6792_v37 = vld [vmem:[%s19410_s5 + $0x8] sm:$0xff] }
 0x23e   :  { %20158 = vst [vmem:[#allocation571_spill] sm:$0xff] %v16098_v62  ;;  %v16100_v4 = vpop.f32.mrf.mxu1  ;;  %7276 = vmatprep.mubr.f32.mxu1 %v6792_v37 }
 0x23f   :  { %20157 = vst [vmem:[#allocation570_spill] sm:$0xff] %v16096_v8  ;;  %20159 = vst [vmem:[#allocation572_spill] sm:$0xff] %v16100_v4  ;;  %v16102_v5 = vpop.f32.mrf.mxu0 }
 0x240   :  { %20160 = vst [vmem:[#allocation573_spill] sm:$0xff] %v16102_v5  ;;  %v16104_v25 = vpop.f32.mrf.mxu1 }
 0x241   :  { %20161 = vst [vmem:[#allocation574_spill] sm:$0xff] %v16104_v25  ;;  %v16106_v53 = vpop.f32.mrf.mxu0 }
 0x242   :  { %20162 = vst [vmem:[#allocation575_spill] sm:$0xff] %v16106_v53  ;;  %v16108_v21 = vpop.f32.mrf.mxu1 }
 0x243   :  { %20163 = vst [vmem:[#allocation576_spill] sm:$0xff] %v16108_v21  ;;  %v16110_v33 = vpop.f32.mrf.mxu0 }
 0x244   :  { %20164 = vst [vmem:[#allocation577_spill] sm:$0xff] %v16110_v33  ;;  %v16112_v13 = vpop.f32.mrf.mxu1 }
 0x245   :  { %20165 = vst [vmem:[#allocation578_spill] sm:$0xff] %v16112_v13  ;;  %v16114_v18 = vpop.f32.mrf.mxu0 }
 0x246   :  { %20166 = vst [vmem:[#allocation579_spill] sm:$0xff] %v16114_v18  ;;  %v16116_v34 = vpop.f32.mrf.mxu1 }
 0x247   :  { %20167 = vst [vmem:[#allocation580_spill] sm:$0xff] %v16116_v34  ;;  %v16118_v48 = vpop.f32.mrf.mxu0 }
 0x248   :  { %20168 = vst [vmem:[#allocation581_spill] sm:$0xff] %v16118_v48  ;;  %v16120_v43 = vpop.f32.mrf.mxu1 }
 0x249   :  { %20169 = vst [vmem:[#allocation582_spill] sm:$0xff] %v16120_v43  ;;  %v16125_v22 = vpop.f32.mrf.mxu0 }
 0x24a   :  { %20170 = vst [vmem:[#allocation583_spill] sm:$0xff] %v16125_v22  ;;  %v16127_v36 = vpop.f32.mrf.mxu1 }
 0x24b   :  { %20171 = vst [vmem:[#allocation584_spill] sm:$0xff] %v16127_v36  ;;  %v16129_v41 = vpop.f32.mrf.mxu0 }
 0x24c   :  { %20172 = vst [vmem:[#allocation585_spill] sm:$0xff] %v16129_v41  ;;  %v16131_v3 = vpop.f32.mrf.mxu1 }
 0x24d   :  { %v16133_v45 = vpop.f32.mrf.mxu0 }
 0x24e   :  { %20173 = vst [vmem:[#allocation586_spill] sm:$0xff] %v16133_v45  ;;  %v16135_v60 = vpop.f32.mrf.mxu1 }
 0x24f   :  { %v16137_v8 = vpop.f32.mrf.mxu0 }
 0x250   :  { %20174 = vst [vmem:[#allocation587_spill] sm:$0xff] %v16137_v8  ;;  %v16139_v25 = vpop.f32.mrf.mxu1 }
 0x251   :  { %v16141_v4 = vpop.f32.mrf.mxu0 }
 0x252   :  { %20175 = vst [vmem:[#allocation588_spill] sm:$0xff] %v16141_v4  ;;  %v16143_v21 = vpop.f32.mrf.mxu1 }
 0x253   :  { %v16145_v13 = vpop.f32.mrf.mxu0 }
 0x254   :  { %20176 = vst [vmem:[#allocation589_spill] sm:$0xff] %v16145_v13  ;;  %v16147_v37 = vpop.f32.mrf.mxu1 }
 0x255   :  { %v16149_v34 = vpop.f32.mrf.mxu0 }
 0x256   :  { %20177 = vst [vmem:[#allocation590_spill] sm:$0xff] %v16149_v34  ;;  %v16151_v43 = vpop.f32.mrf.mxu1  ;;  %v16171_v34 = vpop.permute.xlu0 %6178 }
 0x257   :  { %v16153_v36 = vpop.f32.mrf.mxu0  ;;  %20183 = vst [vmem:[#allocation596_spill] sm:$0xff] %v16171_v34 }
 0x258   :  { %20178 = vst [vmem:[#allocation591_spill] sm:$0xff] %v16153_v36  ;;  %v16155_v45 = vpop.f32.mrf.mxu1 }
 0x259   :  { %v16157_v12 = vpop.f32.mrf.mxu0 }
 0x25a   :  { %20179 = vst [vmem:[#allocation592_spill] sm:$0xff] %v16157_v12  ;;  %v16159_v8 = vpop.f32.mrf.mxu1 }
 0x25b   :  { %v16161_v20 = vpop.f32.mrf.mxu0 }
 0x25c   :  { %20180 = vst [vmem:[#allocation593_spill] sm:$0xff] %v16161_v20  ;;  %v16163_v4 = vpop.f32.mrf.mxu1 }
 0x25d   :  { %20181 = vst [vmem:[#allocation594_spill] sm:$0xff] %v16163_v4  ;;  %v16165_v10 = vpop.f32.mrf.mxu0  ;;  %v16185_v4 = vpop.permute.xlu0 %6173 }
 0x25e   :  { %v16167_v13 = vpop.f32.mrf.mxu1  ;;  %20188 = vst [vmem:[#allocation601_spill] sm:$0xff] %v16185_v4 }
 0x25f   :  { %20182 = vst [vmem:[#allocation595_spill] sm:$0xff] %v16167_v13  ;;  %v16169_v39 = vpop.f32.mrf.mxu0 }
 0x260   :  { %v16173_v42 = vpop.f32.mrf.mxu1 }
 0x261   :  { %20184 = vst [vmem:[#allocation597_spill] sm:$0xff] %v16173_v42  ;;  %v16175_v36 = vpop.f32.mrf.mxu0 }
 0x262   :  { %20185 = vst [vmem:[#allocation598_spill] sm:$0xff] %v16175_v36  ;;  %v16177_v55 = vpop.f32.mrf.mxu1 }
 0x263   :  { %20186 = vst [vmem:[#allocation599_spill] sm:$0xff] %v16177_v55  ;;  %v16179_v12 = vpop.f32.mrf.mxu0  ;;  %v16199_v55 = vpop.permute.xlu0 %6168 }
 0x264   :  { %v16181_v46 = vpop.f32.mrf.mxu1  ;;  %20192 = vst [vmem:[#allocation605_spill] sm:$0xff] %v16199_v55  ;;  %v20266_v55 = vld [vmem:[#allocation424_spill] sm:$0xff] }
 0x265   :  { %20187 = vst [vmem:[#allocation600_spill] sm:$0xff] %v16181_v46  ;;  %v16183_v20 = vpop.f32.mrf.mxu0  ;;  %v1389_v34 = vmax.f32 %v20266_v55, 0.0 }
 0x266   :  { %v16187_v58 = vpop.f32.mrf.mxu1 }
 0x267   :  { %20189 = vst [vmem:[#allocation602_spill] sm:$0xff] %v16187_v58  ;;  %v16189_v13 = vpop.f32.mrf.mxu0 }
 0x268   :  { %v16191_v49 = vpop.f32.mrf.mxu1 }
 0x269   :  { %20190 = vst [vmem:[#allocation603_spill] sm:$0xff] %v16191_v49  ;;  %v16193_v30 = vpop.f32.mrf.mxu0  ;;  %v16213_v49 = vpop.permute.xlu0 %6163 }
 0x26a   :  { %v16195_v42 = vpop.f32.mrf.mxu1  ;;  %20199 = vst [vmem:[#allocation612_spill] sm:$0xff] %v16213_v49 }
 0x26b   :  { %20191 = vst [vmem:[#allocation604_spill] sm:$0xff] %v16195_v42  ;;  %v16197_v27 = vpop.f32.mrf.mxu0 }
 0x26c   :  { %v16201_v47 = vpop.f32.mrf.mxu1 }
 0x26d   :  { %20193 = vst [vmem:[#allocation606_spill] sm:$0xff] %v16201_v47  ;;  %v16203_v46 = vpop.f32.mrf.mxu0 }
 0x26e   :  { %20194 = vst [vmem:[#allocation607_spill] sm:$0xff] %v16203_v46  ;;  %v16205_v26 = vpop.f32.mrf.mxu1 }
 0x26f   :  { %20195 = vst [vmem:[#allocation608_spill] sm:$0xff] %v16205_v26  ;;  %v16207_v59 = vpop.f32.mrf.mxu0  ;;  %v16227_v26 = vpop.permute.xlu0 %5522 }
 0x270   :  { %20196 = vst [vmem:[#allocation609_spill] sm:$0xff] %v16207_v59  ;;  %v16209_v58 = vpop.f32.mrf.mxu1  ;;  %20206 = vst [vmem:[#allocation619_spill] sm:$0xff] %v16227_v26 }
 0x271   :  { %20197 = vst [vmem:[#allocation610_spill] sm:$0xff] %v16209_v58  ;;  %v16211_v0 = vpop.f32.mrf.mxu0 }
 0x272   :  { %20198 = vst [vmem:[#allocation611_spill] sm:$0xff] %v16211_v0  ;;  %v16215_v32 = vpop.f32.mrf.mxu1 }
 0x273   :  { %20200 = vst [vmem:[#allocation613_spill] sm:$0xff] %v16215_v32  ;;  %v16217_v42 = vpop.f32.mrf.mxu0  ;;  %v16241_v33 = vpop.permute.xlu0 %5512 }
 0x274   :  { %20201 = vst [vmem:[#allocation614_spill] sm:$0xff] %v16217_v42  ;;  %v16219_v62 = vpop.f32.mrf.mxu1  ;;  %20213 = vst [vmem:[#allocation626_spill] sm:$0xff] %v16241_v33 }
 0x275   :  { %20202 = vst [vmem:[#allocation615_spill] sm:$0xff] %v16219_v62  ;;  %v16221_v5 = vpop.f32.mrf.mxu0 }
 0x276   :  { %20203 = vst [vmem:[#allocation616_spill] sm:$0xff] %v16221_v5  ;;  %v16223_v47 = vpop.f32.mrf.mxu1 }
 0x277   :  { %20204 = vst [vmem:[#allocation617_spill] sm:$0xff] %v16223_v47  ;;  %v16225_v46 = vpop.f32.mrf.mxu0  ;;  %v16255_v62 = vpop.permute.xlu0 %4866 }
 0x278   :  { %20205 = vst [vmem:[#allocation618_spill] sm:$0xff] %v16225_v46  ;;  %v16229_v59 = vpop.f32.mrf.mxu1  ;;  %20220 = vst [vmem:[#allocation633_spill] sm:$0xff] %v16255_v62 }
 0x279   :  { %20207 = vst [vmem:[#allocation620_spill] sm:$0xff] %v16229_v59  ;;  %v16231_v58 = vpop.f32.mrf.mxu0 }
 0x27a   :  { %20208 = vst [vmem:[#allocation621_spill] sm:$0xff] %v16231_v58  ;;  %v16233_v0 = vpop.f32.mrf.mxu1 }
 0x27b   :  { %20209 = vst [vmem:[#allocation622_spill] sm:$0xff] %v16233_v0  ;;  %v16235_v53 = vpop.f32.mrf.mxu0 }
 0x27c   :  { %20210 = vst [vmem:[#allocation623_spill] sm:$0xff] %v16235_v53  ;;  %v16237_v32 = vpop.f32.mrf.mxu1 }
 0x27d   :  { %20211 = vst [vmem:[#allocation624_spill] sm:$0xff] %v16237_v32  ;;  %v16239_v42 = vpop.f32.mrf.mxu0 }
 0x27e   :  { %20212 = vst [vmem:[#allocation625_spill] sm:$0xff] %v16239_v42  ;;  %v16243_v5 = vpop.f32.mrf.mxu1 }
 0x27f   :  { %20214 = vst [vmem:[#allocation627_spill] sm:$0xff] %v16243_v5  ;;  %v16245_v18 = vpop.f32.mrf.mxu0 }
 0x280   :  { %20215 = vst [vmem:[#allocation628_spill] sm:$0xff] %v16245_v18  ;;  %v16247_v46 = vpop.f32.mrf.mxu1  ;;  %v16266_v18 = vsub.s32 4, %v15877_v15 }
 0x281   :  { %20216 = vst [vmem:[#allocation629_spill] sm:$0xff] %v16247_v46  ;;  %v16249_v48 = vpop.f32.mrf.mxu0  ;;  %v16284_v46 = vpop.permute.xlu0 %4856 }
 0x282   :  { %20217 = vst [vmem:[#allocation630_spill] sm:$0xff] %v16249_v48  ;;  %v16251_v41 = vpop.f32.mrf.mxu1  ;;  %20225 = vst [vmem:[#allocation638_spill] sm:$0xff] %v16266_v18  ;;  %v16271_v48 = vsub.s32 2, %v15877_v15 }
 0x283   :  { %20218 = vst [vmem:[#allocation631_spill] sm:$0xff] %v16251_v41  ;;  %v16253_v58 = vpop.f32.mrf.mxu0  ;;  %20232 = vst [vmem:[#allocation645_spill] sm:$0xff] %v16284_v46 }
 0x284   :  { %20219 = vst [vmem:[#allocation632_spill] sm:$0xff] %v16253_v58  ;;  %v16257_v53 = vpop.f32.mrf.mxu1  ;;  %20227 = vst [vmem:[#allocation640_spill] sm:$0xff] %v16271_v48  ;;  %v16276_v58 = vsub.s32 5, %v15877_v15  ;;  %v16299_v22 = vrot.slane %v16047_v1, %v16271_v48 }
 0x285   :  { %20221 = vst [vmem:[#allocation634_spill] sm:$0xff] %v16257_v53  ;;  %v16259_v0 = vpop.f32.mrf.mxu0  ;;  %v16279_v53 = vsub.s32 3, %v15877_v15 }
 0x286   :  { %20222 = vst [vmem:[#allocation635_spill] sm:$0xff] %v16259_v0  ;;  %v16261_v42 = vpop.f32.mrf.mxu1  ;;  %20229 = vst [vmem:[#allocation642_spill] sm:$0xff] %v16276_v58  ;;  %v16295_v0 = vrot.slane %v16047_v1, %v16266_v18  ;;  %v16319_v2 = vrot.slane %v16047_v1, %v16276_v58 }
 0x287   :  { %20223 = vst [vmem:[#allocation636_spill] sm:$0xff] %v16261_v42  ;;  %v16263_v59 = vpop.f32.mrf.mxu0  ;;  %20230 = vst [vmem:[#allocation643_spill] sm:$0xff] %v16279_v53  ;;  %v16282_v42 = vsub.s32 6, %v15877_v15 }
 0x288   :  { %20224 = vst [vmem:[#allocation637_spill] sm:$0xff] %v16263_v59  ;;  %v16268_v32 = vpop.f32.mrf.mxu1  ;;  %20236 = vst [vmem:[#allocation649_spill] sm:$0xff] %v16295_v0 }
 0x289   :  { %20226 = vst [vmem:[#allocation639_spill] sm:$0xff] %v16268_v32  ;;  %v16273_v5 = vpop.f32.mrf.mxu0  ;;  %20231 = vst [vmem:[#allocation644_spill] sm:$0xff] %v16282_v42  ;;  %v16289_v32 = vsub.s32 7, %v15877_v15  ;;  %v16309_v15 = vrot.slane %v16003_v6, %v16271_v48  ;;  %v16362_v54 = vrot.slane %v15956_v11, %v16282_v42 }
 0x28a   :  { %20228 = vst [vmem:[#allocation641_spill] sm:$0xff] %v16273_v5  ;;  %v16286_v41 = vpop.f32.mrf.mxu1  ;;  %20237 = vst [vmem:[#allocation650_spill] sm:$0xff] %v16299_v22  ;;  %v16305_v5 = vrot.slane %v16047_v1, %v16282_v42 }
 0x28b   :  { %20233 = vst [vmem:[#allocation646_spill] sm:$0xff] %v16286_v41  ;;  %20234 = vst [vmem:[#allocation647_spill] sm:$0xff] %v16289_v32  ;;  %v16291_v47 = vpop.f32.mrf.mxu0 }
 0x28c   :  { %20235 = vst [vmem:[#allocation648_spill] sm:$0xff] %v16291_v47  ;;  %v16301_v59 = vpop.f32.mrf.mxu1  ;;  %20239 = vst [vmem:[#allocation652_spill] sm:$0xff] %v16305_v5  ;;  %v16315_v47 = vrot.slane %v16003_v6, %v16279_v53  ;;  %v16327_v5 = vrot.slane %v16003_v6, %v16266_v18 }
 0x28d   :  { %20238 = vst [vmem:[#allocation651_spill] sm:$0xff] %v16301_v59  ;;  %20240 = vst [vmem:[#allocation653_spill] sm:$0xff] %v16309_v15  ;;  %v16311_v41 = vpop.f32.mrf.mxu0  ;;  %v16323_v59 = vrot.slane %v16003_v6, %v16282_v42  ;;  %v16337_v15 = vrot.slane %v16003_v6, %v16289_v32 }
 0x28e   :  { %20241 = vst [vmem:[#allocation654_spill] sm:$0xff] %v16311_v41  ;;  %20242 = vst [vmem:[#allocation655_spill] sm:$0xff] %v16315_v47  ;;  %v16329_v57 = vpop.f32.mrf.mxu1  ;;  %v16333_v41 = vrot.slane %v16047_v1, %v16279_v53  ;;  %v16341_v47 = vrot.slane %v15956_v11, %v16266_v18 }
 0x28f   :  { %20243 = vst [vmem:[#allocation656_spill] sm:$0xff] %v16319_v2  ;;  %20244 = vst [vmem:[#allocation657_spill] sm:$0xff] %v16323_v59  ;;  %v16345_v59 = vrot.slane %v15956_v11, %v16271_v48  ;;  %v16347_v35 = vpop.f32.mrf.mxu0 }
 0x290   :  { %20245 = vst [vmem:[#allocation658_spill] sm:$0xff] %v16327_v5  ;;  %20246 = vst [vmem:[#allocation659_spill] sm:$0xff] %v16329_v57  ;;  %v16351_v57 = vrot.slane %v15956_v11, %v16276_v58  ;;  %v16355_v5 = vrot.slane %v16047_v1, %v16289_v32  ;;  %v20260_v1 = vld [vmem:[#allocation421_spill] sm:$0xff] }
 0x291   :  { %20247 = vst [vmem:[#allocation660_spill] sm:$0xff] %v16333_v41  ;;  %20248 = vst [vmem:[#allocation661_spill] sm:$0xff] %v16337_v15  ;;  %v1390_v15 = vmax.f32 %v15213_v52, 0.0  ;;  %v20261_v52 = vld [vmem:[#allocation422_spill] sm:$0xff] }
 0x292   :  { %20249 = vst [vmem:[#allocation662_spill] sm:$0xff] %v16341_v47  ;;  %20250 = vst [vmem:[#allocation663_spill] sm:$0xff] %v16345_v59  ;;  %v1399_v47 = vmax.f32 %v20255_v44, 0.0  ;;  %v16364_v59 = vpop.permute.xlu0 %4210  ;;  %v1388_v56 = vmax.f32 %v20261_v52, 0.0  ;;  %v20263_v44 = vld [vmem:[#allocation526_spill] sm:$0xff]  ;;  %v16395_v52 = vrot.slane %v16003_v6, %v16276_v58 }
 0x293   :  { %20251 = vst [vmem:[#allocation664_spill] sm:$0xff] %v16347_v35  ;;  %20252 = vst [vmem:[#allocation665_spill] sm:$0xff] %v16351_v57  ;;  %v16369_v57 = vld [vmem:[%s19406_s1 + $0x24] sm:$0xff]  ;;  %v16371_v35 = vpop.f32.mrf.mxu1  ;;  %v16378_v49 = vrot.slane %v20263_v44, %v16271_v48  ;;  %v16385_v4 = vrot.slane %v20263_v44, %v16282_v42  ;;  %v16399_v9 = vrot.slane %v20263_v44, %v16266_v18 }
 0x294   :  { %20253 = vst [vmem:[#allocation666_spill] sm:$0xff] %v16355_v5  ;;  %20256 = vst [vmem:[#allocation419_spill] sm:$0xff] %v16362_v54  ;;  %v1400_v5 = vmax.f32 %v20260_v1, 0.0  ;;  %v16380_v54 = vpop.f32.mrf.mxu0  ;;  %v16391_v1 = vrot.slane %v20263_v44, %v16279_v53  ;;  %v16403_v55 = vrot.slane %v16369_v57, %v15890_v29  ;;  %v16416_v6 = vmul.f32 %v16295_v0, %v1390_v15 }
 0x295   :  { %20257 = vst [vmem:[#allocation420_spill] sm:$0xff] %v16364_v59  ;;  %20258 = vst [vmem:[#allocation667_spill] sm:$0xff] %v16369_v57  ;;  %v16387_v36 = vpop.f32.mrf.mxu1 }
 0x296   :  { %20259 = vst [vmem:[#allocation668_spill] sm:$0xff] %v16371_v35  ;;  %20264 = vst [vmem:[#allocation421_spill] sm:$0xff] %v16378_v49  ;;  %v16405_v35 = vpop.f32.mrf.mxu0  ;;  %v20307_v49 = vld [vmem:[#allocation413_spill] sm:$0xff] }
 0x297   :  { %20265 = vst [vmem:[#allocation422_spill] sm:$0xff] %v16380_v54  ;;  %20267 = vst [vmem:[#allocation423_spill] sm:$0xff] %v16385_v4  ;;  %v16413_v4 = vrot.slane %v20263_v44, %v16289_v32  ;;  %v16425_v54 = vrot.slane %v16369_v57, %v15898_v16  ;;  %v16434_v44 = vmul.f32 %v16295_v0, %v1408_v28  ;;  %v16451_v28 = vpop.permute.xlu0 %4200 }
 0x298   :  { %20268 = vst [vmem:[#allocation526_spill] sm:$0xff] %v16387_v36  ;;  %20269 = vst [vmem:[#allocation424_spill] sm:$0xff] %v16391_v1  ;;  %v16409_v36 = vrot.slane %v15956_v11, %v16279_v53  ;;  %v16431_v11 = vmul.f32 %v16299_v22, %v1388_v56  ;;  %v20294_v22 = vld [vmem:[#allocation509_spill] sm:$0xff]  ;;  %v20308_v1 = vld [vmem:[#allocation499_spill] sm:$0xff] }
 0x299   :  { %20270 = vst [vmem:[#allocation669_spill] sm:$0xff] %v16395_v52  ;;  %20271 = vst [vmem:[#allocation670_spill] sm:$0xff] %v16399_v9  ;;  %v16419_v52 = vmul.f32 %v16295_v0, %v1399_v47  ;;  %v16421_v9 = vpop.f32.mrf.mxu1  ;;  %v16440_v47 = vld [vmem:[%s19406_s1 + $0x36] sm:$0xff]  ;;  %v16464_v0 = vmul.f32 %v16333_v41, %v1389_v34 }
 0x29a   :  { %20272 = vst [vmem:[#allocation671_spill] sm:$0xff] %v16403_v55  ;;  %20273 = vst [vmem:[#allocation672_spill] sm:$0xff] %v16405_v35  ;;  %v16428_v35 = vmul.f32 %v16319_v2, %v1391_v19  ;;  %v5870_v19 = vpop.f32.mrf.mxu0  ;;  %v20297_v34 = vld [vmem:[#allocation486_spill] sm:$0xff]  ;;  %v20305_v55 = vld [vmem:[#allocation497_spill] sm:$0xff] }
 0x29b   :  { %20274 = vst [vmem:[#allocation673_spill] sm:$0xff] %v16409_v36  ;;  %20275 = vst [vmem:[#allocation674_spill] sm:$0xff] %v16413_v4  ;;  %v16461_v57 = vpop.f32.mrf.mxu1 }
 0x29c   :  { %20276 = vst [vmem:[#allocation675_spill] sm:$0xff] %v16416_v6  ;;  %20277 = vst [vmem:[#allocation676_spill] sm:$0xff] %v16419_v52  ;;  %v16445_v52 = vld [vmem:[%s19406_s1 + $0x3f] sm:$0xff]  ;;  %v4702_v6 = vld [vmem:[%s19406_s1 + $0x2d] sm:$0xff]  ;;  %v16481_v56 = vpop.f32.mrf.mxu0 }
 0x29d   :  { %20278 = vst [vmem:[#allocation677_spill] sm:$0xff] %v16428_v35  ;;  %20279 = vst [vmem:[#allocation678_spill] sm:$0xff] %v16431_v11  ;;  %v16448_v35 = vmul.f32 %v16319_v2, %v1400_v5  ;;  %v16459_v32 = vrot.slane %v16445_v52, %v16282_v42  ;;  %v20289_v5 = vld [vmem:[#allocation517_spill] sm:$0xff]  ;;  %v20292_v2 = vld [vmem:[#allocation506_spill] sm:$0xff]  ;;  %v16479_v42 = vrot.slane %v4702_v6, %v15890_v29 }
 0x29e   :  { %20280 = vst [vmem:[#allocation679_spill] sm:$0xff] %v16434_v44  ;;  %20282 = vst [vmem:[#allocation680_spill] sm:$0xff] %v16440_v47  ;;  %v20287_v44 = vld [vmem:[#allocation508_spill] sm:$0xff]  ;;  %v16472_v15 = vadd.f32 %v20292_v2, %v20289_v5  ;;  %v5609_v2 = vpop.f32.mrf.mxu1 }
 0x29f   :  { %20283 = vst [vmem:[#allocation681_spill] sm:$0xff] %v16445_v52  ;;  %20284 = vst [vmem:[#allocation682_spill] sm:$0xff] %v16448_v35  ;;  %v5871_v11 = vadd.f32 %v5870_v19, %v20287_v44  ;;  %v20290_v35 = vld [vmem:[#allocation504_spill] sm:$0xff]  ;;  %v16476_v19 = vadd.f32 %v20294_v22, %v15850_v24 }
 0x2a0   :  { %20286 = vst [vmem:[#allocation683_spill] sm:$0xff] %v16451_v28  ;;  %20288 = vst [vmem:[#allocation684_spill] sm:$0xff] %v16464_v0  ;;  %v16468_v4 = vadd.f32 %v20290_v35, %v20289_v5  ;;  %v16485_v0 = vadd.f32 %v20297_v34, %v15032_v51  ;;  %v16489_v35 = vrot.slane %v16440_v47, %v15890_v29  ;;  %v20299_v22 = vld [vmem:[#allocation488_spill] sm:$0xff]  ;;  %v20303_v34 = vld [vmem:[#allocation495_spill] sm:$0xff] }
 0x2a1   :  { %20293 = vst [vmem:[#allocation506_spill] sm:$0xff] %v16472_v15  ;;  %20295 = vst [vmem:[#allocation509_spill] sm:$0xff] %v16476_v19  ;;  %v5984_v41 = vmax.f32 %v5871_v11, 0.0  ;;  %v16493_v5 = vrot.slane %v16440_v47, %v15898_v16  ;;  %v16497_v48 = vadd.f32 %v20299_v22, %v15032_v51  ;;  %v16505_v36 = vadd.f32 %v20303_v34, %v15011_v50  ;;  %v20310_v34 = vld [vmem:[#allocation502_spill] sm:$0xff] }
 0x2a2   :  { %20291 = vst [vmem:[#allocation504_spill] sm:$0xff] %v16468_v4  ;;  %20296 = vst [vmem:[#allocation685_spill] sm:$0xff] %v16481_v56  ;;  %v20301_v56 = vld [vmem:[#allocation490_spill] sm:$0xff]  ;;  %v16508_v11 = vrot.slane %v4702_v6, %v15898_v16  ;;  %v16512_v47 = vadd.f32 %v20305_v55, %v15011_v50  ;;  %v16516_v22 = vadd.f32 %v20308_v1, %v20307_v49  ;;  %v20312_v1 = vld [vmem:[#allocation511_spill] sm:$0xff] }
 0x2a3   :  { %20298 = vst [vmem:[#allocation486_spill] sm:$0xff] %v16485_v0  ;;  %20300 = vst [vmem:[#allocation488_spill] sm:$0xff] %v16497_v48  ;;  %v16501_v53 = vadd.f32 %v20301_v56, %v15892_v63  ;;  %v5876_v0 = vpop.f32.mrf.mxu0  ;;  %v16519_v51 = vmul.f32 %v16459_v32, %v5984_v41  ;;  %v5611_v48 = vpop.f32.mrf.mxu1  ;;  %v16548_v55 = vld [vmem:[%s19406_s1 + $0x48] sm:$0xff] }
 0x2a4   :  { %20304 = vst [vmem:[#allocation495_spill] sm:$0xff] %v16505_v36  ;;  %20306 = vst [vmem:[#allocation497_spill] sm:$0xff] %v16512_v47  ;;  %v5877_v56 = vadd.f32 %v5876_v0, %v16241_v33  ;;  %v16533_v47 = vadd.f32 %v20312_v1, %v15850_v24  ;;  %v16535_v41 = vpop.permute.xlu0 %3554  ;;  %v16539_v0 = vadd.f32 %v15926_v14, %v16017_v40 }
 0x2a5   :  { %20302 = vst [vmem:[#allocation490_spill] sm:$0xff] %v16501_v53  ;;  %20309 = vst [vmem:[#allocation499_spill] sm:$0xff] %v16519_v51  ;;  %v16524_v53 = vadd.f32 %v20310_v34, %v20307_v49  ;;  %v16529_v50 = vpop.f32.mrf.mxu0  ;;  %v16543_v34 = vrot.slane %v16445_v52, %v15890_v29  ;;  %v5615_v36 = vpop.f32.mrf.mxu1  ;;  %v16552_v1 = vadd.f32 %v15970_v31, %v15982_v38 }
 0x2a6   :  { %20311 = vst [vmem:[#allocation502_spill] sm:$0xff] %v16529_v50  ;;  %20313 = vst [vmem:[#allocation511_spill] sm:$0xff] %v16535_v41  ;;  %v5993_v6 = vmax.f32 %v5877_v56, 0.0  ;;  %v16556_v51 = vadd.f32 %v15984_v61, %v15982_v38  ;;  %v16560_v14 = vadd.f32 %v15992_v23, %v16535_v41  ;;  %v16564_v56 = vrot.slane %v16445_v52, %v15898_v16  ;;  %v20317_v38 = vld [vmem:[#allocation501_spill] sm:$0xff] }
 0x2a7   :  { %20314 = vst [vmem:[#allocation686_spill] sm:$0xff] %v16539_v0  ;;  %20315 = vst [vmem:[#allocation687_spill] sm:$0xff] %v16548_v55  ;;  %v5882_v50 = vpop.f32.mrf.mxu0  ;;  %v16568_v49 = vadd.f32 %v16007_v7, %v16535_v41  ;;  %v16572_v31 = vadd.f32 %v16143_v21, %v16451_v28  ;;  %v5617_v23 = vpop.f32.mrf.mxu1  ;;  %v20318_v0 = vld [vmem:[#allocation528_spill] sm:$0xff]  ;;  %v16587_v7 = vrot.slane %v16445_v52, %v16266_v18 }
 0x2a8   :  { %v16575_v61 = vmul.f32 %v16459_v32, %v5993_v6  ;;  %v5883_v24 = vadd.f32 %v5882_v50, %v20317_v38  ;;  %v16580_v4 = vadd.f32 %v16147_v37, %v20318_v0  ;;  %v5618_v15 = vadd.f32 %v5617_v23, %v20317_v38 }
 0x2a9   :  { %v16583_v19 = vpop.f32.mrf.mxu0  ;;  %v16591_v21 = vrot.slane %v16548_v55, %v15890_v29  ;;  %v16595_v50 = vadd.f32 %v16151_v43, %v20318_v0  ;;  %v16599_v37 = vrot.slane %v16445_v52, %v16276_v58  ;;  %v16603_v23 = vrot.slane %v16548_v55, %v15898_v16 }
 0x2aa   :  { %20316 = vst [vmem:[#allocation688_spill] sm:$0xff] %v16575_v61  ;;  %20319 = vst [vmem:[#allocation689_spill] sm:$0xff] %v16583_v19  ;;  %v6002_v6 = vmax.f32 %v5883_v24, 0.0  ;;  %v5621_v61 = vpop.f32.mrf.mxu1  ;;  %v16607_v19 = vadd.f32 %v16131_v3, %v15945_v17  ;;  %v16611_v29 = vadd.f32 %v16135_v60, %v15945_v17  ;;  %v16615_v24 = vadd.f32 %v16139_v25, %v16451_v28 }
 0x2ab   :  { %20320 = vst [vmem:[#allocation690_spill] sm:$0xff] %v16599_v37  ;;  %v5622_v43 = vadd.f32 %v5621_v61, %v16227_v26  ;;  %v5888_v41 = vpop.f32.mrf.mxu0  ;;  %v5616_v16 = vadd.f32 %v5615_v36, %v20317_v38  ;;  %v5612_v17 = vadd.f32 %v5611_v48, %v16241_v33  ;;  %v5997_v18 = vmax.f32 %v5618_v15, 0.0 }
 0x2ac   :  { %v16621_v52 = vmul.f32 %v16459_v32, %v6002_v6  ;;  %v5889_v3 = vadd.f32 %v5888_v41, %v16227_v26  ;;  %v5623_v58 = vpop.f32.mrf.mxu1  ;;  %v5610_v0 = vadd.f32 %v5609_v2, %v16241_v33  ;;  %v16633_v41 = vadd.f32 %v16155_v45, %v16364_v59 }
 0x2ad   :  { %v5624_v25 = vadd.f32 %v5623_v58, %v16227_v26  ;;  %v16627_v28 = vpop.f32.mrf.mxu0  ;;  %v6005_v36 = vmax.f32 %v5622_v43, 0.0  ;;  %v5606_v60 = vadd.f32 %v16461_v57, %v20287_v44  ;;  %v4968_v61 = vadd.f32 %v16197_v27, %v16255_v62 }
 0x2ae   :  { %20321 = vst [vmem:[#allocation691_spill] sm:$0xff] %v16621_v52  ;;  %20322 = vst [vmem:[#allocation692_spill] sm:$0xff] %v16627_v28  ;;  %v6011_v55 = vmax.f32 %v5889_v3, 0.0  ;;  %v5781_v6 = vpop.f32.mrf.mxu1  ;;  %v5604_v2 = vadd.f32 %v16421_v9, %v20287_v44  ;;  %v5996_v43 = vmax.f32 %v5616_v16, 0.0  ;;  %v5988_v52 = vmax.f32 %v5612_v17, 0.0 }
 0x2af   :  { %v6006_v48 = vmax.f32 %v5624_v25, 0.0  ;;  %v5782_v15 = vadd.f32 %v5781_v6, %v20287_v44  ;;  %v16638_v58 = vpop.f32.mrf.mxu0  ;;  %v6082_v6 = vmul.f32 %v16564_v56, %v5997_v18  ;;  %v16655_v27 = vadd.f32 %v16159_v8, %v16364_v59 }
 0x2b0   :  { %v16645_v3 = vmul.f32 %v16459_v32, %v6011_v55  ;;  %v16647_v45 = vpop.f32.mrf.mxu1  ;;  %v4966_v16 = vadd.f32 %v16193_v30, %v16255_v62  ;;  %v5987_v9 = vmax.f32 %v5610_v0, 0.0  ;;  %v6090_v32 = vmul.f32 %v16543_v34, %v6005_v36 }
 0x2b1   :  { %20324 = vst [vmem:[#allocation694_spill] sm:$0xff] %v16647_v45  ;;  %v5982_v28 = vmax.f32 %v5782_v15, 0.0  ;;  %v16649_v57 = vpop.f32.mrf.mxu0  ;;  %v6091_v25 = vmul.f32 %v16564_v56, %v6006_v48  ;;  %v5979_v15 = vmax.f32 %v5606_v60, 0.0  ;;  %v4956_v8 = vadd.f32 %v16179_v12, %v16284_v46 }
 0x2b2   :  { %20323 = vst [vmem:[#allocation693_spill] sm:$0xff] %v16645_v3  ;;  %v5787_v55 = vpop.f32.mrf.mxu1  ;;  %v20325_v3 = vld [vmem:[#allocation514_spill] sm:$0xff]  ;;  %v5978_v0 = vmax.f32 %v5604_v2, 0.0  ;;  %v6081_v36 = vmul.f32 %v16543_v34, %v5996_v43  ;;  %v5350_v60 = vmax.f32 %v4968_v61, 0.0  ;;  %v5349_v43 = vmax.f32 %v4966_v16, 0.0 }
 0x2b3   :  { %v4962_v17 = vadd.f32 %v16189_v13, %v20325_v3  ;;  %v16663_v45 = vmul.f32 %v16587_v7, %v5982_v28  ;;  %v5788_v18 = vadd.f32 %v5787_v55, %v16241_v33  ;;  %v16666_v48 = vpop.f32.mrf.mxu0  ;;  %7244 = vmatprep.subr.mxu1 %v6091_v25  ;;  %v4960_v30 = vadd.f32 %v16183_v20, %v20325_v3  ;;  %v20328_v13 = vld [vmem:[#allocation520_spill] sm:$0xff]  ;;  %v20329_v20 = vld [vmem:[#allocation598_spill] sm:$0xff] }
 0x2b4   :  { %v16673_v62 = vpop.f32.mrf.mxu1  ;;  %7245 = vmatpush2.msra.mxu1 %v6090_v32  ;;  %v16677_v28 = vadd.f32 %v16165_v10, %v20328_v13  ;;  %v6073_v25 = vmul.f32 %v16564_v56, %v5988_v52  ;;  %v4950_v12 = vadd.f32 %v16169_v39, %v20328_v13  ;;  %v4954_v2 = vadd.f32 %v20329_v20, %v16284_v46 }
 0x2b5   :  { %20326 = vst [vmem:[#allocation695_spill] sm:$0xff] %v16663_v45  ;;  %20327 = vst [vmem:[#allocation696_spill] sm:$0xff] %v16673_v62  ;;  %v5991_v55 = vmax.f32 %v5788_v18, 0.0  ;;  %v6267_v45 = vpop.f32.mrf.mxu0  ;;  %7246 = vmatprep.subr.mxu1 %v6082_v6  ;;  %v6072_v62 = vmul.f32 %v16543_v34, %v5987_v9  ;;  %v5341_v3 = vmax.f32 %v4962_v17, 0.0  ;;  %v6064_v52 = vmul.f32 %v16564_v56, %v5979_v15 }
 0x2b6   :  { %v5793_v32 = vpop.f32.mrf.mxu1  ;;  %7247 = vmatpush2.msra.mxu1 %v6081_v36  ;;  %v4693_v39 = vmax.f32 %v16633_v41, 0.0  ;;  %v5332_v18 = vmax.f32 %v4956_v8, 0.0  ;;  %v5340_v13 = vmax.f32 %v4960_v30, 0.0  ;;  %v6063_v16 = vmul.f32 %v16543_v34, %v5978_v0 }
 0x2b7   :  { %v16686_v10 = vmul.f32 %v16587_v7, %v5991_v55  ;;  %v5794_v61 = vadd.f32 %v5793_v32, %v20317_v38  ;;  %v6271_v6 = vpop.f32.mrf.mxu0  ;;  %7248 = vmatprep.subr.mxu1 %v6073_v25  ;;  %v4694_v9 = vmax.f32 %v16655_v27, 0.0  ;;  %v5435_v32 = vmul.f32 %v16493_v5, %v5350_v60 }
 0x2b8   :  { %v5795_v20 = vpop.f32.mrf.mxu1  ;;  %7249 = vmatpush2.msra.mxu1 %v6072_v62  ;;  %v5322_v25 = vmax.f32 %v16677_v28, 0.0  ;;  %v5323_v56 = vmax.f32 %v4950_v12, 0.0  ;;  %v5331_v15 = vmax.f32 %v4954_v2, 0.0  ;;  %v5434_v41 = vmul.f32 %v16489_v35, %v5349_v43  ;;  %v20333_v12 = vld [vmem:[#allocation596_spill] sm:$0xff] }
 0x2b9   :  { %20330 = vst [vmem:[#allocation598_spill] sm:$0xff] %v16686_v10  ;;  %v6000_v17 = vmax.f32 %v5794_v61, 0.0  ;;  %v5796_v36 = vadd.f32 %v5795_v20, %v20317_v38  ;;  %v6273_v55 = vpop.f32.mrf.mxu0  ;;  %7250 = vmatprep.subr.mxu1 %v6064_v52  ;;  %v5426_v0 = vmul.f32 %v16493_v5, %v5341_v3  ;;  %v5425_v60 = vmul.f32 %v16489_v35, %v5340_v13  ;;  %v20332_v61 = vld [vmem:[#allocation601_spill] sm:$0xff] }
 0x2ba   :  { %v5799_v8 = vpop.f32.mrf.mxu1  ;;  %7251 = vmatpush2.msra.mxu1 %v6063_v16  ;;  %v6274_v28 = vadd.f32 %v6273_v55, %v20332_v61  ;;  %v5417_v43 = vmul.f32 %v16493_v5, %v5332_v18  ;;  %v6272_v16 = vadd.f32 %v6271_v6, %v20332_v61  ;;  %v5416_v3 = vmul.f32 %v16489_v35, %v5331_v15  ;;  %v20335_v13 = vld [vmem:[#allocation605_spill] sm:$0xff]  ;;  %v20338_v15 = vld [vmem:[#allocation612_spill] sm:$0xff] }
 0x2bb   :  { %v16698_v34 = vmul.f32 %v16587_v7, %v6000_v17  ;;  %v6001_v62 = vmax.f32 %v5796_v36, 0.0  ;;  %v5800_v27 = vadd.f32 %v5799_v8, %v16227_v26  ;;  %v6277_v30 = vpop.f32.mrf.mxu0  ;;  %7252 = vmatprep.subr.mxu1 %v5435_v32  ;;  %v6268_v55 = vadd.f32 %v6267_v45, %v20335_v13 }
 0x2bc   :  { %v6278_v2 = vadd.f32 %v6277_v30, %v20333_v12  ;;  %v5801_v52 = vpop.f32.mrf.mxu1  ;;  %7253 = vmatpush2.msra.mxu1 %v5434_v41  ;;  %v5408_v18 = vmul.f32 %v16493_v5, %v5323_v56  ;;  %v6266_v6 = vadd.f32 %v16666_v48, %v20335_v13  ;;  %v5407_v45 = vmul.f32 %v16489_v35, %v5322_v25 }
 0x2bd   :  { %20331 = vst [vmem:[#allocation697_spill] sm:$0xff] %v16698_v34  ;;  %v16708_v20 = vmul.f32 %v16599_v37, %v6001_v62  ;;  %v6009_v17 = vmax.f32 %v5800_v27, 0.0  ;;  %v5802_v36 = vadd.f32 %v5801_v52, %v16227_v26  ;;  %v6279_v32 = vpop.f32.mrf.mxu0  ;;  %7254 = vmatprep.subr.mxu1 %v5426_v0  ;;  %v6262_v52 = vadd.f32 %v16649_v57, %v20338_v15  ;;  %v20390_v34 = vld [vmem:[#allocation687_spill] sm:$0xff] }
 0x2be   :  { %v6280_v8 = vadd.f32 %v6279_v32, %v20333_v12  ;;  %v16714_v30 = vpop.f32.mrf.mxu1  ;;  %7255 = vmatpush2.msra.mxu1 %v5425_v60  ;;  %v6661_v62 = vmax.f32 %v6278_v2, 0.0  ;;  %v6653_v32 = vmax.f32 %v6274_v28, 0.0  ;;  %v6260_v5 = vadd.f32 %v16638_v58, %v20338_v15 }
 0x2bf   :  { %20334 = vst [vmem:[#allocation698_spill] sm:$0xff] %v16708_v20  ;;  %20336 = vst [vmem:[#allocation699_spill] sm:$0xff] %v16714_v30  ;;  %v16720_v41 = vmul.f32 %v16587_v7, %v6009_v17  ;;  %v6010_v27 = vmax.f32 %v5802_v36, 0.0  ;;  %v16722_v0 = vpop.f32.mrf.mxu0  ;;  %7256 = vmatprep.subr.mxu1 %v5417_v43  ;;  %v6652_v7 = vmax.f32 %v6272_v16, 0.0  ;;  %v4779_v56 = vmul.f32 %v16508_v11, %v4694_v9  ;;  %v16747_v36 = vpop.permute.xlu0 %3544 }
 0x2c0   :  { %v6662_v60 = vmax.f32 %v6280_v8, 0.0  ;;  %v16727_v30 = vpop.f32.mrf.mxu1  ;;  %7257 = vmatpush2.msra.mxu1 %v5416_v3  ;;  %v4675_v35 = vmax.f32 %v16615_v24, 0.0  ;;  %v4778_v25 = vmul.f32 %v16479_v42, %v4693_v39  ;;  %v6644_v57 = vmax.f32 %v6268_v55, 0.0  ;;  %20343 = vst [vmem:[#allocation704_spill] sm:$0xff] %v16747_v36 }
 0x2c1   :  { %20337 = vst [vmem:[#allocation700_spill] sm:$0xff] %v16720_v41  ;;  %20339 = vst [vmem:[#allocation701_spill] sm:$0xff] %v16727_v30  ;;  %v16732_v48 = vmul.f32 %v16599_v37, %v6010_v27  ;;  %7258 = vmatprep.subr.mxu1 %v5408_v18  ;;  %v4667_v43 = vmax.f32 %v16611_v29, 0.0  ;;  %v6643_v58 = vmax.f32 %v6266_v6, 0.0  ;;  %v6746_v16 = vmul.f32 %v16591_v21, %v6661_v62  ;;  %v16742_v17 = vpop.f32.mrf.mxu0  ;;  %v20384_v30 = vld [vmem:[#allocation449_spill] sm:$0xff] }
 0x2c2   :  { %v16737_v28 = vpop.f32.mrf.mxu1  ;;  %7259 = vmatpush2.msra.mxu1 %v5407_v45  ;;  %v6747_v2 = vmul.f32 %v16603_v23, %v6662_v60  ;;  %v20342_v9 = vmax.f32 %v16595_v50, 0.0  ;;  %v4666_v39 = vmax.f32 %v16607_v19, 0.0  ;;  %v20344_v3 = vmax.f32 %v16580_v4, 0.0  ;;  %v20347_v45 = vld [vmem:[#allocation538_spill] sm:$0xff] }
 0x2c3   :  { %20340 = vst [vmem:[#allocation702_spill] sm:$0xff] %v16732_v48  ;;  %20341 = vst [vmem:[#allocation703_spill] sm:$0xff] %v16737_v28  ;;  %7260 = vmatprep.subr.mxu1 %v4779_v56  ;;  %v6635_v8 = vmax.f32 %v6262_v52, 0.0  ;;  %v6738_v18 = vmul.f32 %v16603_v23, %v6653_v32  ;;  %v4038_v6 = vmax.f32 %v16568_v49, 0.0  ;;  %v6634_v50 = vmax.f32 %v6260_v5, 0.0  ;;  %v20348_v5 = vld [vmem:[#allocation536_spill] sm:$0xff] }
 0x2c4   :  { %v4770_v24 = vmul.f32 %v16508_v11, %v20342_v9  ;;  %v4769_v55 = vmul.f32 %v16479_v42, %v20344_v3  ;;  %7349 = vmatprep.subr.mxu0 %v6747_v2  ;;  %v16753_v29 = vpop.f32.mrf.mxu1  ;;  %7261 = vmatpush2.msra.mxu1 %v4778_v25  ;;  %v6737_v62 = vmul.f32 %v16591_v21, %v6652_v7  ;;  %v20346_v19 = vmax.f32 %v16572_v31, 0.0  ;;  %v16772_v25 = vpop.f32.mrf.mxu0 }
 0x2c5   :  { %20345 = vst [vmem:[#allocation705_spill] sm:$0xff] %v16753_v29  ;;  %7350 = vmatpush1.msra.mxu0 %v6746_v16  ;;  %v3384_v27 = vmax.f32 %v16533_v47, 0.0  ;;  %v3644_v52 = vadd.f32 %v20347_v45, %v16747_v36  ;;  %v4760_v60 = vmul.f32 %v16479_v42, %v4675_v35  ;;  %v6729_v49 = vmul.f32 %v16603_v23, %v6644_v57  ;;  %v20349_v35 = vld [vmem:[#allocation533_spill] sm:$0xff] }
 0x2c6   :  { %7262 = vmatprep.subr.mxu1 %v4770_v24  ;;  %v4761_v4 = vmul.f32 %v16508_v11, %v20346_v19  ;;  %7351 = vmatprep.subr.mxu0 %v6738_v18  ;;  %v16765_v32 = vpop.f32.mrf.mxu1  ;;  %v3642_v7 = vadd.f32 %v20348_v5, %v16747_v36  ;;  %v4037_v31 = vmax.f32 %v16560_v14, 0.0  ;;  %v6728_v56 = vmul.f32 %v16591_v21, %v6643_v58  ;;  %v20355_v19 = vld [vmem:[#allocation671_spill] sm:$0xff]  ;;  %v16801_v45 = vpop.f32.mrf.mxu0 }
 0x2c7   :  { %7263 = vmatpush2.msra.mxu1 %v4769_v55  ;;  %7352 = vmatpush1.msra.mxu0 %v6737_v62  ;;  %v4752_v47 = vmul.f32 %v16508_v11, %v4667_v43  ;;  %v3638_v2 = vadd.f32 %v20349_v35, %v16017_v40  ;;  %v4029_v16 = vmax.f32 %v16556_v51, 0.0  ;;  %v4751_v57 = vmul.f32 %v16479_v42, %v4666_v39  ;;  %v16788_v51 = vld [vmem:[%s19410_s5 + $0x10] sm:$0xff] }
 0x2c8   :  { %7264 = vmatprep.subr.mxu1 %v4761_v4  ;;  %7353 = vmatprep.subr.mxu0 %v6729_v49  ;;  %v16779_v9 = vpop.f32.mrf.mxu1  ;;  %v6720_v14 = vmul.f32 %v16603_v23, %v6635_v8  ;;  %v4028_v58 = vmax.f32 %v16552_v1, 0.0  ;;  %v6719_v24 = vmul.f32 %v16591_v21, %v6634_v50  ;;  %v4123_v11 = vmul.f32 %v16425_v54, %v4038_v6  ;;  %v20350_v42 = vld [vmem:[#allocation492_spill] sm:$0xff]  ;;  %v20352_v8 = vld [vmem:[#allocation509_spill] sm:$0xff]  ;;  %v20357_v49 = vld [vmem:[#allocation506_spill] sm:$0xff] }
 0x2c9   :  { %7265 = vmatpush2.msra.mxu1 %v4760_v60  ;;  %7354 = vmatpush1.msra.mxu0 %v6728_v56  ;;  %v2433_v43 = vadd.f32 %v20350_v42, %v15892_v63  ;;  %v3366_v39 = vmax.f32 %v16524_v53, 0.0  ;;  %v4020_v23 = vmax.f32 %v3644_v52, 0.0  ;;  %v20351_v21 = vld [vmem:[#allocation424_spill] sm:$0xff]  ;;  %v3365_v55 = vmax.f32 %v16516_v22, 0.0  ;;  %v20354_v6 = vld [vmem:[#allocation421_spill] sm:$0xff] }
 0x2ca   :  { %7266 = vmatprep.subr.mxu1 %v4752_v47  ;;  %7355 = vmatprep.subr.mxu0 %v6720_v14  ;;  %v16793_v1 = vpop.f32.mrf.mxu1  ;;  %v3469_v3 = vmul.f32 %v20351_v21, %v3384_v27  ;;  %v20353_v18 = vmax.f32 %v20352_v8, 0.0  ;;  %v4019_v62 = vmax.f32 %v3642_v7, 0.0  ;;  %v4122_v4 = vmul.f32 %v20355_v19, %v4037_v31  ;;  %v20356_v53 = vld [vmem:[#allocation497_spill] sm:$0xff]  ;;  %v20359_v31 = vld [vmem:[#allocation495_spill] sm:$0xff]  ;;  %v20360_v47 = vld [vmem:[#allocation504_spill] sm:$0xff] }
 0x2cb   :  { %7267 = vmatpush2.msra.mxu1 %v4751_v57  ;;  %7356 = vmatpush1.msra.mxu0 %v6719_v24  ;;  %v3357_v52 = vmax.f32 %v20356_v53, 0.0  ;;  %v4011_v60 = vmax.f32 %v3638_v2, 0.0  ;;  %v4114_v22 = vmul.f32 %v16425_v54, %v4029_v16  ;;  %v20358_v5 = vmax.f32 %v20357_v49, 0.0  ;;  %v20362_v14 = vld [vmem:[#allocation686_spill] sm:$0xff]  ;;  %v20364_v42 = vld [vmem:[#allocation484_spill] sm:$0xff] }
 0x2cc   :  { %v3468_v50 = vmul.f32 %v20354_v6, %v20353_v18  ;;  %7268 = vmatprep.subr.mxu1 %v4123_v11  ;;  %11297 = vmatmul.mubr.msk.f32.vlgmr.msra.gmra.mxu0 %vm7187_vm1, %v16788_v51  ;;  %v16806_v27 = vpop.f32.mrf.mxu1  ;;  %v3356_v56 = vmax.f32 %v20359_v31, 0.0  ;;  %v20361_v35 = vmax.f32 %v20360_v47, 0.0  ;;  %v4010_v2 = vmax.f32 %v20362_v14, 0.0  ;;  %v20363_v11 = vld [vmem:[#allocation531_spill] sm:$0xff]  ;;  %v20365_v49 = vld [vmem:[#allocation482_spill] sm:$0xff] }
 0x2cd   :  { %7438 = vmatprep.subr.mxu0 %v3469_v3  ;;  %v3460_v7 = vmul.f32 %v20351_v21, %v20358_v5  ;;  %v4113_v24 = vmul.f32 %v20355_v19, %v4028_v58  ;;  %7269 = vmatpush2.msra.mxu1 %v4122_v4  ;;  %v2421_v3 = vadd.f32 %v20364_v42, %v20363_v11  ;;  %v2728_v16 = vmax.f32 %v2433_v43, 0.0  ;;  %v20366_v31 = vld [vmem:[#allocation490_spill] sm:$0xff]  ;;  %v16829_v4 = vpop.f32.mrf.mxu0  ;;  %v20367_v43 = vld [vmem:[#allocation416_spill] sm:$0xff] }
 0x2ce   :  { %v3459_v57 = vmul.f32 %v20354_v6, %v20361_v35  ;;  %7439 = vmatpush1.msra.mxu0 %v3468_v50  ;;  %7270 = vmatprep.subr.mxu1 %v4114_v22  ;;  %v16820_v8 = vpop.f32.mrf.mxu1  ;;  %v4105_v18 = vmul.f32 %v16425_v54, %v4020_v23  ;;  %v3451_v53 = vmul.f32 %v20351_v21, %v3366_v39  ;;  %v2727_v47 = vmax.f32 %v20366_v31, 0.0  ;;  %v20368_v22 = vld [vmem:[#allocation480_spill] sm:$0xff] }
 0x2cf   :  { %7440 = vmatprep.subr.mxu0 %v3460_v7  ;;  %v2419_v5 = vadd.f32 %v20365_v49, %v20363_v11  ;;  %v3450_v58 = vmul.f32 %v20354_v6, %v3365_v55  ;;  %v4104_v50 = vmul.f32 %v20355_v19, %v4019_v62  ;;  %7271 = vmatpush2.msra.mxu1 %v4113_v24  ;;  %v20369_v23 = vld [vmem:[#allocation488_spill] sm:$0xff]  ;;  %v20370_v55 = vld [vmem:[#allocation478_spill] sm:$0xff] }
 0x2d0   :  { %7441 = vmatpush1.msra.mxu0 %v3459_v57  ;;  %v16833_v7 = vadd.f32 %v20368_v22, %v20367_v43  ;;  %v2719_v35 = vmax.f32 %v20369_v23, 0.0  ;;  %7272 = vmatprep.subr.mxu1 %v4105_v18  ;;  %v6362_v39 = vpop.f32.mrf.mxu1  ;;  %v4096_v14 = vmul.f32 %v16425_v54, %v4011_v60  ;;  %v3442_v42 = vmul.f32 %v20351_v21, %v3357_v52  ;;  %v20371_v49 = vld [vmem:[#allocation486_spill] sm:$0xff]  ;;  %v20374_v54 = vld [vmem:[#allocation451_spill] sm:$0xff]  ;;  %v20375_v21 = vld [vmem:[#allocation453_spill] sm:$0xff] }
 0x2d1   :  { %7442 = vmatprep.subr.mxu0 %v3451_v53  ;;  %v2413_v62 = vadd.f32 %v20370_v55, %v20367_v43  ;;  %v2718_v31 = vmax.f32 %v20371_v49, 0.0  ;;  %v3441_v57 = vmul.f32 %v20354_v6, %v3356_v56  ;;  %v4095_v24 = vmul.f32 %v20355_v19, %v4010_v2  ;;  %7273 = vmatpush2.msra.mxu1 %v4104_v50  ;;  %v16846_v18 = vld [vmem:[%s19410_s5] sm:$0xff]  ;;  %v20376_v56 = vld [vmem:[#allocation673_spill] sm:$0xff]  ;;  %v20380_v55 = vld [vmem:[#allocation544_spill] sm:$0xff] }
 0x2d2   :  { %7443 = vmatpush1.msra.mxu0 %v3450_v58  ;;  %20372 = vst [vmem:[#allocation538_spill] sm:$0xff] %v16846_v18  ;;  %v20373_v53 = vld [vmem:[#allocation539_spill] sm:$0xff]  ;;  %v2710_v22 = vmax.f32 %v2421_v3, 0.0  ;;  %7274 = vmatprep.subr.mxu1 %v4096_v14  ;;  %v6366_v6 = vpop.f32.mrf.mxu1  ;;  %v2813_v19 = vmul.f32 %v20376_v56, %v2728_v16  ;;  %v20378_v58 = vld [vmem:[#allocation418_spill] sm:$0xff]  ;;  %v20379_v50 = vld [vmem:[#allocation441_spill] sm:$0xff]  ;;  %v2701_v28 = vmax.f32 %v16833_v7, 0.0 }
 0x2d3   :  { %v16850_v60 = vadd.f32 %v20374_v54, %v20373_v53  ;;  %v1777_v52 = vadd.f32 %v20375_v21, %v20373_v53  ;;  %7444 = vmatprep.subr.mxu0 %v3442_v42  ;;  %v16858_v2 = vld [vmem:[%s19410_s5 + $0x20] sm:$0xff]  ;;  %v16862_v23 = vadd.f32 %v20379_v50, %v20378_v58  ;;  %v20381_v49 = vld [vmem:[#allocation445_spill] sm:$0xff]  ;;  %v2709_v21 = vmax.f32 %v2419_v5, 0.0  ;;  %v16869_v42 = vpop.f32.mrf.mxu0  ;;  %7275 = vmatpush2.msra.mxu1 %v4095_v24 }
 0x2d4   :  { %20377 = vst [vmem:[#allocation536_spill] sm:$0xff] %v16858_v2  ;;  %v16866_v54 = vadd.f32 %v20381_v49, %v20380_v55  ;;  %v20382_v3 = vld [vmem:[#allocation663_spill] sm:$0xff]  ;;  %7445 = vmatpush1.msra.mxu0 %v3441_v57  ;;  %v20383_v16 = vld [vmem:[#allocation417_spill] sm:$0xff]  ;;  %v6367_v50 = vadd.f32 %v6366_v6, %v20333_v12  ;;  %7277 = vmatmul.mubr.f32.vlgmr.msra.gmra.mxu1 %v16846_v18  ;;  %v6368_v49 = vpop.f32.mrf.mxu1  ;;  %v2700_v10 = vmax.f32 %v2413_v62, 0.0 }
 0x2d5   :  { %v2812_v14 = vmul.f32 %v20382_v3, %v2727_v47  ;;  %v16873_v29 = vadd.f32 %v20384_v30, %v20383_v16  ;;  %7446 = vmatprep.subr.mxu0 %v2813_v19  ;;  %v2804_v5 = vmul.f32 %v20376_v56, %v2719_v35  ;;  %v2803_v47 = vmul.f32 %v20382_v3, %v2718_v31  ;;  %v16886_v30 = vld [vmem:[%s19410_s5 + $0x18] sm:$0xff]  ;;  %v20386_v7 = vld [vmem:[#allocation447_spill] sm:$0xff] }
 0x2d6   :  { %v6363_v24 = vadd.f32 %v6362_v39, %v20332_v61  ;;  %v6369_v57 = vadd.f32 %v6368_v49, %v20333_v12  ;;  %7282 = vmatprep.mubr.f32.mxu1 %v16858_v2  ;;  %20385 = vst [vmem:[#allocation533_spill] sm:$0xff] %v16886_v30  ;;  %v1769_v6 = vadd.f32 %v20386_v7, %v20383_v16  ;;  %v2071_v35 = vmax.f32 %v16850_v60, 0.0  ;;  %v16896_v19 = vld [vmem:[%s19410_s5 + $0x38] sm:$0xff]  ;;  %v20389_v49 = vld [vmem:[#allocation643_spill] sm:$0xff]  ;;  %v16903_v7 = vpop.f32.mrf.mxu0 }
 0x2d7   :  { %7447 = vmatpush1.msra.mxu0 %v2812_v14  ;;  %v2072_v62 = vmax.f32 %v1777_v52, 0.0  ;;  %v2795_v31 = vmul.f32 %v20376_v56, %v2710_v22  ;;  %v20387_v39 = vmov 0.0   ;;  %20388 = vst [vmem:[#allocation492_spill] sm:$0xff] %v16896_v19  ;;  %v2794_v14 = vmul.f32 %v20382_v3, %v2709_v21  ;;  %v16910_v22 = vld [vmem:[%s19410_s5 + $0x28] sm:$0xff]  ;;  %v20408_v2 = vld [vmem:[#allocation649_spill] sm:$0xff] }
 0x2d8   :  { %7448 = vmatprep.subr.mxu0 %v2804_v5  ;;  %7395 = vmatprep.mubr.f32.mxu0 %v20387_v39  ;;  %v16901_v37 = vrot.slane %v20390_v34, %v20389_v49  ;;  %v6361_v60 = vadd.f32 %v16820_v8, %v20332_v61  ;;  %v6664_v52 = vmax.f32 %v6369_v57, 0.0  ;;  %v20391_v5 = vld [vmem:[#allocation443_spill] sm:$0xff]  ;;  %v6357_v21 = vadd.f32 %v16806_v27, %v20335_v13  ;;  %v16925_v27 = vld [vmem:[%s19410_s5 + $0x30] sm:$0xff] }
 0x2d9   :  { %7449 = vmatpush1.msra.mxu0 %v2803_v47  ;;  %v1763_v20 = vadd.f32 %v20391_v5, %v20380_v55  ;;  %v6663_v41 = vmax.f32 %v6367_v50, 0.0  ;;  %7283 = vmatmul.mubr.f32.gmra.mxu1 %v16886_v30  ;;  %v2786_v48 = vmul.f32 %v20376_v56, %v2701_v28  ;;  %v2063_v8 = vmax.f32 %v16873_v29, 0.0  ;;  %20392 = vst [vmem:[#allocation424_spill] sm:$0xff] %v16925_v27  ;;  %v20393_v5 = vld [vmem:[#allocation640_spill] sm:$0xff] }
 0x2da   :  { %7450 = vmatprep.subr.mxu0 %v2795_v31  ;;  %v2785_v47 = vmul.f32 %v20382_v3, %v2700_v10  ;;  %v6655_v57 = vmax.f32 %v6363_v24, 0.0  ;;  %v6749_v11 = vmul.f32 %v16901_v37, %v6664_v52  ;;  %7288 = vmatprep.mubr.f32.mxu1 %v16896_v19  ;;  %v2062_v50 = vmax.f32 %v1769_v6, 0.0  ;;  %v20394_v10 = vld [vmem:[#allocation655_spill] sm:$0xff]  ;;  %v20395_v3 = vld [vmem:[#allocation653_spill] sm:$0xff] }
 0x2db   :  { %7451 = vmatpush1.msra.mxu0 %v2794_v14  ;;  %v16929_v31 = vrot.slane %v20390_v34, %v20393_v5  ;;  %v6355_v28 = vadd.f32 %v16793_v1, %v20335_v13  ;;  %v2157_v29 = vmul.f32 %v20394_v10, %v2072_v62  ;;  %v2054_v56 = vmax.f32 %v16866_v54, 0.0  ;;  %v6457_v14 = vpop.f32.mrf.mxu0  ;;  %v16943_v1 = vld [vmem:[%s19410_s5 + $0x40] sm:$0xff] }
 0x2dc   :  { %11298 = vmatmul.mubr.msk.f32.gmra.mxu0 %vm7187_vm1, %v16910_v22  ;;  %7452 = vmatprep.subr.mxu0 %v2786_v48  ;;  %v2156_v24 = vmul.f32 %v20395_v3, %v2071_v35  ;;  %v6351_v6 = vadd.f32 %v16779_v9, %v20338_v15  ;;  %v6654_v52 = vmax.f32 %v6361_v60, 0.0  ;;  %v20396_v19 = vld [vmem:[#allocation427_spill] sm:$0xff]  ;;  %v6646_v54 = vmax.f32 %v6357_v21, 0.0  ;;  %v16958_v21 = vld [vmem:[%s19410_s5 + $0x50] sm:$0xff] }
 0x2dd   :  { %7453 = vmatpush1.msra.mxu0 %v2785_v47  ;;  %7575 = vmatprep.subr.mxu1 %v6749_v11  ;;  %v1417_v48 = vmax.f32 %v20396_v19, 0.0  ;;  %v20397_v62 = vld [vmem:[#allocation439_spill] sm:$0xff]  ;;  %v6748_v35 = vmul.f32 %v16929_v31, %v6663_v41  ;;  %v2053_v9 = vmax.f32 %v1763_v20, 0.0  ;;  %v6349_v11 = vadd.f32 %v16765_v32, %v20338_v15  ;;  %20398 = vst [vmem:[#allocation509_spill] sm:$0xff] %v16958_v21  ;;  %v20399_v41 = vld [vmem:[#allocation428_spill] sm:$0xff] }
 0x2de   :  { %v1757_v30 = vadd.f32 %v20397_v62, %v20378_v58  ;;  %7289 = vmatmul.mubr.f32.gmra.mxu1 %v16925_v27  ;;  %7454 = vmatprep.subr.mxu0 %v2157_v29  ;;  %v6740_v60 = vmul.f32 %v16901_v37, %v6655_v57  ;;  %v2148_v19 = vmul.f32 %v20394_v10, %v2063_v8  ;;  %v1398_v47 = vmax.f32 %v20399_v41, 0.0 }
 0x2df   :  { %7401 = vmatprep.mubr.f32.mxu0 %v20387_v39  ;;  %7455 = vmatpush1.msra.mxu0 %v2156_v24  ;;  %v2147_v29 = vmul.f32 %v20395_v3, %v2062_v50  ;;  %v6645_v20 = vmax.f32 %v6355_v28, 0.0  ;;  %v6458_v62 = vadd.f32 %v6457_v14, %v20333_v12  ;;  %v2045_v32 = vmax.f32 %v16862_v23, 0.0  ;;  %v16970_v24 = vld [vmem:[%s19410_s5 + $0x48] sm:$0xff]  ;;  %v20401_v28 = vld [vmem:[#allocation426_spill] sm:$0xff] }
 0x2e0   :  { %7576 = vmatpush1.msra.mxu1 %v6748_v35  ;;  %11299 = vmatmul.mubr.msk.f32.gmra.mxu0 %vm7187_vm1, %v16943_v1  ;;  %v6637_v57 = vmax.f32 %v6351_v6, 0.0  ;;  %v6739_v8 = vmul.f32 %v16929_v31, %v6654_v52  ;;  %20400 = vst [vmem:[#allocation421_spill] sm:$0xff] %v16970_v24  ;;  %v2139_v50 = vmul.f32 %v20394_v10, %v2054_v56  ;;  %v20402_v14 = vmax.f32 %v20401_v28, 0.0  ;;  %v20403_v35 = vld [vmem:[#allocation650_spill] sm:$0xff]  ;;  %v20404_v6 = vld [vmem:[#allocation425_spill] sm:$0xff]  ;;  %v20410_v56 = vld [vmem:[#allocation436_spill] sm:$0xff] }
 0x2e1   :  { %7456 = vmatprep.subr.mxu0 %v2148_v19  ;;  %7577 = vmatprep.subr.mxu1 %v6740_v60  ;;  %v2044_v27 = vmax.f32 %v1757_v30, 0.0  ;;  %v6731_v23 = vmul.f32 %v16901_v37, %v6646_v54  ;;  %v20405_v52 = vmax.f32 %v20404_v6, 0.0  ;;  %v20406_v60 = vld [vmem:[#allocation656_spill] sm:$0xff]  ;;  %v16986_v18 = vmul.f32 %v20408_v2, %v1417_v48  ;;  %v16993_v30 = vld [vmem:[%s19410_s5 + $0x58] sm:$0xff] }
 0x2e2   :  { %v16976_v41 = vmul.f32 %v20403_v35, %v20402_v14  ;;  %7294 = vmatprep.mubr.f32.mxu1 %v16958_v21  ;;  %7457 = vmatpush1.msra.mxu0 %v2147_v29  ;;  %v1416_v63 = vmax.f32 %v20410_v56, 0.0  ;;  %v2138_v28 = vmul.f32 %v20395_v3, %v2053_v9  ;;  %v6636_v14 = vmax.f32 %v6349_v11, 0.0  ;;  %v20411_v54 = vld [vmem:[#allocation429_spill] sm:$0xff]  ;;  %v20412_v6 = vld [vmem:[#allocation430_spill] sm:$0xff]  ;;  %v20415_v56 = vld [vmem:[#allocation660_spill] sm:$0xff] }
 0x2e3   :  { %v16983_v19 = vmul.f32 %v20406_v60, %v20405_v52  ;;  %20409 = vst [vmem:[#allocation497_spill] sm:$0xff] %v16986_v18  ;;  %7578 = vmatpush1.msra.mxu1 %v6739_v8  ;;  %7458 = vmatprep.subr.mxu0 %v2139_v50  ;;  %v1418_v29 = vmax.f32 %v20411_v54, 0.0  ;;  %v1406_v52 = vmax.f32 %v20412_v6, 0.0  ;;  %v6666_v2 = vmax.f32 %v6458_v62, 0.0  ;;  %v20413_v48 = vld [vmem:[#allocation434_spill] sm:$0xff]  ;;  %v17006_v50 = vld [vmem:[%s19410_s5 + $0x68] sm:$0xff] }
 0x2e4   :  { %7295 = vmatmul.mubr.f32.gmra.mxu1 %v16970_v24  ;;  %7579 = vmatprep.subr.mxu1 %v6731_v23  ;;  %v1415_v9 = vmax.f32 %v20413_v48, 0.0  ;;  %v6722_v11 = vmul.f32 %v16901_v37, %v6637_v57  ;;  %v2130_v8 = vmul.f32 %v20394_v10, %v2045_v32  ;;  %20414 = vst [vmem:[#allocation506_spill] sm:$0xff] %v17006_v50  ;;  %v20416_v62 = vld [vmem:[#allocation432_spill] sm:$0xff]  ;;  %v20417_v6 = vld [vmem:[#allocation638_spill] sm:$0xff]  ;;  %v20418_v48 = vld [vmem:[#allocation667_spill] sm:$0xff] }
 0x2e5   :  { %20407 = vst [vmem:[#allocation671_spill] sm:$0xff] %v16983_v19  ;;  %v6730_v19 = vmul.f32 %v16929_v31, %v6645_v20  ;;  %7407 = vmatprep.mubr.f32.mxu0 %v20387_v39  ;;  %7459 = vmatpush1.msra.mxu0 %v2138_v28  ;;  %v1483_v20 = vmul.f32 %v20415_v56, %v1398_v47  ;;  %v1407_v54 = vmax.f32 %v20416_v62, 0.0  ;;  %v20420_v37 = vld [vmem:[#allocation642_spill] sm:$0xff]  ;;  %v20423_v28 = vld [vmem:[#allocation647_spill] sm:$0xff]  ;;  %v20449_v21 = vld [vmem:[#allocation633_spill] sm:$0xff] }
 0x2e6   :  { %v2129_v23 = vmul.f32 %v20395_v3, %v2044_v27  ;;  %v17013_v18 = vrot.slane %v20418_v48, %v20417_v6  ;;  %v17017_v57 = vrot.slane %v20390_v34, %v20420_v37  ;;  %11300 = vmatmul.mubr.msk.f32.gmra.mxu0 %vm7187_vm1, %v16993_v30  ;;  %v20421_v10 = vld [vmem:[#allocation438_spill] sm:$0xff]  ;;  %v6721_v47 = vmul.f32 %v16929_v31, %v6636_v14  ;;  %v20425_v31 = vld [vmem:[#allocation672_spill] sm:$0xff] }
 0x2e7   :  { %7580 = vmatpush1.msra.mxu1 %v6730_v19  ;;  %v1392_v32 = vmax.f32 %v20421_v10, 0.0  ;;  %7460 = vmatprep.subr.mxu0 %v2130_v8  ;;  %v17026_v27 = vld [vmem:[%s19410_s5 + $0x60] sm:$0xff]  ;;  %v1501_v3 = vmul.f32 %v20415_v56, %v1416_v63  ;;  %v12303_v19 = vld [vmem:[%s19406_s1 + $0x12] sm:$0xff]  ;;  %v1491_v10 = vmul.f32 %v20403_v35, %v1406_v52  ;;  %v5713_v14 = vadd.f32 %v20425_v31, %v16227_v26 }
 0x2e8   :  { %20419 = vst [vmem:[#allocation495_spill] sm:$0xff] %v17013_v18  ;;  %7581 = vmatprep.subr.mxu1 %v6722_v11  ;;  %20422 = vst [vmem:[#allocation504_spill] sm:$0xff] %v17026_v27  ;;  %v17033_v62 = vrot.slane %v12303_v19, %v20423_v28  ;;  %v6751_v11 = vmul.f32 %v17017_v57, %v6666_v2  ;;  %7300 = vmatprep.mubr.f32.mxu1 %v17006_v50  ;;  %v20426_v63 = vld [vmem:[#allocation422_spill] sm:$0xff]  ;;  %v17046_v19 = vld [vmem:[%s19410_s5 + $0x70] sm:$0xff] }
 0x2e9   :  { %7461 = vmatpush1.msra.mxu0 %v2129_v23  ;;  %v1500_v8 = vmul.f32 %v20403_v35, %v1415_v9  ;;  %v5711_v18 = vadd.f32 %v20426_v63, %v16227_v26  ;;  %7582 = vmatpush1.msra.mxu1 %v6721_v47  ;;  %v17049_v52 = vmul.f32 %v20406_v60, %v1418_v29  ;;  %v20428_v23 = vld [vmem:[#allocation664_spill] sm:$0xff]  ;;  %v17062_v47 = vld [vmem:[%s19410_s5 + $0x80] sm:$0xff]  ;;  %v6008_v28 = vmax.f32 %v5713_v14, 0.0 }
 0x2ea   :  { %20424 = vst [vmem:[#allocation686_spill] sm:$0xff] %v17033_v62  ;;  %7462 = vmatprep.subr.mxu0 %v1501_v3  ;;  %v17053_v2 = vrot.slane %v20418_v48, %v20393_v5  ;;  %v5707_v35 = vadd.f32 %v20428_v23, %v20317_v38  ;;  %7301 = vmatmul.mubr.f32.gmra.mxu1 %v17026_v27  ;;  %20429 = vst [vmem:[#allocation482_spill] sm:$0xff] %v17062_v47  ;;  %v20430_v3 = vld [vmem:[#allocation652_spill] sm:$0xff]  ;;  %v20433_v48 = vld [vmem:[#allocation442_spill] sm:$0xff] }
 0x2eb   :  { %20427 = vst [vmem:[#allocation484_spill] sm:$0xff] %v17049_v52  ;;  %7801 = vmatprep.subr.mxu1 %v6751_v11  ;;  %v1492_v9 = vmul.f32 %v20415_v56, %v1407_v54  ;;  %v17065_v60 = vmul.f32 %v20430_v3, %v1392_v32  ;;  %v20432_v29 = vld [vmem:[#allocation440_spill] sm:$0xff]  ;;  %v20434_v26 = vld [vmem:[#allocation654_spill] sm:$0xff]  ;;  %7413 = vmatprep.mubr.f32.mxu0 %v20387_v39  ;;  %v6007_v11 = vmax.f32 %v5711_v18, 0.0  ;;  %v20443_v27 = vld [vmem:[#allocation529_spill] sm:$0xff] }
 0x2ec   :  { %v5705_v23 = vadd.f32 %v20434_v26, %v20317_v38  ;;  %7463 = vmatpush1.msra.mxu0 %v1500_v8  ;;  %v17075_v56 = vld [vmem:[%s19410_s5 + $0x78] sm:$0xff]  ;;  %v20436_v54 = vld [vmem:[#allocation444_spill] sm:$0xff]  ;;  %7306 = vmatprep.mubr.f32.mxu1 %v17062_v47 }
 0x2ed   :  { %20431 = vst [vmem:[#allocation490_spill] sm:$0xff] %v17065_v60  ;;  %20435 = vst [vmem:[#allocation480_spill] sm:$0xff] %v17075_v56  ;;  %v20437_v32 = vld [vmem:[#allocation680_spill] sm:$0xff]  ;;  %11301 = vmatmul.mubr.msk.f32.gmra.mxu0 %vm7187_vm1, %v17046_v19  ;;  %7464 = vmatprep.subr.mxu0 %v1492_v9  ;;  %v20439_v26 = vld [vmem:[#allocation681_spill] sm:$0xff] }
 0x2ee   :  { %v17080_v60 = vrot.slane %v20437_v32, %v20393_v5  ;;  %v20438_v31 = vld [vmem:[#allocation648_spill] sm:$0xff]  ;;  %v17088_v8 = vrot.slane %v20439_v26, %v20393_v5  ;;  %v20440_v38 = vld [vmem:[#allocation641_spill] sm:$0xff]  ;;  %7465 = vmatpush1.msra.mxu0 %v1491_v10  ;;  %v6033_v14 = vrot.slane %v20439_v26, %v20389_v49  ;;  %7307 = vmatmul.mubr.f32.gmra.mxu1 %v17075_v56  ;;  %v20445_v26 = vld [vmem:[#allocation583_spill] sm:$0xff] }
 0x2ef   :  { %v5701_v63 = vadd.f32 %v20438_v31, %v16241_v33  ;;  %v5699_v52 = vadd.f32 %v20440_v38, %v16241_v33  ;;  %v17096_v31 = vld [vmem:[%s19410_s5 + $0x88] sm:$0xff]  ;;  %v20444_v62 = vld [vmem:[#allocation637_spill] sm:$0xff]  ;;  %v5999_v38 = vmax.f32 %v5707_v35, 0.0  ;;  %7466 = vmatprep.subr.mxu0 %v1483_v20  ;;  %v17114_v10 = vrot.slane %v20437_v32, %v20389_v49  ;;  %7419 = vmatprep.mubr.f32.mxu0 %v20387_v39  ;;  %v20453_v37 = vld [vmem:[#allocation678_spill] sm:$0xff] }
 0x2f0   :  { %20441 = vst [vmem:[#allocation488_spill] sm:$0xff] %v17096_v31  ;;  %v20442_v9 = vld [vmem:[#allocation512_spill] sm:$0xff]  ;;  %v5695_v24 = vadd.f32 %v20444_v62, %v20287_v44  ;;  %v17110_v18 = vld [vmem:[%s19410_s5 + $0x98] sm:$0xff]  ;;  %v20446_v33 = vld [vmem:[#allocation635_spill] sm:$0xff]  ;;  %v5998_v35 = vmax.f32 %v5705_v23, 0.0  ;;  %v17124_v20 = vrot.slane %v20390_v34, %v20417_v6  ;;  %7467 = vmatpush1.msra.mxu0 %v16976_v41  ;;  %v6093_v6 = vmul.f32 %v6033_v14, %v6008_v28 }
 0x2f1   :  { %v17102_v50 = vadd.f32 %v20443_v27, %v20442_v9  ;;  %v17118_v27 = vadd.f32 %v20445_v26, %v16364_v59  ;;  %v5693_v62 = vadd.f32 %v20446_v33, %v20287_v44  ;;  %v17131_v32 = vld [vmem:[%s19410_s5 + $0x90] sm:$0xff]  ;;  %v20450_v33 = vld [vmem:[#allocation631_spill] sm:$0xff]  ;;  %v5990_v44 = vmax.f32 %v5701_v63, 0.0  ;;  %11302 = vmatmul.mubr.msk.f32.gmra.mxu0 %vm7187_vm1, %v17096_v31  ;;  %7312 = vmatprep.mubr.f32.mxu1 %v17110_v18 }
 0x2f2   :  { %v20447_v56 = vld [vmem:[#allocation520_spill] sm:$0xff]  ;;  %v20448_v26 = vld [vmem:[#allocation617_spill] sm:$0xff]  ;;  %v5057_v23 = vadd.f32 %v20450_v33, %v20449_v21  ;;  %v5989_v16 = vmax.f32 %v5699_v52, 0.0  ;;  %v6092_v53 = vmul.f32 %v17088_v8, %v6007_v11  ;;  %v17152_v63 = vld [vmem:[%s19410_s5 + $0xa0] sm:$0xff]  ;;  %v5981_v31 = vmax.f32 %v5695_v24, 0.0  ;;  %7313 = vmatmul.mubr.f32.gmra.mxu1 %v17131_v32  ;;  %7425 = vmatprep.mubr.f32.mxu0 %v20387_v39 }
 0x2f3   :  { %v17135_v47 = vadd.f32 %v20448_v26, %v20447_v56  ;;  %v20451_v34 = vld [vmem:[#allocation684_spill] sm:$0xff]  ;;  %v20452_v41 = vld [vmem:[#allocation629_spill] sm:$0xff]  ;;  %v6456_v26 = vadd.f32 %v16903_v7, %v20333_v12  ;;  %v20454_v33 = vld [vmem:[#allocation514_spill] sm:$0xff]  ;;  %v6452_v52 = vadd.f32 %v16869_v42, %v20332_v61  ;;  %v6084_v7 = vmul.f32 %v6033_v14, %v5999_v38 }
 0x2f4   :  { %7468 = vmatprep.subr.mxu0 %v20451_v34  ;;  %v5055_v43 = vadd.f32 %v20452_v41, %v20449_v21  ;;  %v20455_v28 = vld [vmem:[#allocation627_spill] sm:$0xff]  ;;  %v20456_v11 = vld [vmem:[#allocation624_spill] sm:$0xff]  ;;  %v5980_v12 = vmax.f32 %v5693_v62, 0.0  ;;  %v6083_v21 = vmul.f32 %v17088_v8, %v5998_v35  ;;  %v6450_v24 = vadd.f32 %v16829_v4, %v20332_v61 }
 0x2f5   :  { %7469 = vmatpush1.msra.mxu0 %v20453_v37  ;;  %v5051_v34 = vadd.f32 %v20455_v28, %v20454_v33  ;;  %v17162_v37 = vld [vmem:[%s19410_s5 + $0xb0] sm:$0xff]  ;;  %v5049_v41 = vadd.f32 %v20456_v11, %v20454_v33  ;;  %v17173_v42 = vld [vmem:[%s19410_s5 + $0xa8] sm:$0xff]  ;;  %v5352_v28 = vmax.f32 %v5057_v23, 0.0  ;;  %v6446_v62 = vadd.f32 %v16801_v45, %v20335_v13  ;;  %v17190_v23 = vld [vmem:[%s19410_s5 + $0xb8] sm:$0xff] }
 0x2f6   :  { %7470 = vmatprep.subr.mxu0 %v6093_v6  ;;  %20457 = vst [vmem:[#allocation478_spill] sm:$0xff] %v17173_v42  ;;  %v20458_v6 = vld [vmem:[#allocation620_spill] sm:$0xff]  ;;  %11303 = vmatmul.mubr.msk.f32.gmra.mxu0 %vm7187_vm1, %v17152_v63  ;;  %v6075_v4 = vmul.f32 %v6033_v14, %v5990_v44  ;;  %v5351_v11 = vmax.f32 %v5055_v43, 0.0  ;;  %v6074_v61 = vmul.f32 %v17088_v8, %v5989_v16  ;;  %v6665_v33 = vmax.f32 %v6456_v26, 0.0 }
 0x2f7   :  { %7471 = vmatpush2.msra.mxu0 %v6092_v53  ;;  %v17177_v38 = vadd.f32 %v20458_v6, %v16284_v46  ;;  %v20459_v53 = vld [vmem:[#allocation622_spill] sm:$0xff]  ;;  %7318 = vmatprep.mubr.f32.mxu1 %v17162_v37  ;;  %v5343_v45 = vmax.f32 %v5051_v34, 0.0  ;;  %v6657_v44 = vmax.f32 %v6452_v52, 0.0  ;;  %v6066_v43 = vmul.f32 %v6033_v14, %v5981_v31  ;;  %v20460_v34 = vld [vmem:[#allocation615_spill] sm:$0xff] }
 0x2f8   :  { %7472 = vmatprep.subr.mxu0 %v6084_v7  ;;  %v5045_v35 = vadd.f32 %v20459_v53, %v16284_v46  ;;  %v6444_v7 = vadd.f32 %v16772_v25, %v20335_v13  ;;  %7319 = vmatmul.mubr.f32.gmra.mxu1 %v17173_v42  ;;  %v5342_v6 = vmax.f32 %v5049_v41, 0.0  ;;  %v6065_v16 = vmul.f32 %v17088_v8, %v5980_v12  ;;  %v20461_v8 = vld [vmem:[#allocation585_spill] sm:$0xff]  ;;  %v20523_v46 = vld [vmem:[#allocation483_spill] sm:$0xff] }
 0x2f9   :  { %7473 = vmatpush2.msra.mxu0 %v6083_v21  ;;  %v6440_v21 = vadd.f32 %v16742_v17, %v20338_v15  ;;  %v6656_v26 = vmax.f32 %v6450_v24, 0.0  ;;  %7431 = vmatprep.mubr.f32.mxu0 %v20387_v39  ;;  %v5037_v53 = vadd.f32 %v20460_v34, %v20447_v56  ;;  %v6438_v25 = vadd.f32 %v16722_v0, %v20338_v15 }
 0x2fa   :  { %7474 = vmatprep.subr.mxu0 %v6075_v4  ;;  %v6648_v52 = vmax.f32 %v6446_v62, 0.0  ;;  %11304 = vmatmul.mubr.msk.f32.gmra.mxu0 %vm7187_vm1, %v17190_v23  ;;  %v5437_v12 = vmul.f32 %v17114_v10, %v5352_v28  ;;  %v4401_v17 = vadd.f32 %v20461_v8, %v16364_v59  ;;  %v5334_v31 = vmax.f32 %v5045_v35, 0.0  ;;  %v20526_v59 = vld [vmem:[#allocation538_spill] sm:$0xff] }
 0x2fb   :  { %7475 = vmatpush2.msra.mxu0 %v6074_v61  ;;  %v5436_v14 = vmul.f32 %v17080_v60, %v5351_v11  ;;  %v6750_v61 = vmul.f32 %v17124_v20, %v6665_v33  ;;  %7615 = vmatprep.mubr.f32.mxu1 %v20387_v39  ;;  %v5333_v0 = vmax.f32 %v17177_v38, 0.0  ;;  %v6647_v41 = vmax.f32 %v6444_v7, 0.0  ;;  %v20462_v11 = vld [vmem:[#allocation528_spill] sm:$0xff]  ;;  %v20463_v38 = vld [vmem:[#allocation581_spill] sm:$0xff] }
 0x2fc   :  { %7476 = vmatprep.subr.mxu0 %v6066_v43  ;;  %v6742_v24 = vmul.f32 %v17017_v57, %v6657_v44  ;;  %11305 = vmatmul.mubr.msk.f32.vlgmr.msra.gmra.mxu1 %vm7187_vm1, %v16788_v51  ;;  %v5428_v28 = vmul.f32 %v17114_v10, %v5343_v45  ;;  %v5325_v62 = vmax.f32 %v17135_v47, 0.0  ;;  %v5427_v4 = vmul.f32 %v17080_v60, %v5342_v6  ;;  %v20464_v47 = vld [vmem:[#allocation579_spill] sm:$0xff] }
 0x2fd   :  { %7477 = vmatpush2.msra.mxu0 %v6065_v16  ;;  %v6639_v35 = vmax.f32 %v6440_v21, 0.0  ;;  %v6741_v33 = vmul.f32 %v17124_v20, %v6656_v26  ;;  %7802 = vmatpush1.msra.mxu1 %v6750_v61  ;;  %v4395_v7 = vadd.f32 %v20463_v38, %v20462_v11  ;;  %v5324_v43 = vmax.f32 %v5037_v53, 0.0  ;;  %v17229_v21 = vld [vmem:[%s19406_s1 + $0x2d] sm:$0xff]  ;;  %v20465_v53 = vld [vmem:[#allocation683_spill] sm:$0xff] }
 0x2fe   :  { %7478 = vmatprep.subr.mxu0 %v5437_v12  ;;  %v6638_v44 = vmax.f32 %v6438_v25, 0.0  ;;  %7803 = vmatprep.subr.mxu1 %v6742_v24  ;;  %v6733_v16 = vmul.f32 %v17017_v57, %v6648_v52  ;;  %v3388_v45 = vmax.f32 %v17102_v50, 0.0  ;;  %v4393_v34 = vadd.f32 %v20464_v47, %v20462_v11  ;;  %v20466_v25 = vld [vmem:[#allocation577_spill] sm:$0xff] }
 0x2ff   :  { %7479 = vmatpush2.msra.mxu0 %v5436_v14  ;;  %7804 = vmatpush1.msra.mxu1 %v6741_v33  ;;  %v5419_v6 = vmul.f32 %v17114_v10, %v5334_v31  ;;  %v17233_v26 = vrot.slane %v17229_v21, %v20389_v49  ;;  %v4389_v52 = vadd.f32 %v20466_v25, %v20465_v53  ;;  %v4696_v50 = vmax.f32 %v4401_v17, 0.0  ;;  %v20467_v31 = vld [vmem:[#allocation575_spill] sm:$0xff]  ;;  %v20509_v11 = vld [vmem:[#allocation417_spill] sm:$0xff] }
 0x300   :  { %7480 = vmatprep.subr.mxu0 %v5428_v28  ;;  %v5418_v12 = vmul.f32 %v17080_v60, %v5333_v0  ;;  %v6732_v8 = vmul.f32 %v17124_v20, %v6647_v41  ;;  %7621 = vmatprep.mubr.f32.mxu1 %v20387_v39  ;;  %v4387_v14 = vadd.f32 %v20467_v31, %v20465_v53  ;;  %v4695_v61 = vmax.f32 %v17118_v27, 0.0  ;;  %v20468_v28 = vld [vmem:[#allocation535_spill] sm:$0xff]  ;;  %v20469_v0 = vld [vmem:[#allocation573_spill] sm:$0xff] }
 0x301   :  { %7481 = vmatpush2.msra.mxu0 %v5427_v4  ;;  %7805 = vmatprep.subr.mxu1 %v6733_v16  ;;  %v6724_v24 = vmul.f32 %v17017_v57, %v6639_v35  ;;  %v5410_v17 = vmul.f32 %v17114_v10, %v5325_v62  ;;  %v4383_v4 = vadd.f32 %v20469_v0, %v20468_v28  ;;  %v4687_v41 = vmax.f32 %v4395_v7, 0.0  ;;  %v20470_v27 = vld [vmem:[#allocation571_spill] sm:$0xff]  ;;  %v20471_v57 = vld [vmem:[#allocation674_spill] sm:$0xff] }
 0x302   :  { %7482 = vmatprep.subr.mxu0 %v5419_v6  ;;  %11306 = vmatmul.mubr.msk.f32.gmra.mxu1 %vm7187_vm1, %v16910_v22  ;;  %v5409_v33 = vmul.f32 %v17080_v60, %v5324_v43  ;;  %v6723_v38 = vmul.f32 %v17124_v20, %v6638_v44  ;;  %v4381_v16 = vadd.f32 %v20470_v27, %v20468_v28  ;;  %v4686_v47 = vmax.f32 %v4393_v34, 0.0  ;;  %v20472_v62 = vld [vmem:[#allocation446_spill] sm:$0xff]  ;;  %v20473_v7 = vld [vmem:[#allocation511_spill] sm:$0xff]  ;;  %v20474_v6 = vld [vmem:[#allocation568_spill] sm:$0xff] }
 0x303   :  { %7806 = vmatpush1.msra.mxu1 %v6732_v8  ;;  %7483 = vmatpush2.msra.mxu0 %v5418_v12  ;;  %v4717_v22 = vrot.slane %v17229_v21, %v20393_v5  ;;  %v3473_v10 = vmul.f32 %v20471_v57, %v3388_v45  ;;  %v1410_v35 = vmax.f32 %v20472_v62, 0.0  ;;  %v3745_v60 = vadd.f32 %v20474_v6, %v20473_v7  ;;  %v20475_v44 = vld [vmem:[#allocation566_spill] sm:$0xff]  ;;  %v20524_v53 = vld [vmem:[#allocation527_spill] sm:$0xff] }
 0x304   :  { %7807 = vmatprep.subr.mxu1 %v6724_v24  ;;  %7484 = vmatprep.subr.mxu0 %v5410_v17  ;;  %v4678_v43 = vmax.f32 %v4389_v52, 0.0  ;;  %v4781_v20 = vmul.f32 %v17233_v26, %v4696_v50  ;;  %v3743_v25 = vadd.f32 %v20475_v44, %v20473_v7  ;;  %v4677_v12 = vmax.f32 %v4387_v14, 0.0  ;;  %v20477_v34 = vld [vmem:[#allocation666_spill] sm:$0xff]  ;;  %v20482_v50 = vld [vmem:[#allocation564_spill] sm:$0xff] }
 0x305   :  { %7808 = vmatpush1.msra.mxu1 %v6723_v38  ;;  %7485 = vmatpush2.msra.mxu0 %v5409_v33  ;;  %v4780_v8 = vmul.f32 %v4717_v22, %v4695_v61  ;;  %v20476_v45 = vmax.f32 %v20432_v29, 0.0  ;;  %v20479_v24 = vmax.f32 %v20433_v48, 0.0  ;;  %v20481_v17 = vld [vmem:[#allocation542_spill] sm:$0xff]  ;;  %v4669_v33 = vmax.f32 %v4383_v4, 0.0 }
 0x306   :  { %7627 = vmatprep.mubr.f32.mxu1 %v20387_v39  ;;  %7890 = vmatprep.subr.mxu1 %v3473_v10  ;;  %v3739_v0 = vadd.f32 %v20482_v50, %v20481_v17  ;;  %v4772_v14 = vmul.f32 %v17233_v26, %v4687_v41  ;;  %v20483_v29 = vld [vmem:[#allocation562_spill] sm:$0xff]  ;;  %v4668_v38 = vmax.f32 %v4381_v16, 0.0  ;;  %v4771_v27 = vmul.f32 %v4717_v22, %v4686_v47  ;;  %v12305_v16 = vld [vmem:[%s19410_s5 + $0x8] sm:$0xff] }
 0x307   :  { %v17266_v31 = vmul.f32 %v20477_v34, %v20476_v45  ;;  %v17271_v52 = vmul.f32 %v20430_v3, %v20479_v24  ;;  %7486 = vmatprep.subr.mxu0 %v4781_v20  ;;  %11307 = vmatmul.mubr.msk.f32.gmra.mxu1 %vm7187_vm1, %v16943_v1  ;;  %v3737_v61 = vadd.f32 %v20483_v29, %v20481_v17  ;;  %v20484_v48 = vmax.f32 %v20436_v54, 0.0  ;;  %v20487_v1 = vld [vmem:[#allocation560_spill] sm:$0xff]  ;;  %v20489_v20 = vld [vmem:[#allocation558_spill] sm:$0xff]  ;;  %v17306_v50 = vld [vmem:[%s19406_s1 + $0x24] sm:$0xff] }
 0x308   :  { %7487 = vmatpush2.msra.mxu0 %v4780_v8  ;;  %7633 = vmatprep.mubr.f32.mxu1 %v20387_v39  ;;  %v17287_v4 = vmul.f32 %v20430_v3, %v1410_v35  ;;  %v3733_v62 = vadd.f32 %v20487_v1, %v16747_v36  ;;  %v4040_v41 = vmax.f32 %v3745_v60, 0.0  ;;  %v4763_v6 = vmul.f32 %v17233_v26, %v4678_v43  ;;  %v20488_v47 = vld [vmem:[#allocation448_spill] sm:$0xff] }
 0x309   :  { %20478 = vst [vmem:[#allocation486_spill] sm:$0xff] %v17266_v31  ;;  %20480 = vst [vmem:[#allocation451_spill] sm:$0xff] %v17271_v52  ;;  %v17284_v10 = vmul.f32 %v20477_v34, %v20484_v48  ;;  %7488 = vmatprep.subr.mxu0 %v4772_v14  ;;  %7502 = vmatprep.mubr.f32.mxu0 %v12305_v16  ;;  %v3731_v44 = vadd.f32 %v20489_v20, %v16747_v36  ;;  %v4039_v8 = vmax.f32 %v3743_v25, 0.0  ;;  %v20490_v45 = vld [vmem:[#allocation556_spill] sm:$0xff]  ;;  %v20495_v20 = vld [vmem:[#allocation457_spill] sm:$0xff] }
 0x30a   :  { %20486 = vst [vmem:[#allocation673_spill] sm:$0xff] %v17287_v4  ;;  %v4762_v35 = vmul.f32 %v4717_v22, %v4677_v12  ;;  %7489 = vmatpush2.msra.mxu0 %v4771_v27  ;;  %v3727_v24 = vadd.f32 %v20490_v45, %v16017_v40  ;;  %v4031_v60 = vmax.f32 %v3739_v0, 0.0  ;;  %v4754_v43 = vmul.f32 %v17233_v26, %v4669_v33  ;;  %v20491_v12 = vld [vmem:[#allocation454_spill] sm:$0xff]  ;;  %v20494_v33 = vld [vmem:[#allocation456_spill] sm:$0xff] }
 0x30b   :  { %20485 = vst [vmem:[#allocation453_spill] sm:$0xff] %v17284_v10  ;;  %7490 = vmatprep.subr.mxu0 %v4763_v6  ;;  %11308 = vmatmul.mubr.msk.f32.gmra.mxu1 %vm7187_vm1, %v16993_v30  ;;  %v4065_v25 = vrot.slane %v17306_v50, %v20389_v49  ;;  %v17312_v14 = vadd.f32 %v20491_v12, %v20378_v58  ;;  %v20492_v0 = vld [vmem:[#allocation554_spill] sm:$0xff]  ;;  %v4030_v27 = vmax.f32 %v3737_v61, 0.0  ;;  %v20493_v30 = vld [vmem:[#allocation455_spill] sm:$0xff]  ;;  %v4022_v6 = vmax.f32 %v3733_v62, 0.0  ;;  %v20530_v17 = vld [vmem:[#allocation536_spill] sm:$0xff] }
 0x30c   :  { %v3725_v29 = vadd.f32 %v20492_v0, %v16017_v40  ;;  %v4753_v48 = vmul.f32 %v4717_v22, %v4668_v38  ;;  %7491 = vmatpush2.msra.mxu0 %v4762_v35  ;;  %7639 = vmatprep.mubr.f32.mxu1 %v20387_v39  ;;  %v17319_v26 = vadd.f32 %v20493_v30, %v20378_v58  ;;  %v20496_v22 = vld [vmem:[#allocation545_spill] sm:$0xff]  ;;  %v4021_v38 = vmax.f32 %v3731_v44, 0.0  ;;  %v20497_v12 = vld [vmem:[#allocation543_spill] sm:$0xff]  ;;  %v20510_v31 = vld [vmem:[#allocation466_spill] sm:$0xff] }
 0x30d   :  { %v17323_v1 = vadd.f32 %v20494_v33, %v20380_v55  ;;  %7492 = vmatprep.subr.mxu0 %v4754_v43  ;;  %v4125_v16 = vmul.f32 %v4065_v25, %v4040_v41  ;;  %v17327_v45 = vadd.f32 %v20495_v20, %v20380_v55  ;;  %v3178_v61 = vadd.f32 %v20496_v22, %v20442_v9  ;;  %v12307_v41 = vld [vmem:[%s19406_s1 + $0x1b] sm:$0xff]  ;;  %v20499_v44 = vld [vmem:[#allocation539_spill] sm:$0xff] }
 0x30e   :  { %v4124_v35 = vmul.f32 %v17053_v2, %v4039_v8  ;;  %7493 = vmatpush2.msra.mxu0 %v4753_v48  ;;  %v3176_v0 = vadd.f32 %v20497_v12, %v20442_v9  ;;  %v4013_v30 = vmax.f32 %v3727_v24, 0.0  ;;  %v4116_v62 = vmul.f32 %v4065_v25, %v4031_v60  ;;  %v20498_v43 = vld [vmem:[#allocation642_spill] sm:$0xff]  ;;  %v20500_v20 = vld [vmem:[#allocation461_spill] sm:$0xff] }
 0x30f   :  { %7494 = vmatprep.subr.mxu0 %v4125_v16  ;;  %11309 = vmatmul.mubr.msk.f32.gmra.mxu1 %vm7187_vm1, %v17046_v19  ;;  %v17340_v33 = vrot.slane %v12307_v41, %v20498_v43  ;;  %v17344_v8 = vadd.f32 %v20500_v20, %v20499_v44  ;;  %v20501_v48 = vld [vmem:[#allocation517_spill] sm:$0xff]  ;;  %v4012_v24 = vmax.f32 %v3725_v29, 0.0  ;;  %v4115_v16 = vmul.f32 %v17053_v2, %v4030_v27  ;;  %v20503_v19 = vld [vmem:[#allocation463_spill] sm:$0xff]  ;;  %v20504_v41 = vld [vmem:[#allocation464_spill] sm:$0xff] }
 0x310   :  { %v20502_v22 = vld [vmem:[#allocation541_spill] sm:$0xff]  ;;  %7495 = vmatpush2.msra.mxu0 %v4124_v35  ;;  %7645 = vmatprep.mubr.f32.mxu1 %v20387_v39  ;;  %v17352_v60 = vadd.f32 %v20503_v19, %v20378_v58  ;;  %v17356_v54 = vadd.f32 %v20504_v41, %v20380_v55  ;;  %v20505_v20 = vld [vmem:[#allocation540_spill] sm:$0xff]  ;;  %v4107_v49 = vmul.f32 %v4065_v25, %v4022_v6  ;;  %v3386_v13 = vmax.f32 %v3178_v61, 0.0  ;;  %v20511_v52 = vld [vmem:[#allocation534_spill] sm:$0xff] }
 0x311   :  { %v3172_v12 = vadd.f32 %v20502_v22, %v20501_v48  ;;  %v3170_v5 = vadd.f32 %v20505_v20, %v20501_v48  ;;  %7496 = vmatprep.subr.mxu0 %v4116_v62  ;;  %v20506_v29 = vld [vmem:[#allocation465_spill] sm:$0xff]  ;;  %v4106_v19 = vmul.f32 %v17053_v2, %v4021_v38  ;;  %v17369_v41 = vadd.f32 %v20510_v31, %v20509_v11  ;;  %v20512_v6 = vld [vmem:[#allocation488_spill] sm:$0xff]  ;;  %v20514_v61 = vld [vmem:[#allocation414_spill] sm:$0xff] }
 0x312   :  { %v17362_v22 = vadd.f32 %v20506_v29, %v20380_v55  ;;  %v20507_v27 = vld [vmem:[#allocation413_spill] sm:$0xff]  ;;  %7497 = vmatpush2.msra.mxu0 %v4115_v16  ;;  %v3385_v62 = vmax.f32 %v3176_v0, 0.0  ;;  %v4098_v29 = vmul.f32 %v4065_v25, %v4013_v30  ;;  %v20513_v55 = vld [vmem:[#allocation467_spill] sm:$0xff]  ;;  %v20515_v38 = vld [vmem:[#allocation532_spill] sm:$0xff]  ;;  %v4097_v31 = vmul.f32 %v17053_v2, %v4012_v24 }
 0x313   :  { %v20508_v35 = vld [vmem:[#allocation537_spill] sm:$0xff]  ;;  %v3164_v20 = vadd.f32 %v20511_v52, %v20507_v27  ;;  %7498 = vmatprep.subr.mxu0 %v4107_v49  ;;  %11310 = vmatmul.mubr.msk.f32.gmra.mxu1 %vm7187_vm1, %v20512_v6  ;;  %v3160_v16 = vadd.f32 %v20515_v38, %v20514_v61  ;;  %v3377_v56 = vmax.f32 %v3172_v12, 0.0  ;;  %v20516_v52 = vld [vmem:[#allocation468_spill] sm:$0xff]  ;;  %v3376_v6 = vmax.f32 %v3170_v5, 0.0  ;;  %v20520_v12 = vld [vmem:[#allocation471_spill] sm:$0xff] }
 0x314   :  { %v3166_v15 = vadd.f32 %v20508_v35, %v20507_v27  ;;  %v17377_v35 = vadd.f32 %v20513_v55, %v20509_v11  ;;  %7499 = vmatpush2.msra.mxu0 %v4106_v19  ;;  %7651 = vmatprep.mubr.f32.mxu1 %v20387_v39  ;;  %v17385_v49 = vadd.f32 %v20516_v52, %v20499_v44  ;;  %v20517_v0 = vld [vmem:[#allocation469_spill] sm:$0xff]  ;;  %v20518_v55 = vld [vmem:[#allocation530_spill] sm:$0xff]  ;;  %v20519_v38 = vld [vmem:[#allocation416_spill] sm:$0xff] }
 0x315   :  { %v17389_v25 = vadd.f32 %v20517_v0, %v20499_v44  ;;  %v3158_v30 = vadd.f32 %v20518_v55, %v20514_v61  ;;  %7500 = vmatprep.subr.mxu0 %v4098_v29  ;;  %v17395_v10 = vadd.f32 %v20520_v12, %v20519_v38  ;;  %v20521_v2 = vld [vmem:[#allocation524_spill] sm:$0xff]  ;;  %v20522_v24 = vld [vmem:[#allocation485_spill] sm:$0xff]  ;;  %v3471_v52 = vmul.f32 %v17340_v33, %v3386_v13  ;;  %v20525_v5 = vld [vmem:[#allocation670_spill] sm:$0xff] }
 0x316   :  { %v2522_v19 = vadd.f32 %v20522_v24, %v20521_v2  ;;  %v3368_v4 = vmax.f32 %v3166_v15, 0.0  ;;  %7501 = vmatpush2.msra.mxu0 %v4097_v31  ;;  %v2520_v0 = vadd.f32 %v20523_v46, %v20521_v2  ;;  %v3265_v28 = vadd.f32 %v20524_v53, %v20442_v9  ;;  %v20527_v12 = vld [vmem:[#allocation415_spill] sm:$0xff]  ;;  %v20528_v24 = vld [vmem:[#allocation481_spill] sm:$0xff]  ;;  %v20529_v31 = vld [vmem:[#allocation522_spill] sm:$0xff] }
 0x317   :  { %v3367_v55 = vmax.f32 %v3164_v20, 0.0  ;;  %v3470_v29 = vmul.f32 %v20525_v5, %v3385_v62  ;;  %7503 = vmatmul.mubr.f32.vlgmr.msra.gmra.mxu0 %v20526_v59  ;;  %11311 = vmatmul.mubr.msk.f32.gmra.mxu1 %vm7187_vm1, %v17152_v63  ;;  %v2516_v15 = vadd.f32 %v20528_v24, %v20527_v12  ;;  %v3261_v13 = vadd.f32 %v20529_v31, %v20501_v48  ;;  %v20531_v53 = vld [vmem:[#allocation531_spill] sm:$0xff]  ;;  %v20533_v59 = vld [vmem:[#allocation521_spill] sm:$0xff] }
 0x318   :  { %v3359_v7 = vmax.f32 %v3160_v16, 0.0  ;;  %7664 = vmatprep.subr.mxu0 %v3471_v52  ;;  %v3462_v46 = vmul.f32 %v17340_v33, %v3377_v56  ;;  %7508 = vmatprep.mubr.f32.mxu0 %v20530_v17  ;;  %v20532_v20 = vld [vmem:[#allocation475_spill] sm:$0xff]  ;;  %v3259_v9 = vadd.f32 %v20533_v59, %v20501_v48  ;;  %v3358_v63 = vmax.f32 %v3158_v30, 0.0  ;;  %v20535_v56 = vld [vmem:[#allocation518_spill] sm:$0xff] }
 0x319   :  { %v17416_v62 = vadd.f32 %v20532_v20, %v20531_v53  ;;  %v3461_v36 = vmul.f32 %v20525_v5, %v3376_v6  ;;  %7665 = vmatpush1.msra.mxu0 %v3470_v29  ;;  %7657 = vmatprep.mubr.f32.mxu1 %v20387_v39  ;;  %v20534_v16 = vld [vmem:[#allocation479_spill] sm:$0xff]  ;;  %v2730_v24 = vmax.f32 %v2522_v19, 0.0  ;;  %v3255_v17 = vadd.f32 %v20535_v56, %v20507_v27  ;;  %v20536_v20 = vld [vmem:[#allocation477_spill] sm:$0xff]  ;;  %v20537_v19 = vld [vmem:[#allocation516_spill] sm:$0xff] }
 0x31a   :  { %v2514_v52 = vadd.f32 %v20534_v16, %v20527_v12  ;;  %7666 = vmatprep.subr.mxu0 %v3462_v46  ;;  %v3453_v31 = vmul.f32 %v17340_v33, %v3368_v4  ;;  %v2510_v42 = vadd.f32 %v20536_v20, %v20531_v53  ;;  %v2729_v59 = vmax.f32 %v2520_v0, 0.0  ;;  %v20538_v56 = vld [vmem:[#allocation533_spill] sm:$0xff] }
 0x31b   :  { %v3387_v30 = vmax.f32 %v3265_v28, 0.0  ;;  %v3452_v6 = vmul.f32 %v20525_v5, %v3367_v55  ;;  %7667 = vmatpush1.msra.mxu0 %v3461_v36  ;;  %11312 = vmatmul.mubr.msk.f32.gmra.mxu1 %vm7187_vm1, %v17190_v23  ;;  %v2721_v29 = vmax.f32 %v2516_v15, 0.0  ;;  %v3253_v16 = vadd.f32 %v20537_v19, %v20507_v27  ;;  %v20539_v46 = vld [vmem:[#allocation473_spill] sm:$0xff]  ;;  %v20540_v28 = vld [vmem:[#allocation515_spill] sm:$0xff]  ;;  %v20541_v23 = vld [vmem:[#allocation492_spill] sm:$0xff] }
 0x31c   :  { %v3379_v48 = vmax.f32 %v3261_v13, 0.0  ;;  %7509 = vmatmul.mubr.f32.gmra.mxu0 %v20538_v56  ;;  %7668 = vmatprep.subr.mxu0 %v3453_v31  ;;  %v3444_v4 = vmul.f32 %v17340_v33, %v3359_v7  ;;  %v2504_v0 = vadd.f32 %v20539_v46, %v20519_v38  ;;  %v3249_v55 = vadd.f32 %v20540_v28, %v20514_v61  ;;  %v20542_v13 = vld [vmem:[#allocation513_spill] sm:$0xff]  ;;  %v20544_v46 = vld [vmem:[#allocation662_spill] sm:$0xff] }
 0x31d   :  { %v3378_v36 = vmax.f32 %v3259_v9, 0.0  ;;  %v3443_v20 = vmul.f32 %v20525_v5, %v3358_v63  ;;  %7669 = vmatpush1.msra.mxu0 %v3452_v6  ;;  %7514 = vmatprep.mubr.f32.mxu0 %v20541_v23  ;;  %v2720_v15 = vmax.f32 %v2514_v52, 0.0  ;;  %v3247_v19 = vadd.f32 %v20542_v13, %v20514_v61  ;;  %v20543_v7 = vld [vmem:[#allocation665_spill] sm:$0xff]  ;;  %v20545_v9 = vld [vmem:[#allocation510_spill] sm:$0xff]  ;;  %v20546_v5 = vld [vmem:[#allocation423_spill] sm:$0xff] }
 0x31e   :  { %v3370_v56 = vmax.f32 %v3255_v17, 0.0  ;;  %7670 = vmatprep.subr.mxu0 %v3444_v4  ;;  %7841 = vmatprep.mubr.f32.mxu1 %v20387_v39  ;;  %v2815_v33 = vmul.f32 %v20543_v7, %v2730_v24  ;;  %v2712_v31 = vmax.f32 %v2510_v42, 0.0  ;;  %v2814_v27 = vmul.f32 %v20544_v46, %v2729_v59  ;;  %v20547_v6 = vld [vmem:[#allocation424_spill] sm:$0xff]  ;;  %v20548_v4 = vld [vmem:[#allocation507_spill] sm:$0xff] }
 0x31f   :  { %v2611_v28 = vadd.f32 %v20545_v9, %v20521_v2  ;;  %v3472_v63 = vmul.f32 %v20546_v5, %v3387_v30  ;;  %7671 = vmatpush1.msra.mxu0 %v3443_v20  ;;  %11313 = vmatmul.mubr.msk.f32.vlgmr.msra.gmra.mxu1 %vm7187_vm1, %v16788_v51  ;;  %v2711_v52 = vmax.f32 %v17416_v62, 0.0  ;;  %v3369_v17 = vmax.f32 %v3253_v16, 0.0  ;;  %v20549_v62 = vld [vmem:[#allocation505_spill] sm:$0xff] }
 0x320   :  { %7515 = vmatmul.mubr.f32.gmra.mxu0 %v20547_v6  ;;  %7672 = vmatprep.subr.mxu0 %v2815_v33  ;;  %v3464_v24 = vmul.f32 %v20471_v57, %v3379_v48  ;;  %v2806_v42 = vmul.f32 %v20543_v7, %v2721_v29  ;;  %v2703_v59 = vmax.f32 %v2504_v0, 0.0  ;;  %v2609_v23 = vadd.f32 %v20548_v4, %v20521_v2  ;;  %v20550_v0 = vld [vmem:[#allocation503_spill] sm:$0xff] }
 0x321   :  { %v3361_v13 = vmax.f32 %v3249_v55, 0.0  ;;  %v3463_v30 = vmul.f32 %v20546_v5, %v3378_v36  ;;  %7891 = vmatpush1.msra.mxu1 %v3472_v63  ;;  %7673 = vmatpush1.msra.mxu0 %v2814_v27  ;;  %v2805_v51 = vmul.f32 %v20544_v46, %v2720_v15  ;;  %v2605_v16 = vadd.f32 %v20549_v62, %v20527_v12  ;;  %v20551_v36 = vld [vmem:[#allocation509_spill] sm:$0xff] }
 0x322   :  { %v3360_v20 = vmax.f32 %v3247_v19, 0.0  ;;  %7892 = vmatprep.subr.mxu1 %v3464_v24  ;;  %7674 = vmatprep.subr.mxu0 %v2806_v42  ;;  %v3455_v48 = vmul.f32 %v20471_v57, %v3370_v56  ;;  %v2702_v29 = vmax.f32 %v17395_v10, 0.0  ;;  %v2603_v33 = vadd.f32 %v20550_v0, %v20527_v12  ;;  %v20552_v19 = vld [vmem:[#allocation500_spill] sm:$0xff]  ;;  %v20561_v0 = vld [vmem:[#allocation658_spill] sm:$0xff] }
 0x323   :  { %v2732_v55 = vmax.f32 %v2611_v28, 0.0  ;;  %7893 = vmatpush1.msra.mxu1 %v3463_v30  ;;  %7520 = vmatprep.mubr.f32.mxu0 %v20551_v36  ;;  %v2797_v27 = vmul.f32 %v20543_v7, %v2712_v31  ;;  %v2074_v15 = vmax.f32 %v17389_v25, 0.0  ;;  %v2796_v9 = vmul.f32 %v20544_v46, %v2711_v52  ;;  %v20553_v28 = vld [vmem:[#allocation421_spill] sm:$0xff]  ;;  %v20554_v52 = vld [vmem:[#allocation498_spill] sm:$0xff]  ;;  %v20562_v36 = vld [vmem:[#allocation419_spill] sm:$0xff] }
 0x324   :  { %v2599_v63 = vadd.f32 %v20552_v19, %v20531_v53  ;;  %v3454_v56 = vmul.f32 %v20546_v5, %v3369_v17  ;;  %7675 = vmatpush1.msra.mxu0 %v2805_v51  ;;  %7894 = vmatprep.subr.mxu1 %v3455_v48  ;;  %v2073_v10 = vmax.f32 %v17385_v49, 0.0  ;;  %v2731_v6 = vmax.f32 %v2609_v23, 0.0  ;;  %v20555_v23 = vld [vmem:[#allocation496_spill] sm:$0xff] }
 0x325   :  { %7521 = vmatmul.mubr.f32.gmra.mxu0 %v20553_v28  ;;  %7676 = vmatprep.subr.mxu0 %v2797_v27  ;;  %v3446_v24 = vmul.f32 %v20471_v57, %v3361_v13  ;;  %v2788_v31 = vmul.f32 %v20543_v7, %v2703_v59  ;;  %v2065_v25 = vmax.f32 %v17377_v35, 0.0  ;;  %v2597_v42 = vadd.f32 %v20554_v52, %v20531_v53  ;;  %v20556_v57 = vld [vmem:[#allocation686_spill] sm:$0xff] }
 0x326   :  { %v2723_v4 = vmax.f32 %v2605_v16, 0.0  ;;  %v3445_v17 = vmul.f32 %v20546_v5, %v3360_v20  ;;  %7895 = vmatpush1.msra.mxu1 %v3454_v56  ;;  %7677 = vmatpush1.msra.mxu0 %v2796_v9  ;;  %v2787_v49 = vmul.f32 %v20544_v46, %v2702_v29  ;;  %v2593_v30 = vadd.f32 %v20555_v23, %v20519_v38  ;;  %v20557_v59 = vld [vmem:[#allocation494_spill] sm:$0xff]  ;;  %v20559_v16 = vld [vmem:[#allocation669_spill] sm:$0xff]  ;;  %v20563_v9 = vld [vmem:[#allocation504_spill] sm:$0xff] }
 0x327   :  { %v2722_v51 = vmax.f32 %v2603_v33, 0.0  ;;  %7896 = vmatprep.subr.mxu1 %v3446_v24  ;;  %7678 = vmatprep.subr.mxu0 %v2788_v31  ;;  %v2817_v7 = vmul.f32 %v20556_v57, %v2732_v55  ;;  %v2064_v35 = vmax.f32 %v17369_v41, 0.0  ;;  %v2591_v13 = vadd.f32 %v20557_v59, %v20519_v38  ;;  %v20558_v5 = vld [vmem:[#allocation506_spill] sm:$0xff] }
 0x328   :  { %v2714_v62 = vmax.f32 %v2599_v63, 0.0  ;;  %7897 = vmatpush1.msra.mxu1 %v3445_v17  ;;  %7526 = vmatprep.mubr.f32.mxu0 %v20558_v5  ;;  %v2159_v20 = vmul.f32 %v20559_v16, %v2074_v15  ;;  %v20560_v46 = vld [vmem:[#allocation462_spill] sm:$0xff]  ;;  %v2056_v29 = vmax.f32 %v17362_v22, 0.0  ;;  %v2158_v33 = vmul.f32 %v20561_v0, %v2073_v10  ;;  %v20564_v63 = vld [vmem:[#allocation460_spill] sm:$0xff] }
 0x329   :  { %v1846_v48 = vadd.f32 %v20560_v46, %v20378_v58  ;;  %v2816_v55 = vmul.f32 %v20562_v36, %v2731_v6  ;;  %7679 = vmatpush1.msra.mxu0 %v2787_v49  ;;  %7898 = vmatprep.subr.mxu1 %v2817_v7  ;;  %v2055_v41 = vmax.f32 %v17356_v54, 0.0  ;;  %v2713_v27 = vmax.f32 %v2597_v42, 0.0  ;;  %v20565_v54 = vld [vmem:[#allocation459_spill] sm:$0xff]  ;;  %v20566_v52 = vld [vmem:[#allocation458_spill] sm:$0xff] }
 0x32a   :  { %7527 = vmatmul.mubr.f32.gmra.mxu0 %v20563_v9  ;;  %7680 = vmatprep.subr.mxu0 %v2159_v20  ;;  %v2808_v19 = vmul.f32 %v20556_v57, %v2723_v4  ;;  %v2150_v15 = vmul.f32 %v20559_v16, %v2065_v25  ;;  %v1953_v56 = vadd.f32 %v20564_v63, %v20499_v44  ;;  %v2047_v22 = vmax.f32 %v17352_v60, 0.0  ;;  %v20567_v17 = vld [vmem:[#allocation482_spill] sm:$0xff]  ;;  %v20574_v9 = vld [vmem:[#allocation644_spill] sm:$0xff]  ;;  %v20623_v44 = vld [vmem:[#allocation599_spill] sm:$0xff] }
 0x32b   :  { %v2705_v10 = vmax.f32 %v2593_v30, 0.0  ;;  %v2807_v6 = vmul.f32 %v20562_v36, %v2722_v51  ;;  %7899 = vmatpush1.msra.mxu1 %v2816_v55  ;;  %7681 = vmatpush1.msra.mxu0 %v2158_v33  ;;  %v1949_v28 = vadd.f32 %v20565_v54, %v20509_v11  ;;  %v2149_v24 = vmul.f32 %v20561_v0, %v2064_v35  ;;  %v20568_v23 = vld [vmem:[#allocation450_spill] sm:$0xff]  ;;  %v20569_v51 = vld [vmem:[#allocation452_spill] sm:$0xff] }
 0x32c   :  { %v2704_v31 = vmax.f32 %v2591_v13, 0.0  ;;  %7900 = vmatprep.subr.mxu1 %v2808_v19  ;;  %7682 = vmatprep.subr.mxu0 %v2150_v15  ;;  %v2799_v25 = vmul.f32 %v20556_v57, %v2714_v62  ;;  %v1947_v42 = vadd.f32 %v20566_v52, %v20509_v11  ;;  %v2076_v60 = vmax.f32 %v17344_v8, 0.0  ;;  %v20570_v8 = vld [vmem:[#allocation480_spill] sm:$0xff]  ;;  %v20621_v58 = vld [vmem:[#allocation690_spill] sm:$0xff]  ;;  %v20622_v11 = vld [vmem:[#allocation683_spill] sm:$0xff] }
 0x32d   :  { %v2046_v4 = vmax.f32 %v1846_v48, 0.0  ;;  %7901 = vmatpush1.msra.mxu1 %v2807_v6  ;;  %7532 = vmatprep.mubr.f32.mxu0 %v20567_v17  ;;  %v2141_v49 = vmul.f32 %v20559_v16, %v2056_v29  ;;  %v1419_v30 = vmax.f32 %v20568_v23, 0.0  ;;  %v1420_v7 = vmax.f32 %v20569_v51, 0.0  ;;  %v20582_v17 = vld [vmem:[#allocation696_spill] sm:$0xff]  ;;  %v20583_v51 = vld [vmem:[#allocation679_spill] sm:$0xff]  ;;  %v20625_v53 = vld [vmem:[#allocation614_spill] sm:$0xff] }
 0x32e   :  { %v2140_v35 = vmul.f32 %v20561_v0, %v2055_v41  ;;  %v2798_v59 = vmul.f32 %v20562_v36, %v2713_v27  ;;  %7683 = vmatpush1.msra.mxu0 %v2149_v24  ;;  %7902 = vmatprep.subr.mxu1 %v2799_v25  ;;  %v2048_v13 = vmax.f32 %v17312_v14, 0.0  ;;  %v2075_v62 = vmax.f32 %v1953_v56, 0.0  ;;  %v20571_v27 = vld [vmem:[#allocation661_spill] sm:$0xff]  ;;  %v20580_v25 = vld [vmem:[#allocation647_spill] sm:$0xff] }
 0x32f   :  { %7533 = vmatmul.mubr.f32.gmra.mxu0 %v20570_v8  ;;  %7684 = vmatprep.subr.mxu0 %v2141_v49  ;;  %v2790_v5 = vmul.f32 %v20556_v57, %v2705_v10  ;;  %v2132_v20 = vmul.f32 %v20559_v16, %v2047_v22  ;;  %v2049_v46 = vmax.f32 %v17319_v26, 0.0  ;;  %v2057_v48 = vmax.f32 %v17323_v1, 0.0  ;;  %v20576_v10 = vld [vmem:[#allocation497_spill] sm:$0xff]  ;;  %v20587_v8 = vld [vmem:[#allocation478_spill] sm:$0xff] }
 0x330   :  { %v2067_v29 = vmax.f32 %v1949_v28, 0.0  ;;  %v2789_v33 = vmul.f32 %v20562_v36, %v2704_v31  ;;  %7903 = vmatpush1.msra.mxu1 %v2798_v59  ;;  %7685 = vmatpush1.msra.mxu0 %v2140_v35  ;;  %v2058_v55 = vmax.f32 %v17327_v45, 0.0  ;;  %v2066_v14 = vmax.f32 %v1947_v42, 0.0  ;;  %v20578_v28 = vld [vmem:[#allocation638_spill] sm:$0xff]  ;;  %v20579_v31 = vld [vmem:[#allocation671_spill] sm:$0xff]  ;;  %v20584_v59 = vld [vmem:[#allocation549_spill] sm:$0xff] }
 0x331   :  { %v2131_v41 = vmul.f32 %v20561_v0, %v2046_v4  ;;  %7904 = vmatprep.subr.mxu1 %v2790_v5  ;;  %7686 = vmatprep.subr.mxu0 %v2132_v20  ;;  %v2161_v57 = vmul.f32 %v20571_v27, %v2076_v60  ;;  %v17527_v16 = vmul.f32 %v20430_v3, %v1419_v30  ;;  %v20572_v26 = vmax.f32 %v20488_v47, 0.0  ;;  %v20573_v0 = vld [vmem:[#allocation657_spill] sm:$0xff]  ;;  %v20575_v47 = vld [vmem:[#allocation484_spill] sm:$0xff]  ;;  %v20581_v4 = vld [vmem:[#allocation626_spill] sm:$0xff] }
 0x332   :  { %7905 = vmatpush1.msra.mxu1 %v2789_v33  ;;  %7538 = vmatprep.mubr.f32.mxu0 %v17110_v18  ;;  %v17537_v45 = vrot.slane %v17306_v50, %v20498_v43  ;;  %v2160_v36 = vmul.f32 %v20573_v0, %v2075_v62  ;;  %v17542_v19 = vrot.slane %v17306_v50, %v20574_v9  ;;  %v12308_v42 = vld [vmem:[%s19406_s1 + $0x36] sm:$0xff] }
 0x333   :  { %v17533_v1 = vmul.f32 %v20477_v34, %v20572_v26  ;;  %7687 = vmatpush1.msra.mxu0 %v2131_v41  ;;  %7906 = vmatprep.subr.mxu1 %v2161_v57  ;;  %v1505_v3 = vmul.f32 %v20477_v34, %v1420_v7  ;;  %v2133_v18 = vmul.f32 %v20573_v0, %v2048_v13  ;;  %v20577_v34 = vld [vmem:[#allocation547_spill] sm:$0xff]  ;;  %v20585_v13 = vld [vmem:[#allocation508_spill] sm:$0xff]  ;;  %v20588_v5 = vld [vmem:[#allocation682_spill] sm:$0xff] }
 0x334   :  { %7539 = vmatmul.mubr.f32.gmra.mxu0 %v17131_v32  ;;  %7688 = vmatprep.subr.mxu0 %v20575_v47  ;;  %v2152_v15 = vmul.f32 %v20571_v27, %v2067_v29  ;;  %v2134_v63 = vmul.f32 %v20571_v27, %v2049_v46  ;;  %v2142_v56 = vmul.f32 %v20573_v0, %v2057_v48  ;;  %v4014_v54 = vmax.f32 %v20577_v34, 0.0  ;;  %v20589_v46 = vld [vmem:[#allocation495_spill] sm:$0xff]  ;;  %v20591_v29 = vld [vmem:[#allocation704_spill] sm:$0xff]  ;;  %v20595_v26 = vld [vmem:[#allocation633_spill] sm:$0xff] }
 0x335   :  { %v2151_v22 = vmul.f32 %v20573_v0, %v2066_v14  ;;  %7907 = vmatpush1.msra.mxu1 %v2160_v36  ;;  %7689 = vmatpush1.msra.mxu0 %v20576_v10  ;;  %v2143_v6 = vmul.f32 %v20571_v27, %v2058_v55  ;;  %v17557_v32 = vrot.slane %v17229_v21, %v20574_v9  ;;  %v20593_v55 = vld [vmem:[#allocation676_spill] sm:$0xff]  ;;  %v12309_v14 = vld [vmem:[%s19406_s1 + $0x3f] sm:$0xff]  ;;  %v20594_v27 = vld [vmem:[#allocation553_spill] sm:$0xff] }
 0x336   :  { %v17561_v24 = vrot.slane %v17229_v21, %v20578_v28  ;;  %7908 = vmatprep.subr.mxu1 %v2152_v15  ;;  %7690 = vmatprep.subr.mxu0 %v20579_v31  ;;  %v17566_v52 = vrot.slane %v17229_v21, %v20580_v25  ;;  %v17572_v60 = vrot.slane %v12308_v42, %v20578_v28  ;;  %v20596_v0 = vld [vmem:[#allocation623_spill] sm:$0xff]  ;;  %v20598_v15 = vld [vmem:[#allocation692_spill] sm:$0xff]  ;;  %v20599_v10 = vld [vmem:[#allocation677_spill] sm:$0xff] }
 0x337   :  { %v5790_v49 = vadd.f32 %v20582_v17, %v20581_v4  ;;  %7909 = vmatpush1.msra.mxu1 %v2151_v22  ;;  %7544 = vmatprep.mubr.f32.mxu0 %v17162_v37  ;;  %v17579_v23 = vrot.slane %v17306_v50, %v20580_v25  ;;  %v17582_v30 = vrot.slane %v12308_v42, %v20574_v9  ;;  %v20586_v50 = vld [vmem:[#allocation694_spill] sm:$0xff]  ;;  %v20597_v47 = vld [vmem:[#allocation619_spill] sm:$0xff]  ;;  %v20602_v31 = vld [vmem:[#allocation557_spill] sm:$0xff] }
 0x338   :  { %7691 = vmatpush1.msra.mxu0 %v20583_v51  ;;  %7910 = vmatprep.subr.mxu1 %v2143_v6  ;;  %v17586_v7 = vrot.slane %v12308_v42, %v20498_v43  ;;  %v17590_v35 = vrot.slane %v17229_v21, %v20498_v43  ;;  %v17594_v37 = vadd.f32 %v20584_v59, %v16017_v40  ;;  %v20592_v21 = vld [vmem:[#allocation551_spill] sm:$0xff]  ;;  %v20600_v6 = vld [vmem:[#allocation542_spill] sm:$0xff]  ;;  %v20603_v17 = vld [vmem:[#allocation621_spill] sm:$0xff]  ;;  %v17636_v59 = vpop.f32.mrf.mxu1 }
 0x339   :  { %v5784_v62 = vadd.f32 %v20586_v50, %v20585_v13  ;;  %7545 = vmatmul.mubr.f32.gmra.mxu0 %v20587_v8  ;;  %7692 = vmatprep.subr.mxu0 %v20588_v5  ;;  %v17601_v20 = vrot.slane %v12308_v42, %v20580_v25  ;;  %v17604_v48 = vmul.f32 %v20589_v46, %v4014_v54  ;;  %v20601_v34 = vld [vmem:[#allocation555_spill] sm:$0xff]  ;;  %v20608_v5 = vld [vmem:[#allocation514_spill] sm:$0xff] }
 0x33a   :  { %v17608_v33 = vadd.f32 %v20592_v21, %v20591_v29  ;;  %7911 = vmatpush1.msra.mxu1 %v2142_v56  ;;  %7693 = vmatpush1.msra.mxu0 %v20593_v55  ;;  %v17615_v41 = vrot.slane %v12309_v14, %v20580_v25  ;;  %v17619_v57 = vadd.f32 %v20594_v27, %v20591_v29  ;;  %v5992_v56 = vmax.f32 %v5790_v49, 0.0  ;;  %v20605_v50 = vld [vmem:[#allocation675_spill] sm:$0xff]  ;;  %v20609_v21 = vld [vmem:[#allocation618_spill] sm:$0xff]  ;;  %v20610_v14 = vld [vmem:[#allocation501_spill] sm:$0xff] }
 0x33b   :  { %20590 = vst [vmem:[#allocation441_spill] sm:$0xff] %v17604_v48  ;;  %v5146_v36 = vadd.f32 %v20596_v0, %v20595_v26  ;;  %v5891_v22 = vadd.f32 %v20598_v15, %v20597_v47  ;;  %7912 = vmatprep.subr.mxu1 %v2134_v63  ;;  %7694 = vmatprep.subr.mxu0 %v20599_v10  ;;  %20604 = vst [vmem:[#allocation445_spill] sm:$0xff] %v17636_v59  ;;  %v20606_v49 = vld [vmem:[#allocation511_spill] sm:$0xff]  ;;  %v20611_v27 = vld [vmem:[#allocation689_spill] sm:$0xff]  ;;  %v5983_v15 = vmax.f32 %v5784_v62, 0.0 }
 0x33c   :  { %v17628_v54 = vadd.f32 %v20601_v34, %v20600_v6  ;;  %v17632_v42 = vadd.f32 %v20602_v31, %v20600_v6  ;;  %v5144_v51 = vadd.f32 %v20603_v17, %v20595_v26  ;;  %7913 = vmatpush1.msra.mxu1 %v2133_v18  ;;  %7695 = vmatpush1.msra.mxu0 %v20605_v50  ;;  %v20607_v63 = vld [vmem:[#allocation559_spill] sm:$0xff]  ;;  %v20612_v10 = vld [vmem:[#allocation702_spill] sm:$0xff]  ;;  %v20613_v34 = vld [vmem:[#allocation561_spill] sm:$0xff] }
 0x33d   :  { %v17641_v8 = vadd.f32 %v20607_v63, %v20606_v49  ;;  %v5140_v55 = vadd.f32 %v20609_v21, %v20608_v5  ;;  %v5885_v0 = vadd.f32 %v20611_v27, %v20610_v14  ;;  %7914 = vmatprep.subr.mxu1 %v1505_v3  ;;  %7696 = vmatprep.subr.mxu0 %v20612_v10  ;;  %v20614_v18 = vld [vmem:[#allocation420_spill] sm:$0xff]  ;;  %v20615_v17 = vld [vmem:[#allocation593_spill] sm:$0xff]  ;;  %v20616_v63 = vld [vmem:[#allocation535_spill] sm:$0xff]  ;;  %v5354_v27 = vmax.f32 %v5146_v36, 0.0 }
 0x33e   :  { %v17650_v31 = vadd.f32 %v20613_v34, %v20606_v49  ;;  %v17654_v50 = vadd.f32 %v20615_v17, %v20614_v18  ;;  %v20617_v28 = vld [vmem:[#allocation594_spill] sm:$0xff]  ;;  %7915 = vmatpush1.msra.mxu1 %v17527_v16  ;;  %v20618_v21 = vld [vmem:[#allocation700_spill] sm:$0xff]  ;;  %v6012_v10 = vmax.f32 %v5891_v22, 0.0  ;;  %v6077_v17 = vmul.f32 %v20621_v58, %v5992_v56  ;;  %v20628_v36 = vld [vmem:[#allocation673_spill] sm:$0xff]  ;;  %7847 = vmatprep.mubr.f32.mxu1 %v20387_v39 }
 0x33f   :  { %v17658_v43 = vadd.f32 %v20617_v28, %v20616_v63  ;;  %7697 = vmatpush2.msra.mxu0 %v20618_v21  ;;  %v20619_v3 = vld [vmem:[#allocation616_spill] sm:$0xff]  ;;  %7916 = vmatprep.subr.mxu1 %v17533_v1  ;;  %v20620_v34 = vld [vmem:[#allocation698_spill] sm:$0xff]  ;;  %v17669_v38 = vadd.f32 %v20623_v44, %v20622_v11  ;;  %v20624_v28 = vld [vmem:[#allocation645_spill] sm:$0xff]  ;;  %v5353_v12 = vmax.f32 %v5144_v51, 0.0  ;;  %v6003_v61 = vmax.f32 %v5885_v0, 0.0 }
 0x340   :  { %v5138_v62 = vadd.f32 %v20619_v3, %v20608_v5  ;;  %7698 = vmatprep.subr.mxu0 %v20620_v34  ;;  %v5134_v16 = vadd.f32 %v20625_v53, %v20624_v28  ;;  %v20626_v21 = vld [vmem:[#allocation502_spill] sm:$0xff]  ;;  %v17675_v3 = vpop.f32.mrf.mxu1  ;;  %7917 = vmatpush1.msra.mxu1 %v20628_v36  ;;  %v20629_v1 = vld [vmem:[#allocation697_spill] sm:$0xff]  ;;  %v20630_v22 = vld [vmem:[#allocation611_spill] sm:$0xff]  ;;  %v5345_v34 = vmax.f32 %v5140_v55, 0.0  ;;  %v6068_v53 = vmul.f32 %v20621_v58, %v5983_v15 }
 0x341   :  { %v5879_v2 = vadd.f32 %v20626_v21, %v20581_v4  ;;  %20627 = vst [vmem:[#allocation663_spill] sm:$0xff] %v17675_v3  ;;  %7699 = vmatpush2.msra.mxu0 %v20629_v1  ;;  %v5132_v56 = vadd.f32 %v20630_v22, %v20624_v28  ;;  %v20631_v44 = vld [vmem:[#allocation453_spill] sm:$0xff]  ;;  %v20632_v51 = vld [vmem:[#allocation603_spill] sm:$0xff]  ;;  %v20633_v21 = vld [vmem:[#allocation520_spill] sm:$0xff]  ;;  %v6097_v15 = vmul.f32 %v17615_v41, %v6012_v10 }
 0x342   :  { %7918 = vmatprep.subr.mxu1 %v20631_v44  ;;  %7700 = vmatprep.subr.mxu0 %v6077_v17  ;;  %v17685_v14 = vadd.f32 %v20632_v51, %v20614_v18  ;;  %v20634_v4 = vld [vmem:[#allocation609_spill] sm:$0xff]  ;;  %v20636_v59 = vld [vmem:[#allocation451_spill] sm:$0xff]  ;;  %v20637_v22 = vld [vmem:[#allocation598_spill] sm:$0xff]  ;;  %v5344_v17 = vmax.f32 %v5138_v62, 0.0  ;;  %v5439_v44 = vmul.f32 %v17586_v7, %v5354_v27  ;;  %v6088_v27 = vmul.f32 %v17615_v41, %v6003_v61 }
 0x343   :  { %v5128_v47 = vadd.f32 %v20634_v4, %v20633_v21  ;;  %v20635_v36 = vld [vmem:[#allocation685_spill] sm:$0xff]  ;;  %7919 = vmatpush1.msra.mxu1 %v20636_v59  ;;  %7701 = vmatpush2.msra.mxu0 %v20637_v22  ;;  %v20638_v55 = vld [vmem:[#allocation604_spill] sm:$0xff]  ;;  %v20639_v58 = vld [vmem:[#allocation486_spill] sm:$0xff]  ;;  %v5438_v59 = vmul.f32 %v17572_v60, %v5353_v12  ;;  %v17703_v22 = vpop.f32.mrf.mxu1  ;;  %v5335_v62 = vmax.f32 %v5132_v56, 0.0  ;;  %v5430_v10 = vmul.f32 %v17586_v7, %v5345_v34 }
 0x344   :  { %v5873_v1 = vadd.f32 %v20635_v36, %v20585_v13  ;;  %v17695_v0 = vadd.f32 %v20638_v55, %v20614_v18  ;;  %7920 = vmatprep.subr.mxu1 %v20639_v58  ;;  %7702 = vmatprep.subr.mxu0 %v6068_v53  ;;  %v20640_v4 = vld [vmem:[#allocation607_spill] sm:$0xff]  ;;  %v5336_v36 = vmax.f32 %v5134_v16, 0.0  ;;  %v5994_v13 = vmax.f32 %v5879_v2, 0.0  ;;  %20641 = vst [vmem:[#allocation449_spill] sm:$0xff] %v17703_v22  ;;  %v20642_v3 = vld [vmem:[#allocation490_spill] sm:$0xff]  ;;  %v20645_v16 = vld [vmem:[#allocation528_spill] sm:$0xff] }
 0x345   :  { %v5126_v51 = vadd.f32 %v20640_v4, %v20633_v21  ;;  %7921 = vmatpush1.msra.mxu1 %v20642_v3  ;;  %v20643_v55 = vld [vmem:[#allocation695_spill] sm:$0xff]  ;;  %v20644_v53 = vld [vmem:[#allocation526_spill] sm:$0xff]  ;;  %v20646_v4 = vld [vmem:[#allocation600_spill] sm:$0xff]  ;;  %v5327_v2 = vmax.f32 %v5128_v47, 0.0  ;;  %v5429_v61 = vmul.f32 %v17572_v60, %v5344_v17  ;;  %v4697_v17 = vmax.f32 %v17685_v14, 0.0 }
 0x346   :  { %7703 = vmatpush2.msra.mxu0 %v20643_v55  ;;  %v5235_v58 = vadd.f32 %v20644_v53, %v20595_v26  ;;  %7922 = vmatprep.subr.mxu1 %v6097_v15  ;;  %v17713_v12 = vadd.f32 %v20646_v4, %v20645_v16  ;;  %v20647_v48 = vld [vmem:[#allocation668_spill] sm:$0xff]  ;;  %v5985_v22 = vmax.f32 %v5873_v1, 0.0  ;;  %v20648_v55 = vld [vmem:[#allocation693_spill] sm:$0xff]  ;;  %v20649_v15 = vld [vmem:[#allocation602_spill] sm:$0xff]  ;;  %v17726_v1 = vpop.f32.mrf.mxu1 }
 0x347   :  { %7704 = vmatprep.subr.mxu0 %v5439_v44  ;;  %v5233_v3 = vadd.f32 %v20647_v48, %v20595_v26  ;;  %7923 = vmatpush2.msra.mxu1 %v20648_v55  ;;  %v4484_v44 = vadd.f32 %v20649_v15, %v20645_v16  ;;  %v20650_v34 = vld [vmem:[#allocation659_spill] sm:$0xff]  ;;  %v5326_v47 = vmax.f32 %v5126_v51, 0.0  ;;  %v6079_v55 = vmul.f32 %v17615_v41, %v5994_v13  ;;  %v20653_v13 = vld [vmem:[#allocation646_spill] sm:$0xff]  ;;  %v20656_v26 = vld [vmem:[#allocation688_spill] sm:$0xff] }
 0x348   :  { %7705 = vmatpush2.msra.mxu0 %v5438_v59  ;;  %v5229_v53 = vadd.f32 %v20650_v34, %v20608_v5  ;;  %7924 = vmatprep.subr.mxu1 %v6088_v27  ;;  %v20651_v4 = vld [vmem:[#allocation651_spill] sm:$0xff]  ;;  %v5421_v15 = vmul.f32 %v17586_v7, %v5336_v36  ;;  %v4698_v34 = vmax.f32 %v17695_v0, 0.0  ;;  %v5420_v27 = vmul.f32 %v17572_v60, %v5335_v62  ;;  %v20654_v62 = vld [vmem:[#allocation597_spill] sm:$0xff] }
 0x349   :  { %7706 = vmatprep.subr.mxu0 %v5430_v10  ;;  %v5227_v48 = vadd.f32 %v20651_v4, %v20608_v5  ;;  %v20652_v59 = vld [vmem:[#allocation691_spill] sm:$0xff]  ;;  %v5356_v51 = vmax.f32 %v5235_v58, 0.0  ;;  %v5223_v4 = vadd.f32 %v20653_v13, %v20624_v28  ;;  %v5355_v36 = vmax.f32 %v5233_v3, 0.0 }
 0x34a   :  { %7925 = vmatpush2.msra.mxu1 %v20652_v59  ;;  %7707 = vmatpush2.msra.mxu0 %v5429_v61  ;;  %v17738_v10 = vld [vmem:[%s19410_s5 + $0x28] sm:$0xff]  ;;  %v6070_v14 = vmul.f32 %v17615_v41, %v5985_v22  ;;  %v5412_v0 = vmul.f32 %v17586_v7, %v5327_v2  ;;  %v4476_v58 = vadd.f32 %v20654_v62, %v20622_v11  ;;  %v4689_v61 = vmax.f32 %v4484_v44, 0.0  ;;  %v17756_v2 = vpop.f32.mrf.mxu1 }
 0x34b   :  { %11314 = vmatmul.mubr.msk.f32.gmra.mxu1 %vm7187_vm1, %v17738_v10  ;;  %7926 = vmatprep.subr.mxu1 %v6079_v55  ;;  %v20655_v59 = vld [vmem:[#allocation639_spill] sm:$0xff]  ;;  %v5347_v5 = vmax.f32 %v5229_v53, 0.0  ;;  %v5411_v55 = vmul.f32 %v17572_v60, %v5326_v47  ;;  %v20658_v41 = vld [vmem:[#allocation636_spill] sm:$0xff]  ;;  %v5346_v7 = vmax.f32 %v5227_v48, 0.0  ;;  %v4688_v44 = vmax.f32 %v17713_v12, 0.0  ;;  %v20659_v53 = vld [vmem:[#allocation634_spill] sm:$0xff] }
 0x34c   :  { %7708 = vmatprep.subr.mxu0 %v5421_v15  ;;  %v5221_v56 = vadd.f32 %v20655_v59, %v20624_v28  ;;  %7927 = vmatpush2.msra.mxu1 %v20656_v26  ;;  %v20657_v13 = vld [vmem:[#allocation595_spill] sm:$0xff]  ;;  %v5217_v22 = vadd.f32 %v20658_v41, %v20633_v21  ;;  %v5215_v15 = vadd.f32 %v20659_v53, %v20633_v21  ;;  %v4680_v47 = vmax.f32 %v17669_v38, 0.0 }
 0x34d   :  { %7709 = vmatpush2.msra.mxu0 %v5420_v27  ;;  %v4472_v3 = vadd.f32 %v20657_v13, %v20616_v63  ;;  %7928 = vmatprep.subr.mxu1 %v6070_v14  ;;  %v20660_v26 = vld [vmem:[#allocation499_spill] sm:$0xff]  ;;  %v5441_v27 = vmul.f32 %v17601_v20, %v5356_v51  ;;  %v4783_v60 = vmul.f32 %v17590_v35, %v4698_v34  ;;  %v5338_v62 = vmax.f32 %v5223_v4, 0.0  ;;  %v20661_v34 = vld [vmem:[#allocation592_spill] sm:$0xff] }
 0x34e   :  { %7710 = vmatprep.subr.mxu0 %v5412_v0  ;;  %7853 = vmatprep.mubr.f32.mxu1 %v20387_v39  ;;  %v4782_v48 = vmul.f32 %v17561_v24, %v4697_v17  ;;  %v5440_v14 = vmul.f32 %v17582_v30, %v5355_v36  ;;  %v17771_v12 = vld [vmem:[%s19410_s5 + $0x40] sm:$0xff]  ;;  %v4679_v0 = vmax.f32 %v4476_v58, 0.0  ;;  %v5337_v51 = vmax.f32 %v5221_v56, 0.0 }
 0x34f   :  { %7929 = vmatpush2.msra.mxu1 %v20660_v26  ;;  %7711 = vmatpush2.msra.mxu0 %v5411_v55  ;;  %v5432_v38 = vmul.f32 %v17601_v20, %v5347_v5  ;;  %v4774_v17 = vmul.f32 %v17590_v35, %v4689_v61  ;;  %v4577_v4 = vadd.f32 %v20661_v34, %v20614_v18  ;;  %v4671_v36 = vmax.f32 %v4472_v3, 0.0  ;;  %v17780_v55 = vpop.f32.mrf.mxu1  ;;  %v20662_v56 = vld [vmem:[#allocation591_spill] sm:$0xff]  ;;  %v20663_v61 = vld [vmem:[#allocation590_spill] sm:$0xff] }
 0x350   :  { %11315 = vmatmul.mubr.msk.f32.gmra.mxu1 %vm7187_vm1, %v17771_v12  ;;  %7930 = vmatprep.subr.mxu1 %v5441_v27  ;;  %v5329_v59 = vmax.f32 %v5217_v22, 0.0  ;;  %v5431_v13 = vmul.f32 %v17582_v30, %v5346_v7  ;;  %v4041_v58 = vmax.f32 %v17641_v8, 0.0  ;;  %v4573_v41 = vadd.f32 %v20662_v56, %v20645_v16 }
 0x351   :  { %7712 = vmatprep.subr.mxu0 %v4783_v60  ;;  %7931 = vmatpush2.msra.mxu1 %v5440_v14  ;;  %v4773_v5 = vmul.f32 %v17561_v24, %v4688_v44  ;;  %v5328_v53 = vmax.f32 %v5215_v15, 0.0  ;;  %v4571_v3 = vadd.f32 %v20663_v61, %v20645_v16  ;;  %v4670_v22 = vmax.f32 %v17658_v43, 0.0  ;;  %v17799_v43 = vld [vmem:[%s19410_s5 + $0x58] sm:$0xff]  ;;  %v20668_v61 = vld [vmem:[#allocation584_spill] sm:$0xff] }
 0x352   :  { %7713 = vmatpush2.msra.mxu0 %v4782_v48  ;;  %7932 = vmatprep.subr.mxu1 %v5432_v38  ;;  %v5423_v7 = vmul.f32 %v17601_v20, %v5338_v62  ;;  %v4765_v8 = vmul.f32 %v17590_v35, %v4680_v47  ;;  %v4042_v26 = vmax.f32 %v17650_v31, 0.0  ;;  %v4700_v27 = vmax.f32 %v17654_v50, 0.0  ;;  %v20664_v60 = vld [vmem:[#allocation589_spill] sm:$0xff]  ;;  %v6544_v31 = vpop.f32.mrf.mxu1 }
 0x353   :  { %7714 = vmatprep.subr.mxu0 %v4774_v17  ;;  %7859 = vmatprep.mubr.f32.mxu1 %v20387_v39  ;;  %v4764_v44 = vmul.f32 %v17561_v24, %v4679_v0  ;;  %v5422_v15 = vmul.f32 %v17582_v30, %v5337_v51  ;;  %v4567_v47 = vadd.f32 %v20664_v60, %v20622_v11  ;;  %v4699_v48 = vmax.f32 %v4577_v4, 0.0  ;;  %v20665_v0 = vld [vmem:[#allocation588_spill] sm:$0xff]  ;;  %v20666_v4 = vld [vmem:[#allocation587_spill] sm:$0xff] }
 0x354   :  { %7933 = vmatpush2.msra.mxu1 %v5431_v13  ;;  %7715 = vmatpush2.msra.mxu0 %v4773_v5  ;;  %v5414_v50 = vmul.f32 %v17601_v20, %v5329_v59  ;;  %v4756_v62 = vmul.f32 %v17590_v35, %v4671_v36  ;;  %v4033_v14 = vmax.f32 %v17632_v42, 0.0  ;;  %v4565_v51 = vadd.f32 %v20665_v0, %v20622_v11  ;;  %v20667_v42 = vld [vmem:[#allocation586_spill] sm:$0xff] }
 0x355   :  { %11316 = vmatmul.mubr.msk.f32.gmra.mxu1 %vm7187_vm1, %v17799_v43  ;;  %7934 = vmatprep.subr.mxu1 %v5423_v7  ;;  %v4691_v38 = vmax.f32 %v4573_v41, 0.0  ;;  %v5413_v17 = vmul.f32 %v17582_v30, %v5328_v53  ;;  %v4024_v34 = vmax.f32 %v17619_v57, 0.0  ;;  %v4561_v13 = vadd.f32 %v20666_v4, %v20616_v63  ;;  %v6546_v53 = vpop.f32.mrf.mxu1 }
 0x356   :  { %7716 = vmatprep.subr.mxu0 %v4765_v8  ;;  %7935 = vmatpush2.msra.mxu1 %v5422_v15  ;;  %v4690_v56 = vmax.f32 %v4571_v3, 0.0  ;;  %v4755_v20 = vmul.f32 %v17561_v24, %v4670_v22  ;;  %v4032_v35 = vmax.f32 %v17628_v54, 0.0  ;;  %v4559_v36 = vadd.f32 %v20667_v42, %v20616_v63  ;;  %v17827_v54 = vld [vmem:[%s19410_s5 + $0x70] sm:$0xff]  ;;  %v20669_v8 = vld [vmem:[#allocation582_spill] sm:$0xff] }
 0x357   :  { %7717 = vmatpush2.msra.mxu0 %v4764_v44  ;;  %7936 = vmatprep.subr.mxu1 %v5414_v50  ;;  %v4785_v30 = vmul.f32 %v17566_v52, %v4700_v27  ;;  %v4127_v57 = vmul.f32 %v17537_v45, %v4042_v26  ;;  %v4023_v59 = vmax.f32 %v17608_v33, 0.0  ;;  %v4126_v41 = vmul.f32 %v20589_v46, %v4041_v58  ;;  %v17833_v33 = vpop.f32.mrf.mxu0  ;;  %v20674_v42 = vld [vmem:[#allocation576_spill] sm:$0xff] }
 0x358   :  { %7718 = vmatprep.subr.mxu0 %v4756_v62  ;;  %7865 = vmatprep.mubr.f32.mxu1 %v20387_v39  ;;  %v4682_v5 = vmax.f32 %v4567_v47, 0.0  ;;  %v4784_v24 = vmul.f32 %v17557_v32, %v4699_v48  ;;  %v3923_v3 = vadd.f32 %v20668_v61, %v20606_v49  ;;  %v4681_v22 = vmax.f32 %v4565_v51, 0.0  ;;  %v20670_v47 = vld [vmem:[#allocation580_spill] sm:$0xff] }
 0x359   :  { %7937 = vmatpush2.msra.mxu1 %v5413_v17  ;;  %7719 = vmatpush2.msra.mxu0 %v4755_v20  ;;  %v4776_v58 = vmul.f32 %v17566_v52, %v4691_v38  ;;  %v4118_v7 = vmul.f32 %v17537_v45, %v4033_v14  ;;  %v3921_v26 = vadd.f32 %v20669_v8, %v20606_v49  ;;  %v4673_v27 = vmax.f32 %v4561_v13, 0.0  ;;  %v20671_v62 = vld [vmem:[#allocation596_spill] sm:$0xff]  ;;  %v20672_v14 = vld [vmem:[#allocation578_spill] sm:$0xff]  ;;  %v20673_v20 = vld [vmem:[#allocation601_spill] sm:$0xff] }
 0x35a   :  { %11317 = vmatmul.mubr.msk.f32.gmra.mxu1 %vm7187_vm1, %v17827_v54  ;;  %7938 = vmatprep.subr.mxu1 %v4785_v30  ;;  %v4775_v44 = vmul.f32 %v17557_v32, %v4690_v56  ;;  %v4109_v15 = vmul.f32 %v17537_v45, %v4024_v34  ;;  %v4117_v60 = vmul.f32 %v20589_v46, %v4032_v35  ;;  %v4672_v50 = vmax.f32 %v4559_v36, 0.0  ;;  %v17852_v56 = vpop.f32.mrf.mxu0 }
 0x35b   :  { %7720 = vmatprep.subr.mxu0 %v4127_v57  ;;  %7939 = vmatpush2.msra.mxu1 %v4784_v24  ;;  %v3917_v48 = vadd.f32 %v20670_v47, %v20600_v6  ;;  %v6547_v0 = vadd.f32 %v6546_v53, %v20671_v62  ;;  %v3915_v51 = vadd.f32 %v20672_v14, %v20600_v6  ;;  %v4044_v4 = vmax.f32 %v3923_v3, 0.0  ;;  %v20676_v53 = vld [vmem:[#allocation572_spill] sm:$0xff]  ;;  %v20677_v3 = vld [vmem:[#allocation574_spill] sm:$0xff] }
 0x35c   :  { %7721 = vmatpush2.msra.mxu0 %v4126_v41  ;;  %7940 = vmatprep.subr.mxu1 %v4776_v58  ;;  %v6545_v38 = vadd.f32 %v6544_v31, %v20671_v62  ;;  %v4767_v17 = vmul.f32 %v17566_v52, %v4682_v5  ;;  %v4108_v34 = vmul.f32 %v20589_v46, %v4023_v59  ;;  %v17859_v31 = vld [vmem:[%s19410_s5 + $0x88] sm:$0xff]  ;;  %v4043_v36 = vmax.f32 %v3921_v26, 0.0  ;;  %v20678_v58 = vld [vmem:[#allocation605_spill] sm:$0xff] }
 0x35d   :  { %7722 = vmatprep.subr.mxu0 %v4118_v7  ;;  %7871 = vmatprep.mubr.f32.mxu1 %v20387_v39  ;;  %v4766_v13 = vmul.f32 %v17557_v32, %v4681_v22  ;;  %v6541_v35 = vadd.f32 %v17780_v55, %v20673_v20  ;;  %v17865_v46 = vadd.f32 %v20674_v42, %v20591_v29  ;;  %v20675_v55 = vmax.f32 %v17594_v37, 0.0 }
 0x35e   :  { %7941 = vmatpush2.msra.mxu1 %v4775_v44  ;;  %7723 = vmatpush2.msra.mxu0 %v4117_v60  ;;  %v4758_v30 = vmul.f32 %v17566_v52, %v4673_v27  ;;  %v4035_v59 = vmax.f32 %v3917_v48, 0.0  ;;  %v4757_v41 = vmul.f32 %v17557_v32, %v4672_v50  ;;  %v6539_v5 = vadd.f32 %v17756_v2, %v20673_v20  ;;  %v12315_v32 = vld [vmem:[%s19406_s1 + $0x48] sm:$0xff]  ;;  %v20679_v60 = vld [vmem:[#allocation449_spill] sm:$0xff] }
 0x35f   :  { %11318 = vmatmul.mubr.msk.f32.gmra.mxu1 %vm7187_vm1, %v17859_v31  ;;  %7942 = vmatprep.subr.mxu1 %v4767_v17  ;;  %v4100_v57 = vmul.f32 %v17537_v45, %v20675_v55  ;;  %v6668_v24 = vmax.f32 %v6547_v0, 0.0  ;;  %v17876_v61 = vadd.f32 %v20676_v53, %v16017_v40  ;;  %v3909_v52 = vadd.f32 %v20677_v3, %v20591_v29  ;;  %v12168_v45 = vpop.f32.mrf.mxu0  ;;  %v20680_v48 = vld [vmem:[#allocation441_spill] sm:$0xff]  ;;  %v20681_v50 = vld [vmem:[#allocation612_spill] sm:$0xff]  ;;  %v20682_v0 = vld [vmem:[#allocation663_spill] sm:$0xff] }
 0x360   :  { %7724 = vmatprep.subr.mxu0 %v4109_v15  ;;  %7943 = vmatpush2.msra.mxu1 %v4766_v13  ;;  %v4034_v22 = vmax.f32 %v3915_v51, 0.0  ;;  %v6667_v37 = vmax.f32 %v6545_v38, 0.0  ;;  %v17884_v2 = vrot.slane %v12315_v32, %v20580_v25  ;;  %v6535_v7 = vadd.f32 %v17726_v1, %v20678_v58  ;;  %v17901_v1 = vld [vmem:[%s19410_s5 + $0x8] sm:$0xff]  ;;  %v17910_v17 = vld [vmem:[%s19410_s5 + $0xa0] sm:$0xff]  ;;  %v20683_v55 = vld [vmem:[#allocation445_spill] sm:$0xff] }
 0x361   :  { %7725 = vmatpush2.msra.mxu0 %v4108_v34  ;;  %7944 = vmatprep.subr.mxu1 %v4758_v30  ;;  %v6659_v8 = vmax.f32 %v6541_v35, 0.0  ;;  %v4129_v26 = vmul.f32 %v17579_v23, %v4044_v4  ;;  %v4026_v27 = vmax.f32 %v17865_v46, 0.0  ;;  %v4128_v44 = vmul.f32 %v17542_v19, %v4043_v36  ;;  %v17921_v46 = vld [vmem:[%s19410_s5] sm:$0xff]  ;;  %v6625_v30 = vpop.f32.mrf.mxu0 }
 0x362   :  { %7726 = vmatprep.subr.mxu0 %v4100_v57  ;;  %7877 = vmatprep.mubr.f32.mxu1 %v20387_v39  ;;  %v17893_v15 = vrot.slane %v12315_v32, %v20574_v9  ;;  %v6533_v47 = vadd.f32 %v20679_v60, %v20678_v58  ;;  %v6529_v14 = vadd.f32 %v20682_v0, %v20681_v50  ;;  %v6658_v51 = vmax.f32 %v6539_v5, 0.0  ;;  %v20684_v5 = vld [vmem:[#allocation570_spill] sm:$0xff]  ;;  %v20685_v53 = vld [vmem:[#allocation619_spill] sm:$0xff] }
 0x363   :  { %7945 = vmatpush2.msra.mxu1 %v4757_v41  ;;  %7727 = vmatpush2.msra.mxu0 %v20680_v48  ;;  %v6753_v38 = vmul.f32 %v17884_v2, %v6668_v24  ;;  %v4120_v34 = vmul.f32 %v17579_v23, %v4035_v59  ;;  %v4017_v4 = vmax.f32 %v17876_v61, 0.0  ;;  %v4025_v13 = vmax.f32 %v3909_v52, 0.0  ;;  %v20686_v61 = vld [vmem:[#allocation703_spill] sm:$0xff] }
 0x364   :  { %7728 = vmatprep.mubr.f32.mxu0 %v17901_v1  ;;  %11319 = vmatmul.mubr.msk.f32.gmra.mxu1 %vm7187_vm1, %v17910_v17  ;;  %v4119_v35 = vmul.f32 %v17542_v19, %v4034_v22  ;;  %v6752_v42 = vmul.f32 %v17893_v15, %v6667_v37  ;;  %v6631_v36 = vadd.f32 %v12168_v45, %v20671_v62  ;;  %v6650_v59 = vmax.f32 %v6535_v7, 0.0  ;;  %v17939_v7 = vld [vmem:[%s19410_s5 + $0x20] sm:$0xff] }
 0x365   :  { %7946 = vmatprep.subr.mxu1 %v4129_v26  ;;  %7729 = vmatmul.mubr.f32.vlgmr.msra.gmra.mxu0 %v17921_v46  ;;  %v6527_v57 = vadd.f32 %v20683_v55, %v20681_v50  ;;  %v6744_v41 = vmul.f32 %v17884_v2, %v6659_v8  ;;  %v4016_v24 = vmax.f32 %v20684_v5, 0.0  ;;  %v5975_v3 = vadd.f32 %v20686_v61, %v20685_v53  ;;  %v17945_v8 = vld [vmem:[%s19410_s5 + $0xb8] sm:$0xff]  ;;  %v18006_v55 = vld [vmem:[%s19410_s5 + $0x68] sm:$0xff] }
 0x366   :  { %7947 = vmatpush2.msra.mxu1 %v4128_v44  ;;  %8027 = vmatprep.subr.mxu0 %v6753_v38  ;;  %v6649_v52 = vmax.f32 %v6533_v47, 0.0  ;;  %v6641_v22 = vmax.f32 %v6529_v14, 0.0  ;;  %v6743_v62 = vmul.f32 %v17893_v15, %v6658_v51  ;;  %v4111_v37 = vmul.f32 %v17579_v23, %v4026_v27  ;;  %v17958_v14 = vld [vmem:[%s19410_s5 + $0x18] sm:$0xff] }
 0x367   :  { %7948 = vmatprep.subr.mxu1 %v4120_v34  ;;  %8028 = vmatpush1.msra.mxu0 %v6752_v42  ;;  %v4110_v45 = vmul.f32 %v17542_v19, %v4025_v13  ;;  %v6626_v32 = vadd.f32 %v6625_v30, %v20673_v20  ;;  %v6669_v26 = vmax.f32 %v6631_v36, 0.0  ;;  %v6640_v27 = vmax.f32 %v6527_v57, 0.0  ;;  %v17992_v42 = vld [vmem:[%s19410_s5 + $0x50] sm:$0xff]  ;;  %v17999_v30 = vld [vmem:[%s19410_s5 + $0x48] sm:$0xff]  ;;  %v18013_v57 = vld [vmem:[%s19410_s5 + $0x60] sm:$0xff] }
 0x368   :  { %7883 = vmatprep.mubr.f32.mxu1 %v20387_v39  ;;  %7949 = vmatpush2.msra.mxu1 %v4119_v35  ;;  %v6735_v44 = vmul.f32 %v17884_v2, %v6650_v59  ;;  %v4102_v20 = vmul.f32 %v17579_v23, %v4017_v4  ;;  %v4101_v60 = vmul.f32 %v17542_v19, %v4016_v24  ;;  %v6013_v47 = vmax.f32 %v5975_v3, 0.0  ;;  %v11296_v19 = vld [vmem:[%s19406_s1 + $0x50] ss:$0 sm:$0xff]  ;;  %v18020_v59 = vld [vmem:[%s19410_s5 + $0x80] sm:$0xff]  ;;  %v18034_v5 = vld [vmem:[%s19410_s5 + $0x98] sm:$0xff] }
 0x369   :  { %8029 = vmatprep.subr.mxu0 %v6744_v41  ;;  %7734 = vmatprep.mubr.f32.mxu0 %v17939_v7  ;;  %v6621_v48 = vadd.f32 %v17833_v33, %v20678_v58  ;;  %v6734_v0 = vmul.f32 %v17893_v15, %v6649_v52  ;;  %v6726_v51 = vmul.f32 %v17884_v2, %v6641_v22  ;;  %v6660_v33 = vmax.f32 %v6626_v32, 0.0  ;;  %v17970_v58 = vld [vmem:[%s19406_s1 + $0x47] ss:$0 sm:$0xff]  ;;  %v18027_v41 = vld [vmem:[%s19410_s5 + $0x78] sm:$0xff]  ;;  %v20687_v24 = vld [vmem:[#allocation512_spill] sm:$0xff] }
 0x36a   :  { %11320 = vmatmul.mubr.msk.f32.gmra.mxu1 %vm7187_vm1, %v17945_v8  ;;  %7950 = vmatprep.subr.mxu1 %v4111_v37  ;;  %v6616_v23 = vadd.f32 %v17852_v56, %v20681_v50  ;;  %v6754_v38 = vmul.f32 %v11296_v19, %v6669_v26  ;;  %v6725_v2 = vmul.f32 %v17893_v15, %v6640_v27  ;;  %v17978_v56 = vld [vmem:[%s19410_s5 + $0x38] sm:$0xff]  ;;  %v17985_v15 = vld [vmem:[%s19410_s5 + $0x30] sm:$0xff] }
 0x36b   :  { %8030 = vmatpush1.msra.mxu0 %v6743_v62  ;;  %7951 = vmatpush2.msra.mxu1 %v4110_v45  ;;  %v6098_v34 = vmul.f32 %v17970_v58, %v6013_v47  ;;  %v6651_v4 = vmax.f32 %v6621_v48, 0.0  ;;  %v6745_v13 = vmul.f32 %v11296_v19, %v6660_v33  ;;  %v20688_v53 = vld [vmem:[#allocation550_spill] sm:$0xff]  ;;  %v20689_v3 = vld [vmem:[#allocation501_spill] sm:$0xff]  ;;  %v20692_v45 = vld [vmem:[#allocation552_spill] sm:$0xff] }
 0x36c   :  { %7735 = vmatmul.mubr.f32.gmra.mxu0 %v17958_v14  ;;  %8031 = vmatprep.subr.mxu0 %v6735_v44  ;;  %v6642_v50 = vmax.f32 %v6616_v23, 0.0  ;;  %v3351_v61 = vadd.f32 %v20688_v53, %v20687_v24  ;;  %v20690_v52 = vld [vmem:[#allocation705_spill] sm:$0xff]  ;;  %v20693_v27 = vld [vmem:[#allocation626_spill] sm:$0xff]  ;;  %v20694_v44 = vld [vmem:[#allocation699_spill] sm:$0xff] }
 0x36d   :  { %7952 = vmatprep.subr.mxu1 %v4102_v20  ;;  %8032 = vmatpush1.msra.mxu0 %v6734_v0  ;;  %v6736_v35 = vmul.f32 %v11296_v19, %v6651_v4  ;;  %v5970_v22 = vadd.f32 %v20690_v52, %v20689_v3  ;;  %v18045_v62 = vld [vmem:[%s19410_s5 + $0x90] sm:$0xff]  ;;  %v5965_v20 = vadd.f32 %v20694_v44, %v20693_v27  ;;  %v20696_v47 = vld [vmem:[#allocation546_spill] sm:$0xff]  ;;  %v20704_v52 = vld [vmem:[#allocation491_spill] sm:$0xff] }
 0x36e   :  { %7953 = vmatpush2.msra.mxu1 %v4101_v60  ;;  %7954 = vmatprep.mubr.f32.mxu1 %v17901_v1  ;;  %v6727_v36 = vmul.f32 %v11296_v19, %v6642_v50  ;;  %v20691_v37 = vld [vmem:[#allocation517_spill] sm:$0xff]  ;;  %v3389_v0 = vmax.f32 %v3351_v61, 0.0  ;;  %v20702_v24 = vld [vmem:[#allocation630_spill] sm:$0xff]  ;;  %v20703_v3 = vld [vmem:[#allocation524_spill] sm:$0xff] }
 0x36f   :  { %8033 = vmatprep.subr.mxu0 %v6726_v51  ;;  %7740 = vmatprep.mubr.f32.mxu0 %v17978_v56  ;;  %v3346_v32 = vadd.f32 %v20692_v45, %v20691_v37  ;;  %v18054_v26 = vld [vmem:[%s19410_s5 + $0xb0] sm:$0xff]  ;;  %v6004_v33 = vmax.f32 %v5970_v22, 0.0  ;;  %v5995_v61 = vmax.f32 %v5965_v20, 0.0  ;;  %v2695_v22 = vadd.f32 %v20704_v52, %v20703_v3  ;;  %v20707_v20 = vld [vmem:[#allocation415_spill] sm:$0xff] }
 0x370   :  { %7955 = vmatmul.mubr.f32.vlgmr.msra.gmra.mxu1 %v17921_v46  ;;  %8034 = vmatpush1.msra.mxu0 %v6725_v2  ;;  %v20695_v60 = vld [vmem:[#allocation413_spill] sm:$0xff]  ;;  %v20697_v51 = vld [vmem:[#allocation508_spill] sm:$0xff]  ;;  %v20699_v2 = vld [vmem:[#allocation414_spill] sm:$0xff] }
 0x371   :  { %12169 = vmatprep.subr.mxu1 %v6754_v38  ;;  %7741 = vmatmul.mubr.f32.gmra.mxu0 %v17985_v15  ;;  %v3341_v48 = vadd.f32 %v20696_v47, %v20695_v60  ;;  %v20698_v19 = vld [vmem:[#allocation701_spill] sm:$0xff]  ;;  %v3380_v50 = vmax.f32 %v3346_v32, 0.0  ;;  %v20705_v32 = vld [vmem:[#allocation514_spill] sm:$0xff]  ;;  %v20706_v27 = vld [vmem:[#allocation632_spill] sm:$0xff]  ;;  %v6089_v47 = vmul.f32 %v17970_v58, %v6004_v33 }
 0x372   :  { %11429 = vmatprep.subr.mxu0 %v6098_v34  ;;  %12170 = vmatpush3.msra.mxu1 %v6754_v38  ;;  %v5960_v23 = vadd.f32 %v20698_v19, %v20697_v51  ;;  %v18067_v38 = vld [vmem:[%s19410_s5 + $0xa8] sm:$0xff]  ;;  %v5314_v44 = vadd.f32 %v20706_v27, %v20705_v32  ;;  %v12334_v51 = vld [vmem:[%s19410_s5 + $0x10] sm:$0xff]  ;;  %v2733_v27 = vmax.f32 %v2695_v22, 0.0 }
 0x373   :  { %7960 = vmatprep.mubr.f32.mxu1 %v17939_v7  ;;  %12171 = vmatprep.subr.mxu1 %v6745_v13  ;;  %v20700_v34 = vld [vmem:[#allocation548_spill] sm:$0xff]  ;;  %v3371_v37 = vmax.f32 %v3341_v48, 0.0  ;;  %v20708_v19 = vld [vmem:[#allocation493_spill] sm:$0xff]  ;;  %v20710_v3 = vld [vmem:[#allocation531_spill] sm:$0xff] }
 0x374   :  { %7746 = vmatprep.mubr.f32.mxu0 %v17992_v42  ;;  %12172 = vmatpush3.msra.mxu1 %v6745_v13  ;;  %v3336_v4 = vadd.f32 %v20700_v34, %v20699_v2  ;;  %v18073_v13 = vpop.permute.xlu1 %7179  ;;  %v5986_v60 = vmax.f32 %v5960_v23, 0.0  ;;  %v2690_v48 = vadd.f32 %v20708_v19, %v20707_v20  ;;  %v18094_v34 = vpop.permute.xlu0 %7184  ;;  %v20709_v23 = vld [vmem:[#allocation625_spill] sm:$0xff]  ;;  %v20711_v52 = vld [vmem:[#allocation487_spill] sm:$0xff]  ;;  %v11254_v19 = vld [vmem:[%s19406_s1 + $0x3e] ss:$0 sm:$0xff] }
 0x375   :  { %7961 = vmatmul.mubr.f32.gmra.mxu1 %v17958_v14  ;;  %12173 = vmatprep.subr.mxu1 %v6736_v35  ;;  %v5309_v33 = vadd.f32 %v20709_v23, %v20624_v28  ;;  %v2685_v32 = vadd.f32 %v20711_v52, %v20710_v3  ;;  %v20718_v3 = vld [vmem:[#allocation613_spill] sm:$0xff] }
 0x376   :  { %7747 = vmatmul.mubr.f32.gmra.mxu0 %v17999_v30  ;;  %12174 = vmatpush3.msra.mxu1 %v6736_v35  ;;  %v11191_v35 = vld [vmem:[%s19406_s1 + $0x23] ss:$0 sm:$0xff]  ;;  %v6071_v28 = vmul.f32 %v17970_v58, %v5986_v60  ;;  %v2724_v22 = vmax.f32 %v2690_v48, 0.0  ;;  %v4658_v52 = vadd.f32 %v20718_v3, %v20645_v16  ;;  %v20727_v3 = vld [vmem:[#allocation567_spill] sm:$0xff] }
 0x377   :  { %12175 = vmatprep.subr.mxu1 %v6727_v36  ;;  %7966 = vmatprep.mubr.f32.mxu1 %v17978_v56  ;;  %v3474_v45 = vmul.f32 %v11191_v35, %v3389_v0  ;;  %v3362_v0 = vmax.f32 %v3336_v4, 0.0  ;;  %v3465_v2 = vmul.f32 %v11191_v35, %v3380_v50  ;;  %v3456_v9 = vmul.f32 %v11191_v35, %v3371_v37  ;;  %v20712_v4 = vld [vmem:[#allocation628_spill] sm:$0xff]  ;;  %v20717_v48 = vld [vmem:[#allocation474_spill] sm:$0xff] }
 0x378   :  { %12176 = vmatpush3.msra.mxu1 %v6727_v36  ;;  %7752 = vmatprep.mubr.f32.mxu0 %v18006_v55  ;;  %v20701_v36 = vld [vmem:[#allocation633_spill] sm:$0xff]  ;;  %v18102_v20 = vpop.permute.xlu1 %7169  ;;  %v5304_v50 = vadd.f32 %v20712_v4, %v20633_v21  ;;  %v5339_v60 = vmax.f32 %v5309_v33, 0.0  ;;  %v2715_v23 = vmax.f32 %v2685_v32, 0.0 }
 0x379   :  { %7967 = vmatmul.mubr.f32.gmra.mxu1 %v17985_v15  ;;  %v5319_v53 = vadd.f32 %v20702_v24, %v20701_v36  ;;  %v6080_v24 = vmul.f32 %v17970_v58, %v5995_v61  ;;  %v20714_v61 = vld [vmem:[#allocation489_spill] sm:$0xff]  ;;  %v3447_v37 = vmul.f32 %v11191_v35, %v3362_v0  ;;  %v20715_v58 = vld [vmem:[#allocation610_spill] sm:$0xff]  ;;  %v20716_v35 = vld [vmem:[#allocation539_spill] sm:$0xff] }
 0x37a   :  { %7753 = vmatmul.mubr.f32.gmra.mxu0 %v18013_v57  ;;  %7972 = vmatprep.mubr.f32.mxu1 %v17992_v42  ;;  %v11170_v21 = vld [vmem:[%s19406_s1 + $0x1a] ss:$0 sm:$0xff]  ;;  %v2039_v0 = vadd.f32 %v20717_v48, %v20716_v35  ;;  %v20726_v35 = vld [vmem:[#allocation472_spill] sm:$0xff] }
 0x37b   :  { %7758 = vmatprep.mubr.f32.mxu0 %v18020_v59  ;;  %v5357_v36 = vmax.f32 %v5319_v53, 0.0  ;;  %v20713_v53 = vld [vmem:[#allocation416_spill] sm:$0xff]  ;;  %v20719_v33 = vld [vmem:[#allocation417_spill] sm:$0xff] }
 0x37d   :  { %7973 = vmatmul.mubr.f32.gmra.mxu1 %v17999_v30 }
 0x37e   :  { %7759 = vmatmul.mubr.f32.gmra.mxu0 %v18027_v41  ;;  %7978 = vmatprep.mubr.f32.mxu1 %v18006_v55 }
 0x37f   :  { %7764 = vmatprep.mubr.f32.mxu0 %v18034_v5 }
 0x381   :  { %7979 = vmatmul.mubr.f32.gmra.mxu1 %v18013_v57 }
 0x382   :  { %7765 = vmatmul.mubr.f32.gmra.mxu0 %v18045_v62  ;;  %7984 = vmatprep.mubr.f32.mxu1 %v18020_v59 }
 0x383   :  { %7770 = vmatprep.mubr.f32.mxu0 %v18054_v26 }
 0x385   :  { %7985 = vmatmul.mubr.f32.gmra.mxu1 %v18027_v41 }
 0x386   :  { %7771 = vmatmul.mubr.f32.gmra.mxu0 %v18067_v38  ;;  %7990 = vmatprep.mubr.f32.mxu1 %v18034_v5 }
 0x387   :  { %8067 = vmatprep.mubr.f32.mxu0 %v20387_v39 }
 0x389   :  { %7991 = vmatmul.mubr.f32.gmra.mxu1 %v18045_v62 }
 0x38a   :  { %11321 = vmatmul.mubr.msk.f32.vlgmr.msra.gmra.mxu0 %vm7187_vm1, %v12334_v51  ;;  %7996 = vmatprep.mubr.f32.mxu1 %v18054_v26 }
 0x38b   :  { %11430 = vmatpush3.msra.mxu0 %v3474_v45  ;;  %8073 = vmatprep.mubr.f32.mxu0 %v20387_v39  ;;  %v5348_v45 = vmax.f32 %v5314_v44, 0.0  ;;  %v4663_v44 = vadd.f32 %v20715_v58, %v20614_v18  ;;  %v5330_v18 = vmax.f32 %v5304_v50, 0.0  ;;  %v5424_v50 = vmul.f32 %v11254_v19, %v5339_v60 }
 0x38c   :  { %11431 = vmatprep.subr.mxu0 %v6089_v47  ;;  %v2680_v47 = vadd.f32 %v20714_v61, %v20713_v53  ;;  %v20723_v61 = vld [vmem:[#allocation470_spill] sm:$0xff]  ;;  %v2077_v58 = vmax.f32 %v2039_v0, 0.0  ;;  %v4692_v60 = vmax.f32 %v4658_v52, 0.0  ;;  %v4007_v52 = vadd.f32 %v20727_v3, %v20606_v49 }
 0x38d   :  { %11432 = vmatpush3.msra.mxu0 %v3465_v2  ;;  %7997 = vmatmul.mubr.f32.gmra.mxu1 %v18067_v38  ;;  %v5442_v2 = vmul.f32 %v11254_v19, %v5357_v36  ;;  %v20720_v36 = vld [vmem:[#allocation476_spill] sm:$0xff]  ;;  %v4701_v16 = vmax.f32 %v4663_v44, 0.0 }
 0x38e   :  { %11433 = vmatprep.subr.mxu0 %v6080_v24  ;;  %11322 = vmatmul.mubr.msk.f32.gmra.mxu0 %vm7187_vm1, %v17738_v10  ;;  %v2818_v24 = vmul.f32 %v11170_v21, %v2733_v27  ;;  %v2034_v4 = vadd.f32 %v20720_v36, %v20719_v33  ;;  %v2706_v32 = vmax.f32 %v2680_v47, 0.0  ;;  %v2809_v27 = vmul.f32 %v11170_v21, %v2724_v22  ;;  %v11233_v22 = vld [vmem:[%s19406_s1 + $0x35] ss:$0 sm:$0xff] }
 0x38f   :  { %11434 = vmatpush3.msra.mxu0 %v3456_v9  ;;  %8079 = vmatprep.mubr.f32.mxu0 %v20387_v39  ;;  %v18124_v9 = vpop.permute.xlu0 %7174  ;;  %v2800_v47 = vmul.f32 %v11170_v21, %v2715_v23  ;;  %v20728_v33 = vld [vmem:[#allocation569_spill] sm:$0xff]  ;;  %v4777_v49 = vmul.f32 %v11233_v22, %v4692_v60 }
 0x390   :  { %11435 = vmatprep.subr.mxu0 %v6071_v28  ;;  %12177 = vmatprep.mubr.msk.f32.mxu1 %vm7187_vm1, %v12334_v51  ;;  %v5433_v51 = vmul.f32 %v11254_v19, %v5348_v45  ;;  %v18134_v28 = vpop.permute.xlu1 %7159  ;;  %v20722_v45 = vld [vmem:[#allocation544_spill] sm:$0xff]  ;;  %v2068_v0 = vmax.f32 %v2034_v4, 0.0  ;;  %v2791_v23 = vmul.f32 %v11170_v21, %v2706_v32  ;;  %v4002_v36 = vadd.f32 %v20728_v33, %v20600_v6  ;;  %v7391_v32 = vpop.f32.mrf.mxu0  ;;  %v20734_v33 = vld [vmem:[#allocation431_spill] sm:$0xff] }
 0x391   :  { %11436 = vmatpush3.msra.mxu0 %v3447_v37  ;;  %12178 = vmatmul.mubr.msk.f32.vlgmr.msra.gmra.mxu1 %vm7187_vm1, %v17738_v10  ;;  %v20721_v10 = vld [vmem:[#allocation606_spill] sm:$0xff]  ;;  %v2029_v37 = vadd.f32 %v20723_v61, %v20722_v45  ;;  %v4045_v61 = vmax.f32 %v4007_v52, 0.0 }
 0x392   :  { %11437 = vmatprep.subr.mxu0 %v5442_v2  ;;  %11323 = vmatmul.mubr.msk.f32.gmra.mxu0 %vm7187_vm1, %v17771_v12  ;;  %v4653_v53 = vadd.f32 %v20721_v10, %v20622_v11  ;;  %v20724_v11 = vld [vmem:[#allocation608_spill] sm:$0xff]  ;;  %v20725_v2 = vld [vmem:[#allocation418_spill] sm:$0xff] }
 0x393   :  { %11438 = vmatpush3.msra.mxu0 %v2818_v24  ;;  %8085 = vmatprep.mubr.f32.mxu0 %v20387_v39  ;;  %v4648_v44 = vadd.f32 %v20724_v11, %v20616_v63  ;;  %v2024_v48 = vadd.f32 %v20726_v35, %v20725_v2  ;;  %v18154_v24 = vpop.permute.xlu0 %7164  ;;  %v11149_v63 = vld [vmem:[%s19406_s1 + $0x11] ss:$0 sm:$0xff]  ;;  %v4036_v2 = vmax.f32 %v4002_v36, 0.0  ;;  %v1403_v36 = vmax.f32 %v20734_v33, 0.0 }
 0x394   :  { %11439 = vmatprep.subr.mxu0 %v5433_v51  ;;  %12180 = vmatprep.mubr.msk.f32.mxu1 %vm7187_vm1, %v17771_v12  ;;  %v5415_v12 = vmul.f32 %v11254_v19, %v5330_v18  ;;  %v4683_v51 = vmax.f32 %v4653_v53, 0.0  ;;  %v2059_v19 = vmax.f32 %v2029_v37, 0.0  ;;  %v2162_v21 = vmul.f32 %v11149_v63, %v2077_v58  ;;  %v18164_v18 = vpop.permute.xlu1 %7149 }
 0x395   :  { %11440 = vmatpush3.msra.mxu0 %v2809_v27  ;;  %12181 = vmatmul.mubr.msk.f32.gmra.mxu1 %vm7187_vm1, %v17799_v43  ;;  %v4674_v4 = vmax.f32 %v4648_v44, 0.0  ;;  %v7278_v27 = vpop.f32.mrf.mxu1  ;;  %v2050_v10 = vmax.f32 %v2024_v48, 0.0  ;;  %v2153_v53 = vmul.f32 %v11149_v63, %v2068_v0  ;;  %v7393_v48 = vpop.f32.mrf.mxu0 }
 0x396   :  { %11441 = vmatprep.subr.mxu0 %v5424_v50  ;;  %11324 = vmatmul.mubr.msk.f32.gmra.mxu0 %vm7187_vm1, %v17799_v43  ;;  %v4786_v43 = vmul.f32 %v11233_v22, %v4701_v16  ;;  %v7279_v16 = vadd.f32 %v7278_v27, %v18164_v18  ;;  %v20729_v50 = vld [vmem:[#allocation563_spill] sm:$0xff]  ;;  %v4768_v6 = vmul.f32 %v11233_v22, %v4683_v51  ;;  %v11212_v51 = vld [vmem:[%s19406_s1 + $0x2c] ss:$0 sm:$0xff] }
 0x397   :  { %11442 = vmatpush3.msra.mxu0 %v2800_v47  ;;  %8091 = vmatprep.mubr.f32.mxu0 %v20387_v39  ;;  %v3997_v45 = vadd.f32 %v20729_v50, %v20591_v29  ;;  %v7280_v37 = vpop.f32.mrf.mxu1  ;;  %v2144_v47 = vmul.f32 %v11149_v63, %v2059_v19  ;;  %v18179_v11 = vpop.permute.xlu0 %7154  ;;  %v20732_v29 = vld [vmem:[#allocation565_spill] sm:$0xff]  ;;  %v4759_v35 = vmul.f32 %v11233_v22, %v4674_v4 }
 0x398   :  { %11443 = vmatprep.subr.mxu0 %v5415_v12  ;;  %12183 = vmatprep.mubr.msk.f32.mxu1 %vm7187_vm1, %v17827_v54  ;;  %v18181_v44 = vadd.f32 %v7391_v32, %v7279_v16  ;;  %v7281_v60 = vadd.f32 %v7280_v37, %v18164_v18  ;;  %v3992_v12 = vadd.f32 %v20732_v29, %v16017_v40  ;;  %v20736_v50 = vld [vmem:[#allocation433_spill] sm:$0xff] }
 0x399   :  { %11444 = vmatpush3.msra.mxu0 %v2791_v23  ;;  %12184 = vmatmul.mubr.msk.f32.gmra.mxu1 %vm7187_vm1, %v17859_v31  ;;  %v7284_v0 = vpop.f32.mrf.mxu1  ;;  %v20733_v23 = vld [vmem:[#allocation437_spill] sm:$0xff]  ;;  %v2135_v52 = vmul.f32 %v11149_v63, %v2050_v10  ;;  %v4027_v22 = vmax.f32 %v3997_v45, 0.0  ;;  %v4130_v19 = vmul.f32 %v11212_v51, %v4045_v61  ;;  %v4121_v10 = vmul.f32 %v11212_v51, %v4036_v2 }
 0x39a   :  { %11445 = vmatprep.subr.mxu0 %v4786_v43  ;;  %11325 = vmatmul.mubr.msk.f32.gmra.mxu0 %vm7187_vm1, %v17827_v54  ;;  %v20730_v54 = vld [vmem:[#allocation435_spill] sm:$0xff]  ;;  %20731 = vst [vmem:[#allocation447_spill] sm:$0xff] %v18181_v44  ;;  %v1412_v3 = vmax.f32 %v20733_v23, 0.0  ;;  %v18195_v43 = vadd.f32 %v7393_v48, %v7281_v60  ;;  %v7285_v40 = vadd.f32 %v7284_v0, %v18179_v11  ;;  %v4018_v27 = vmax.f32 %v3992_v12, 0.0 }
 0x39b   :  { %11446 = vmatpush3.msra.mxu0 %v2162_v21  ;;  %8097 = vmatprep.mubr.f32.mxu0 %v20387_v39  ;;  %v1421_v58 = vmax.f32 %v20730_v54, 0.0  ;;  %v7286_v21 = vpop.f32.mrf.mxu1  ;;  %v1394_v45 = vmax.f32 %v20736_v50, 0.0  ;;  %v4112_v54 = vmul.f32 %v11212_v51, %v4027_v22 }
 0x39c   :  { %11447 = vmatprep.subr.mxu0 %v4777_v49  ;;  %12186 = vmatprep.mubr.msk.f32.mxu1 %vm7187_vm1, %v17910_v17  ;;  %v7397_v63 = vpop.f32.mrf.mxu0  ;;  %v7287_v49 = vadd.f32 %v7286_v21, %v18179_v11  ;;  %v4103_v29 = vmul.f32 %v11212_v51, %v4018_v27 }
 0x39d   :  { %11448 = vmatpush3.msra.mxu0 %v2153_v53  ;;  %12187 = vmatmul.mubr.msk.f32.gmra.mxu1 %vm7187_vm1, %v17945_v8  ;;  %v18203_v32 = vadd.f32 %v7397_v63, %v7285_v40 }
 0x39e   :  { %11449 = vmatprep.subr.mxu0 %v4768_v6  ;;  %11326 = vmatmul.mubr.msk.f32.gmra.mxu0 %vm7187_vm1, %v17859_v31  ;;  %v11128_v31 = vld [vmem:[%s19406_s1 + $0x8] ss:$0 sm:$0xff]  ;;  %v7290_v53 = vpop.f32.mrf.mxu1  ;;  %v7399_v16 = vpop.f32.mrf.mxu0 }
 0x39f   :  { %11450 = vmatpush3.msra.mxu0 %v2144_v47  ;;  %8103 = vmatprep.mubr.f32.mxu0 %v20387_v39  ;;  %v1506_v4 = vmul.f32 %v11128_v31, %v1421_v58  ;;  %20735 = vst [vmem:[#allocation687_spill] sm:$0xff] %v18203_v32  ;;  %v1497_v61 = vmul.f32 %v11128_v31, %v1412_v3 }
 0x3a0   :  { %11451 = vmatprep.subr.mxu0 %v4759_v35  ;;  %v7291_v6 = vadd.f32 %v7290_v53, %v18134_v28  ;;  %v18210_v37 = vadd.f32 %v7399_v16, %v7287_v49  ;;  %v18212_v58 = vpop.f32.mrf.mxu1  ;;  %v7403_v47 = vpop.f32.mrf.mxu0  ;;  %v1488_v60 = vmul.f32 %v11128_v31, %v1403_v36  ;;  %v1479_v2 = vmul.f32 %v11128_v31, %v1394_v45 }
 0x3a1   :  { %11452 = vmatpush3.msra.mxu0 %v2135_v52 }
 0x3a2   :  { %11453 = vmatprep.subr.mxu0 %v4130_v19  ;;  %11327 = vmatmul.mubr.msk.f32.gmra.mxu0 %vm7187_vm1, %v17910_v17  ;;  %v18214_v17 = vadd.f32 %v7403_v47, %v7291_v6  ;;  %v18218_v12 = vpop.f32.mrf.mxu0 }
 0x3a3   :  { %11454 = vmatpush3.msra.mxu0 %v1506_v4  ;;  %8109 = vmatprep.mubr.f32.mxu0 %v20387_v39 }
 0x3a4   :  { %11455 = vmatprep.subr.mxu0 %v4121_v10  ;;  %20737 = vst [vmem:[#allocation443_spill] sm:$0xff] %v18214_v17  ;;  %v7296_v35 = vpop.f32.mrf.mxu1 }
 0x3a5   :  { %11456 = vmatpush3.msra.mxu0 %v1497_v61  ;;  %v7297_v48 = vadd.f32 %v7296_v35, %v18154_v24 }
 0x3a6   :  { %11457 = vmatprep.subr.mxu0 %v4112_v54  ;;  %11328 = vmatmul.mubr.msk.f32.gmra.mxu0 %vm7187_vm1, %v17945_v8  ;;  %v18223_v0 = vpop.f32.mrf.mxu1  ;;  %v7409_v23 = vpop.f32.mrf.mxu0 }
 0x3a7   :  { %11458 = vmatpush3.msra.mxu0 %v1488_v60  ;;  %8180 = vmatprep.mubr.f32.mxu0 %v17901_v1  ;;  %v18226_v8 = vadd.f32 %v7409_v23, %v7297_v48 }
 0x3a8   :  { %11459 = vmatprep.subr.mxu0 %v4103_v29  ;;  %v18228_v3 = vpop.f32.mrf.mxu0 }
 0x3a9   :  { %11460 = vmatpush3.msra.mxu0 %v1479_v2  ;;  %20738 = vst [vmem:[#allocation655_spill] sm:$0xff] %v18226_v8 }
 0x3aa   :  { %8181 = vmatmul.mubr.f32.vlgmr.msra.gmra.mxu0 %v17921_v46  ;;  %v7302_v52 = vpop.f32.mrf.mxu1 }
 0x3ab   :  { %8185 = vmatprep.mubr.f32.mxu0 %v17939_v7  ;;  %v7303_v1 = vadd.f32 %v7302_v52, %v18102_v20 }
 0x3ac   :  { %v18233_v51 = vpop.f32.mrf.mxu1 }
 0x3ad   :  { %v7415_v40 = vpop.f32.mrf.mxu0 }
 0x3ae   :  { %8186 = vmatmul.mubr.f32.gmra.mxu0 %v17958_v14  ;;  %v18235_v46 = vadd.f32 %v7415_v40, %v7303_v1  ;;  %v18238_v31 = vpop.f32.mrf.mxu1 }
 0x3af   :  { %8190 = vmatprep.mubr.f32.mxu0 %v17978_v56 }
 0x3b0   :  { %20739 = vst [vmem:[#allocation653_spill] sm:$0xff] %v18235_v46  ;;  %v7310_v7 = vpop.f32.mrf.mxu1 }
 0x3b2   :  { %8191 = vmatmul.mubr.f32.gmra.mxu0 %v17985_v15  ;;  %v18242_v14 = vpop.f32.mrf.mxu1  ;;  %v18250_v15 = vpop.f32.mrf.mxu0 }
 0x3b3   :  { %8195 = vmatprep.mubr.f32.mxu0 %v17992_v42 }
 0x3b4   :  { %v7316_v56 = vpop.f32.mrf.mxu1 }
 0x3b5   :  { %v7317_v44 = vadd.f32 %v7316_v56, %v18073_v13  ;;  %v18313_v56 = vld [vmem:[%s19407_s2] sm:$0xff] }
 0x3b6   :  { %8196 = vmatmul.mubr.f32.gmra.mxu0 %v17999_v30  ;;  %v18256_v30 = vpop.f32.mrf.mxu0 }
 0x3b7   :  { %8200 = vmatprep.mubr.f32.mxu0 %v18006_v55 }
 0x3b8   :  { %v18246_v22 = vpop.f32.mrf.mxu1 }
 0x3ba   :  { %8201 = vmatmul.mubr.f32.gmra.mxu0 %v18013_v57  ;;  %v7322_v19 = vpop.f32.mrf.mxu1  ;;  %v8592_v57 = vld [vmem:[%s19412_s7 + $0x8] sm:$0xff] }
 0x3bb   :  { %8205 = vmatprep.mubr.f32.mxu0 %v18020_v59  ;;  %v7423_v59 = vpop.f32.mrf.mxu0 }
 0x3bc   :  { %v18253_v42 = vpop.f32.mrf.mxu1 }
 0x3bd   :  { %20740 = vst [vmem:[#allocation427_spill] sm:$0xff] %v18253_v42  ;;  %v7311_v42 = vadd.f32 %v7310_v7, %v18124_v9 }
 0x3be   :  { %8206 = vmatmul.mubr.f32.gmra.mxu0 %v18027_v41  ;;  %v18259_v55 = vpop.f32.mrf.mxu1 }
 0x3bf   :  { %8210 = vmatprep.mubr.f32.mxu0 %v18034_v5  ;;  %v18267_v5 = vpop.f32.mrf.mxu0 }
 0x3c2   :  { %8211 = vmatmul.mubr.f32.gmra.mxu0 %v18045_v62  ;;  %v18265_v41 = vpop.f32.mrf.mxu1  ;;  %v7429_v62 = vpop.f32.mrf.mxu0 }
 0x3c3   :  { %8215 = vmatprep.mubr.f32.mxu0 %v18054_v26  ;;  %20741 = vst [vmem:[#allocation439_spill] sm:$0xff] %v18265_v41 }
 0x3c4   :  { %v18269_v21 = vpop.f32.mrf.mxu1  ;;  %v18273_v26 = vpop.f32.mrf.mxu0 }
 0x3c6   :  { %8216 = vmatmul.mubr.f32.gmra.mxu0 %v18067_v38  ;;  %v7435_v36 = vpop.f32.mrf.mxu0 }
 0x3c7   :  { %8840 = vmatprep.mubr.f32.mxu0 %v8592_v57  ;;  %v18271_v63 = vpop.f32.mrf.mxu1  ;;  %v7323_v57 = vadd.f32 %v7322_v19, %v18094_v34  ;;  %v7305_v19 = vadd.f32 %v18233_v51, %v18102_v20 }
 0x3c8   :  { %20742 = vst [vmem:[#allocation428_spill] sm:$0xff] %v18271_v63 }
 0x3c9   :  { %v18275_v33 = vpop.f32.mrf.mxu1  ;;  %v7436_v8 = vadd.f32 %v7435_v36, %v7323_v57 }
 0x3cb   :  { %v18279_v49 = vpop.f32.mrf.mxu1 }
 0x3cc   :  { %20744 = vst [vmem:[#allocation650_spill] sm:$0xff] %v18279_v49 }
 0x3cd   :  { %v7637_v27 = vpop.f32.mrf.mxu1 }
 0x3cf   :  { %v18283_v16 = vpop.f32.mrf.mxu1 }
 0x3d0   :  { %20746 = vst [vmem:[#allocation656_spill] sm:$0xff] %v18283_v16  ;;  %v20749_v16 = vld [vmem:[#allocation525_spill] sm:$0xff] }
 0x3d1   :  { %v7643_v61 = vpop.f32.mrf.mxu1 }
 0x3d3   :  { %v18289_v47 = vpop.f32.mrf.mxu1 }
 0x3d5   :  { %v7649_v29 = vpop.f32.mrf.mxu1 }
 0x3d7   :  { %v18277_v4 = vpop.f32.mrf.mxu0  ;;  %v18295_v48 = vpop.f32.mrf.mxu1 }
 0x3d8   :  { %20743 = vst [vmem:[#allocation426_spill] sm:$0xff] %v18277_v4 }
 0x3d9   :  { %v7506_v38 = vpop.f32.mrf.mxu0  ;;  %v7655_v52 = vpop.f32.mrf.mxu1 }
 0x3db   :  { %v18300_v39 = vpop.f32.mrf.mxu1 }
 0x3dc   :  { %v18281_v10 = vpop.f32.mrf.mxu0 }
 0x3dd   :  { %20745 = vst [vmem:[#allocation425_spill] sm:$0xff] %v18281_v10  ;;  %v7661_v46 = vpop.f32.mrf.mxu1  ;;  %v7430_v10 = vadd.f32 %v7429_v62, %v7317_v44 }
 0x3de   :  { %v7512_v53 = vpop.f32.mrf.mxu0 }
 0x3e0   :  { %v18285_v50 = vpop.f32.mrf.mxu0 }
 0x3e1   :  { %20747 = vst [vmem:[#allocation649_spill] sm:$0xff] %v18285_v50  ;;  %v18325_v50 = vrot.slane %v18313_v56, %v20749_v16 }
 0x3e2   :  { %v7518_v45 = vpop.f32.mrf.mxu0 }
 0x3e3   :  { %v7519_v44 = vadd.f32 %v7518_v45, %v18134_v28 }
 0x3e5   :  { %v18287_v6 = vpop.f32.mrf.mxu0 }
 0x3e7   :  { %v7524_v54 = vpop.f32.mrf.mxu0 }
 0x3ea   :  { %v18291_v60 = vpop.f32.mrf.mxu0 }
 0x3ec   :  { %v7530_v2 = vpop.f32.mrf.mxu0 }
 0x3ed   :  { %v7531_v63 = vadd.f32 %v7530_v2, %v18102_v20  ;;  %v7424_v2 = vadd.f32 %v7423_v59, %v7311_v42  ;;  %v7513_v42 = vadd.f32 %v7512_v53, %v18179_v11 }
 0x3ef   :  { %v18293_v35 = vpop.f32.mrf.mxu0  ;;  %v7644_v51 = vadd.f32 %v7643_v61, %v7531_v63  ;;  %v8372_v45 = vmax.f32 %v7424_v2, 0.0  ;;  %v7507_v61 = vadd.f32 %v7506_v38, %v18164_v18 }
 0x3f1   :  { %v7536_v23 = vpop.f32.mrf.mxu0 }
 0x3f2   :  { %v7537_v17 = vadd.f32 %v7536_v23, %v18124_v9  ;;  %v7525_v23 = vadd.f32 %v7524_v54, %v18154_v24  ;;  %v8365_v54 = vmax.f32 %v7644_v51, 0.0 }
 0x3f4   :  { %v18297_v1 = vpop.f32.mrf.mxu0  ;;  %v7650_v7 = vadd.f32 %v7649_v29, %v7537_v17  ;;  %v7293_v17 = vadd.f32 %v18212_v58, %v18134_v28  ;;  %v7638_v59 = vadd.f32 %v7637_v27, %v7525_v23  ;;  %v7632_v58 = vadd.f32 %v18275_v33, %v7519_v44 }
 0x3f6   :  { %v7542_v40 = vpop.f32.mrf.mxu0 }
 0x3f7   :  { %v7543_v25 = vadd.f32 %v7542_v40, %v18073_v13  ;;  %v7299_v40 = vadd.f32 %v18223_v0, %v18154_v24  ;;  %v7418_v0 = vadd.f32 %v18250_v15, %v7305_v19  ;;  %v8356_v19 = vmax.f32 %v7638_v59, 0.0 }
 0x3f9   :  { %v7546_v32 = vpop.f32.mrf.mxu0  ;;  %v7656_v4 = vadd.f32 %v7655_v52, %v7543_v25  ;;  %v8390_v25 = vmax.f32 %v7436_v8, 0.0  ;;  %v20748_v52 = vld [vmem:[#allocation643_spill] sm:$0xff]  ;;  %v18330_v8 = vpop.f32.mrf.mxu1  ;;  %v8363_v53 = vmax.f32 %v7418_v0, 0.0 }
 0x3fa   :  { %20750 = vst [vmem:[#allocation436_spill] sm:$0xff] %v18330_v8  ;;  %v7547_v38 = vadd.f32 %v7546_v32, %v18094_v34 }
 0x3fb   :  { %v7548_v41 = vpop.f32.mrf.mxu0  ;;  %v8383_v62 = vmax.f32 %v7656_v4, 0.0  ;;  %v7412_v4 = vadd.f32 %v18228_v3, %v7299_v40  ;;  %v8511_v16 = vmul.f32 %v18325_v50, %v8390_v25  ;;  %v18341_v29 = vpop.f32.mrf.mxu1  ;;  %v7626_v3 = vadd.f32 %v18269_v21, %v7513_v42 }
 0x3fc   :  { %v7549_v49 = vadd.f32 %v7548_v41, %v18094_v34  ;;  %v18320_v41 = vrot.slane %v18313_v56, %v20748_v52  ;;  %v8347_v40 = vmax.f32 %v7632_v58, 0.0  ;;  %v7541_v21 = vadd.f32 %v18297_v1, %v18073_v13 }
 0x3fd   :  { %v8354_v33 = vmax.f32 %v7412_v4, 0.0  ;;  %v8484_v32 = vmul.f32 %v18325_v50, %v8363_v53  ;;  %v7315_v52 = vadd.f32 %v18242_v14, %v18073_v13  ;;  %v8336_v1 = vmax.f32 %v18210_v37, 0.0 }
 0x3fe   :  { %v7662_v36 = vadd.f32 %v7661_v46, %v7549_v49  ;;  %v8381_v46 = vmax.f32 %v7430_v10, 0.0  ;;  %v8374_v49 = vmax.f32 %v7650_v7, 0.0  ;;  %v8504_v15 = vmul.f32 %v18320_v41, %v8383_v62 }
 0x3ff   :  { %v7406_v10 = vadd.f32 %v18218_v12, %v7293_v17  ;;  %v8493_v7 = vmul.f32 %v18325_v50, %v8372_v45  ;;  %v7321_v12 = vadd.f32 %v18246_v22, %v18094_v34  ;;  %v8486_v2 = vmul.f32 %v18320_v41, %v8365_v54  ;;  %v20753_v54 = vld [vmem:[#allocation656_spill] sm:$0xff] }
 0x400   :  { %v8392_v57 = vmax.f32 %v7662_v36, 0.0  ;;  %v8502_v27 = vmul.f32 %v18325_v50, %v8381_v46  ;;  %v8495_v23 = vmul.f32 %v18320_v41, %v8374_v49  ;;  %v7620_v36 = vadd.f32 %v18259_v55, %v7507_v61 }
 0x401   :  { %v8345_v25 = vmax.f32 %v7406_v10, 0.0  ;;  %v8338_v22 = vmax.f32 %v7626_v3, 0.0  ;;  %v8477_v51 = vmul.f32 %v18320_v41, %v8356_v19  ;;  %v7535_v55 = vadd.f32 %v18293_v35, %v18124_v9 }
 0x402   :  { %v8513_v63 = vmul.f32 %v18320_v41, %v8392_v57  ;;  %v7660_v62 = vadd.f32 %v18300_v39, %v7547_v38  ;;  %v8475_v57 = vmul.f32 %v18325_v50, %v8354_v33  ;;  %v7309_v17 = vadd.f32 %v18238_v31, %v18124_v9 }
 0x403   :  { %v7434_v14 = vadd.f32 %v18273_v26, %v7321_v12  ;;  %v8329_v46 = vmax.f32 %v7620_v36, 0.0  ;;  %v8468_v42 = vmul.f32 %v18320_v41, %v8347_v40  ;;  %v7529_v35 = vadd.f32 %v18291_v60, %v18102_v20  ;;  %v8594_v26 = vld [vmem:[%s19412_s7 + $0x18] sm:$0xff] }
 0x404   :  { %11497 = vmatprep.subr.mxu0 %v8513_v63  ;;  %v7654_v39 = vadd.f32 %v18295_v48, %v7541_v21  ;;  %v8327_v37 = vmax.f32 %v18195_v43, 0.0  ;;  %v8466_v59 = vmul.f32 %v18325_v50, %v8345_v25  ;;  %v7428_v31 = vadd.f32 %v18267_v5, %v7315_v52  ;;  %8945 = vmatprep.mubr.f32.mxu1 %v8594_v26  ;;  %v20757_v21 = vld [vmem:[#allocation426_spill] sm:$0xff] }
 0x405   :  { %11498 = vmatpush3.msra.mxu0 %v8511_v16  ;;  %v8459_v49 = vmul.f32 %v18320_v41, %v8338_v22  ;;  %v7523_v63 = vadd.f32 %v18287_v6, %v18154_v24  ;;  %v7648_v60 = vadd.f32 %v18289_v47, %v7535_v55  ;;  %v8391_v48 = vmax.f32 %v7660_v62, 0.0  ;;  %v20751_v16 = vld [vmem:[#allocation640_spill] sm:$0xff]  ;;  %v20752_v6 = vld [vmem:[#allocation649_spill] sm:$0xff] }
 0x406   :  { %11499 = vmatprep.subr.mxu0 %v8504_v15  ;;  %v8457_v43 = vmul.f32 %v18325_v50, %v8336_v1  ;;  %v7422_v5 = vadd.f32 %v18256_v30, %v7309_v17  ;;  %v8389_v45 = vmax.f32 %v7434_v14, 0.0  ;;  %v18389_v61 = vrot.slane %v18313_v56, %v20751_v16  ;;  %v20764_v16 = vld [vmem:[#allocation687_spill] sm:$0xff] }
 0x407   :  { %11500 = vmatpush3.msra.mxu0 %v8502_v27  ;;  %v8450_v58 = vmul.f32 %v18320_v41, %v8329_v46  ;;  %v7517_v47 = vadd.f32 %v20752_v6, %v18134_v28  ;;  %v7642_v15 = vadd.f32 %v20753_v54, %v7529_v35  ;;  %v8382_v10 = vmax.f32 %v7654_v39, 0.0  ;;  %v20754_v27 = vld [vmem:[#allocation523_spill] sm:$0xff]  ;;  %v20756_v41 = vld [vmem:[#allocation650_spill] sm:$0xff] }
 0x408   :  { %11501 = vmatprep.subr.mxu0 %v8495_v23  ;;  %v8405_v30 = vrot.slane %v18313_v56, %v20754_v27  ;;  %v8448_v3 = vmul.f32 %v18325_v50, %v8327_v37  ;;  %v8380_v19 = vmax.f32 %v7428_v31, 0.0  ;;  %v20755_v23 = vld [vmem:[#allocation425_spill] sm:$0xff]  ;;  %v7636_v33 = vadd.f32 %v20756_v41, %v7523_v63  ;;  %v20758_v50 = vld [vmem:[#allocation428_spill] sm:$0xff]  ;;  %v20762_v37 = vld [vmem:[#allocation427_spill] sm:$0xff] }
 0x409   :  { %11502 = vmatpush3.msra.mxu0 %v8493_v7  ;;  %v7511_v38 = vadd.f32 %v20755_v23, %v18179_v11  ;;  %v8373_v7 = vmax.f32 %v7648_v60, 0.0  ;;  %v8512_v12 = vmul.f32 %v18389_v61, %v8391_v48  ;;  %v8371_v36 = vmax.f32 %v7422_v5, 0.0  ;;  %v20763_v63 = vld [vmem:[#allocation443_spill] sm:$0xff] }
 0x40a   :  { %11503 = vmatprep.subr.mxu0 %v8486_v2  ;;  %v8510_v40 = vmul.f32 %v8405_v30, %v8389_v45  ;;  %v7505_v25 = vadd.f32 %v20757_v21, %v18164_v18  ;;  %v8364_v52 = vmax.f32 %v7642_v15, 0.0  ;;  %v8503_v22 = vmul.f32 %v18389_v61, %v8382_v10  ;;  %v20765_v15 = vld [vmem:[#allocation447_spill] sm:$0xff] }
 0x40b   :  { %v18356_v44 = vpop.f32.mrf.mxu1  ;;  %11504 = vmatpush3.msra.mxu0 %v8484_v32  ;;  %v7630_v32 = vadd.f32 %v20758_v50, %v7517_v47  ;;  %v8501_v62 = vmul.f32 %v8405_v30, %v8380_v19  ;;  %v8355_v14 = vmax.f32 %v7636_v33, 0.0  ;;  %v8494_v46 = vmul.f32 %v18389_v61, %v8373_v7  ;;  %v8591_v7 = vld [vmem:[%s19412_s7] sm:$0xff] }
 0x40c   :  { %11505 = vmatprep.subr.mxu0 %v8477_v51  ;;  %v20759_v51 = vld [vmem:[#allocation653_spill] sm:$0xff]  ;;  %v8492_v39 = vmul.f32 %v8405_v30, %v8371_v36  ;;  %v8485_v26 = vmul.f32 %v18389_v61, %v8364_v52  ;;  %v8344_v60 = vmax.f32 %v20763_v63, 0.0  ;;  %v8326_v10 = vmax.f32 %v20765_v15, 0.0 }
 0x40d   :  { %v18367_v0 = vpop.f32.mrf.mxu1  ;;  %11506 = vmatpush3.msra.mxu0 %v8475_v57  ;;  %v8362_v55 = vmax.f32 %v20759_v51, 0.0  ;;  %v20760_v57 = vld [vmem:[#allocation439_spill] sm:$0xff]  ;;  %v8346_v31 = vmax.f32 %v7630_v32, 0.0  ;;  %v8476_v5 = vmul.f32 %v18389_v61, %v8355_v14  ;;  %v8617_v63 = vld [vmem:[%s19412_s7 + $0xd0] sm:$0xff] }
 0x40e   :  { %11507 = vmatprep.subr.mxu0 %v8468_v42  ;;  %v7624_v17 = vadd.f32 %v20760_v57, %v7511_v38  ;;  %v20761_v42 = vld [vmem:[#allocation655_spill] sm:$0xff]  ;;  %v8465_v27 = vmul.f32 %v8405_v30, %v8344_v60  ;;  %v8447_v33 = vmul.f32 %v8405_v30, %v8326_v10  ;;  %v8621_v15 = vld [vmem:[%s19412_s7 + $0xf0] sm:$0xff] }
 0x40f   :  { %11508 = vmatpush3.msra.mxu0 %v8466_v59  ;;  %v8353_v35 = vmax.f32 %v20761_v42, 0.0  ;;  %v7618_v59 = vadd.f32 %v20762_v37, %v7505_v25  ;;  %v8483_v48 = vmul.f32 %v8405_v30, %v8362_v55  ;;  %v8467_v54 = vmul.f32 %v18389_v61, %v8346_v31  ;;  %v8602_v25 = vld [vmem:[%s19412_s7 + $0x58] sm:$0xff]  ;;  %v8611_v31 = vld [vmem:[%s19412_s7 + $0xa0] sm:$0xff] }
 0x410   :  { %v18383_v4 = vpop.f32.mrf.mxu1  ;;  %11509 = vmatprep.subr.mxu0 %v8459_v49 }
 0x411   :  { %11510 = vmatpush3.msra.mxu0 %v8457_v43  ;;  %v8337_v43 = vmax.f32 %v7624_v17, 0.0  ;;  %v8474_v6 = vmul.f32 %v8405_v30, %v8353_v35  ;;  %v8328_v47 = vmax.f32 %v7618_v59, 0.0  ;;  %v8612_v35 = vld [vmem:[%s19412_s7 + $0xa8] sm:$0xff] }
 0x412   :  { %v18395_v53 = vpop.f32.mrf.mxu1  ;;  %11511 = vmatprep.subr.mxu0 %v8450_v58  ;;  %v8335_v58 = vmax.f32 %v20764_v16, 0.0 }
 0x413   :  { %11512 = vmatpush3.msra.mxu0 %v8448_v3  ;;  %v8458_v19 = vmul.f32 %v18389_v61, %v8337_v43  ;;  %v8449_v41 = vmul.f32 %v18389_v61, %v8328_v47  ;;  %v8596_v61 = vld [vmem:[%s19412_s7 + $0x28] sm:$0xff] }
 0x414   :  { %11513 = vmatprep.subr.mxu0 %v8512_v12  ;;  %v8456_v23 = vmul.f32 %v8405_v30, %v8335_v58  ;;  %v8597_v12 = vld [vmem:[%s19412_s7 + $0x30] sm:$0xff]  ;;  %v8616_v43 = vld [vmem:[%s19412_s7 + $0xc8] sm:$0xff]  ;;  %v8622_v58 = vld [vmem:[%s19412_s7 + $0xf8] sm:$0xff] }
 0x415   :  { %v18404_v2 = vpop.f32.mrf.mxu1  ;;  %11514 = vmatpush3.msra.mxu0 %v8510_v40 }
 0x416   :  { %11515 = vmatprep.subr.mxu0 %v8503_v22  ;;  %v8601_v22 = vld [vmem:[%s19412_s7 + $0x50] sm:$0xff] }
 0x417   :  { %v18411_v1 = vpop.f32.mrf.mxu1  ;;  %11516 = vmatpush3.msra.mxu0 %v8501_v62  ;;  %v8607_v62 = vld [vmem:[%s19412_s7 + $0x80] sm:$0xff] }
 0x418   :  { %11517 = vmatprep.subr.mxu0 %v8494_v46  ;;  %v8606_v46 = vld [vmem:[%s19412_s7 + $0x78] sm:$0xff] }
 0x419   :  { %11518 = vmatpush3.msra.mxu0 %v8492_v39 }
 0x41a   :  { %v18418_v49 = vpop.f32.mrf.mxu1  ;;  %11519 = vmatprep.subr.mxu0 %v8485_v26 }
 0x41b   :  { %11520 = vmatpush3.msra.mxu0 %v8483_v48 }
 0x41c   :  { %v18422_v45 = vpop.f32.mrf.mxu1  ;;  %11521 = vmatprep.subr.mxu0 %v8476_v5 }
 0x41d   :  { %11522 = vmatpush3.msra.mxu0 %v8474_v6 }
 0x41e   :  { %11523 = vmatprep.subr.mxu0 %v8467_v54 }
 0x41f   :  { %v18427_v3 = vpop.f32.mrf.mxu1  ;;  %11524 = vmatpush3.msra.mxu0 %v8465_v27  ;;  %v8627_v27 = vld [vmem:[%s19412_s7 + $0x120] sm:$0xff] }
 0x420   :  { %11525 = vmatprep.subr.mxu0 %v8458_v19 }
 0x421   :  { %v18430_v38 = vpop.f32.mrf.mxu1  ;;  %11526 = vmatpush3.msra.mxu0 %v8456_v23 }
 0x422   :  { %11527 = vmatprep.subr.mxu0 %v8449_v41 }
 0x423   :  { %11528 = vmatpush3.msra.mxu0 %v8447_v33  ;;  %v8626_v33 = vld [vmem:[%s19412_s7 + $0x118] sm:$0xff] }
 0x424   :  { %v18439_v36 = vpop.f32.mrf.mxu1  ;;  %8841 = vmatmul.mubr.f32.vlgmr.msra.gmra.mxu0 %v8591_v7  ;;  %v8595_v7 = vld [vmem:[%s19412_s7 + $0x20] sm:$0xff] }
 0x425   :  { %v18441_v40 = vpop.f32.mrf.mxu0  ;;  %8845 = vmatprep.mubr.f32.mxu0 %v8597_v12 }
 0x426   :  { %20766 = vst [vmem:[#allocation429_spill] sm:$0xff] %v18441_v40  ;;  %v18443_v21 = vpop.f32.mrf.mxu1 }
 0x427   :  { %v7732_v30 = vpop.f32.mrf.mxu0 }
 0x428   :  { %v7733_v50 = vadd.f32 %v7732_v30, %v18164_v18  ;;  %8846 = vmatmul.mubr.f32.gmra.mxu0 %v8596_v61 }
 0x429   :  { %8850 = vmatprep.mubr.f32.mxu0 %v8602_v25 }
 0x42a   :  { %v18452_v32 = vpop.f32.mrf.mxu1  ;;  %v18455_v52 = vadd.f32 %v18341_v29, %v7733_v50 }
 0x42c   :  { %v7736_v51 = vpop.f32.mrf.mxu0  ;;  %v18460_v55 = vpop.f32.mrf.mxu1  ;;  %8851 = vmatmul.mubr.f32.gmra.mxu0 %v8601_v22 }
 0x42d   :  { %v7737_v57 = vadd.f32 %v7736_v51, %v18179_v11  ;;  %8855 = vmatprep.mubr.f32.mxu0 %v8607_v62 }
 0x42e   :  { %v7738_v17 = vpop.f32.mrf.mxu0 }
 0x42f   :  { %v18467_v14 = vadd.f32 %v18356_v44, %v7737_v57  ;;  %v7739_v29 = vadd.f32 %v7738_v17, %v18179_v11 }
 0x430   :  { %v18473_v42 = vpop.f32.mrf.mxu1  ;;  %8856 = vmatmul.mubr.f32.gmra.mxu0 %v8606_v46 }
 0x431   :  { %20767 = vst [vmem:[#allocation430_spill] sm:$0xff] %v18467_v14  ;;  %20768 = vst [vmem:[#allocation434_spill] sm:$0xff] %v18473_v42  ;;  %v18479_v39 = vadd.f32 %v18367_v0, %v7739_v29  ;;  %v7742_v37 = vpop.f32.mrf.mxu0  ;;  %8860 = vmatprep.mubr.f32.mxu0 %v8612_v35 }
 0x432   :  { %v18481_v59 = vpop.f32.mrf.mxu1  ;;  %v7743_v44 = vadd.f32 %v7742_v37, %v18134_v28 }
 0x433   :  { %v18487_v26 = vpop.f32.mrf.mxu0 }
 0x434   :  { %v18493_v0 = vadd.f32 %v18383_v4, %v7743_v44  ;;  %8861 = vmatmul.mubr.f32.gmra.mxu0 %v8611_v31 }
 0x435   :  { %v18495_v60 = vpop.f32.mrf.mxu1  ;;  %8865 = vmatprep.mubr.f32.mxu0 %v8617_v63 }
 0x436   :  { %20769 = vst [vmem:[#allocation660_spill] sm:$0xff] %v18493_v0  ;;  %20770 = vst [vmem:[#allocation432_spill] sm:$0xff] %v18495_v60  ;;  %v7748_v48 = vpop.f32.mrf.mxu0 }
 0x437   :  { %v7749_v5 = vadd.f32 %v7748_v48, %v18154_v24  ;;  %v18501_v16 = vpop.f32.mrf.mxu1 }
 0x438   :  { %v18506_v6 = vpop.f32.mrf.mxu0  ;;  %8866 = vmatmul.mubr.f32.gmra.mxu0 %v8616_v43 }
 0x439   :  { %v18509_v4 = vadd.f32 %v18404_v2, %v7749_v5  ;;  %v18511_v47 = vpop.f32.mrf.mxu1  ;;  %8870 = vmatprep.mubr.f32.mxu0 %v8622_v58 }
 0x43a   :  { %20772 = vst [vmem:[#allocation438_spill] sm:$0xff] %v18511_v47  ;;  %v7754_v54 = vpop.f32.mrf.mxu0 }
 0x43b   :  { %20771 = vst [vmem:[#allocation667_spill] sm:$0xff] %v18509_v4  ;;  %v7755_v10 = vadd.f32 %v7754_v54, %v18102_v20  ;;  %v18520_v19 = vpop.f32.mrf.mxu1 }
 0x43c   :  { %v7756_v23 = vpop.f32.mrf.mxu0  ;;  %8871 = vmatmul.mubr.f32.gmra.mxu0 %v8621_v15 }
 0x43d   :  { %v18523_v2 = vadd.f32 %v18418_v49, %v7755_v10  ;;  %8875 = vmatprep.mubr.f32.mxu0 %v8627_v27  ;;  %v18533_v12 = vpop.f32.mrf.mxu1 }
 0x43e   :  { %v18525_v41 = vpop.f32.mrf.mxu0 }
 0x43f   :  { %20773 = vst [vmem:[#allocation672_spill] sm:$0xff] %v18523_v2  ;;  %v7976_v49 = vpop.f32.mrf.mxu1 }
 0x440   :  { %v7762_v61 = vpop.f32.mrf.mxu0  ;;  %8876 = vmatmul.mubr.f32.gmra.mxu0 %v8626_v33 }
 0x441   :  { %12205 = vmatprep.mubr.msk.f32.mxu0 %vm8751_vm2, %v8595_v7  ;;  %v18540_v22 = vpop.f32.mrf.mxu1  ;;  %v7763_v4 = vadd.f32 %v7762_v61, %v18124_v9  ;;  %v7751_v61 = vadd.f32 %v18506_v6, %v18154_v24 }
 0x442   :  { %v18535_v30 = vpop.f32.mrf.mxu0 }
 0x443   :  { %v7982_v57 = vpop.f32.mrf.mxu1 }
 0x444   :  { %v7768_v25 = vpop.f32.mrf.mxu0 }
 0x445   :  { %v18548_v46 = vpop.f32.mrf.mxu1  ;;  %v7769_v14 = vadd.f32 %v7768_v25, %v18073_v13 }
 0x446   :  { %v18538_v50 = vpop.f32.mrf.mxu0 }
 0x447   :  { %v7988_v44 = vpop.f32.mrf.mxu1  ;;  %v7882_v60 = vadd.f32 %v18443_v21, %v7769_v14 }
 0x448   :  { %v7774_v51 = vpop.f32.mrf.mxu0  ;;  %v7989_v42 = vadd.f32 %v7988_v44, %v18124_v9 }
 0x449   :  { %v18556_v48 = vpop.f32.mrf.mxu1  ;;  %v7775_v33 = vadd.f32 %v7774_v51, %v18094_v34  ;;  %v7757_v51 = vadd.f32 %v7756_v23, %v18102_v20  ;;  %v8385_v6 = vmax.f32 %v7882_v60, 0.0 }
 0x44a   :  { %v18542_v62 = vpop.f32.mrf.mxu0 }
 0x44b   :  { %20774 = vst [vmem:[#allocation422_spill] sm:$0xff] %v18542_v62  ;;  %v7994_v58 = vpop.f32.mrf.mxu1 }
 0x44c   :  { %v18544_v17 = vpop.f32.mrf.mxu0  ;;  %v7995_v62 = vadd.f32 %v7994_v58, %v18073_v13 }
 0x44d   :  { %v18562_v10 = vpop.f32.mrf.mxu1 }
 0x44e   :  { %v18546_v29 = vpop.f32.mrf.mxu0 }
 0x44f   :  { %20775 = vst [vmem:[#allocation664_spill] sm:$0xff] %v18546_v29  ;;  %v8000_v0 = vpop.f32.mrf.mxu1  ;;  %v7888_v29 = vadd.f32 %v18460_v55, %v7775_v33  ;;  %v7876_v55 = vadd.f32 %v18430_v38, %v7763_v4  ;;  %v7870_v38 = vadd.f32 %v18422_v45, %v7757_v51  ;;  %v7965_v45 = vadd.f32 %v18501_v16, %v18179_v11 }
 0x450   :  { %v18550_v35 = vpop.f32.mrf.mxu0  ;;  %v8001_v40 = vadd.f32 %v8000_v0, %v18094_v34  ;;  %v7977_v0 = vadd.f32 %v7976_v49, %v18154_v24 }
 0x451   :  { %v8394_v33 = vmax.f32 %v7888_v29, 0.0 }
 0x452   :  { %v18552_v37 = vpop.f32.mrf.mxu0 }
 0x453   :  { %20776 = vst [vmem:[#allocation652_spill] sm:$0xff] %v18552_v37 }
 0x454   :  { %v8083_v31 = vpop.f32.mrf.mxu0 }
 0x456   :  { %v18554_v63 = vpop.f32.mrf.mxu0 }
 0x457   :  { %20777 = vst [vmem:[#allocation440_spill] sm:$0xff] %v18554_v63  ;;  %v7983_v63 = vadd.f32 %v7982_v57, %v18102_v20  ;;  %v7971_v57 = vadd.f32 %v18520_v19, %v18134_v28 }
 0x458   :  { %v8089_v43 = vpop.f32.mrf.mxu0 }
 0x459   :  { %v8090_v29 = vadd.f32 %v8089_v43, %v7977_v0 }
 0x45a   :  { %v18558_v5 = vpop.f32.mrf.mxu0 }
 0x45b   :  { %20778 = vst [vmem:[#allocation442_spill] sm:$0xff] %v18558_v5  ;;  %v20779_v5 = vld [vmem:[#allocation647_spill] sm:$0xff] }
 0x45c   :  { %v8095_v54 = vpop.f32.mrf.mxu0  ;;  %v18583_v44 = vrot.slane %v18313_v56, %v20779_v5  ;;  %v8376_v5 = vmax.f32 %v7876_v55, 0.0 }
 0x45d   :  { %v8096_v21 = vadd.f32 %v8095_v54, %v7983_v63  ;;  %v7864_v63 = vadd.f32 %v18411_v1, %v7751_v61  ;;  %v7959_v1 = vadd.f32 %v18481_v59, %v18164_v18  ;;  %v8360_v61 = vmax.f32 %v8090_v29, 0.0 }
 0x45e   :  { %v18560_v15 = vpop.f32.mrf.mxu0  ;;  %v7999_v59 = vadd.f32 %v18562_v10, %v18094_v34 }
 0x45f   :  { %v8369_v60 = vmax.f32 %v8096_v21, 0.0  ;;  %v8072_v21 = vadd.f32 %v18544_v17, %v7959_v1 }
 0x460   :  { %v8101_v27 = vpop.f32.mrf.mxu0 }
 0x461   :  { %v8102_v47 = vadd.f32 %v8101_v27, %v7989_v42  ;;  %v7745_v42 = vadd.f32 %v18487_v26, %v18134_v28  ;;  %v8084_v26 = vadd.f32 %v8083_v31, %v7971_v57  ;;  %v8358_v31 = vmax.f32 %v7864_v63, 0.0 }
 0x462   :  { %v18565_v7 = vpop.f32.mrf.mxu0  ;;  %v8340_v57 = vmax.f32 %v18479_v39, 0.0 }
 0x463   :  { %v8378_v49 = vmax.f32 %v8102_v47, 0.0  ;;  %v7858_v19 = vadd.f32 %v18395_v53, %v7745_v42  ;;  %v8367_v47 = vmax.f32 %v7870_v38, 0.0  ;;  %v7773_v53 = vadd.f32 %v18538_v50, %v18094_v34 }
 0x464   :  { %v8107_v8 = vpop.f32.mrf.mxu0  ;;  %v7767_v50 = vadd.f32 %v18535_v30, %v18073_v13  ;;  %v7993_v38 = vadd.f32 %v18556_v48, %v18073_v13  ;;  %v7987_v48 = vadd.f32 %v18548_v46, %v18124_v9  ;;  %v7981_v46 = vadd.f32 %v18540_v22, %v18102_v20 }
 0x465   :  { %v8108_v37 = vadd.f32 %v8107_v8, %v7995_v62  ;;  %v20780_v62 = vld [vmem:[#allocation642_spill] sm:$0xff]  ;;  %v8499_v16 = vmul.f32 %v18583_v44, %v8378_v49  ;;  %v7761_v49 = vadd.f32 %v18525_v41, %v18124_v9  ;;  %v7886_v30 = vadd.f32 %v18452_v32, %v7773_v53 }
 0x466   :  { %v18571_v2 = vpop.f32.mrf.mxu0  ;;  %v8106_v39 = vadd.f32 %v18565_v7, %v7993_v38  ;;  %v7880_v32 = vadd.f32 %v18439_v36, %v7767_v50  ;;  %v20781_v36 = vld [vmem:[#allocation644_spill] sm:$0xff]  ;;  %v7975_v22 = vadd.f32 %v18533_v12, %v18154_v24 }
 0x467   :  { %v8387_v14 = vmax.f32 %v8108_v37, 0.0  ;;  %v8112_v10 = vadd.f32 %v18571_v2, %v7999_v59 }
 0x468   :  { %v8113_v25 = vpop.f32.mrf.mxu0  ;;  %v8384_v53 = vmax.f32 %v7880_v32, 0.0 }
 0x469   :  { %v8114_v58 = vadd.f32 %v8113_v25, %v8001_v40  ;;  %v18590_v40 = vrot.slane %v18313_v56, %v20780_v62  ;;  %v8508_v51 = vmul.f32 %v18583_v44, %v8387_v14  ;;  %v8490_v14 = vmul.f32 %v18583_v44, %v8369_v60 }
 0x46a   :  { %v18585_v8 = vpop.f32.mrf.mxu0  ;;  %v8395_v7 = vmax.f32 %v8112_v10, 0.0  ;;  %v20787_v10 = vld [vmem:[#allocation652_spill] sm:$0xff] }
 0x46b   :  { %v8396_v23 = vmax.f32 %v8114_v58, 0.0  ;;  %v8515_v54 = vmul.f32 %v18590_v40, %v8394_v33  ;;  %v8506_v43 = vmul.f32 %v18590_v40, %v8385_v6  ;;  %v8078_v58 = vadd.f32 %v18550_v35, %v7965_v45  ;;  %v18618_v33 = vpop.f32.mrf.mxu1 }
 0x46c   :  { %v18595_v4 = vpop.f32.mrf.mxu0  ;;  %v8497_v55 = vmul.f32 %v18590_v40, %v8376_v5  ;;  %v8351_v35 = vmax.f32 %v8084_v26, 0.0  ;;  %v8488_v62 = vmul.f32 %v18590_v40, %v8367_v47  ;;  %v8481_v6 = vmul.f32 %v18583_v44, %v8360_v61 }
 0x46d   :  { %v8517_v37 = vmul.f32 %v18583_v44, %v8396_v23  ;;  %v8349_v23 = vmax.f32 %v7858_v19, 0.0  ;;  %v8342_v17 = vmax.f32 %v8078_v58, 0.0  ;;  %v8479_v29 = vmul.f32 %v18590_v40, %v8358_v31  ;;  %v20783_v31 = vld [vmem:[#allocation638_spill] sm:$0xff] }
 0x46e   :  { %v18602_v27 = vpop.f32.mrf.mxu0  ;;  %v8333_v5 = vmax.f32 %v8072_v21, 0.0  ;;  %v8472_v2 = vmul.f32 %v18583_v44, %v8351_v35  ;;  %v7874_v19 = vadd.f32 %v18427_v3, %v7761_v49  ;;  %v8393_v47 = vmax.f32 %v7886_v30, 0.0  ;;  %v20784_v35 = vld [vmem:[#allocation438_spill] sm:$0xff]  ;;  %v20788_v30 = vld [vmem:[#allocation429_spill] sm:$0xff] }
 0x46f   :  { %11553 = vmatprep.subr.mxu1 %v8517_v37  ;;  %v18640_v37 = vpop.f32.mrf.mxu1  ;;  %v8470_v41 = vmul.f32 %v18590_v40, %v8349_v23  ;;  %v8463_v60 = vmul.f32 %v18583_v44, %v8342_v17  ;;  %v18673_v3 = vrot.slane %v18313_v56, %v20783_v31  ;;  %v7969_v12 = vadd.f32 %v20784_v35, %v18134_v28  ;;  %v20794_v31 = vld [vmem:[#allocation436_spill] sm:$0xff] }
 0x470   :  { %v18609_v25 = vpop.f32.mrf.mxu0  ;;  %11554 = vmatpush3.msra.mxu1 %v8515_v54  ;;  %v8331_v54 = vmax.f32 %v18455_v52, 0.0  ;;  %v8461_v52 = vmul.f32 %v18590_v40, %v8340_v57  ;;  %v8454_v58 = vmul.f32 %v18583_v44, %v8333_v5  ;;  %v8375_v50 = vmax.f32 %v7874_v19, 0.0  ;;  %v20789_v5 = vld [vmem:[#allocation434_spill] sm:$0xff] }
 0x471   :  { %11555 = vmatprep.subr.mxu1 %v8508_v51  ;;  %v18651_v45 = vpop.f32.mrf.mxu1  ;;  %v8100_v51 = vadd.f32 %v18560_v15, %v7987_v48  ;;  %v20782_v15 = vld [vmem:[#allocation442_spill] sm:$0xff]  ;;  %v8082_v57 = vadd.f32 %v20787_v10, %v7969_v12  ;;  %v7731_v48 = vadd.f32 %v20788_v30, %v18164_v18 }
 0x472   :  { %v18620_v0 = vpop.f32.mrf.mxu0  ;;  %11556 = vmatpush3.msra.mxu1 %v8506_v43  ;;  %v18663_v43 = vrot.slane %v18313_v56, %v20781_v36  ;;  %v8094_v61 = vadd.f32 %v20782_v15, %v7981_v46  ;;  %v8514_v56 = vmul.f32 %v18673_v3, %v8393_v47  ;;  %v20791_v46 = vld [vmem:[#allocation664_spill] sm:$0xff]  ;;  %v8496_v47 = vmul.f32 %v18673_v3, %v8375_v50  ;;  %v20793_v36 = vld [vmem:[#allocation422_spill] sm:$0xff] }
 0x473   :  { %11557 = vmatprep.subr.mxu1 %v8499_v16  ;;  %v8386_v16 = vmax.f32 %v8106_v39, 0.0  ;;  %v18676_v21 = vpop.f32.mrf.mxu1  ;;  %v8377_v23 = vmax.f32 %v8100_v51, 0.0  ;;  %v20790_v39 = vld [vmem:[#allocation672_spill] sm:$0xff] }
 0x474   :  { %v18629_v42 = vpop.f32.mrf.mxu0  ;;  %11558 = vmatpush3.msra.mxu1 %v8497_v55  ;;  %v8452_v55 = vmul.f32 %v18590_v40, %v8331_v54  ;;  %v20786_v40 = vld [vmem:[#allocation432_spill] sm:$0xff]  ;;  %v8366_v54 = vmax.f32 %v20790_v39, 0.0 }
 0x475   :  { %11559 = vmatprep.subr.mxu1 %v8490_v14  ;;  %v20785_v14 = vld [vmem:[#allocation440_spill] sm:$0xff]  ;;  %v18683_v17 = vpop.f32.mrf.mxu1  ;;  %v8507_v49 = vmul.f32 %v18663_v43, %v8386_v16 }
 0x476   :  { %v18642_v63 = vpop.f32.mrf.mxu0  ;;  %11560 = vmatpush3.msra.mxu1 %v8488_v62  ;;  %v8088_v44 = vadd.f32 %v20785_v14, %v7975_v22  ;;  %v8516_v62 = vmul.f32 %v18663_v43, %v8395_v7  ;;  %v8498_v7 = vmul.f32 %v18663_v43, %v8377_v23  ;;  %v8487_v12 = vmul.f32 %v18673_v3, %v8366_v54 }
 0x477   :  { %11561 = vmatprep.subr.mxu1 %v8481_v6  ;;  %v7963_v6 = vadd.f32 %v20786_v40, %v18179_v11  ;;  %v20796_v40 = vld [vmem:[#allocation430_spill] sm:$0xff] }
 0x478   :  { %v18653_v26 = vpop.f32.mrf.mxu0  ;;  %11562 = vmatpush3.msra.mxu1 %v8479_v29  ;;  %v8368_v29 = vmax.f32 %v8094_v61, 0.0  ;;  %v8359_v51 = vmax.f32 %v8088_v44, 0.0  ;;  %v8350_v61 = vmax.f32 %v8082_v57, 0.0 }
 0x479   :  { %11563 = vmatprep.subr.mxu1 %v8472_v2  ;;  %v7957_v2 = vadd.f32 %v20789_v5, %v18164_v18 }
 0x47a   :  { %v18665_v1 = vpop.f32.mrf.mxu0  ;;  %11564 = vmatpush3.msra.mxu1 %v8470_v41  ;;  %v8505_v41 = vmul.f32 %v18673_v3, %v8384_v53  ;;  %v8489_v16 = vmul.f32 %v18663_v43, %v8368_v29  ;;  %v20795_v53 = vld [vmem:[#allocation660_spill] sm:$0xff] }
 0x47b   :  { %11565 = vmatprep.subr.mxu1 %v8463_v60  ;;  %v8076_v60 = vadd.f32 %v20791_v46, %v7963_v6  ;;  %v8070_v22 = vadd.f32 %v20793_v36, %v7957_v2  ;;  %v8348_v35 = vmax.f32 %v20795_v53, 0.0  ;;  %v8339_v6 = vmax.f32 %v20796_v40, 0.0  ;;  %v8600_v40 = vld [vmem:[%s19412_s7 + $0x48] sm:$0xff] }
 0x47c   :  { %v11474_v59 = vpop.f32.mrf.mxu0  ;;  %11566 = vmatpush3.msra.mxu1 %v8461_v52  ;;  %v20792_v52 = vld [vmem:[#allocation667_spill] sm:$0xff] }
 0x47d   :  { %11567 = vmatprep.subr.mxu1 %v8454_v58  ;;  %v8357_v19 = vmax.f32 %v20792_v52, 0.0  ;;  %v8307_v58 = vpop.f32.mrf.mxu1  ;;  %v8341_v23 = vmax.f32 %v8076_v60, 0.0  ;;  %v8332_v57 = vmax.f32 %v8070_v22, 0.0  ;;  %v11475_v30 = vadd.f32 %v11474_v59, %v18665_v1 }
 0x47e   :  { %v11476_v38 = vpop.f32.mrf.mxu0  ;;  %11568 = vmatpush3.msra.mxu1 %v8452_v55  ;;  %v7844_v55 = vadd.f32 %v20794_v31, %v7731_v48  ;;  %v8469_v2 = vmul.f32 %v18673_v3, %v8348_v35  ;;  %v8460_v1 = vmul.f32 %v18673_v3, %v8339_v6  ;;  %v8624_v6 = vld [vmem:[%s19412_s7 + $0x108] sm:$0xff] }
 0x47f   :  { %11569 = vmatprep.subr.mxu1 %v8516_v62  ;;  %v12188_v44 = vpop.f32.mrf.mxu1  ;;  %v8480_v62 = vmul.f32 %v18663_v43, %v8359_v51  ;;  %v8478_v10 = vmul.f32 %v18673_v3, %v8357_v19  ;;  %v8462_v54 = vmul.f32 %v18663_v43, %v8341_v23  ;;  %v8453_v59 = vmul.f32 %v18663_v43, %v8332_v57  ;;  %v8623_v57 = vld [vmem:[%s19412_s7 + $0x100] sm:$0xff] }
 0x480   :  { %v11477_v32 = vpop.f32.mrf.mxu0  ;;  %11570 = vmatpush3.msra.mxu1 %v8514_v56  ;;  %v8330_v5 = vmax.f32 %v7844_v55, 0.0  ;;  %v8203_v60 = vadd.f32 %v11475_v30, %v18102_v20  ;;  %v11463_v20 = vadd.f32 %v18595_v4, %v18585_v8  ;;  %v8615_v30 = vld [vmem:[%s19412_s7 + $0xc0] sm:$0xff] }
 0x481   :  { %11571 = vmatprep.subr.mxu1 %v8507_v49  ;;  %v11478_v50 = vadd.f32 %v11477_v32, %v11476_v38  ;;  %v8471_v49 = vmul.f32 %v18663_v43, %v8350_v61  ;;  %v8317_v39 = vpop.f32.mrf.mxu1 }
 0x482   :  { %v11479_v15 = vpop.f32.mrf.mxu0  ;;  %11572 = vmatpush3.msra.mxu1 %v8505_v41  ;;  %v11472_v41 = vadd.f32 %v18653_v26, %v18642_v63  ;;  %v8451_v63 = vmul.f32 %v18673_v3, %v8330_v5  ;;  %v11466_v26 = vadd.f32 %v18609_v25, %v18602_v27  ;;  %v8308_v52 = vadd.f32 %v8307_v58, %v8203_v60  ;;  %v8598_v27 = vld [vmem:[%s19412_s7 + $0x38] sm:$0xff]  ;;  %v8620_v5 = vld [vmem:[%s19412_s7 + $0xe8] sm:$0xff] }
 0x483   :  { %11573 = vmatprep.subr.mxu1 %v8498_v7  ;;  %v8208_v32 = vadd.f32 %v11478_v50, %v18124_v9  ;;  %v8593_v9 = vld [vmem:[%s19412_s7 + $0x10] sm:$0xff]  ;;  %v8183_v36 = vadd.f32 %v11463_v20, %v18164_v18 }
 0x484   :  { %v11480_v14 = vpop.f32.mrf.mxu0  ;;  %11574 = vmatpush3.msra.mxu1 %v8496_v47  ;;  %v8198_v43 = vadd.f32 %v11472_v41, %v18154_v24  ;;  %v11337_v24 = vld [vmem:[%s19407_s2 + $0x8] ss:$0 sm:$0xff]  ;;  %v8188_v25 = vadd.f32 %v11466_v26, %v18179_v11  ;;  %v8370_v58 = vmax.f32 %v8308_v52, 0.0  ;;  %v8603_v11 = vld [vmem:[%s19412_s7 + $0x60] sm:$0xff]  ;;  %v8609_v18 = vld [vmem:[%s19412_s7 + $0x90] sm:$0xff] }
 0x485   :  { %v11481_v56 = vadd.f32 %v11480_v14, %v11479_v15  ;;  %11575 = vmatprep.subr.mxu1 %v8489_v16 }
 0x486   :  { %v11482_v29 = vpop.f32.mrf.mxu0  ;;  %11576 = vmatpush3.msra.mxu1 %v8487_v12  ;;  %v8303_v8 = vadd.f32 %v18651_v45, %v8198_v43  ;;  %v8293_v45 = vadd.f32 %v18618_v33, %v8188_v25  ;;  %v8491_v55 = vmul.f32 %v11337_v24, %v8370_v58  ;;  %v8608_v33 = vld [vmem:[%s19412_s7 + $0x88] sm:$0xff]  ;;  %v8614_v12 = vld [vmem:[%s19412_s7 + $0xb8] sm:$0xff]  ;;  %v8714_v25 = vpop.permute.xlu0 %8713 }
 0x487   :  { %11577 = vmatprep.subr.mxu1 %v8480_v62  ;;  %v8213_v48 = vadd.f32 %v11481_v56, %v18073_v13  ;;  %v11469_v13 = vadd.f32 %v18629_v42, %v18620_v0  ;;  %v8313_v0 = vadd.f32 %v18683_v17, %v8208_v32  ;;  %v8619_v62 = vld [vmem:[%s19412_s7 + $0xe0] sm:$0xff]  ;;  %v8618_v56 = vld [vmem:[%s19412_s7 + $0xd8] sm:$0xff] }
 0x488   :  { %v11483_v38 = vpop.f32.mrf.mxu0  ;;  %11578 = vmatpush3.msra.mxu1 %v8478_v10  ;;  %v8361_v61 = vmax.f32 %v8303_v8, 0.0  ;;  %v8343_v53 = vmax.f32 %v8293_v45, 0.0  ;;  %v8605_v10 = vld [vmem:[%s19412_s7 + $0x70] sm:$0xff] }
 0x489   :  { %v11484_v46 = vadd.f32 %v11483_v38, %v11482_v29  ;;  %11579 = vmatprep.subr.mxu1 %v8471_v49  ;;  %v8318_v7 = vadd.f32 %v8317_v39, %v8213_v48  ;;  %v8193_v3 = vadd.f32 %v11469_v13, %v18134_v28  ;;  %v8379_v4 = vmax.f32 %v8313_v0, 0.0  ;;  %v8604_v28 = vld [vmem:[%s19412_s7 + $0x68] sm:$0xff]  ;;  %v8610_v29 = vld [vmem:[%s19412_s7 + $0x98] sm:$0xff]  ;;  %v8629_v49 = vld [vmem:[%s19412_s7 + $0x130] sm:$0xff] }
 0x48a   :  { %11580 = vmatpush3.msra.mxu1 %v8469_v2  ;;  %v8482_v35 = vmul.f32 %v11337_v24, %v8361_v61  ;;  %v8464_v23 = vmul.f32 %v11337_v24, %v8343_v53  ;;  %v8628_v48 = vld [vmem:[%s19412_s7 + $0x128] sm:$0xff]  ;;  %v8625_v2 = vld [vmem:[%s19412_s7 + $0x110] sm:$0xff]  ;;  %v8630_v38 = vld [vmem:[%s19412_s7 + $0x138] sm:$0xff]  ;;  %v8724_v53 = vpop.permute.xlu0 %8723 }
 0x48b   :  { %v8218_v51 = vadd.f32 %v11484_v46, %v18094_v34  ;;  %11581 = vmatprep.subr.mxu1 %v8462_v54  ;;  %v8599_v34 = vld [vmem:[%s19412_s7 + $0x40] sm:$0xff]  ;;  %v8388_v47 = vmax.f32 %v8318_v7, 0.0  ;;  %v8298_v22 = vadd.f32 %v18676_v21, %v8193_v3  ;;  %v8500_v16 = vmul.f32 %v11337_v24, %v8379_v4 }
 0x48c   :  { %11582 = vmatpush3.msra.mxu1 %v8460_v1  ;;  %v8288_v21 = vadd.f32 %v18640_v37, %v8183_v36  ;;  %v8719_v36 = vpop.permute.xlu1 %8718 }
 0x48d   :  { %v8323_v42 = vadd.f32 %v12188_v44, %v8218_v51  ;;  %11583 = vmatprep.subr.mxu1 %v8453_v59  ;;  %v8509_v15 = vmul.f32 %v11337_v24, %v8388_v47  ;;  %v8352_v31 = vmax.f32 %v8298_v22, 0.0  ;;  %v8613_v44 = vld [vmem:[%s19412_s7 + $0xb0] sm:$0xff]  ;;  %s12371_s7 = smov 64  }
 0x48e   :  { %11584 = vmatpush3.msra.mxu1 %v8451_v63  ;;  %v8334_v14 = vmax.f32 %v8288_v21, 0.0 }
 0x48f   :  { %v8397_v19 = vmax.f32 %v8323_v42, 0.0  ;;  %8946 = vmatmul.mubr.f32.vlgmr.msra.gmra.mxu1 %v8593_v9  ;;  %v8473_v37 = vmul.f32 %v11337_v24, %v8352_v31 }
 0x490   :  { %8950 = vmatprep.mubr.f32.mxu1 %v8599_v34  ;;  %v8455_v50 = vmul.f32 %v11337_v24, %v8334_v14 }
 0x491   :  { %v8518_v17 = vmul.f32 %v11337_v24, %v8397_v19 }
 0x493   :  { %8951 = vmatmul.mubr.f32.gmra.mxu1 %v8598_v27  ;;  %12189 = vmatprep.subr.mxu0 %v8518_v17 }
 0x494   :  { %12190 = vmatpush3.msra.mxu0 %v8518_v17  ;;  %8955 = vmatprep.mubr.f32.mxu1 %v8604_v28 }
 0x495   :  { %12191 = vmatprep.subr.mxu0 %v8509_v15 }
 0x496   :  { %12192 = vmatpush3.msra.mxu0 %v8509_v15 }
 0x497   :  { %8956 = vmatmul.mubr.f32.gmra.mxu1 %v8603_v11  ;;  %12193 = vmatprep.subr.mxu0 %v8500_v16 }
 0x498   :  { %12194 = vmatpush3.msra.mxu0 %v8500_v16  ;;  %8960 = vmatprep.mubr.f32.mxu1 %v8609_v18 }
 0x499   :  { %12195 = vmatprep.subr.mxu0 %v8491_v55 }
 0x49a   :  { %12196 = vmatpush3.msra.mxu0 %v8491_v55 }
 0x49b   :  { %8961 = vmatmul.mubr.f32.gmra.mxu1 %v8608_v33  ;;  %12197 = vmatprep.subr.mxu0 %v8482_v35 }
 0x49c   :  { %12198 = vmatpush3.msra.mxu0 %v8482_v35  ;;  %8965 = vmatprep.mubr.f32.mxu1 %v8614_v12 }
 0x49d   :  { %12199 = vmatprep.subr.mxu0 %v8473_v37 }
 0x49e   :  { %12200 = vmatpush3.msra.mxu0 %v8473_v37 }
 0x49f   :  { %8966 = vmatmul.mubr.f32.gmra.mxu1 %v8613_v44  ;;  %12201 = vmatprep.subr.mxu0 %v8464_v23 }
 0x4a0   :  { %12202 = vmatpush3.msra.mxu0 %v8464_v23  ;;  %8970 = vmatprep.mubr.f32.mxu1 %v8619_v62 }
 0x4a1   :  { %12203 = vmatprep.subr.mxu0 %v8455_v50 }
 0x4a2   :  { %12204 = vmatpush3.msra.mxu0 %v8455_v50 }
 0x4a3   :  { %8971 = vmatmul.mubr.f32.gmra.mxu1 %v8618_v56  ;;  %12206 = vmatmul.mubr.msk.f32.vlgmr.msra.gmra.mxu0 %vm8751_vm2, %v8600_v40  ;;  %v8729_v40 = vpop.permute.xlu1 %8728 }
 0x4a4   :  { %8975 = vmatprep.mubr.f32.mxu1 %v8624_v6  ;;  %12208 = vmatprep.mubr.msk.f32.mxu0 %vm8751_vm2, %v8605_v10 }
 0x4a7   :  { %8976 = vmatmul.mubr.f32.gmra.mxu1 %v8623_v57  ;;  %12209 = vmatmul.mubr.msk.f32.gmra.mxu0 %vm8751_vm2, %v8610_v29 }
 0x4a8   :  { %8980 = vmatprep.mubr.f32.mxu1 %v8629_v49  ;;  %12211 = vmatprep.mubr.msk.f32.mxu0 %vm8751_vm2, %v8615_v30 }
 0x4ab   :  { %8981 = vmatmul.mubr.f32.gmra.mxu1 %v8628_v48  ;;  %12212 = vmatmul.mubr.msk.f32.gmra.mxu0 %vm8751_vm2, %v8620_v5 }
 0x4ac   :  { %12214 = vmatprep.mubr.msk.f32.mxu0 %vm8751_vm2, %v8625_v2  ;;  %v8734_v2 = vpop.permute.xlu0 %8733 }
 0x4af   :  { %12215 = vmatmul.mubr.msk.f32.gmra.mxu0 %vm8751_vm2, %v8630_v38 }
 0x4e4   :  { %v11529_v39 = vpop.f32.mrf.mxu0 }
 0x4e6   :  { %v11530_v54 = vpop.f32.mrf.mxu0 }
 0x4e7   :  { %v11531_v24 = vadd.f32 %v11530_v54, %v11529_v39 }
 0x4e8   :  { %v11532_v41 = vpop.f32.mrf.mxu0 }
 0x4e9   :  { %v8843_v22 = vadd.f32 %v11531_v24, %v8714_v25 }
 0x4ea   :  { %v11533_v32 = vpop.f32.mrf.mxu0 }
 0x4eb   :  { %v11534_v8 = vadd.f32 %v11533_v32, %v11532_v41 }
 0x4ec   :  { %v11535_v46 = vpop.f32.mrf.mxu0 }
 0x4ed   :  { %v8848_v45 = vadd.f32 %v11534_v8, %v8719_v36 }
 0x4ee   :  { %v11536_v1 = vpop.f32.mrf.mxu0 }
 0x4ef   :  { %v11537_v61 = vadd.f32 %v11536_v1, %v11535_v46 }
 0x4f0   :  { %v11538_v59 = vpop.f32.mrf.mxu0 }
 0x4f1   :  { %v8853_v12 = vadd.f32 %v11537_v61, %v8724_v53 }
 0x4f2   :  { %v11539_v13 = vpop.f32.mrf.mxu0 }
 0x4f3   :  { %v11540_v14 = vadd.f32 %v11539_v13, %v11538_v59  ;;  %v8739_v13 = vpop.permute.xlu1 %8738 }
 0x4f4   :  { %v11541_v60 = vpop.f32.mrf.mxu0 }
 0x4f5   :  { %v8858_v6 = vadd.f32 %v11540_v14, %v8729_v40 }
 0x4f6   :  { %v11542_v51 = vpop.f32.mrf.mxu0 }
 0x4f7   :  { %v11543_v10 = vadd.f32 %v11542_v51, %v11541_v60  ;;  %v8749_v25 = vpop.permute.xlu1 %8748 }
 0x4f8   :  { %v11544_v7 = vpop.f32.mrf.mxu0 }
 0x4f9   :  { %v8863_v38 = vadd.f32 %v11543_v10, %v8734_v2 }
 0x4fa   :  { %v11545_v9 = vpop.f32.mrf.mxu0 }
 0x4fb   :  { %v11546_v39 = vadd.f32 %v11545_v9, %v11544_v7 }
 0x4fc   :  { %v11547_v0 = vpop.f32.mrf.mxu0 }
 0x4fe   :  { %v11548_v20 = vpop.f32.mrf.mxu0 }
 0x4ff   :  { %v11549_v60 = vadd.f32 %v11548_v20, %v11547_v0 }
 0x500   :  { %v11550_v19 = vpop.f32.mrf.mxu0 }
 0x502   :  { %v11551_v17 = vpop.f32.mrf.mxu0 }
 0x54f   :  { %v11585_v63 = vpop.f32.mrf.mxu1 }
 0x551   :  { %v11586_v26 = vpop.f32.mrf.mxu1 }
 0x552   :  { %v11587_v4 = vadd.f32 %v11586_v26, %v11585_v63  ;;  %v8868_v63 = vadd.f32 %v11546_v39, %v8739_v13 }
 0x553   :  { %v11588_v43 = vpop.f32.mrf.mxu1 }
 0x554   :  { %v8948_v16 = vadd.f32 %v11587_v4, %v8843_v22 }
 0x555   :  { %v11589_v42 = vpop.f32.mrf.mxu1 }
 0x556   :  { %v11590_v58 = vadd.f32 %v11589_v42, %v11588_v43 }
 0x557   :  { %v11591_v34 = vpop.f32.mrf.mxu1 }
 0x558   :  { %v8953_v55 = vadd.f32 %v11590_v58, %v8848_v45 }
 0x559   :  { %v11592_v3 = vpop.f32.mrf.mxu1 }
 0x55a   :  { %v11593_v31 = vadd.f32 %v11592_v3, %v11591_v34  ;;  %v11552_v34 = vadd.f32 %v11551_v17, %v11550_v19  ;;  %v20797_v17 = vmov 0.0  }
 0x55b   :  { %v11594_v52 = vpop.f32.mrf.mxu1  ;;  %885 = vst.msk [vmem:[#allocation5 + $0x30] sm:$0x3] %vm884_vm3, %v20797_v17 }
 0x55c   :  { %v8958_v56 = vadd.f32 %v11593_v31, %v8853_v12  ;;  %v8878_v4 = vadd.f32 %v11552_v34, %v8749_v25 }
 0x55d   :  { %v11595_v47 = vpop.f32.mrf.mxu1 }
 0x55e   :  { %v11596_v50 = vadd.f32 %v11595_v47, %v11594_v52  ;;  %v8744_v47 = vpop.permute.xlu0 %8743 }
 0x55f   :  { %v11597_v27 = vpop.f32.mrf.mxu1  ;;  %v8873_v7 = vadd.f32 %v11549_v60, %v8744_v47 }
 0x560   :  { %v8963_v5 = vadd.f32 %v11596_v50, %v8858_v6 }
 0x561   :  { %v11598_v28 = vpop.f32.mrf.mxu1 }
 0x562   :  { %v11599_v48 = vadd.f32 %v11598_v28, %v11597_v27 }
 0x563   :  { %v11600_v15 = vpop.f32.mrf.mxu1  ;;  %v12207_v11 = vpop.f32.mrf.mxu0 }
 0x564   :  { %v9058_v37 = vadd.f32 %v12207_v11, %v8953_v55  ;;  %v8968_v59 = vadd.f32 %v11599_v48, %v8863_v38 }
 0x565   :  { %v11601_v18 = vpop.f32.mrf.mxu1  ;;  %v9052_v21 = vpop.f32.mrf.mxu0 }
 0x566   :  { %v9053_v33 = vadd.f32 %v9052_v21, %v8948_v16  ;;  %v9092_v57 = vmax.f32 %v9058_v37, 0.0  ;;  %v11602_v1 = vadd.f32 %v11601_v18, %v11600_v15 }
 0x567   :  { %v12210_v35 = vpop.f32.mrf.mxu0  ;;  %v11603_v23 = vpop.f32.mrf.mxu1 }
 0x568   :  { %v9091_v44 = vmax.f32 %v9053_v33, 0.0  ;;  %v9068_v54 = vadd.f32 %v12210_v35, %v8963_v5  ;;  %v8973_v52 = vadd.f32 %v11602_v1, %v8868_v63 }
 0x569   :  { %v9062_v62 = vpop.f32.mrf.mxu0  ;;  %v11604_v49 = vpop.f32.mrf.mxu1 }
 0x56a   :  { %9099 = vxpose.xlu0.b32.start [1/8] (short) %v9091_v44, 128  ;;  %v9063_v29 = vadd.f32 %v9062_v62, %v8958_v56  ;;  %v9094_v51 = vmax.f32 %v9068_v54, 0.0  ;;  %v11605_v3 = vadd.f32 %v11604_v49, %v11603_v23 }
 0x56b   :  { %v12213_v30 = vpop.f32.mrf.mxu0  ;;  %v11606_v32 = vpop.f32.mrf.mxu1 }
 0x56c   :  { %v9093_v41 = vmax.f32 %v9063_v29, 0.0  ;;  %v9078_v9 = vadd.f32 %v12213_v30, %v8973_v52  ;;  %v8978_v28 = vadd.f32 %v11605_v3, %v8873_v7 }
 0x56d   :  { %v9072_v46 = vpop.f32.mrf.mxu0  ;;  %v11607_v43 = vpop.f32.mrf.mxu1 }
 0x56e   :  { %9100 = vxpose.xlu0.b32.cont [2/8] (short) %v9092_v57, 128  ;;  %v9073_v26 = vadd.f32 %v9072_v46, %v8968_v59  ;;  %v11608_v24 = vadd.f32 %v11607_v43, %v11606_v32  ;;  %v9096_v36 = vmax.f32 %v9078_v9, 0.0 }
 0x56f   :  { %v12216_v42 = vpop.f32.mrf.mxu0 }
 0x570   :  { %v9095_v27 = vmax.f32 %v9073_v26, 0.0  ;;  %v8983_v0 = vadd.f32 %v11608_v24, %v8878_v4 }
 0x571   :  { %v9082_v8 = vpop.f32.mrf.mxu0 }
 0x572   :  { %9101 = vxpose.xlu0.b32.cont [3/8] (short) %v9093_v41, 128  ;;  %v9083_v20 = vadd.f32 %v9082_v8, %v8978_v28  ;;  %v9088_v22 = vadd.f32 %v12216_v42, %v8983_v0 }
 0x574   :  { %v9097_v58 = vmax.f32 %v9083_v20, 0.0  ;;  %v9098_v19 = vmax.f32 %v9088_v22, 0.0 }
 0x576   :  { %9102 = vxpose.xlu0.b32.cont [4/8] (short) %v9094_v51, 128 }
 0x57a   :  { %9103 = vxpose.xlu0.b32.cont [5/8] (short) %v9095_v27, 128 }
 0x57e   :  { %9104 = vxpose.xlu0.b32.cont [6/8] (short) %v9096_v36, 128 }
 0x582   :  { %9105 = vxpose.xlu0.b32.cont [7/8] (short) %v9097_v58, 128 }
 0x586   :  { %9106 = vxpose.xlu0.b32.end [8/8] (short) %v9098_v19, 128 }
 0x5e6   :  { %v9115_v15 = vpop.trf.xlu0 }
 0x5e7   :  { %9131 = vst.msk [vmem:[#allocation4] sm:$0xff] %vm8751_vm2, %v9115_v15 }
 0x5ea   :  { %v9116_v11 = vpop.trf.xlu0 }
 0x5eb   :  { %9132 = vst.msk [vmem:[#allocation4 + $0x8] sm:$0xff] %vm8751_vm2, %v9116_v11 }
 0x5ee   :  { %v11346_v45 = vld.sshfl [vmem:[#allocation4 + $0x2] sm:$0x3 pattern:$0x76325410]  ;;  %v9117_v61 = vpop.trf.xlu0  ;;  %v9147_v16 = vld [vmem:[#allocation4] sm:$0x3] }
 0x5ef   :  { %9159 = vrot.lane.b32.xlu1 %v11346_v45, %s12371_s7  ;;  %9133 = vst.msk [vmem:[#allocation4 + $0x10] sm:$0xff] %vm8751_vm2, %v9117_v61  ;;  %v9163_v18 = vld [vmem:[#allocation4 + $0x4] sm:$0x3] }
 0x5f0   :  { %9149 = vst.msk [vmem:[#allocation5] sm:$0x3] %vm9148_vm4, %v9147_v16  ;;  %9164 = vst.msk [vmem:[#allocation5 + $0x2] sm:$0x3] %vm9148_vm4, %v9163_v18 }
 0x5f1   :  { %v11347_v21 = vld.sshfl [vmem:[#allocation4 + $0x6] sm:$0x3 pattern:$0x76325410] }
 0x5f2   :  { %v9118_v31 = vpop.trf.xlu0  ;;  %v9178_v55 = vld [vmem:[#allocation4 + $0x8] sm:$0x3]  ;;  %v9193_v33 = vld [vmem:[#allocation4 + $0xc] sm:$0x3] }
 0x5f3   :  { %9174 = vrot.lane.b32.xlu1 %v11347_v21, %s12371_s7  ;;  %9134 = vst.msk [vmem:[#allocation4 + $0x18] sm:$0xff] %vm8751_vm2, %v9118_v31  ;;  %v11348_v53 = vld.sshfl [vmem:[#allocation4 + $0xa] sm:$0x3 pattern:$0x76325410] }
 0x5f4   :  { %9179 = vst.msk [vmem:[#allocation5 + $0x4] sm:$0x3] %vm9148_vm4, %v9178_v55  ;;  %9194 = vst.msk [vmem:[#allocation5 + $0x6] sm:$0x3] %vm9148_vm4, %v9193_v33 }
 0x5f5   :  { %v11349_v37 = vld.sshfl [vmem:[#allocation4 + $0xe] sm:$0x3 pattern:$0x76325410] }
 0x5f6   :  { %v9119_v35 = vpop.trf.xlu0  ;;  %v9208_v12 = vld [vmem:[#allocation4 + $0x10] sm:$0x3]  ;;  %v9223_v14 = vld [vmem:[#allocation4 + $0x14] sm:$0x3] }
 0x5f7   :  { %9189 = vrot.lane.b32.xlu1 %v11348_v53, %s12371_s7  ;;  %9135 = vst.msk [vmem:[#allocation4 + $0x20] sm:$0xff] %vm8751_vm2, %v9119_v35  ;;  %v11350_v50 = vld.sshfl [vmem:[#allocation4 + $0x12] sm:$0x3 pattern:$0x76325410] }
 0x5f8   :  { %9209 = vst.msk [vmem:[#allocation5 + $0x8] sm:$0x3] %vm9148_vm4, %v9208_v12  ;;  %9224 = vst.msk [vmem:[#allocation5 + $0xa] sm:$0x3] %vm9148_vm4, %v9223_v14 }
 0x5f9   :  { %v11351_v10 = vld.sshfl [vmem:[#allocation4 + $0x16] sm:$0x3 pattern:$0x76325410] }
 0x5fa   :  { %v9120_v44 = vpop.trf.xlu0  ;;  %v9238_v23 = vld [vmem:[#allocation4 + $0x18] sm:$0x3]  ;;  %v9253_v62 = vld [vmem:[#allocation4 + $0x1c] sm:$0x3] }
 0x5fb   :  { %9204 = vrot.lane.b32.xlu1 %v11349_v37, %s12371_s7  ;;  %9136 = vst.msk [vmem:[#allocation4 + $0x28] sm:$0xff] %vm8751_vm2, %v9120_v44  ;;  %v11352_v30 = vld.sshfl [vmem:[#allocation4 + $0x1a] sm:$0x3 pattern:$0x76325410] }
 0x5fc   :  { %9239 = vst.msk [vmem:[#allocation5 + $0xc] sm:$0x3] %vm9148_vm4, %v9238_v23  ;;  %9254 = vst.msk [vmem:[#allocation5 + $0xe] sm:$0x3] %vm9148_vm4, %v9253_v62 }
 0x5fd   :  { %v11353_v38 = vld.sshfl [vmem:[#allocation4 + $0x1e] sm:$0x3 pattern:$0x76325410] }
 0x5fe   :  { %v9121_v56 = vpop.trf.xlu0  ;;  %v9268_v40 = vld [vmem:[#allocation4 + $0x20] sm:$0x3]  ;;  %v9283_v6 = vld [vmem:[#allocation4 + $0x24] sm:$0x3] }
 0x5ff   :  { %9219 = vrot.lane.b32.xlu1 %v11350_v50, %s12371_s7  ;;  %9137 = vst.msk [vmem:[#allocation4 + $0x30] sm:$0xff] %vm8751_vm2, %v9121_v56  ;;  %v11354_v46 = vld.sshfl [vmem:[#allocation4 + $0x22] sm:$0x3 pattern:$0x76325410] }
 0x600   :  { %9269 = vst.msk [vmem:[#allocation5 + $0x10] sm:$0x3] %vm9148_vm4, %v9268_v40  ;;  %9284 = vst.msk [vmem:[#allocation5 + $0x12] sm:$0x3] %vm9148_vm4, %v9283_v6 }
 0x601   :  { %v11355_v63 = vld.sshfl [vmem:[#allocation4 + $0x26] sm:$0x3 pattern:$0x76325410] }
 0x602   :  { %v9122_v57 = vpop.trf.xlu0  ;;  %v9298_v29 = vld [vmem:[#allocation4 + $0x28] sm:$0x3]  ;;  %v9313_v49 = vld [vmem:[#allocation4 + $0x2c] sm:$0x3] }
 0x603   :  { %9234 = vrot.lane.b32.xlu1 %v11351_v10, %s12371_s7  ;;  %9138 = vst.msk [vmem:[#allocation4 + $0x38] sm:$0xff] %vm8751_vm2, %v9122_v57  ;;  %v11356_v43 = vld.sshfl [vmem:[#allocation4 + $0x2a] sm:$0x3 pattern:$0x76325410] }
 0x604   :  { %9299 = vst.msk [vmem:[#allocation5 + $0x14] sm:$0x3] %vm9148_vm4, %v9298_v29  ;;  %9314 = vst.msk [vmem:[#allocation5 + $0x16] sm:$0x3] %vm9148_vm4, %v9313_v49 }
 0x605   :  { %v11357_v52 = vld.sshfl [vmem:[#allocation4 + $0x2e] sm:$0x3 pattern:$0x76325410] }
 0x606   :  { %v9123_v48 = vpop.trf.xlu0  ;;  %v9328_v5 = vld [vmem:[#allocation4 + $0x30] sm:$0x3]  ;;  %v9343_v2 = vld [vmem:[#allocation4 + $0x34] sm:$0x3] }
 0x607   :  { %9249 = vrot.lane.b32.xlu1 %v11352_v30, %s12371_s7  ;;  %9139 = vst.msk [vmem:[#allocation4 + $0x40] sm:$0xff] %vm8751_vm2, %v9123_v48  ;;  %v11358_v24 = vld.sshfl [vmem:[#allocation4 + $0x32] sm:$0x3 pattern:$0x76325410] }
 0x608   :  { %9329 = vst.msk [vmem:[#allocation5 + $0x18] sm:$0x3] %vm9148_vm4, %v9328_v5  ;;  %9344 = vst.msk [vmem:[#allocation5 + $0x1a] sm:$0x3] %vm9148_vm4, %v9343_v2  ;;  %v20798_v30 = vld [vmem:[#allocation44_spill] sm:$0xff] }
 0x609   :  { %v11359_v8 = vld.sshfl [vmem:[#allocation4 + $0x36] sm:$0x3 pattern:$0x76325410]  ;;  %11625 = vmatprep.subr.mxu1 %v20798_v30  ;;  %v20799_v48 = vld [vmem:[#allocation76_spill] sm:$0xff] }
 0x60a   :  { %v9124_v39 = vpop.trf.xlu0  ;;  %v9358_v54 = vld [vmem:[#allocation4 + $0x38] sm:$0x3]  ;;  %v11361_v41 = vld.sshfl [vmem:[#allocation4 + $0x3e] sm:$0x3 pattern:$0x76325410]  ;;  %11660 = vmatprep.subr.mxu0 %v20799_v48 }
 0x60b   :  { %9264 = vrot.lane.b32.xlu1 %v11353_v38, %s12371_s7  ;;  %9140 = vst.msk [vmem:[#allocation4 + $0x48] sm:$0xff] %vm8751_vm2, %v9124_v39  ;;  %v9373_v32 = vld [vmem:[#allocation4 + $0x3c] sm:$0x3]  ;;  %9384 = vrot.lane.b32.xlu0 %v11361_v41, %s12371_s7 }
 0x60c   :  { %9359 = vst.msk [vmem:[#allocation5 + $0x1c] sm:$0x3] %vm9148_vm4, %v9358_v54  ;;  %9374 = vst.msk [vmem:[#allocation5 + $0x1e] sm:$0x3] %vm9148_vm4, %v9373_v32 }
 0x60d   :  { %v11360_v28 = vld.sshfl [vmem:[#allocation4 + $0x3a] sm:$0x3 pattern:$0x76325410] }
 0x60e   :  { %v9125_v1 = vpop.trf.xlu0  ;;  %v9388_v59 = vld [vmem:[#allocation4 + $0x40] sm:$0x3]  ;;  %v9403_v13 = vld [vmem:[#allocation4 + $0x44] sm:$0x3] }
 0x60f   :  { %9279 = vrot.lane.b32.xlu1 %v11354_v46, %s12371_s7  ;;  %9141 = vst.msk [vmem:[#allocation4 + $0x50] sm:$0xff] %vm8751_vm2, %v9125_v1  ;;  %v11362_v36 = vld.sshfl [vmem:[#allocation4 + $0x42] sm:$0x3 pattern:$0x76325410] }
 0x610   :  { %9389 = vst.msk [vmem:[#allocation5 + $0x20] sm:$0x3] %vm9148_vm4, %v9388_v59  ;;  %9404 = vst.msk [vmem:[#allocation5 + $0x22] sm:$0x3] %vm9148_vm4, %v9403_v13 }
 0x611   :  { %v11363_v0 = vld.sshfl [vmem:[#allocation4 + $0x46] sm:$0x3 pattern:$0x76325410] }
 0x612   :  { %v9126_v60 = vpop.trf.xlu0  ;;  %v9418_v51 = vld [vmem:[#allocation4 + $0x48] sm:$0x3]  ;;  %v9433_v26 = vld [vmem:[#allocation4 + $0x4c] sm:$0x3] }
 0x613   :  { %9294 = vrot.lane.b32.xlu1 %v11355_v63, %s12371_s7  ;;  %9142 = vst.msk [vmem:[#allocation4 + $0x58] sm:$0xff] %vm8751_vm2, %v9126_v60  ;;  %v11364_v20 = vld.sshfl [vmem:[#allocation4 + $0x4a] sm:$0x3 pattern:$0x76325410] }
 0x614   :  { %9419 = vst.msk [vmem:[#allocation5 + $0x24] sm:$0x3] %vm9148_vm4, %v9418_v51  ;;  %9434 = vst.msk [vmem:[#allocation5 + $0x26] sm:$0x3] %vm9148_vm4, %v9433_v26 }
 0x615   :  { %v11365_v22 = vld.sshfl [vmem:[#allocation4 + $0x4e] sm:$0x3 pattern:$0x76325410] }
 0x616   :  { %v9127_v42 = vpop.trf.xlu0  ;;  %v9448_v34 = vld [vmem:[#allocation4 + $0x50] sm:$0x3]  ;;  %v9463_v3 = vld [vmem:[#allocation4 + $0x54] sm:$0x3] }
 0x617   :  { %9309 = vrot.lane.b32.xlu1 %v11356_v43, %s12371_s7  ;;  %9143 = vst.msk [vmem:[#allocation4 + $0x60] sm:$0xff] %vm8751_vm2, %v9127_v42  ;;  %v11366_v58 = vld.sshfl [vmem:[#allocation4 + $0x52] sm:$0x3 pattern:$0x76325410] }
 0x618   :  { %9449 = vst.msk [vmem:[#allocation5 + $0x28] sm:$0x3] %vm9148_vm4, %v9448_v34  ;;  %9464 = vst.msk [vmem:[#allocation5 + $0x2a] sm:$0x3] %vm9148_vm4, %v9463_v3 }
 0x619   :  { %v11367_v19 = vld.sshfl [vmem:[#allocation4 + $0x56] sm:$0x3 pattern:$0x76325410] }
 0x61a   :  { %v9128_v47 = vpop.trf.xlu0  ;;  %v9478_v7 = vld [vmem:[#allocation4 + $0x58] sm:$0x3]  ;;  %v9493_v9 = vld [vmem:[#allocation4 + $0x5c] sm:$0x3] }
 0x61b   :  { %9324 = vrot.lane.b32.xlu1 %v11357_v52, %s12371_s7  ;;  %9479 = vst.msk [vmem:[#allocation5 + $0x2c] sm:$0x3] %vm9148_vm4, %v9478_v7  ;;  %9494 = vst.msk [vmem:[#allocation5 + $0x2e] sm:$0x3] %vm9148_vm4, %v9493_v9 }
 0x61c   :  { %v11368_v15 = vld.sshfl [vmem:[#allocation4 + $0x5a] sm:$0x3 pattern:$0x76325410] }
 0x61d   :  { %v11369_v11 = vld.sshfl [vmem:[#allocation4 + $0x5e] sm:$0x3 pattern:$0x76325410] }
 0x61e   :  { %v9508_v27 = vld [vmem:[#allocation4 + $0x60] sm:$0x3]  ;;  %v9129_v25 = vpop.trf.xlu0 }
 0x61f   :  { %9339 = vrot.lane.b32.xlu1 %v11358_v24, %s12371_s7  ;;  %9509 = vst.msk [vmem:[#allocation5 + $0x30] sm:$0x3] %vm9148_vm4, %v9508_v27 }
 0x622   :  { %v9130_v4 = vpop.trf.xlu0 }
 0x623   :  { %9354 = vrot.lane.b32.xlu1 %v11359_v8, %s12371_s7 }
 0x627   :  { %9369 = vrot.lane.b32.xlu1 %v11360_v28, %s12371_s7 }
 0x62b   :  { %9399 = vrot.lane.b32.xlu1 %v11362_v36, %s12371_s7 }
 0x62f   :  { %9414 = vrot.lane.b32.xlu1 %v11363_v0, %s12371_s7 }
 0x633   :  { %9429 = vrot.lane.b32.xlu1 %v11364_v20, %s12371_s7 }
 0x637   :  { %9444 = vrot.lane.b32.xlu1 %v11365_v22, %s12371_s7 }
 0x63b   :  { %9459 = vrot.lane.b32.xlu1 %v11366_v58, %s12371_s7 }
 0x63f   :  { %9474 = vrot.lane.b32.xlu1 %v11367_v19, %s12371_s7 }
 0x643   :  { %9489 = vrot.lane.b32.xlu1 %v11368_v15, %s12371_s7 }
 0x647   :  { %9504 = vrot.lane.b32.xlu1 %v11369_v11, %s12371_s7 }
 0x661   :  { %v9160_v45 = vpop.permute.xlu1 %9159 }
 0x662   :  { %9162 = vst.msk [vmem:[#allocation5] sm:$0x3] %vm884_vm3, %v9160_v45 }
 0x665   :  { %v9175_v61 = vpop.permute.xlu1 %9174 }
 0x666   :  { %9177 = vst.msk [vmem:[#allocation5 + $0x2] sm:$0x3] %vm884_vm3, %v9175_v61 }
 0x669   :  { %v9190_v16 = vpop.permute.xlu1 %9189 }
 0x66a   :  { %9192 = vst.msk [vmem:[#allocation5 + $0x4] sm:$0x3] %vm884_vm3, %v9190_v16 }
 0x66d   :  { %v9205_v18 = vpop.permute.xlu1 %9204 }
 0x66e   :  { %9207 = vst.msk [vmem:[#allocation5 + $0x6] sm:$0x3] %vm884_vm3, %v9205_v18 }
 0x671   :  { %v9220_v21 = vpop.permute.xlu1 %9219 }
 0x672   :  { %9222 = vst.msk [vmem:[#allocation5 + $0x8] sm:$0x3] %vm884_vm3, %v9220_v21 }
 0x675   :  { %v9235_v31 = vpop.permute.xlu1 %9234 }
 0x676   :  { %9237 = vst.msk [vmem:[#allocation5 + $0xa] sm:$0x3] %vm884_vm3, %v9235_v31 }
 0x679   :  { %v9250_v55 = vpop.permute.xlu1 %9249 }
 0x67a   :  { %9252 = vst.msk [vmem:[#allocation5 + $0xc] sm:$0x3] %vm884_vm3, %v9250_v55 }
 0x67d   :  { %v9265_v33 = vpop.permute.xlu1 %9264  ;;  %v9385_v53 = vpop.permute.xlu0 %9384 }
 0x67e   :  { %9267 = vst.msk [vmem:[#allocation5 + $0xe] sm:$0x3] %vm884_vm3, %v9265_v33  ;;  %9387 = vst.msk [vmem:[#allocation5 + $0x1e] sm:$0x3] %vm884_vm3, %v9385_v53 }
 0x681   :  { %v9280_v35 = vpop.permute.xlu1 %9279 }
 0x682   :  { %9282 = vst.msk [vmem:[#allocation5 + $0x10] sm:$0x3] %vm884_vm3, %v9280_v35 }
 0x685   :  { %v9295_v12 = vpop.permute.xlu1 %9294 }
 0x686   :  { %9297 = vst.msk [vmem:[#allocation5 + $0x12] sm:$0x3] %vm884_vm3, %v9295_v12 }
 0x689   :  { %v9310_v14 = vpop.permute.xlu1 %9309 }
 0x68a   :  { %9312 = vst.msk [vmem:[#allocation5 + $0x14] sm:$0x3] %vm884_vm3, %v9310_v14 }
 0x68d   :  { %v9325_v37 = vpop.permute.xlu1 %9324 }
 0x68e   :  { %9327 = vst.msk [vmem:[#allocation5 + $0x16] sm:$0x3] %vm884_vm3, %v9325_v37 }
 0x691   :  { %v9340_v44 = vpop.permute.xlu1 %9339 }
 0x692   :  { %9342 = vst.msk [vmem:[#allocation5 + $0x18] sm:$0x3] %vm884_vm3, %v9340_v44 }
 0x695   :  { %v9355_v23 = vpop.permute.xlu1 %9354 }
 0x696   :  { %9357 = vst.msk [vmem:[#allocation5 + $0x1a] sm:$0x3] %vm884_vm3, %v9355_v23 }
 0x699   :  { %v9370_v62 = vpop.permute.xlu1 %9369 }
 0x69a   :  { %9372 = vst.msk [vmem:[#allocation5 + $0x1c] sm:$0x3] %vm884_vm3, %v9370_v62 }
 0x69d   :  { %v9400_v50 = vpop.permute.xlu1 %9399 }
 0x69e   :  { %9402 = vst.msk [vmem:[#allocation5 + $0x20] sm:$0x3] %vm884_vm3, %v9400_v50 }
 0x6a1   :  { %v9415_v56 = vpop.permute.xlu1 %9414 }
 0x6a2   :  { %9417 = vst.msk [vmem:[#allocation5 + $0x22] sm:$0x3] %vm884_vm3, %v9415_v56 }
 0x6a5   :  { %v9430_v40 = vpop.permute.xlu1 %9429 }
 0x6a6   :  { %9432 = vst.msk [vmem:[#allocation5 + $0x24] sm:$0x3] %vm884_vm3, %v9430_v40 }
 0x6a9   :  { %v9445_v6 = vpop.permute.xlu1 %9444 }
 0x6aa   :  { %9447 = vst.msk [vmem:[#allocation5 + $0x26] sm:$0x3] %vm884_vm3, %v9445_v6 }
 0x6ad   :  { %v9460_v10 = vpop.permute.xlu1 %9459 }
 0x6ae   :  { %9462 = vst.msk [vmem:[#allocation5 + $0x28] sm:$0x3] %vm884_vm3, %v9460_v10 }
 0x6b1   :  { %v9475_v57 = vpop.permute.xlu1 %9474 }
 0x6b2   :  { %9477 = vst.msk [vmem:[#allocation5 + $0x2a] sm:$0x3] %vm884_vm3, %v9475_v57 }
 0x6b5   :  { %v9490_v29 = vpop.permute.xlu1 %9489 }
 0x6b6   :  { %9492 = vst.msk [vmem:[#allocation5 + $0x2c] sm:$0x3] %vm884_vm3, %v9490_v29 }
 0x6b9   :  { %v9505_v49 = vpop.permute.xlu1 %9504 }
 0x6ba   :  { %9507 = vst.msk [vmem:[#allocation5 + $0x2e] sm:$0x3] %vm884_vm3, %v9505_v49 }
 0x6bb   :  { %12365 = dma.done.wait [#allocation7], 51200 }
 0x6bc   :  { %12366 = vsyncadd [#allocation7], 4294916096  ;;  %v20800_v5 = vld [vmem:[#allocation28_spill] sm:$0xff]  ;;  %v20802_v38 = vld [vmem:[#allocation43_spill] sm:$0xff]  ;;  %v12372_v3 = vmov 1983009808  }
 0x6bd   :  { %11626 = vmatpush3.msra.mxu1 %v20800_v5  ;;  %v20801_v2 = vld [vmem:[#allocation60_spill] sm:$0xff]  ;;  %v20803_v39 = vld [vmem:[#allocation75_spill] sm:$0xff]  ;;  %v20806_v32 = vld [vmem:[#allocation42_spill] sm:$0xff]  ;;  %v9936_v52 = vunpack.c.l.s4 %v12372_v3  ;;  %vm12373_vm5 = vmmov 0   ;;  %s12374_s15 = smov [#allocation8]  }
 0x6be   :  { %11661 = vmatpush3.msra.mxu0 %v20801_v2  ;;  %11627 = vmatprep.subr.mxu1 %v20802_v38  ;;  %v20804_v54 = vld [vmem:[#allocation27_spill] sm:$0xff]  ;;  %v20807_v46 = vld [vmem:[#allocation74_spill] sm:$0xff]  ;;  %v20810_v13 = vld [vmem:[#allocation41_spill] sm:$0xff]  ;;  %s11086_s16 = sshll.u32 %s12374_s15, 4  ;;  %s11087_s16 = int_to_ptr.vmem [resolvable:$true] %s11086_s16 }
 0x6bf   :  { %11662 = vmatprep.subr.mxu0 %v20803_v39  ;;  %11628 = vmatpush3.msra.mxu1 %v20804_v54  ;;  %v20805_v41 = vld [vmem:[#allocation59_spill] sm:$0xff]  ;;  %v20808_v1 = vld [vmem:[#allocation26_spill] sm:$0xff]  ;;  %v20811_v63 = vld [vmem:[#allocation73_spill] sm:$0xff]  ;;  %v9937_v28 = vunpack.c.0.s8 %v9936_v52  ;;  %s12345_s0 = scalar_lea.vmem %s11087_s16, 32  ;;  %p12350_p1 = scmp.lt.s32.totalorder %s11087_s16, %s11087_s16 }
 0x6c0   :  { %11663 = vmatpush3.msra.mxu0 %v20805_v41  ;;  %11629 = vmatprep.subr.mxu1 %v20806_v32  ;;  %v20809_v59 = vld [vmem:[#allocation58_spill] sm:$0xff]  ;;  %v20812_v60 = vld [vmem:[#allocation25_spill] sm:$0xff]  ;;  %v20814_v26 = vld [vmem:[#allocation40_spill] sm:$0xff]  ;;  %p12346_p0 = scmp.ne.s32.totalorder %s11087_s16, %s12345_s0  ;;  %p12351_p2 = scmp.lt.s32.totalorder %s12345_s0, %s12345_s0 }
 0x6c1   :  { %11664 = vmatprep.subr.mxu0 %v20807_v46  ;;  %11630 = vmatpush3.msra.mxu1 %v20808_v1  ;;  %v20813_v51 = vld [vmem:[#allocation57_spill] sm:$0xff]  ;;  %v20815_v43 = vld [vmem:[#allocation72_spill] sm:$0xff]  ;;  %v20818_v47 = vld [vmem:[#allocation39_spill] sm:$0xff] }
 0x6c2   :  { %11665 = vmatpush3.msra.mxu0 %v20809_v59  ;;  %11631 = vmatprep.subr.mxu1 %v20810_v13  ;;  %v20816_v42 = vld [vmem:[#allocation24_spill] sm:$0xff]  ;;  %v20819_v7 = vld [vmem:[#allocation71_spill] sm:$0xff]  ;;  %v20822_v27 = vld [vmem:[#allocation38_spill] sm:$0xff]  ;;  %p12352_p3 = por %p12351_p2, %p12350_p1 }
 0x6c3   :  { %11666 = vmatprep.subr.mxu0 %v20811_v63  ;;  %11632 = vmatpush3.msra.mxu1 %v20812_v60  ;;  %v20817_v34 = vld [vmem:[#allocation56_spill] sm:$0xff]  ;;  %v20820_v9 = vld [vmem:[#allocation23_spill] sm:$0xff]  ;;  %v20823_v25 = vld [vmem:[#allocation70_spill] sm:$0xff] }
 0x6c4   :  { %11667 = vmatpush3.msra.mxu0 %v20813_v51  ;;  %11633 = vmatprep.subr.mxu1 %v20814_v26  ;;  %v20821_v24 = vld [vmem:[#allocation55_spill] sm:$0xff]  ;;  %v20824_v8 = vld [vmem:[#allocation22_spill] sm:$0xff]  ;;  %v20826_v36 = vld [vmem:[#allocation37_spill] sm:$0xff]  ;;  %p12353_p4 = pnand %p12352_p3, %p12346_p0 }
 0x6c5   :  { %11668 = vmatprep.subr.mxu0 %v20815_v43  ;;  %11634 = vmatpush3.msra.mxu1 %v20816_v42  ;;  %v20825_v4 = vld [vmem:[#allocation54_spill] sm:$0xff]  ;;  %v20827_v0 = vld [vmem:[#allocation69_spill] sm:$0xff]  ;;  %v20830_v58 = vld [vmem:[#allocation36_spill] sm:$0xff] }
 0x6c6   :  { %11669 = vmatpush3.msra.mxu0 %v20817_v34  ;;  %11635 = vmatprep.subr.mxu1 %v20818_v47  ;;  %v20828_v20 = vld [vmem:[#allocation21_spill] sm:$0xff]  ;;  %v20831_v19 = vld [vmem:[#allocation68_spill] sm:$0xff]  ;;  %v20834_v45 = vld [vmem:[#allocation519_spill] sm:$0xff] }
 0x6c7   :  { %11670 = vmatprep.subr.mxu0 %v20819_v7  ;;  %11636 = vmatpush3.msra.mxu1 %v20820_v9  ;;  %v20829_v22 = vld [vmem:[#allocation53_spill] sm:$0xff]  ;;  %v20832_v15 = vld [vmem:[#allocation20_spill] sm:$0xff]  ;;  %v18936_v61 = vsub.s32 %v9937_v28, %v20834_v45  ;;  %v20835_v16 = vld [vmem:[#allocation35_spill] sm:$0xff] }
 0x6c8   :  { %11671 = vmatpush3.msra.mxu0 %v20821_v24  ;;  %11637 = vmatprep.subr.mxu1 %v20822_v27  ;;  %v20833_v11 = vld [vmem:[#allocation52_spill] sm:$0xff]  ;;  %v20836_v18 = vld [vmem:[#allocation67_spill] sm:$0xff]  ;;  %v20839_v33 = vld [vmem:[#allocation34_spill] sm:$0xff] }
 0x6c9   :  { %11672 = vmatprep.subr.mxu0 %v20823_v25  ;;  %11638 = vmatpush3.msra.mxu1 %v20824_v8  ;;  %v9513_v21 = vld [vmem:[#allocation5] sm:$0xff]  ;;  %v20843_v44 = vld [vmem:[#allocation33_spill] sm:$0xff]  ;;  %v20847_v56 = vld [vmem:[#allocation32_spill] sm:$0xff] }
 0x6ca   :  { %11673 = vmatpush3.msra.mxu0 %v20825_v4  ;;  %11639 = vmatprep.subr.mxu1 %v20826_v36  ;;  %v20837_v31 = vld [vmem:[#allocation19_spill] sm:$0xff]  ;;  %v20840_v53 = vld [vmem:[#allocation66_spill] sm:$0xff]  ;;  %v9941_v14 = vrot.slane %v9513_v21, %v18936_v61  ;;  %v9934_v37 = vcombine.high %v9513_v21, %v9513_v21  ;;  %v20844_v23 = vld [vmem:[#allocation65_spill] sm:$0xff] }
 0x6cb   :  { %11674 = vmatprep.subr.mxu0 %v20827_v0  ;;  %11640 = vmatpush3.msra.mxu1 %v20828_v20  ;;  %v20838_v55 = vld [vmem:[#allocation51_spill] sm:$0xff]  ;;  %v20841_v35 = vld [vmem:[#allocation18_spill] sm:$0xff]  ;;  %v20845_v62 = vld [vmem:[#allocation17_spill] sm:$0xff] }
 0x6cc   :  { %11675 = vmatpush3.msra.mxu0 %v20829_v22  ;;  %11641 = vmatprep.subr.mxu1 %v20830_v58  ;;  %v20842_v12 = vld [vmem:[#allocation50_spill] sm:$0xff]  ;;  %v20846_v50 = vld [vmem:[#allocation49_spill] sm:$0xff]  ;;  %v20848_v40 = vld [vmem:[#allocation64_spill] sm:$0xff]  ;;  %v9949_v57 = vcombine.high %v9941_v14, %v9941_v14  ;;  %v9948_v29 = vrot.slane %v9934_v37, %v18936_v61 }
 0x6cd   :  { %11676 = vmatprep.subr.mxu0 %v20831_v19  ;;  %11642 = vmatpush3.msra.mxu1 %v20832_v15  ;;  %v20849_v6 = vld [vmem:[#allocation16_spill] sm:$0xff]  ;;  %v20851_v49 = vld [vmem:[#allocation31_spill] sm:$0xff]  ;;  %v20855_v2 = vld [vmem:[#allocation30_spill] sm:$0xff] }
 0x6ce   :  { %11677 = vmatpush3.msra.mxu0 %v20833_v11  ;;  %11643 = vmatprep.subr.mxu1 %v20835_v16  ;;  %v20850_v10 = vld [vmem:[#allocation48_spill] sm:$0xff]  ;;  %v20852_v30 = vld [vmem:[#allocation63_spill] sm:$0xff]  ;;  %v20856_v38 = vld [vmem:[#allocation62_spill] sm:$0xff]  ;;  %v9950_v54 = vcombine.high %v9948_v29, %v9948_v29 }
 0x6cf   :  { %11678 = vmatprep.subr.mxu0 %v20836_v18  ;;  %11644 = vmatpush3.msra.mxu1 %v20837_v31  ;;  %v20853_v48 = vld [vmem:[#allocation15_spill] sm:$0xff]  ;;  %v20857_v39 = vld [vmem:[#allocation14_spill] sm:$0xff]  ;;  %v20858_v41 = vld [vmem:[#allocation29_spill] sm:$0xff] }
 0x6d0   :  { %11679 = vmatpush3.msra.mxu0 %v20838_v55  ;;  %11645 = vmatprep.subr.mxu1 %v20839_v33  ;;  %v20854_v5 = vld [vmem:[#allocation47_spill] sm:$0xff]  ;;  %v20859_v32 = vld [vmem:[#allocation46_spill] sm:$0xff]  ;;  %v20860_v46 = vld [vmem:[#allocation13_spill] sm:$0xff] }
 0x6d1   :  { %11680 = vmatprep.subr.mxu0 %v20840_v53  ;;  %11646 = vmatpush3.msra.mxu1 %v20841_v35  ;;  %v20861_v1 = vld [vmem:[#allocation61_spill] sm:$0xff]  ;;  %v20862_v59 = vld [vmem:[#allocation108_spill] sm:$0xff]  ;;  %v20865_v60 = vld [vmem:[#allocation107_spill] sm:$0xff] }
 0x6d2   :  { %11681 = vmatpush3.msra.mxu0 %v20842_v12  ;;  %11647 = vmatprep.subr.mxu1 %v20843_v44  ;;  %v20863_v13 = vld [vmem:[#allocation45_spill] sm:$0xff]  ;;  %v20864_v63 = vld [vmem:[#allocation92_spill] sm:$0xff]  ;;  %v20867_v26 = vld [vmem:[#allocation91_spill] sm:$0xff] }
 0x6d3   :  { %11682 = vmatprep.subr.mxu0 %v20844_v23  ;;  %11648 = vmatpush3.msra.mxu1 %v20845_v62  ;;  %v20866_v51 = vld [vmem:[#allocation140_spill] sm:$0xff]  ;;  %v20869_v42 = vld [vmem:[#allocation106_spill] sm:$0xff]  ;;  %v20870_v34 = vld [vmem:[#allocation139_spill] sm:$0xff] }
 0x6d4   :  { %11683 = vmatpush3.msra.mxu0 %v20846_v50  ;;  %11649 = vmatprep.subr.mxu1 %v20847_v56  ;;  %v20868_v43 = vld [vmem:[#allocation124_spill] sm:$0xff]  ;;  %v20871_v3 = vld [vmem:[#allocation90_spill] sm:$0xff]  ;;  %v20872_v52 = vld [vmem:[#allocation123_spill] sm:$0xff] }
 0x6d5   :  { %11684 = vmatprep.subr.mxu0 %v20848_v40  ;;  %11650 = vmatpush3.msra.mxu1 %v20849_v6  ;;  %v20873_v47 = vld [vmem:[#allocation105_spill] sm:$0xff]  ;;  %v20874_v7 = vld [vmem:[#allocation138_spill] sm:$0xff]  ;;  %v20877_v27 = vld [vmem:[#allocation104_spill] sm:$0xff] }
 0x6d6   :  { %11685 = vmatpush3.msra.mxu0 %v20850_v10  ;;  %11651 = vmatprep.subr.mxu1 %v20851_v49  ;;  %v20875_v9 = vld [vmem:[#allocation89_spill] sm:$0xff]  ;;  %v20876_v24 = vld [vmem:[#allocation122_spill] sm:$0xff]  ;;  %v20879_v8 = vld [vmem:[#allocation88_spill] sm:$0xff] }
 0x6d7   :  { %11686 = vmatprep.subr.mxu0 %v20852_v30  ;;  %11652 = vmatpush3.msra.mxu1 %v20853_v48  ;;  %v20878_v25 = vld [vmem:[#allocation137_spill] sm:$0xff]  ;;  %v20881_v28 = vld [vmem:[#allocation103_spill] sm:$0xff]  ;;  %v20882_v36 = vld [vmem:[#allocation136_spill] sm:$0xff] }
 0x6d8   :  { %11687 = vmatpush3.msra.mxu0 %v20854_v5  ;;  %11653 = vmatprep.subr.mxu1 %v20855_v2  ;;  %v20880_v4 = vld [vmem:[#allocation121_spill] sm:$0xff]  ;;  %v20883_v0 = vld [vmem:[#allocation87_spill] sm:$0xff]  ;;  %v20884_v20 = vld [vmem:[#allocation120_spill] sm:$0xff] }
 0x6d9   :  { %11688 = vmatprep.subr.mxu0 %v20856_v38  ;;  %11654 = vmatpush3.msra.mxu1 %v20857_v39  ;;  %v20885_v22 = vld [vmem:[#allocation102_spill] sm:$0xff]  ;;  %v20886_v58 = vld [vmem:[#allocation135_spill] sm:$0xff]  ;;  %v20889_v11 = vld [vmem:[#allocation101_spill] sm:$0xff] }
 0x6da   :  { %10132 = vmatprep.mubr.f32.mxu1 %v9949_v57  ;;  %11655 = vmatprep.subr.mxu1 %v20858_v41  ;;  %v20887_v19 = vld [vmem:[#allocation86_spill] sm:$0xff]  ;;  %v20888_v15 = vld [vmem:[#allocation119_spill] sm:$0xff]  ;;  %v20891_v16 = vld [vmem:[#allocation85_spill] sm:$0xff] }
 0x6db   :  { %11689 = vmatpush3.msra.mxu0 %v20859_v32  ;;  %11656 = vmatpush3.msra.mxu1 %v20860_v46  ;;  %v20890_v45 = vld [vmem:[#allocation134_spill] sm:$0xff]  ;;  %v20893_v21 = vld [vmem:[#allocation100_spill] sm:$0xff]  ;;  %v20894_v31 = vld [vmem:[#allocation133_spill] sm:$0xff] }
 0x6dc   :  { %11690 = vmatprep.subr.mxu0 %v20861_v1  ;;  %10133 = vmatmul.mubr.f32.vlgmr.msra.gmra.mxu1 %v9941_v14  ;;  %v20892_v18 = vld [vmem:[#allocation118_spill] sm:$0xff]  ;;  %v20895_v55 = vld [vmem:[#allocation84_spill] sm:$0xff]  ;;  %v20896_v33 = vld [vmem:[#allocation117_spill] sm:$0xff] }
 0x6dd   :  { %11695 = vmatprep.subr.mxu1 %v20862_v59  ;;  %11691 = vmatpush3.msra.mxu0 %v20863_v13  ;;  %v20897_v53 = vld [vmem:[#allocation99_spill] sm:$0xff]  ;;  %v20898_v35 = vld [vmem:[#allocation132_spill] sm:$0xff]  ;;  %v20901_v44 = vld [vmem:[#allocation98_spill] sm:$0xff] }
 0x6de   :  { %10202 = vmatprep.mubr.f32.mxu0 %v9950_v54  ;;  %11696 = vmatpush3.msra.mxu1 %v20864_v63  ;;  %v20899_v12 = vld [vmem:[#allocation83_spill] sm:$0xff]  ;;  %v20900_v14 = vld [vmem:[#allocation116_spill] sm:$0xff]  ;;  %v20903_v62 = vld [vmem:[#allocation82_spill] sm:$0xff] }
 0x6df   :  { %10203 = vmatmul.mubr.f32.vlgmr.msra.gmra.mxu0 %v9948_v29  ;;  %11697 = vmatprep.subr.mxu1 %v20865_v60  ;;  %v9514_v37 = vld [vmem:[#allocation5 + $0x8] sm:$0xff]  ;;  %v20905_v56 = vld [vmem:[#allocation97_spill] sm:$0xff]  ;;  %v20906_v40 = vld [vmem:[#allocation130_spill] sm:$0xff] }
 0x6e0   :  { %11730 = vmatprep.subr.mxu0 %v20866_v51  ;;  %11698 = vmatpush3.msra.mxu1 %v20867_v26  ;;  %v20902_v23 = vld [vmem:[#allocation131_spill] sm:$0xff]  ;;  %v9951_v6 = vcombine.high %v9514_v37, %v9514_v37  ;;  %v20907_v10 = vld [vmem:[#allocation81_spill] sm:$0xff]  ;;  %v20908_v57 = vld [vmem:[#allocation114_spill] sm:$0xff]  ;;  %v9958_v29 = vrot.slane %v9514_v37, %v18936_v61 }
 0x6e1   :  { %11731 = vmatpush3.msra.mxu0 %v20868_v43  ;;  %11699 = vmatprep.subr.mxu1 %v20869_v42  ;;  %v20904_v50 = vld [vmem:[#allocation115_spill] sm:$0xff]  ;;  %v20909_v49 = vld [vmem:[#allocation96_spill] sm:$0xff]  ;;  %v20910_v30 = vld [vmem:[#allocation129_spill] sm:$0xff] }
 0x6e2   :  { %11732 = vmatprep.subr.mxu0 %v20870_v34  ;;  %11700 = vmatpush3.msra.mxu1 %v20871_v3  ;;  %v20911_v48 = vld [vmem:[#allocation80_spill] sm:$0xff]  ;;  %v20912_v5 = vld [vmem:[#allocation113_spill] sm:$0xff]  ;;  %v20913_v2 = vld [vmem:[#allocation95_spill] sm:$0xff]  ;;  %v9965_v39 = vrot.slane %v9951_v6, %v18936_v61  ;;  %v9966_v32 = vcombine.high %v9958_v29, %v9958_v29 }
 0x6e3   :  { %11733 = vmatpush3.msra.mxu0 %v20872_v52  ;;  %11701 = vmatprep.subr.mxu1 %v20873_v47  ;;  %v20914_v38 = vld [vmem:[#allocation128_spill] sm:$0xff]  ;;  %v20915_v54 = vld [vmem:[#allocation79_spill] sm:$0xff]  ;;  %v20917_v46 = vld [vmem:[#allocation94_spill] sm:$0xff] }
 0x6e4   :  { %11734 = vmatprep.subr.mxu0 %v20874_v7  ;;  %11702 = vmatpush3.msra.mxu1 %v20875_v9  ;;  %v20916_v41 = vld [vmem:[#allocation112_spill] sm:$0xff]  ;;  %v20918_v1 = vld [vmem:[#allocation127_spill] sm:$0xff]  ;;  %v20919_v59 = vld [vmem:[#allocation78_spill] sm:$0xff]  ;;  %v9967_v51 = vcombine.high %v9965_v39, %v9965_v39 }
 0x6e5   :  { %11735 = vmatpush3.msra.mxu0 %v20876_v24  ;;  %11703 = vmatprep.subr.mxu1 %v20877_v27  ;;  %v20920_v13 = vld [vmem:[#allocation111_spill] sm:$0xff]  ;;  %v20921_v63 = vld [vmem:[#allocation93_spill] sm:$0xff]  ;;  %v20922_v60 = vld [vmem:[#allocation126_spill] sm:$0xff] }
 0x6e6   :  { %11736 = vmatprep.subr.mxu0 %v20878_v25  ;;  %11704 = vmatpush3.msra.mxu1 %v20879_v8  ;;  %v20923_v26 = vld [vmem:[#allocation77_spill] sm:$0xff]  ;;  %v20924_v43 = vld [vmem:[#allocation110_spill] sm:$0xff]  ;;  %v20926_v34 = vld [vmem:[#allocation172_spill] sm:$0xff] }
 0x6e7   :  { %11737 = vmatpush3.msra.mxu0 %v20880_v4  ;;  %11705 = vmatprep.subr.mxu1 %v20881_v28  ;;  %v20925_v42 = vld [vmem:[#allocation125_spill] sm:$0xff]  ;;  %v20928_v52 = vld [vmem:[#allocation156_spill] sm:$0xff]  ;;  %v20929_v47 = vld [vmem:[#allocation171_spill] sm:$0xff] }
 0x6e8   :  { %11738 = vmatprep.subr.mxu0 %v20882_v36  ;;  %11706 = vmatpush3.msra.mxu1 %v20883_v0  ;;  %v20927_v3 = vld [vmem:[#allocation109_spill] sm:$0xff]  ;;  %v20930_v7 = vld [vmem:[#allocation204_spill] sm:$0xff]  ;;  %v20931_v9 = vld [vmem:[#allocation155_spill] sm:$0xff] }
 0x6e9   :  { %11739 = vmatpush3.msra.mxu0 %v20884_v20  ;;  %11707 = vmatprep.subr.mxu1 %v20885_v22  ;;  %v20932_v24 = vld [vmem:[#allocation188_spill] sm:$0xff]  ;;  %v20933_v27 = vld [vmem:[#allocation170_spill] sm:$0xff]  ;;  %v20934_v25 = vld [vmem:[#allocation203_spill] sm:$0xff] }
 0x6ea   :  { %11740 = vmatprep.subr.mxu0 %v20886_v58  ;;  %11708 = vmatpush3.msra.mxu1 %v20887_v19  ;;  %v20935_v8 = vld [vmem:[#allocation154_spill] sm:$0xff]  ;;  %v20936_v4 = vld [vmem:[#allocation187_spill] sm:$0xff]  ;;  %v20937_v28 = vld [vmem:[#allocation169_spill] sm:$0xff] }
 0x6eb   :  { %11741 = vmatpush3.msra.mxu0 %v20888_v15  ;;  %11709 = vmatprep.subr.mxu1 %v20889_v11  ;;  %v20938_v36 = vld [vmem:[#allocation202_spill] sm:$0xff]  ;;  %v20939_v0 = vld [vmem:[#allocation153_spill] sm:$0xff]  ;;  %v20941_v22 = vld [vmem:[#allocation168_spill] sm:$0xff] }
 0x6ec   :  { %11742 = vmatprep.subr.mxu0 %v20890_v45  ;;  %11710 = vmatpush3.msra.mxu1 %v20891_v16  ;;  %v20940_v20 = vld [vmem:[#allocation186_spill] sm:$0xff]  ;;  %v20942_v58 = vld [vmem:[#allocation201_spill] sm:$0xff]  ;;  %v20943_v19 = vld [vmem:[#allocation152_spill] sm:$0xff] }
 0x6ed   :  { %11743 = vmatpush3.msra.mxu0 %v20892_v18  ;;  %11711 = vmatprep.subr.mxu1 %v20893_v21  ;;  %v20944_v15 = vld [vmem:[#allocation185_spill] sm:$0xff]  ;;  %v20945_v11 = vld [vmem:[#allocation167_spill] sm:$0xff]  ;;  %v20946_v45 = vld [vmem:[#allocation200_spill] sm:$0xff] }
 0x6ee   :  { %11744 = vmatprep.subr.mxu0 %v20894_v31  ;;  %11712 = vmatpush3.msra.mxu1 %v20895_v55  ;;  %v20947_v16 = vld [vmem:[#allocation151_spill] sm:$0xff]  ;;  %v20948_v18 = vld [vmem:[#allocation184_spill] sm:$0xff]  ;;  %v20949_v21 = vld [vmem:[#allocation166_spill] sm:$0xff] }
 0x6ef   :  { %11745 = vmatpush3.msra.mxu0 %v20896_v33  ;;  %11713 = vmatprep.subr.mxu1 %v20897_v53  ;;  %v20950_v31 = vld [vmem:[#allocation199_spill] sm:$0xff]  ;;  %v20951_v55 = vld [vmem:[#allocation150_spill] sm:$0xff]  ;;  %v20953_v53 = vld [vmem:[#allocation165_spill] sm:$0xff] }
 0x6f0   :  { %11746 = vmatprep.subr.mxu0 %v20898_v35  ;;  %11714 = vmatpush3.msra.mxu1 %v20899_v12  ;;  %v20952_v33 = vld [vmem:[#allocation183_spill] sm:$0xff]  ;;  %v20954_v35 = vld [vmem:[#allocation198_spill] sm:$0xff]  ;;  %v20955_v12 = vld [vmem:[#allocation149_spill] sm:$0xff] }
 0x6f1   :  { %11747 = vmatpush3.msra.mxu0 %v20900_v14  ;;  %11715 = vmatprep.subr.mxu1 %v20901_v44  ;;  %v20956_v14 = vld [vmem:[#allocation182_spill] sm:$0xff]  ;;  %v20957_v37 = vld [vmem:[#allocation164_spill] sm:$0xff]  ;;  %v20958_v44 = vld [vmem:[#allocation197_spill] sm:$0xff] }
 0x6f2   :  { %11748 = vmatprep.subr.mxu0 %v20902_v23  ;;  %11716 = vmatpush3.msra.mxu1 %v20903_v62  ;;  %v20959_v23 = vld [vmem:[#allocation148_spill] sm:$0xff]  ;;  %v20960_v62 = vld [vmem:[#allocation181_spill] sm:$0xff] }
 0x6f3   :  { %11749 = vmatpush3.msra.mxu0 %v20904_v50  ;;  %11717 = vmatprep.subr.mxu1 %v20905_v56  ;;  %v20961_v50 = vld [vmem:[#allocation163_spill] sm:$0xff]  ;;  %v20962_v56 = vld [vmem:[#allocation196_spill] sm:$0xff] }
 0x6f4   :  { %11750 = vmatprep.subr.mxu0 %v20906_v40  ;;  %11718 = vmatpush3.msra.mxu1 %v20907_v10  ;;  %v20963_v40 = vld [vmem:[#allocation147_spill] sm:$0xff]  ;;  %v20964_v6 = vld [vmem:[#allocation180_spill] sm:$0xff] }
 0x6f5   :  { %11751 = vmatpush3.msra.mxu0 %v20908_v57  ;;  %11719 = vmatprep.subr.mxu1 %v20909_v49  ;;  %v9515_v10 = vld [vmem:[#allocation5 + $0x10] sm:$0xff]  ;;  %v20965_v57 = vld [vmem:[#allocation162_spill] sm:$0xff] }
 0x6f6   :  { %11752 = vmatprep.subr.mxu0 %v20910_v30  ;;  %11720 = vmatpush3.msra.mxu1 %v20911_v48  ;;  %v20967_v49 = vld [vmem:[#allocation146_spill] sm:$0xff]  ;;  %v20968_v30 = vld [vmem:[#allocation179_spill] sm:$0xff]  ;;  %v20969_v48 = vld [vmem:[#allocation161_spill] sm:$0xff] }
 0x6f7   :  { %11753 = vmatpush3.msra.mxu0 %v20912_v5  ;;  %11721 = vmatprep.subr.mxu1 %v20913_v2  ;;  %v20970_v5 = vld [vmem:[#allocation194_spill] sm:$0xff]  ;;  %v9968_v2 = vcombine.high %v9515_v10, %v9515_v10 }
 0x6f8   :  { %11754 = vmatprep.subr.mxu0 %v20914_v38  ;;  %11722 = vmatpush3.msra.mxu1 %v20915_v54  ;;  %v20971_v38 = vld [vmem:[#allocation145_spill] sm:$0xff]  ;;  %v9975_v54 = vrot.slane %v9515_v10, %v18936_v61  ;;  %v21021_v10 = vld [vmem:[#allocation228_spill] sm:$0xff] }
 0x6f9   :  { %11755 = vmatpush3.msra.mxu0 %v20916_v41  ;;  %11723 = vmatprep.subr.mxu1 %v20917_v46  ;;  %v20973_v41 = vld [vmem:[#allocation160_spill] sm:$0xff] }
 0x6fa   :  { %11756 = vmatprep.subr.mxu0 %v20918_v1  ;;  %11724 = vmatpush3.msra.mxu1 %v20919_v59  ;;  %v20975_v46 = vld [vmem:[#allocation144_spill] sm:$0xff]  ;;  %v20976_v1 = vld [vmem:[#allocation177_spill] sm:$0xff]  ;;  %v20977_v59 = vld [vmem:[#allocation159_spill] sm:$0xff] }
 0x6fb   :  { %11757 = vmatpush3.msra.mxu0 %v20920_v13  ;;  %11725 = vmatprep.subr.mxu1 %v20921_v63  ;;  %v20978_v13 = vld [vmem:[#allocation192_spill] sm:$0xff]  ;;  %v9982_v63 = vrot.slane %v9968_v2, %v18936_v61 }
 0x6fc   :  { %11758 = vmatprep.subr.mxu0 %v20922_v60  ;;  %11726 = vmatpush3.msra.mxu1 %v20923_v26  ;;  %v20979_v60 = vld [vmem:[#allocation143_spill] sm:$0xff]  ;;  %v9983_v26 = vcombine.high %v9975_v54, %v9975_v54  ;;  %v21028_v2 = vld [vmem:[#allocation244_spill] sm:$0xff] }
 0x6fd   :  { %10272 = vmatprep.mubr.f32.mxu1 %v9966_v32  ;;  %11759 = vmatpush3.msra.mxu0 %v20924_v43  ;;  %v20974_v32 = vld [vmem:[#allocation193_spill] sm:$0xff]  ;;  %v20981_v43 = vld [vmem:[#allocation158_spill] sm:$0xff] }
 0x6fe   :  { %10273 = vmatmul.mubr.f32.vlgmr.msra.gmra.mxu1 %v9958_v29  ;;  %11760 = vmatprep.subr.mxu0 %v20925_v42  ;;  %v20966_v29 = vld [vmem:[#allocation195_spill] sm:$0xff] }
 0x6ff   :  { %11765 = vmatprep.subr.mxu1 %v20926_v34  ;;  %11761 = vmatpush3.msra.mxu0 %v20927_v3  ;;  %v20982_v42 = vld [vmem:[#allocation191_spill] sm:$0xff]  ;;  %v20983_v34 = vld [vmem:[#allocation142_spill] sm:$0xff] }
 0x700   :  { %10342 = vmatprep.mubr.f32.mxu0 %v9967_v51  ;;  %11766 = vmatpush3.msra.mxu1 %v20928_v52  ;;  %v20980_v51 = vld [vmem:[#allocation176_spill] sm:$0xff]  ;;  %v20984_v3 = vld [vmem:[#allocation175_spill] sm:$0xff]  ;;  %v20985_v52 = vld [vmem:[#allocation157_spill] sm:$0xff] }
 0x701   :  { %10343 = vmatmul.mubr.f32.vlgmr.msra.gmra.mxu0 %v9965_v39  ;;  %11767 = vmatprep.subr.mxu1 %v20929_v47  ;;  %v20972_v39 = vld [vmem:[#allocation178_spill] sm:$0xff] }
 0x702   :  { %11800 = vmatprep.subr.mxu0 %v20930_v7  ;;  %11768 = vmatpush3.msra.mxu1 %v20931_v9  ;;  %v20986_v47 = vld [vmem:[#allocation190_spill] sm:$0xff]  ;;  %v9984_v7 = vcombine.high %v9982_v63, %v9982_v63  ;;  %v20987_v9 = vld [vmem:[#allocation141_spill] sm:$0xff] }
 0x703   :  { %11801 = vmatpush3.msra.mxu0 %v20932_v24  ;;  %11769 = vmatprep.subr.mxu1 %v20933_v27  ;;  %v20988_v24 = vld [vmem:[#allocation174_spill] sm:$0xff]  ;;  %v20989_v27 = vld [vmem:[#allocation189_spill] sm:$0xff] }
 0x704   :  { %11802 = vmatprep.subr.mxu0 %v20934_v25  ;;  %11770 = vmatpush3.msra.mxu1 %v20935_v8  ;;  %v20990_v25 = vld [vmem:[#allocation236_spill] sm:$0xff]  ;;  %v20991_v8 = vld [vmem:[#allocation173_spill] sm:$0xff] }
 0x705   :  { %11803 = vmatpush3.msra.mxu0 %v20936_v4  ;;  %11771 = vmatprep.subr.mxu1 %v20937_v28  ;;  %v20992_v4 = vld [vmem:[#allocation220_spill] sm:$0xff]  ;;  %v20993_v28 = vld [vmem:[#allocation235_spill] sm:$0xff] }
 0x706   :  { %11804 = vmatprep.subr.mxu0 %v20938_v36  ;;  %11772 = vmatpush3.msra.mxu1 %v20939_v0  ;;  %v20994_v36 = vld [vmem:[#allocation268_spill] sm:$0xff]  ;;  %v20995_v0 = vld [vmem:[#allocation219_spill] sm:$0xff] }
 0x707   :  { %11805 = vmatpush3.msra.mxu0 %v20940_v20  ;;  %11773 = vmatprep.subr.mxu1 %v20941_v22  ;;  %v20996_v20 = vld [vmem:[#allocation252_spill] sm:$0xff]  ;;  %v20997_v22 = vld [vmem:[#allocation234_spill] sm:$0xff] }
 0x708   :  { %11806 = vmatprep.subr.mxu0 %v20942_v58  ;;  %11774 = vmatpush3.msra.mxu1 %v20943_v19  ;;  %v20998_v58 = vld [vmem:[#allocation267_spill] sm:$0xff]  ;;  %v20999_v19 = vld [vmem:[#allocation218_spill] sm:$0xff] }
 0x709   :  { %11807 = vmatpush3.msra.mxu0 %v20944_v15  ;;  %11775 = vmatprep.subr.mxu1 %v20945_v11  ;;  %v21000_v15 = vld [vmem:[#allocation251_spill] sm:$0xff]  ;;  %v21001_v11 = vld [vmem:[#allocation233_spill] sm:$0xff] }
 0x70a   :  { %11808 = vmatprep.subr.mxu0 %v20946_v45  ;;  %11776 = vmatpush3.msra.mxu1 %v20947_v16  ;;  %v21002_v45 = vld [vmem:[#allocation266_spill] sm:$0xff]  ;;  %v21003_v16 = vld [vmem:[#allocation217_spill] sm:$0xff] }
 0x70b   :  { %11809 = vmatpush3.msra.mxu0 %v20948_v18  ;;  %11777 = vmatprep.subr.mxu1 %v20949_v21  ;;  %v21004_v18 = vld [vmem:[#allocation250_spill] sm:$0xff]  ;;  %v21005_v21 = vld [vmem:[#allocation232_spill] sm:$0xff] }
 0x70c   :  { %11810 = vmatprep.subr.mxu0 %v20950_v31  ;;  %11778 = vmatpush3.msra.mxu1 %v20951_v55  ;;  %v21006_v31 = vld [vmem:[#allocation265_spill] sm:$0xff]  ;;  %v21007_v55 = vld [vmem:[#allocation216_spill] sm:$0xff] }
 0x70d   :  { %11811 = vmatpush3.msra.mxu0 %v20952_v33  ;;  %11779 = vmatprep.subr.mxu1 %v20953_v53  ;;  %v21008_v33 = vld [vmem:[#allocation249_spill] sm:$0xff]  ;;  %v21009_v53 = vld [vmem:[#allocation231_spill] sm:$0xff] }
 0x70e   :  { %11812 = vmatprep.subr.mxu0 %v20954_v35  ;;  %11780 = vmatpush3.msra.mxu1 %v20955_v12  ;;  %v21010_v35 = vld [vmem:[#allocation264_spill] sm:$0xff]  ;;  %v21011_v12 = vld [vmem:[#allocation215_spill] sm:$0xff] }
 0x70f   :  { %11813 = vmatpush3.msra.mxu0 %v20956_v14  ;;  %11781 = vmatprep.subr.mxu1 %v20957_v37  ;;  %v21012_v14 = vld [vmem:[#allocation248_spill] sm:$0xff]  ;;  %v21013_v37 = vld [vmem:[#allocation230_spill] sm:$0xff] }
 0x710   :  { %11814 = vmatprep.subr.mxu0 %v20958_v44  ;;  %11782 = vmatpush3.msra.mxu1 %v20959_v23  ;;  %v21014_v44 = vld [vmem:[#allocation263_spill] sm:$0xff]  ;;  %v21015_v23 = vld [vmem:[#allocation214_spill] sm:$0xff] }
 0x711   :  { %11815 = vmatpush3.msra.mxu0 %v20960_v62  ;;  %11783 = vmatprep.subr.mxu1 %v20961_v50  ;;  %v21016_v62 = vld [vmem:[#allocation247_spill] sm:$0xff]  ;;  %v21017_v50 = vld [vmem:[#allocation229_spill] sm:$0xff] }
 0x712   :  { %11816 = vmatprep.subr.mxu0 %v20962_v56  ;;  %11784 = vmatpush3.msra.mxu1 %v20963_v40  ;;  %v21018_v56 = vld [vmem:[#allocation262_spill] sm:$0xff]  ;;  %v21019_v40 = vld [vmem:[#allocation213_spill] sm:$0xff] }
 0x713   :  { %11817 = vmatpush3.msra.mxu0 %v20964_v6  ;;  %11785 = vmatprep.subr.mxu1 %v20965_v57  ;;  %v21020_v6 = vld [vmem:[#allocation246_spill] sm:$0xff]  ;;  %v21022_v57 = vld [vmem:[#allocation261_spill] sm:$0xff] }
 0x714   :  { %11818 = vmatprep.subr.mxu0 %v20966_v29  ;;  %11786 = vmatpush3.msra.mxu1 %v20967_v49  ;;  %v21023_v29 = vld [vmem:[#allocation212_spill] sm:$0xff]  ;;  %v21024_v49 = vld [vmem:[#allocation245_spill] sm:$0xff] }
 0x715   :  { %11819 = vmatpush3.msra.mxu0 %v20968_v30  ;;  %11787 = vmatprep.subr.mxu1 %v20969_v48  ;;  %v21025_v30 = vld [vmem:[#allocation227_spill] sm:$0xff]  ;;  %v21026_v48 = vld [vmem:[#allocation260_spill] sm:$0xff] }
 0x716   :  { %11820 = vmatprep.subr.mxu0 %v20970_v5  ;;  %11788 = vmatpush3.msra.mxu1 %v20971_v38  ;;  %v21027_v5 = vld [vmem:[#allocation211_spill] sm:$0xff]  ;;  %v9516_v38 = vld [vmem:[#allocation5 + $0x18] sm:$0xff] }
 0x717   :  { %11821 = vmatpush3.msra.mxu0 %v20972_v39  ;;  %11789 = vmatprep.subr.mxu1 %v20973_v41  ;;  %v21029_v39 = vld [vmem:[#allocation226_spill] sm:$0xff] }
 0x718   :  { %11822 = vmatprep.subr.mxu0 %v20974_v32  ;;  %11790 = vmatpush3.msra.mxu1 %v20975_v46  ;;  %v21031_v41 = vld [vmem:[#allocation210_spill] sm:$0xff]  ;;  %v21032_v32 = vld [vmem:[#allocation243_spill] sm:$0xff]  ;;  %v21033_v46 = vld [vmem:[#allocation225_spill] sm:$0xff] }
 0x719   :  { %11823 = vmatpush3.msra.mxu0 %v20976_v1  ;;  %11791 = vmatprep.subr.mxu1 %v20977_v59  ;;  %v21034_v1 = vld [vmem:[#allocation258_spill] sm:$0xff]  ;;  %v9985_v59 = vcombine.high %v9516_v38, %v9516_v38 }
 0x71a   :  { %11824 = vmatprep.subr.mxu0 %v20978_v13  ;;  %11792 = vmatpush3.msra.mxu1 %v20979_v60  ;;  %v21035_v13 = vld [vmem:[#allocation209_spill] sm:$0xff]  ;;  %v9992_v60 = vrot.slane %v9516_v38, %v18936_v61  ;;  %v21085_v38 = vld [vmem:[#allocation292_spill] sm:$0xff] }
 0x71b   :  { %11825 = vmatpush3.msra.mxu0 %v20980_v51  ;;  %11793 = vmatprep.subr.mxu1 %v20981_v43  ;;  %v21037_v51 = vld [vmem:[#allocation224_spill] sm:$0xff] }
 0x71c   :  { %11826 = vmatprep.subr.mxu0 %v20982_v42  ;;  %11794 = vmatpush3.msra.mxu1 %v20983_v34  ;;  %v21039_v43 = vld [vmem:[#allocation208_spill] sm:$0xff]  ;;  %v21040_v42 = vld [vmem:[#allocation241_spill] sm:$0xff]  ;;  %v21041_v34 = vld [vmem:[#allocation223_spill] sm:$0xff] }
 0x71d   :  { %11827 = vmatpush3.msra.mxu0 %v20984_v3  ;;  %11795 = vmatprep.subr.mxu1 %v20985_v52  ;;  %v21042_v3 = vld [vmem:[#allocation256_spill] sm:$0xff]  ;;  %v9999_v52 = vrot.slane %v9985_v59, %v18936_v61 }
 0x71e   :  { %11828 = vmatprep.subr.mxu0 %v20986_v47  ;;  %11796 = vmatpush3.msra.mxu1 %v20987_v9  ;;  %v21043_v47 = vld [vmem:[#allocation207_spill] sm:$0xff]  ;;  %v10000_v9 = vcombine.high %v9992_v60, %v9992_v60  ;;  %v21092_v59 = vld [vmem:[#allocation308_spill] sm:$0xff] }
 0x71f   :  { %10412 = vmatprep.mubr.f32.mxu1 %v9983_v26  ;;  %11829 = vmatpush3.msra.mxu0 %v20988_v24  ;;  %v21038_v26 = vld [vmem:[#allocation257_spill] sm:$0xff]  ;;  %v21045_v24 = vld [vmem:[#allocation222_spill] sm:$0xff] }
 0x720   :  { %10413 = vmatmul.mubr.f32.vlgmr.msra.gmra.mxu1 %v9975_v54  ;;  %11830 = vmatprep.subr.mxu0 %v20989_v27  ;;  %v21030_v54 = vld [vmem:[#allocation259_spill] sm:$0xff] }
 0x721   :  { %11835 = vmatprep.subr.mxu1 %v20990_v25  ;;  %11831 = vmatpush3.msra.mxu0 %v20991_v8  ;;  %v21046_v27 = vld [vmem:[#allocation255_spill] sm:$0xff]  ;;  %v21047_v25 = vld [vmem:[#allocation206_spill] sm:$0xff] }
 0x722   :  { %10482 = vmatprep.mubr.f32.mxu0 %v9984_v7  ;;  %11836 = vmatpush3.msra.mxu1 %v20992_v4  ;;  %v21044_v7 = vld [vmem:[#allocation240_spill] sm:$0xff]  ;;  %v21048_v8 = vld [vmem:[#allocation239_spill] sm:$0xff]  ;;  %v21049_v4 = vld [vmem:[#allocation221_spill] sm:$0xff] }
 0x723   :  { %10483 = vmatmul.mubr.f32.vlgmr.msra.gmra.mxu0 %v9982_v63  ;;  %11837 = vmatprep.subr.mxu1 %v20993_v28  ;;  %v21036_v63 = vld [vmem:[#allocation242_spill] sm:$0xff] }
 0x724   :  { %11870 = vmatprep.subr.mxu0 %v20994_v36  ;;  %11838 = vmatpush3.msra.mxu1 %v20995_v0  ;;  %v21050_v28 = vld [vmem:[#allocation254_spill] sm:$0xff]  ;;  %v10001_v36 = vcombine.high %v9999_v52, %v9999_v52  ;;  %v21051_v0 = vld [vmem:[#allocation205_spill] sm:$0xff] }
 0x725   :  { %11871 = vmatpush3.msra.mxu0 %v20996_v20  ;;  %11839 = vmatprep.subr.mxu1 %v20997_v22  ;;  %v21052_v20 = vld [vmem:[#allocation238_spill] sm:$0xff]  ;;  %v21053_v22 = vld [vmem:[#allocation253_spill] sm:$0xff] }
 0x726   :  { %11872 = vmatprep.subr.mxu0 %v20998_v58  ;;  %11840 = vmatpush3.msra.mxu1 %v20999_v19  ;;  %v21054_v58 = vld [vmem:[#allocation300_spill] sm:$0xff]  ;;  %v21055_v19 = vld [vmem:[#allocation237_spill] sm:$0xff] }
 0x727   :  { %11873 = vmatpush3.msra.mxu0 %v21000_v15  ;;  %11841 = vmatprep.subr.mxu1 %v21001_v11  ;;  %v21056_v15 = vld [vmem:[#allocation284_spill] sm:$0xff]  ;;  %v21057_v11 = vld [vmem:[#allocation299_spill] sm:$0xff] }
 0x728   :  { %11874 = vmatprep.subr.mxu0 %v21002_v45  ;;  %11842 = vmatpush3.msra.mxu1 %v21003_v16  ;;  %v21058_v45 = vld [vmem:[#allocation332_spill] sm:$0xff]  ;;  %v21059_v16 = vld [vmem:[#allocation283_spill] sm:$0xff] }
 0x729   :  { %11875 = vmatpush3.msra.mxu0 %v21004_v18  ;;  %11843 = vmatprep.subr.mxu1 %v21005_v21  ;;  %v21060_v18 = vld [vmem:[#allocation316_spill] sm:$0xff]  ;;  %v21061_v21 = vld [vmem:[#allocation298_spill] sm:$0xff] }
 0x72a   :  { %11876 = vmatprep.subr.mxu0 %v21006_v31  ;;  %11844 = vmatpush3.msra.mxu1 %v21007_v55  ;;  %v21062_v31 = vld [vmem:[#allocation331_spill] sm:$0xff]  ;;  %v21063_v55 = vld [vmem:[#allocation282_spill] sm:$0xff] }
 0x72b   :  { %11877 = vmatpush3.msra.mxu0 %v21008_v33  ;;  %11845 = vmatprep.subr.mxu1 %v21009_v53  ;;  %v21064_v33 = vld [vmem:[#allocation315_spill] sm:$0xff]  ;;  %v21065_v53 = vld [vmem:[#allocation297_spill] sm:$0xff] }
 0x72c   :  { %11878 = vmatprep.subr.mxu0 %v21010_v35  ;;  %11846 = vmatpush3.msra.mxu1 %v21011_v12  ;;  %v21066_v35 = vld [vmem:[#allocation330_spill] sm:$0xff]  ;;  %v21067_v12 = vld [vmem:[#allocation281_spill] sm:$0xff] }
 0x72d   :  { %11879 = vmatpush3.msra.mxu0 %v21012_v14  ;;  %11847 = vmatprep.subr.mxu1 %v21013_v37  ;;  %v21068_v14 = vld [vmem:[#allocation314_spill] sm:$0xff]  ;;  %v21069_v37 = vld [vmem:[#allocation296_spill] sm:$0xff] }
 0x72e   :  { %11880 = vmatprep.subr.mxu0 %v21014_v44  ;;  %11848 = vmatpush3.msra.mxu1 %v21015_v23  ;;  %v21070_v44 = vld [vmem:[#allocation329_spill] sm:$0xff]  ;;  %v21071_v23 = vld [vmem:[#allocation280_spill] sm:$0xff] }
 0x72f   :  { %11881 = vmatpush3.msra.mxu0 %v21016_v62  ;;  %11849 = vmatprep.subr.mxu1 %v21017_v50  ;;  %v21072_v62 = vld [vmem:[#allocation313_spill] sm:$0xff]  ;;  %v21073_v50 = vld [vmem:[#allocation295_spill] sm:$0xff] }
 0x730   :  { %11882 = vmatprep.subr.mxu0 %v21018_v56  ;;  %11850 = vmatpush3.msra.mxu1 %v21019_v40  ;;  %v21074_v56 = vld [vmem:[#allocation328_spill] sm:$0xff]  ;;  %v21075_v40 = vld [vmem:[#allocation279_spill] sm:$0xff] }
 0x731   :  { %11883 = vmatpush3.msra.mxu0 %v21020_v6  ;;  %11851 = vmatprep.subr.mxu1 %v21021_v10  ;;  %v21076_v6 = vld [vmem:[#allocation312_spill] sm:$0xff]  ;;  %v21077_v10 = vld [vmem:[#allocation294_spill] sm:$0xff] }
 0x732   :  { %11884 = vmatprep.subr.mxu0 %v21022_v57  ;;  %11852 = vmatpush3.msra.mxu1 %v21023_v29  ;;  %v21078_v57 = vld [vmem:[#allocation327_spill] sm:$0xff]  ;;  %v21079_v29 = vld [vmem:[#allocation278_spill] sm:$0xff] }
 0x733   :  { %11885 = vmatpush3.msra.mxu0 %v21024_v49  ;;  %11853 = vmatprep.subr.mxu1 %v21025_v30  ;;  %v21080_v49 = vld [vmem:[#allocation311_spill] sm:$0xff]  ;;  %v21081_v30 = vld [vmem:[#allocation293_spill] sm:$0xff] }
 0x734   :  { %11886 = vmatprep.subr.mxu0 %v21026_v48  ;;  %11854 = vmatpush3.msra.mxu1 %v21027_v5  ;;  %v21082_v48 = vld [vmem:[#allocation326_spill] sm:$0xff]  ;;  %v21083_v5 = vld [vmem:[#allocation277_spill] sm:$0xff] }
 0x735   :  { %11887 = vmatpush3.msra.mxu0 %v21028_v2  ;;  %11855 = vmatprep.subr.mxu1 %v21029_v39  ;;  %v21084_v2 = vld [vmem:[#allocation310_spill] sm:$0xff]  ;;  %v21086_v39 = vld [vmem:[#allocation325_spill] sm:$0xff] }
 0x736   :  { %11888 = vmatprep.subr.mxu0 %v21030_v54  ;;  %11856 = vmatpush3.msra.mxu1 %v21031_v41  ;;  %v21087_v54 = vld [vmem:[#allocation276_spill] sm:$0xff]  ;;  %v21088_v41 = vld [vmem:[#allocation309_spill] sm:$0xff] }
 0x737   :  { %11889 = vmatpush3.msra.mxu0 %v21032_v32  ;;  %11857 = vmatprep.subr.mxu1 %v21033_v46  ;;  %v21089_v32 = vld [vmem:[#allocation291_spill] sm:$0xff]  ;;  %v21090_v46 = vld [vmem:[#allocation324_spill] sm:$0xff] }
 0x738   :  { %11890 = vmatprep.subr.mxu0 %v21034_v1  ;;  %11858 = vmatpush3.msra.mxu1 %v21035_v13  ;;  %v21091_v1 = vld [vmem:[#allocation275_spill] sm:$0xff] }
 0x739   :  { %11891 = vmatpush3.msra.mxu0 %v21036_v63  ;;  %11859 = vmatprep.subr.mxu1 %v21037_v51  ;;  %v9517_v13 = vld [vmem:[#allocation5 + $0x20] sm:$0xff] }
 0x73a   :  { %11892 = vmatprep.subr.mxu0 %v21038_v26  ;;  %11860 = vmatpush3.msra.mxu1 %v21039_v43  ;;  %v21093_v63 = vld [vmem:[#allocation290_spill] sm:$0xff]  ;;  %v21096_v26 = vld [vmem:[#allocation307_spill] sm:$0xff]  ;;  %v21097_v43 = vld [vmem:[#allocation289_spill] sm:$0xff] }
 0x73b   :  { %11893 = vmatpush3.msra.mxu0 %v21040_v42  ;;  %11861 = vmatprep.subr.mxu1 %v21041_v34  ;;  %v21095_v51 = vld [vmem:[#allocation274_spill] sm:$0xff]  ;;  %v10002_v34 = vcombine.high %v9517_v13, %v9517_v13 }
 0x73c   :  { %11894 = vmatprep.subr.mxu0 %v21042_v3  ;;  %11862 = vmatpush3.msra.mxu1 %v21043_v47  ;;  %v21098_v42 = vld [vmem:[#allocation322_spill] sm:$0xff]  ;;  %v21099_v3 = vld [vmem:[#allocation273_spill] sm:$0xff]  ;;  %v10009_v47 = vrot.slane %v9517_v13, %v18936_v61  ;;  %v21149_v13 = vld [vmem:[#allocation356_spill] sm:$0xff] }
 0x73d   :  { %11895 = vmatpush3.msra.mxu0 %v21044_v7  ;;  %11863 = vmatprep.subr.mxu1 %v21045_v24  ;;  %v21101_v7 = vld [vmem:[#allocation288_spill] sm:$0xff] }
 0x73e   :  { %11896 = vmatprep.subr.mxu0 %v21046_v27  ;;  %11864 = vmatpush3.msra.mxu1 %v21047_v25  ;;  %v21103_v24 = vld [vmem:[#allocation272_spill] sm:$0xff]  ;;  %v21104_v27 = vld [vmem:[#allocation305_spill] sm:$0xff]  ;;  %v21105_v25 = vld [vmem:[#allocation287_spill] sm:$0xff] }
 0x73f   :  { %11897 = vmatpush3.msra.mxu0 %v21048_v8  ;;  %11865 = vmatprep.subr.mxu1 %v21049_v4  ;;  %v21106_v8 = vld [vmem:[#allocation320_spill] sm:$0xff]  ;;  %v10016_v4 = vrot.slane %v10002_v34, %v18936_v61 }
 0x740   :  { %11898 = vmatprep.subr.mxu0 %v21050_v28  ;;  %11866 = vmatpush3.msra.mxu1 %v21051_v0  ;;  %v21107_v28 = vld [vmem:[#allocation271_spill] sm:$0xff]  ;;  %v10017_v0 = vcombine.high %v10009_v47, %v10009_v47  ;;  %v21156_v34 = vld [vmem:[#allocation372_spill] sm:$0xff] }
 0x741   :  { %10552 = vmatprep.mubr.f32.mxu1 %v10000_v9  ;;  %11899 = vmatpush3.msra.mxu0 %v21052_v20  ;;  %v21102_v9 = vld [vmem:[#allocation321_spill] sm:$0xff]  ;;  %v21109_v20 = vld [vmem:[#allocation286_spill] sm:$0xff] }
 0x742   :  { %10553 = vmatmul.mubr.f32.vlgmr.msra.gmra.mxu1 %v9992_v60  ;;  %11900 = vmatprep.subr.mxu0 %v21053_v22  ;;  %v21094_v60 = vld [vmem:[#allocation323_spill] sm:$0xff] }
 0x743   :  { %11905 = vmatprep.subr.mxu1 %v21054_v58  ;;  %11901 = vmatpush3.msra.mxu0 %v21055_v19  ;;  %v21110_v22 = vld [vmem:[#allocation319_spill] sm:$0xff]  ;;  %v21111_v58 = vld [vmem:[#allocation270_spill] sm:$0xff] }
 0x744   :  { %10622 = vmatprep.mubr.f32.mxu0 %v10001_v36  ;;  %11906 = vmatpush3.msra.mxu1 %v21056_v15  ;;  %v21108_v36 = vld [vmem:[#allocation304_spill] sm:$0xff]  ;;  %v21112_v19 = vld [vmem:[#allocation303_spill] sm:$0xff]  ;;  %v21113_v15 = vld [vmem:[#allocation285_spill] sm:$0xff] }
 0x745   :  { %10623 = vmatmul.mubr.f32.vlgmr.msra.gmra.mxu0 %v9999_v52  ;;  %11907 = vmatprep.subr.mxu1 %v21057_v11  ;;  %v21100_v52 = vld [vmem:[#allocation306_spill] sm:$0xff] }
 0x746   :  { %11940 = vmatprep.subr.mxu0 %v21058_v45  ;;  %11908 = vmatpush3.msra.mxu1 %v21059_v16  ;;  %v21114_v11 = vld [vmem:[#allocation318_spill] sm:$0xff]  ;;  %v10018_v45 = vcombine.high %v10016_v4, %v10016_v4  ;;  %v21115_v16 = vld [vmem:[#allocation269_spill] sm:$0xff] }
 0x747   :  { %11941 = vmatpush3.msra.mxu0 %v21060_v18  ;;  %11909 = vmatprep.subr.mxu1 %v21061_v21  ;;  %v21116_v18 = vld [vmem:[#allocation302_spill] sm:$0xff]  ;;  %v21117_v21 = vld [vmem:[#allocation317_spill] sm:$0xff] }
 0x748   :  { %11942 = vmatprep.subr.mxu0 %v21062_v31  ;;  %11910 = vmatpush3.msra.mxu1 %v21063_v55  ;;  %v21118_v31 = vld [vmem:[#allocation364_spill] sm:$0xff]  ;;  %v21119_v55 = vld [vmem:[#allocation301_spill] sm:$0xff] }
 0x749   :  { %11943 = vmatpush3.msra.mxu0 %v21064_v33  ;;  %11911 = vmatprep.subr.mxu1 %v21065_v53  ;;  %v21120_v33 = vld [vmem:[#allocation348_spill] sm:$0xff]  ;;  %v21121_v53 = vld [vmem:[#allocation363_spill] sm:$0xff] }
 0x74a   :  { %11944 = vmatprep.subr.mxu0 %v21066_v35  ;;  %11912 = vmatpush3.msra.mxu1 %v21067_v12  ;;  %v21122_v35 = vld [vmem:[#allocation396_spill] sm:$0xff]  ;;  %v21123_v12 = vld [vmem:[#allocation347_spill] sm:$0xff] }
 0x74b   :  { %11945 = vmatpush3.msra.mxu0 %v21068_v14  ;;  %11913 = vmatprep.subr.mxu1 %v21069_v37  ;;  %v21124_v14 = vld [vmem:[#allocation380_spill] sm:$0xff]  ;;  %v21125_v37 = vld [vmem:[#allocation362_spill] sm:$0xff] }
 0x74c   :  { %11946 = vmatprep.subr.mxu0 %v21070_v44  ;;  %11914 = vmatpush3.msra.mxu1 %v21071_v23  ;;  %v21126_v44 = vld [vmem:[#allocation395_spill] sm:$0xff]  ;;  %v21127_v23 = vld [vmem:[#allocation346_spill] sm:$0xff] }
 0x74d   :  { %11947 = vmatpush3.msra.mxu0 %v21072_v62  ;;  %11915 = vmatprep.subr.mxu1 %v21073_v50  ;;  %v21128_v62 = vld [vmem:[#allocation379_spill] sm:$0xff]  ;;  %v21129_v50 = vld [vmem:[#allocation361_spill] sm:$0xff] }
 0x74e   :  { %11948 = vmatprep.subr.mxu0 %v21074_v56  ;;  %11916 = vmatpush3.msra.mxu1 %v21075_v40  ;;  %v21130_v56 = vld [vmem:[#allocation394_spill] sm:$0xff]  ;;  %v21131_v40 = vld [vmem:[#allocation345_spill] sm:$0xff] }
 0x74f   :  { %11949 = vmatpush3.msra.mxu0 %v21076_v6  ;;  %11917 = vmatprep.subr.mxu1 %v21077_v10  ;;  %v21132_v6 = vld [vmem:[#allocation378_spill] sm:$0xff]  ;;  %v21133_v10 = vld [vmem:[#allocation360_spill] sm:$0xff] }
 0x750   :  { %11950 = vmatprep.subr.mxu0 %v21078_v57  ;;  %11918 = vmatpush3.msra.mxu1 %v21079_v29  ;;  %v21134_v57 = vld [vmem:[#allocation393_spill] sm:$0xff]  ;;  %v21135_v29 = vld [vmem:[#allocation344_spill] sm:$0xff] }
 0x751   :  { %11951 = vmatpush3.msra.mxu0 %v21080_v49  ;;  %11919 = vmatprep.subr.mxu1 %v21081_v30  ;;  %v21136_v49 = vld [vmem:[#allocation377_spill] sm:$0xff]  ;;  %v21137_v30 = vld [vmem:[#allocation359_spill] sm:$0xff] }
 0x752   :  { %11952 = vmatprep.subr.mxu0 %v21082_v48  ;;  %11920 = vmatpush3.msra.mxu1 %v21083_v5  ;;  %v21138_v48 = vld [vmem:[#allocation392_spill] sm:$0xff]  ;;  %v21139_v5 = vld [vmem:[#allocation343_spill] sm:$0xff] }
 0x753   :  { %11953 = vmatpush3.msra.mxu0 %v21084_v2  ;;  %11921 = vmatprep.subr.mxu1 %v21085_v38  ;;  %v21140_v2 = vld [vmem:[#allocation376_spill] sm:$0xff]  ;;  %v21141_v38 = vld [vmem:[#allocation358_spill] sm:$0xff] }
 0x754   :  { %11954 = vmatprep.subr.mxu0 %v21086_v39  ;;  %11922 = vmatpush3.msra.mxu1 %v21087_v54  ;;  %v21142_v39 = vld [vmem:[#allocation391_spill] sm:$0xff]  ;;  %v21143_v54 = vld [vmem:[#allocation342_spill] sm:$0xff] }
 0x755   :  { %11955 = vmatpush3.msra.mxu0 %v21088_v41  ;;  %11923 = vmatprep.subr.mxu1 %v21089_v32  ;;  %v21144_v41 = vld [vmem:[#allocation375_spill] sm:$0xff]  ;;  %v21145_v32 = vld [vmem:[#allocation357_spill] sm:$0xff] }
 0x756   :  { %11956 = vmatprep.subr.mxu0 %v21090_v46  ;;  %11924 = vmatpush3.msra.mxu1 %v21091_v1  ;;  %v21146_v46 = vld [vmem:[#allocation390_spill] sm:$0xff]  ;;  %v21147_v1 = vld [vmem:[#allocation341_spill] sm:$0xff] }
 0x757   :  { %11957 = vmatpush3.msra.mxu0 %v21092_v59  ;;  %11925 = vmatprep.subr.mxu1 %v21093_v63  ;;  %v21148_v59 = vld [vmem:[#allocation374_spill] sm:$0xff]  ;;  %v21150_v63 = vld [vmem:[#allocation389_spill] sm:$0xff] }
 0x758   :  { %11958 = vmatprep.subr.mxu0 %v21094_v60  ;;  %11926 = vmatpush3.msra.mxu1 %v21095_v51  ;;  %v21151_v60 = vld [vmem:[#allocation340_spill] sm:$0xff]  ;;  %v21152_v51 = vld [vmem:[#allocation373_spill] sm:$0xff] }
 0x759   :  { %11959 = vmatpush3.msra.mxu0 %v21096_v26  ;;  %11927 = vmatprep.subr.mxu1 %v21097_v43  ;;  %v21153_v26 = vld [vmem:[#allocation355_spill] sm:$0xff]  ;;  %v21154_v43 = vld [vmem:[#allocation388_spill] sm:$0xff] }
 0x75a   :  { %11960 = vmatprep.subr.mxu0 %v21098_v42  ;;  %11928 = vmatpush3.msra.mxu1 %v21099_v3  ;;  %v21155_v42 = vld [vmem:[#allocation339_spill] sm:$0xff] }
 0x75b   :  { %11961 = vmatpush3.msra.mxu0 %v21100_v52  ;;  %11929 = vmatprep.subr.mxu1 %v21101_v7  ;;  %v9518_v3 = vld [vmem:[#allocation5 + $0x28] sm:$0xff]  ;;  %v21157_v52 = vld [vmem:[#allocation354_spill] sm:$0xff] }
 0x75c   :  { %11962 = vmatprep.subr.mxu0 %v21102_v9  ;;  %11930 = vmatpush3.msra.mxu1 %v21103_v24  ;;  %v21159_v7 = vld [vmem:[#allocation338_spill] sm:$0xff]  ;;  %v21160_v9 = vld [vmem:[#allocation371_spill] sm:$0xff]  ;;  %v21161_v24 = vld [vmem:[#allocation353_spill] sm:$0xff] }
 0x75d   :  { %11963 = vmatpush3.msra.mxu0 %v21104_v27  ;;  %11931 = vmatprep.subr.mxu1 %v21105_v25  ;;  %v21162_v27 = vld [vmem:[#allocation386_spill] sm:$0xff]  ;;  %v10019_v25 = vcombine.high %v9518_v3, %v9518_v3 }
 0x75e   :  { %11964 = vmatprep.subr.mxu0 %v21106_v8  ;;  %11932 = vmatpush3.msra.mxu1 %v21107_v28  ;;  %v21163_v8 = vld [vmem:[#allocation337_spill] sm:$0xff]  ;;  %v10026_v28 = vrot.slane %v9518_v3, %v18936_v61  ;;  %v10980_v3 = vld [vmem:[%s19415_s10 + $0x8] sm:$0xff] }
 0x75f   :  { %11965 = vmatpush3.msra.mxu0 %v21108_v36  ;;  %11933 = vmatprep.subr.mxu1 %v21109_v20  ;;  %v21165_v36 = vld [vmem:[#allocation352_spill] sm:$0xff] }
 0x760   :  { %11966 = vmatprep.subr.mxu0 %v21110_v22  ;;  %11934 = vmatpush3.msra.mxu1 %v21111_v58  ;;  %v21167_v20 = vld [vmem:[#allocation336_spill] sm:$0xff]  ;;  %v21168_v22 = vld [vmem:[#allocation369_spill] sm:$0xff]  ;;  %v21169_v58 = vld [vmem:[#allocation351_spill] sm:$0xff] }
 0x761   :  { %11967 = vmatpush3.msra.mxu0 %v21112_v19  ;;  %11935 = vmatprep.subr.mxu1 %v21113_v15  ;;  %v21170_v19 = vld [vmem:[#allocation384_spill] sm:$0xff]  ;;  %v10033_v15 = vrot.slane %v10019_v25, %v18936_v61  ;;  %v21180_v61 = vld [vmem:[#allocation366_spill] sm:$0xff] }
 0x762   :  { %11968 = vmatprep.subr.mxu0 %v21114_v11  ;;  %11936 = vmatpush3.msra.mxu1 %v21115_v16  ;;  %v21171_v11 = vld [vmem:[#allocation335_spill] sm:$0xff]  ;;  %v10034_v16 = vcombine.high %v10026_v28, %v10026_v28  ;;  %v11370_v25 = vld [vmem:[%s19414_s9] ss:$0 sm:$0xff] }
 0x763   :  { %10692 = vmatprep.mubr.f32.mxu1 %v10017_v0  ;;  %11969 = vmatpush3.msra.mxu0 %v21116_v18  ;;  %v21166_v0 = vld [vmem:[#allocation385_spill] sm:$0xff]  ;;  %v21173_v18 = vld [vmem:[#allocation350_spill] sm:$0xff] }
 0x764   :  { %10693 = vmatmul.mubr.f32.vlgmr.msra.gmra.mxu1 %v10009_v47  ;;  %11970 = vmatprep.subr.mxu0 %v21117_v21  ;;  %v21158_v47 = vld [vmem:[#allocation387_spill] sm:$0xff] }
 0x765   :  { %11975 = vmatprep.subr.mxu1 %v21118_v31  ;;  %11971 = vmatpush3.msra.mxu0 %v21119_v55  ;;  %v21174_v21 = vld [vmem:[#allocation383_spill] sm:$0xff]  ;;  %v21175_v31 = vld [vmem:[#allocation334_spill] sm:$0xff] }
 0x766   :  { %10762 = vmatprep.mubr.f32.mxu0 %v10018_v45  ;;  %11976 = vmatpush3.msra.mxu1 %v21120_v33  ;;  %v21172_v45 = vld [vmem:[#allocation368_spill] sm:$0xff]  ;;  %v21176_v55 = vld [vmem:[#allocation367_spill] sm:$0xff]  ;;  %v21177_v33 = vld [vmem:[#allocation349_spill] sm:$0xff] }
 0x767   :  { %10763 = vmatmul.mubr.f32.vlgmr.msra.gmra.mxu0 %v10016_v4  ;;  %11977 = vmatprep.subr.mxu1 %v21121_v53  ;;  %v21164_v4 = vld [vmem:[#allocation370_spill] sm:$0xff] }
 0x768   :  { %12010 = vmatprep.subr.mxu0 %v21122_v35  ;;  %11978 = vmatpush3.msra.mxu1 %v21123_v12  ;;  %v21178_v53 = vld [vmem:[#allocation382_spill] sm:$0xff]  ;;  %v10035_v35 = vcombine.high %v10033_v15, %v10033_v15  ;;  %v21179_v12 = vld [vmem:[#allocation333_spill] sm:$0xff] }
 0x769   :  { %12011 = vmatpush3.msra.mxu0 %v21124_v14  ;;  %11979 = vmatprep.subr.mxu1 %v21125_v37  ;;  %v21181_v14 = vld [vmem:[#allocation381_spill] sm:$0xff] }
 0x76a   :  { %12012 = vmatprep.subr.mxu0 %v21126_v44  ;;  %11980 = vmatpush3.msra.mxu1 %v21127_v23  ;;  %v21182_v37 = vld [vmem:[#allocation365_spill] sm:$0xff]  ;;  %v21183_v44 = vld [vmem:[#allocation412_spill] sm:$0xff]  ;;  %v21184_v23 = vld [vmem:[#allocation411_spill] sm:$0xff] }
 0x76b   :  { %12013 = vmatpush3.msra.mxu0 %v21128_v62  ;;  %11981 = vmatprep.subr.mxu1 %v21129_v50  ;;  %v21185_v62 = vld [vmem:[#allocation410_spill] sm:$0xff]  ;;  %v21186_v50 = vld [vmem:[#allocation409_spill] sm:$0xff] }
 0x76c   :  { %12014 = vmatprep.subr.mxu0 %v21130_v56  ;;  %11982 = vmatpush3.msra.mxu1 %v21131_v40  ;;  %v21187_v56 = vld [vmem:[#allocation408_spill] sm:$0xff]  ;;  %v21188_v40 = vld [vmem:[#allocation407_spill] sm:$0xff] }
 0x76d   :  { %12015 = vmatpush3.msra.mxu0 %v21132_v6  ;;  %11983 = vmatprep.subr.mxu1 %v21133_v10  ;;  %v21189_v6 = vld [vmem:[#allocation406_spill] sm:$0xff]  ;;  %v21190_v10 = vld [vmem:[#allocation405_spill] sm:$0xff] }
 0x76e   :  { %12016 = vmatprep.subr.mxu0 %v21134_v57  ;;  %11984 = vmatpush3.msra.mxu1 %v21135_v29  ;;  %v21191_v57 = vld [vmem:[#allocation404_spill] sm:$0xff]  ;;  %v21192_v29 = vld [vmem:[#allocation403_spill] sm:$0xff] }
 0x76f   :  { %12017 = vmatpush3.msra.mxu0 %v21136_v49  ;;  %11985 = vmatprep.subr.mxu1 %v21137_v30  ;;  %v21193_v49 = vld [vmem:[#allocation402_spill] sm:$0xff]  ;;  %v21194_v30 = vld [vmem:[#allocation401_spill] sm:$0xff] }
 0x770   :  { %12018 = vmatprep.subr.mxu0 %v21138_v48  ;;  %11986 = vmatpush3.msra.mxu1 %v21139_v5  ;;  %v21195_v48 = vld [vmem:[#allocation400_spill] sm:$0xff]  ;;  %v21196_v5 = vld [vmem:[#allocation399_spill] sm:$0xff] }
 0x771   :  { %12019 = vmatpush3.msra.mxu0 %v21140_v2  ;;  %11987 = vmatprep.subr.mxu1 %v21141_v38  ;;  %v21197_v2 = vld [vmem:[#allocation398_spill] sm:$0xff]  ;;  %v11371_v38 = vld.sshfl [vmem:[#allocation5 + $0x30] sm:$0x3 pattern:$0x76325410] }
 0x772   :  { %12020 = vmatprep.subr.mxu0 %v21142_v39  ;;  %11988 = vmatpush3.msra.mxu1 %v21143_v54  ;;  %v21198_v39 = vld [vmem:[#allocation397_spill] sm:$0xff] }
 0x773   :  { %12021 = vmatpush3.msra.mxu0 %v21144_v41  ;;  %11989 = vmatprep.subr.mxu1 %v21145_v32  ;;  %v10994_v54 = vld [vmem:[%s19415_s10 + $0x78] sm:$0xff]  ;;  %v10993_v41 = vld [vmem:[%s19415_s10 + $0x70] sm:$0xff]  ;;  %v10992_v32 = vld [vmem:[%s19415_s10 + $0x68] sm:$0xff] }
 0x774   :  { %12022 = vmatprep.subr.mxu0 %v21146_v46  ;;  %11990 = vmatpush3.msra.mxu1 %v21147_v1  ;;  %v10991_v46 = vld [vmem:[%s19415_s10 + $0x60] sm:$0xff]  ;;  %v10990_v1 = vld [vmem:[%s19415_s10 + $0x58] sm:$0xff] }
 0x775   :  { %12023 = vmatpush3.msra.mxu0 %v21148_v59  ;;  %11991 = vmatprep.subr.mxu1 %v21149_v13  ;;  %v10989_v59 = vld [vmem:[%s19415_s10 + $0x50] sm:$0xff]  ;;  %v10988_v13 = vld [vmem:[%s19415_s10 + $0x48] sm:$0xff] }
 0x776   :  { %12024 = vmatprep.subr.mxu0 %v21150_v63  ;;  %11992 = vmatpush3.msra.mxu1 %v21151_v60  ;;  %v10987_v63 = vld [vmem:[%s19415_s10 + $0x40] sm:$0xff]  ;;  %v10986_v60 = vld [vmem:[%s19415_s10 + $0x38] sm:$0xff] }
 0x777   :  { %12025 = vmatpush3.msra.mxu0 %v21152_v51  ;;  %11993 = vmatprep.subr.mxu1 %v21153_v26  ;;  %v10985_v51 = vld [vmem:[%s19415_s10 + $0x30] sm:$0xff]  ;;  %v10984_v26 = vld [vmem:[%s19415_s10 + $0x28] sm:$0xff] }
 0x778   :  { %12026 = vmatprep.subr.mxu0 %v21154_v43  ;;  %11994 = vmatpush3.msra.mxu1 %v21155_v42  ;;  %v10983_v43 = vld [vmem:[%s19415_s10 + $0x20] sm:$0xff]  ;;  %v10982_v42 = vld [vmem:[%s19415_s10 + $0x18] sm:$0xff] }
 0x779   :  { %12027 = vmatpush3.msra.mxu0 %v21156_v34  ;;  %11995 = vmatprep.subr.mxu1 %v21157_v52  ;;  %v10981_v34 = vld [vmem:[%s19415_s10 + $0x10] sm:$0xff]  ;;  %v10979_v52 = vld [vmem:[%s19415_s10] sm:$0xff] }
 0x77a   :  { %12028 = vmatprep.subr.mxu0 %v21158_v47  ;;  %11996 = vmatpush3.msra.mxu1 %v21159_v7 }
 0x77b   :  { %12029 = vmatpush3.msra.mxu0 %v21160_v9  ;;  %11997 = vmatprep.subr.mxu1 %v21161_v24 }
 0x77c   :  { %12030 = vmatprep.subr.mxu0 %v21162_v27  ;;  %11998 = vmatpush3.msra.mxu1 %v21163_v8 }
 0x77d   :  { %12031 = vmatpush3.msra.mxu0 %v21164_v4  ;;  %11999 = vmatprep.subr.mxu1 %v21165_v36 }
 0x77e   :  { %12032 = vmatprep.subr.mxu0 %v21166_v0  ;;  %12000 = vmatpush3.msra.mxu1 %v21167_v20 }
 0x77f   :  { %12033 = vmatpush3.msra.mxu0 %v21168_v22  ;;  %12001 = vmatprep.subr.mxu1 %v21169_v58 }
 0x780   :  { %12034 = vmatprep.subr.mxu0 %v21170_v19  ;;  %12002 = vmatpush3.msra.mxu1 %v21171_v11 }
 0x781   :  { %12035 = vmatpush3.msra.mxu0 %v21172_v45  ;;  %12003 = vmatprep.subr.mxu1 %v21173_v18 }
 0x782   :  { %12036 = vmatprep.subr.mxu0 %v21174_v21  ;;  %12004 = vmatpush3.msra.mxu1 %v21175_v31 }
 0x783   :  { %12037 = vmatpush3.msra.mxu0 %v21176_v55  ;;  %12005 = vmatprep.subr.mxu1 %v21177_v33 }
 0x784   :  { %12038 = vmatprep.subr.mxu0 %v21178_v53  ;;  %12006 = vmatpush3.msra.mxu1 %v21179_v12 }
 0x785   :  { %10832 = vmatprep.mubr.f32.mxu1 %v10034_v16  ;;  %12039 = vmatpush3.msra.mxu0 %v21180_v61 }
 0x786   :  { %10833 = vmatmul.mubr.f32.vlgmr.msra.gmra.mxu1 %v10026_v28  ;;  %12040 = vmatprep.subr.mxu0 %v21181_v14 }
 0x787   :  { %12217 = vmatprep.subr.mxu1 %v20797_v17  ;;  %12041 = vmatpush3.msra.mxu0 %v21182_v37 }
 0x788   :  { %10902 = vmatprep.mubr.f32.mxu0 %v10035_v35  ;;  %12218 = vmatpush3.msra.mxu1 %v21183_v44 }
 0x789   :  { %10903 = vmatmul.mubr.f32.vlgmr.msra.gmra.mxu0 %v10033_v15  ;;  %12219 = vmatprep.subr.mxu1 %v20797_v17 }
 0x78a   :  { %12249 = vmatprep.mubr.msk.f32.mxu1 %vm12373_vm5, %v20797_v17  ;;  %12220 = vmatpush3.msra.mxu1 %v21184_v23 }
 0x78b   :  { %12252 = vmatprep.subr.mxu0 %v20797_v17  ;;  %12221 = vmatprep.subr.mxu1 %v20797_v17 }
 0x78c   :  { %12284 = vmatprep.mubr.msk.f32.mxu0 %vm12373_vm5, %v20797_v17  ;;  %12222 = vmatpush3.msra.mxu1 %v21185_v62 }
 0x78d   :  { %12223 = vmatprep.subr.mxu1 %v20797_v17  ;;  %12253 = vmatpush3.msra.mxu0 %v10994_v54 }
 0x78e   :  { %12224 = vmatpush3.msra.mxu1 %v21186_v50  ;;  %12254 = vmatprep.subr.mxu0 %v20797_v17 }
 0x78f   :  { %12225 = vmatprep.subr.mxu1 %v20797_v17  ;;  %12255 = vmatpush3.msra.mxu0 %v10993_v41 }
 0x790   :  { %12226 = vmatpush3.msra.mxu1 %v21187_v56  ;;  %12256 = vmatprep.subr.mxu0 %v20797_v17 }
 0x791   :  { %12227 = vmatprep.subr.mxu1 %v20797_v17  ;;  %12257 = vmatpush3.msra.mxu0 %v10992_v32 }
 0x792   :  { %12228 = vmatpush3.msra.mxu1 %v21188_v40  ;;  %12258 = vmatprep.subr.mxu0 %v20797_v17 }
 0x793   :  { %12229 = vmatprep.subr.mxu1 %v20797_v17  ;;  %12259 = vmatpush3.msra.mxu0 %v10991_v46 }
 0x794   :  { %12230 = vmatpush3.msra.mxu1 %v21189_v6  ;;  %12260 = vmatprep.subr.mxu0 %v20797_v17 }
 0x795   :  { %12231 = vmatprep.subr.mxu1 %v20797_v17  ;;  %12261 = vmatpush3.msra.mxu0 %v10990_v1 }
 0x796   :  { %12232 = vmatpush3.msra.mxu1 %v21190_v10  ;;  %12262 = vmatprep.subr.mxu0 %v20797_v17 }
 0x797   :  { %12233 = vmatprep.subr.mxu1 %v20797_v17  ;;  %12263 = vmatpush3.msra.mxu0 %v10989_v59  ;;  %v11372_v59 = vld [vmem:[%s19416_s11] ss:$0 sm:$0xff] }
 0x798   :  { %12234 = vmatpush3.msra.mxu1 %v21191_v57  ;;  %12264 = vmatprep.subr.mxu0 %v20797_v17 }
 0x799   :  { %12235 = vmatprep.subr.mxu1 %v20797_v17  ;;  %12265 = vmatpush3.msra.mxu0 %v10988_v13 }
 0x79a   :  { %12236 = vmatpush3.msra.mxu1 %v21192_v29  ;;  %12266 = vmatprep.subr.mxu0 %v20797_v17 }
 0x79b   :  { %12237 = vmatprep.subr.mxu1 %v20797_v17  ;;  %12267 = vmatpush3.msra.mxu0 %v10987_v63 }
 0x79c   :  { %12238 = vmatpush3.msra.mxu1 %v21193_v49  ;;  %12268 = vmatprep.subr.mxu0 %v20797_v17  ;;  %v11657_v47 = vpop.f32.mrf.mxu1 }
 0x79d   :  { %12239 = vmatprep.subr.mxu1 %v20797_v17  ;;  %12269 = vmatpush3.msra.mxu0 %v10986_v60 }
 0x79e   :  { %12240 = vmatpush3.msra.mxu1 %v21194_v30  ;;  %12270 = vmatprep.subr.mxu0 %v20797_v17  ;;  %v11658_v7 = vpop.f32.mrf.mxu1 }
 0x79f   :  { %12241 = vmatprep.subr.mxu1 %v20797_v17  ;;  %12271 = vmatpush3.msra.mxu0 %v10985_v51  ;;  %v11692_v9 = vpop.f32.mrf.mxu0  ;;  %v11659_v27 = vadd.f32 %v11658_v7, %v11657_v47 }
 0x7a0   :  { %12242 = vmatpush3.msra.mxu1 %v21195_v48  ;;  %12272 = vmatprep.subr.mxu0 %v20797_v17 }
 0x7a1   :  { %12243 = vmatprep.subr.mxu1 %v20797_v17  ;;  %12273 = vmatpush3.msra.mxu0 %v10984_v26  ;;  %v11693_v8 = vpop.f32.mrf.mxu0  ;;  %v10135_v36 = vadd.f32 %v11659_v27, %v11370_v25 }
 0x7a2   :  { %12244 = vmatpush3.msra.mxu1 %v21196_v5  ;;  %12274 = vmatprep.subr.mxu0 %v20797_v17  ;;  %v11694_v0 = vadd.f32 %v11693_v8, %v11692_v9 }
 0x7a3   :  { %12245 = vmatprep.subr.mxu1 %v20797_v17  ;;  %12275 = vmatpush3.msra.mxu0 %v10983_v43 }
 0x7a4   :  { %12246 = vmatpush3.msra.mxu1 %v21197_v2  ;;  %12276 = vmatprep.subr.mxu0 %v20797_v17  ;;  %v10205_v58 = vadd.f32 %v11694_v0, %v10135_v36 }
 0x7a5   :  { %12247 = vmatprep.subr.mxu1 %v20797_v17  ;;  %12277 = vmatpush3.msra.mxu0 %v10982_v42 }
 0x7a6   :  { %12248 = vmatpush3.msra.mxu1 %v21198_v39  ;;  %12278 = vmatprep.subr.mxu0 %v20797_v17 }
 0x7a7   :  { %12250 = vmatmul.mubr.f32.vlgmr.msra.gmra.mxu1 %v11371_v38  ;;  %12279 = vmatpush3.msra.mxu0 %v10981_v34 }
 0x7a8   :  { %12280 = vmatprep.subr.mxu0 %v20797_v17 }
 0x7a9   :  { %12281 = vmatpush3.msra.mxu0 %v10980_v3 }
 0x7aa   :  { %12282 = vmatprep.subr.mxu0 %v20797_v17 }
 0x7ab   :  { %12283 = vmatpush3.msra.mxu0 %v10979_v52 }
 0x7be   :  { %v11727_v24 = vpop.f32.mrf.mxu1 }
 0x7c0   :  { %v11728_v4 = vpop.f32.mrf.mxu1 }
 0x7c1   :  { %v11762_v28 = vpop.f32.mrf.mxu0  ;;  %v11729_v20 = vadd.f32 %v11728_v4, %v11727_v24 }
 0x7c3   :  { %v11763_v22 = vpop.f32.mrf.mxu0  ;;  %v10275_v11 = vadd.f32 %v11729_v20, %v10205_v58 }
 0x7c4   :  { %v11764_v45 = vadd.f32 %v11763_v22, %v11762_v28 }
 0x7c6   :  { %v10345_v31 = vadd.f32 %v11764_v45, %v10275_v11 }
 0x7e0   :  { %v11797_v17 = vpop.f32.mrf.mxu1 }
 0x7e2   :  { %v11798_v19 = vpop.f32.mrf.mxu1 }
 0x7e3   :  { %v11832_v15 = vpop.f32.mrf.mxu0  ;;  %v11799_v18 = vadd.f32 %v11798_v19, %v11797_v17 }
 0x7e5   :  { %v11833_v21 = vpop.f32.mrf.mxu0  ;;  %v10415_v53 = vadd.f32 %v11799_v18, %v10345_v31 }
 0x7e6   :  { %v11834_v35 = vadd.f32 %v11833_v21, %v11832_v15 }
 0x7e8   :  { %v10485_v37 = vadd.f32 %v11834_v35, %v10415_v53 }
 0x802   :  { %v11867_v16 = vpop.f32.mrf.mxu1 }
 0x804   :  { %v11868_v55 = vpop.f32.mrf.mxu1 }
 0x805   :  { %v11902_v33 = vpop.f32.mrf.mxu0  ;;  %v11869_v61 = vadd.f32 %v11868_v55, %v11867_v16 }
 0x807   :  { %v11903_v14 = vpop.f32.mrf.mxu0  ;;  %v10555_v62 = vadd.f32 %v11869_v61, %v10485_v37 }
 0x808   :  { %v11904_v50 = vadd.f32 %v11903_v14, %v11902_v33 }
 0x80a   :  { %v10625_v10 = vadd.f32 %v11904_v50, %v10555_v62 }
 0x824   :  { %v11937_v12 = vpop.f32.mrf.mxu1 }
 0x826   :  { %v11938_v44 = vpop.f32.mrf.mxu1 }
 0x827   :  { %v11972_v23 = vpop.f32.mrf.mxu0  ;;  %v11939_v40 = vadd.f32 %v11938_v44, %v11937_v12 }
 0x829   :  { %v11973_v6 = vpop.f32.mrf.mxu0  ;;  %v10695_v49 = vadd.f32 %v11939_v40, %v10625_v10 }
 0x82a   :  { %v11974_v30 = vadd.f32 %v11973_v6, %v11972_v23 }
 0x82c   :  { %v10765_v2 = vadd.f32 %v11974_v30, %v10695_v49 }
 0x846   :  { %v12007_v56 = vpop.f32.mrf.mxu1 }
 0x848   :  { %v12008_v57 = vpop.f32.mrf.mxu1 }
 0x849   :  { %v12042_v29 = vpop.f32.mrf.mxu0  ;;  %v12009_v48 = vadd.f32 %v12008_v57, %v12007_v56 }
 0x84b   :  { %v12043_v5 = vpop.f32.mrf.mxu0  ;;  %v10835_v38 = vadd.f32 %v12009_v48, %v10765_v2 }
 0x84c   :  { %v12044_v39 = vadd.f32 %v12043_v5, %v12042_v29 }
 0x84e   :  { %v10905_v54 = vadd.f32 %v12044_v39, %v10835_v38 }
 0x867   :  { %v10974_v41 = vpop.f32.mrf.mxu1 }
 0x868   :  { %v10975_v32 = vadd.f32 %v10974_v41, %v10905_v54 }
 0x869   :  { %v12251_v46 = vpop.f32.mrf.mxu1 }
 0x86a   :  { %v10978_v1 = vmax.f32 %v10975_v32, 0.0 }
 0x86c   :  { %12285 = vmatmul.mubr.f32.vlgmr.msra.gmra.mxu0 %v10978_v1 }
 0x92c   :  { %v11068_v13 = vpop.f32.mrf.mxu0 }
 0x92d   :  { %v11069_v63 = vadd.f32 %v11372_v59, %v11068_v13 }
 0x92e   :  { %v12286_v60 = vpop.f32.mrf.mxu0 }
 0x92f   :  { %v11373_v51 = vmul.f32 -1.442695, %v11069_v63 }
 0x931   :  { %12341 = vpow2.f32 %v11373_v51 }
 0x93e   :  { %v12342_v26 = vpop.eup %12341 }
 0x93f   :  { %v11075_v43 = vadd.f32 1.0, %v12342_v26 }
 0x941   :  { %12343 = vrcp.f32 %v11075_v43 }
 0x94e   :  { %v12344_v42 = vpop.eup %12343 }
 0x94f   :  { %v11078_v34 = vmul.f32 2.0, %v12344_v42 }
 0x951   :  { %11079 = vst [vmem:[#allocation8] sm:$0x3] %v11078_v34 }
 0x952   :  { %12356 = shalt.err (!%p12353_p4)
}
 0x953   :  { %11089 = dma.vmem_to_hbm [thread:$0]  %s11087_s16, 32, %s19418_s13, [#allocation9]  }
 0x954   :  { %12367 = dma.done.wait [#allocation9], 32  }
 0x955   :  { %12368 = vsyncadd [#allocation9], 4294967264 }
 0x956   :  { %11093 = vsyncpa [#allocation9], 1 }
 0x957   :  { %11094 = vsyncmov [#allocation7] }
 0x95a   :  { %s11095_s12 = vpop.sfrf %11094 }
 0x95b   :  { %p11374_p5 = scmp.ne.s32.totalorder %s11095_s12, 0 }
 0x95d   :  { %11099 = shalt.err (%p11374_p5)  }

</bundles_post_ra>
